<compile_context>
chip_gen: v7x
topology: tpu7x:2x2x1
jax: 0.10.0
libtpu: 0.0.40
codegen_flags: <defaults>
</compile_context>

<pallas_src>
import functools

import jax
import jax.numpy as jnp
from jax.experimental import pallas as pl
from jax.experimental.pallas import tpu as pltpu

F32 = jnp.float32

BT = 8                 # images per grid step (batch tile)
LANES1 = 16 * BT       # conv_block1 lane width (128)
LANES2 = 32 * BT       # conv_block2 lane width (256)

# Row offsets inside the packed weight arrays.
# wsmall (107, 128):
R_E, R_W1, R_W2, R_W5E, R_W5O = 0, 8, 17, 26, 35
R_B1, R_B3, R_BFC = 44, 45, 46
R_SEL1, R_SEL2, R_MASKA = 47, 80, 89
# wsmall256 (20, 256):
R_W7, R_B6, R_B8, R_MASKB = 0, 9, 10, 11
# wmat128 (384, 128): rows [0,128) = L3 block-diag, [128,384) = FC block-diag
# wmat256 (512, 256): rows [0,128) = L6 even, [128,256) = L6 odd, [256,512) = L8


# ----------------------------------------------------------------------------- kernel

def _fused_kernel(x_ref, wsm_ref, wm128_ref, wm256_ref, ws2_ref, o_ref,
                  xb_ref, pad2_ref, pad5_ref, pad7_ref):
    relu = lambda v: jnp.maximum(v, 0.0)
    dot = functools.partial(jnp.dot, preferred_element_type=F32)
    row = lambda ref, r: ref[r:r + 1, :]          # one weight/bias row -> (1, lanes)

    # Expand the zero-padded image block (18*24, BT) to the lane-packed layout
    # (18, 24, BT*16) with one tiny MXU matmul (lane index = 16*b + c).
    xb_ref[...] = dot(x_ref[0], wsm_ref[R_E:R_E + BT, :]).reshape(18, 24, LANES1)

    # L1: Conv2d(1,16,3,pad=1) + BN + ReLU as 9 shifted VPU taps, evaluated at
    # width 18 so masked rows drop into pad2 (L2's padded input) as full rows.
    a1 = None
    for kh in range(3):
        for kw in range(3):
            t = xb_ref[kh:kh + 16, kw:kw + 18, :] * row(wsm_ref, R_W1 + 3 * kh + kw)
            a1 = t if a1 is None else a1 + t
    a1 = relu(a1 + row(wsm_ref, R_B1)) * wsm_ref[R_MASKA:R_MASKA + 18, :]
    pad2_ref[0, :, :] = jnp.zeros((18, LANES1), F32)
    pad2_ref[17, :, :] = jnp.zeros((18, LANES1), F32)
    pad2_ref[1:17, :, :] = a1

    # L2: depthwise Conv2d(16,16,3,pad=1,groups=16)  (its bias is folded into b3).
    a2 = None
    for kh in range(3):
        for kw in range(3):
            t = pad2_ref[kh:kh + 16, kw:kw + 16, :] * row(wsm_ref, R_W2 + 3 * kh + kw)
            a2 = t if a2 is None else a2 + t

    # L3: 1x1 conv + BN + ReLU as ONE block-diagonal MXU matmul (M = 256).
    y3 = relu(dot(a2.reshape(256, LANES1), wm128_ref[0:128, :]) + row(wsm_ref, R_B3))
    y3 = y3.reshape(16, 16, LANES1)

    # MaxPool(3, stride=2) -> 7x7: 3-row VPU max + stride-2 column selection via
    # constant 0/1 matmuls; each pooled row lands W-extended (width 11) in pad5.
    sel1 = [wsm_ref[R_SEL1 + 11 * k:R_SEL1 + 11 * k + 11, :][:, 0:16] for k in range(3)]
    for ho in range(7):
        rm = jnp.maximum(jnp.maximum(y3[2 * ho], y3[2 * ho + 1]), y3[2 * ho + 2])
        p = None
        for k in range(3):
            c = dot(sel1[k], rm)                         # (11, 128)
            p = c if p is None else jnp.maximum(p, c)
        pad5_ref[ho + 1, :, :] = p
    pad5_ref[0, :, :] = jnp.zeros((11, LANES1), F32)
    pad5_ref[8, :, :] = jnp.zeros((11, LANES1), F32)

    # L5: grouped Conv2d(16,32,3,pad=1,groups=16) as even/odd depthwise taps,
    # evaluated at extended width 9 (its bias is folded into b6).
    ae = ao = None
    for kh in range(3):
        for kw in range(3):
            s = pad5_ref[kh:kh + 7, kw:kw + 9, :]        # (7, 9, 128)
            te = s * row(wsm_ref, R_W5E + 3 * kh + kw)
            to = s * row(wsm_ref, R_W5O + 3 * kh + kw)
            ae = te if ae is None else ae + te
            ao = to if ao is None else ao + to

    # L6: 1x1 conv + BN + ReLU (two block-diag matmuls per row); masked rows are
    # stored as full-width rows of pad7.
    maskB = ws2_ref[R_MASKB:R_MASKB + 9, :]
    b6 = row(ws2_ref, R_B6)
    for h in range(7):
        y = dot(ae[h], wm256_ref[0:128, :]) + dot(ao[h], wm256_ref[128:256, :]) + b6
        pad7_ref[h + 1, :, :] = relu(y) * maskB
    pad7_ref[0, :, :] = jnp.zeros((9, LANES2), F32)
    pad7_ref[8, :, :] = jnp.zeros((9, LANES2), F32)

    # L7: depthwise Conv2d(32,32,3,pad=1,groups=32)  (its bias is folded into b8).
    a7 = None
    for kh in range(3):
        for kw in range(3):
            t = pad7_ref[kh:kh + 7, kw:kw + 7, :] * row(ws2_ref, R_W7 + 3 * kh + kw)
            a7 = t if a7 is None else a7 + t

    # L8: 1x1 conv + BN + ReLU (block-diag matmuls, one per row), then
    # MaxPool(3,2) -> 3x3 and global average pooling.
    b8 = row(ws2_ref, R_B8)
    y8 = [relu(dot(a7[h], wm256_ref[256:512, :]) + b8) for h in range(7)]
    sel2 = [wsm_ref[R_SEL2 + 3 * k:R_SEL2 + 3 * k + 3, :][:, 0:7] for k in range(3)]
    gsum = jnp.zeros((1, LANES2), F32)
    for ho in range(3):
        rm = jnp.maximum(jnp.maximum(y8[2 * ho], y8[2 * ho + 1]), y8[2 * ho + 2])
        p = None
        for k in range(3):
            c = dot(sel2[k], rm)                         # (3, 256)
            p = c if p is None else jnp.maximum(p, c)
        gsum = gsum + jnp.sum(p, axis=0, keepdims=True)

    # GAP (mean over 3x3) + Linear(32 -> 10) (block-diag, output lanes = 10*b + k).
    g = gsum * (1.0 / 9.0)
    o_ref[0, :, :] = dot(g, wm128_ref[128:384, :]) + row(wsm_ref, R_BFC)


# ----------------------------------------------------------------------------- wrapper

def efficientnet_forward(params, x_nchw):
    """x_nchw: (N, 1, 16, 16) float32 -> logits (N, 10)."""
    wsmall, wmat128, wmat256, wsmall256 = params
    N = x_nchw.shape[0]
    NB = (N + BT - 1) // BT
    Npad = NB * BT

    x = x_nchw[:, 0, :, :].astype(F32)                                 # (N, 16, 16)
    if Npad != N:
        x = jnp.concatenate([x, jnp.zeros((Npad - N, 16, 16), F32)], axis=0)
    # Lane-pack the batch tile and zero-pad: data at rows [1,17), cols [2,18) of
    # an (18, 24) grid (width 24 keeps the in-kernel reshape an exact layout
    # no-op); flatten (H, W) so the kernel's expansion matmul needs no lhs reshape.
    x = x.reshape(NB, BT, 16, 16).transpose(0, 2, 3, 1)                # (NB,16,16,BT)
    x = jnp.pad(x, ((0, 0), (1, 1), (2, 6), (0, 0)))                   # (NB,18,24,BT)
    x = x.reshape(NB, 18 * 24, BT)

    flops_per_img = 2 * (9 * 16 * 18 * 16 + 9 * 256 * 16 + 256 * 16 * 16
                         + 2 * 9 * 7 * 9 * 16 + 2 * 7 * 9 * 16 * 32
                         + 9 * 49 * 32 + 49 * 32 * 32 + 32 * 10)

    out = pl.pallas_call(
        _fused_kernel,
        out_shape=jax.ShapeDtypeStruct((NB, 1, 128), F32),
        grid=(NB,),
        in_specs=[
            pl.BlockSpec((1, 18 * 24, BT), lambda n: (n, 0, 0)),       # image block
            pl.BlockSpec(wsmall.shape, lambda n: (0, 0)),
            pl.BlockSpec(wmat128.shape, lambda n: (0, 0)),
            pl.BlockSpec(wmat256.shape, lambda n: (0, 0)),
            pl.BlockSpec(wsmall256.shape, lambda n: (0, 0)),
        ],
        out_specs=pl.BlockSpec((1, 1, 128), lambda n: (n, 0, 0)),
        scratch_shapes=[
            pltpu.VMEM((18, 24, LANES1), F32),    # xb:   lane-expanded padded image
            pltpu.VMEM((18, 18, LANES1), F32),    # pad2: zero-padded input of L2
            pltpu.VMEM((9, 11, LANES1), F32),     # pad5: zero-padded (W-ext) input of L5
            pltpu.VMEM((9, 9, LANES2), F32),      # pad7: zero-padded input of L7
        ],
        compiler_params=pltpu.CompilerParams(
            dimension_semantics=("parallel",)),
        cost_estimate=pl.CostEstimate(
            flops=Npad * flops_per_img, transcendentals=0,
            bytes_accessed=(x.size + wsmall.size + wmat128.size + wmat256.size
                            + wsmall256.size + NB * 128) * 4),
    )(x, wsmall, wmat128, wmat256, wsmall256)

    logits = out[:, 0, :10 * BT].reshape(Npad, 10)
    return logits[:N]


# ----------------------------------------------------------------------------- params

def _bn_fold(gamma, beta, mean, var, eps=1e-5):
    s = gamma / jnp.sqrt(var + eps)
    return s, beta - mean * s


def init_raw_params(key):
    """Synthetic parameters in PyTorch layout (Conv: (Cout, Cin/groups, K, K))."""
    ks = iter(jax.random.split(key, 40))

    def nrm(shape, scl=0.1):
        return (scl * jax.random.normal(next(ks), shape)).astype(F32)

    def bn_stats(c):
        gamma = 1.0 + nrm((c,))
        beta = nrm((c,))
        mean = nrm((c,))
        var = 1.0 + jnp.abs(nrm((c,)))
        return (gamma, beta, mean, var)

    raw = {}
    raw['W1'] = nrm((16, 1, 3, 3)); raw['b1'] = nrm((16,)); raw['bn1'] = bn_stats(16)
    raw['W2'] = nrm((16, 1, 3, 3)); raw['b2'] = nrm((16,))
    raw['W3'] = nrm((16, 16, 1, 1)); raw['b3'] = nrm((16,)); raw['bn3'] = bn_stats(16)
    raw['W5'] = nrm((32, 1, 3, 3)); raw['b5'] = nrm((32,))
    raw['W6'] = nrm((32, 32, 1, 1)); raw['b6'] = nrm((32,)); raw['bn6'] = bn_stats(32)
    raw['W7'] = nrm((32, 1, 3, 3)); raw['b7'] = nrm((32,))
    raw['W8'] = nrm((32, 32, 1, 1)); raw['b8'] = nrm((32,)); raw['bn8'] = bn_stats(32)
    raw['Wfc'] = nrm((10, 32)); raw['bfc'] = nrm((10,))
    return raw


def prepare_kernel_params(raw):
    """Fold biases / BatchNorm / group interleave, tile over the batch lanes and
    pack everything into 4 kernel-ready arrays (host side, once per model)."""
    s1, sh1 = _bn_fold(*raw['bn1'])
    s3, sh3 = _bn_fold(*raw['bn3'])
    s6, sh6 = _bn_fold(*raw['bn6'])
    s8, sh8 = _bn_fold(*raw['bn8'])

    # Per-image folded weights.
    w1 = jnp.transpose(raw['W1'][:, 0], (1, 2, 0)) * s1[None, None, :]      # (3,3,16)
    b1 = s1 * raw['b1'] + sh1
    w2 = jnp.transpose(raw['W2'][:, 0], (1, 2, 0))                          # (3,3,16)
    w3 = raw['W3'][:, :, 0, 0].T * s3[None, :]                              # (16,16)
    b3 = raw['b2'] @ w3 + s3 * raw['b3'] + sh3
    W5 = raw['W5'][:, 0]                                                    # (32,3,3)
    w5e = jnp.transpose(W5[0::2], (1, 2, 0))                                # (3,3,16)
    w5o = jnp.transpose(W5[1::2], (1, 2, 0))                                # (3,3,16)
    w6 = raw['W6'][:, :, 0, 0].T * s6[None, :]                              # (32,32)
    w6a, w6b = w6[0::2], w6[1::2]                                           # (16,32)
    b6 = raw['b5'][0::2] @ w6a + raw['b5'][1::2] @ w6b + s6 * raw['b6'] + sh6
    w7 = jnp.transpose(raw['W7'][:, 0], (1, 2, 0))                          # (3,3,32)
    w8 = raw['W8'][:, :, 0, 0].T * s8[None, :]                              # (32,32)
    b8 = raw['b7'] @ w8 + s8 * raw['b8'] + sh8
    wfc = raw['Wfc'].T                                                      # (32,10)
    bfc = raw['bfc']                                                        # (10,)

    eye = jnp.eye(BT, dtype=F32)
    taps = lambda w: jnp.tile(w.reshape(9, -1), (1, BT))     # (3,3,C) -> (9, BT*C)
    tvec = lambda v: jnp.tile(v, BT)[None, :]                # (C,)    -> (1, BT*C)

    # wsmall (107,128): expansion matrix, block-1 tap weights/biases, FC bias,
    # pooling selection matrices and the W-padding mask.
    ebc = jnp.kron(eye, jnp.ones((1, 16), F32))                             # (8,128)
    bfct = jnp.pad(jnp.tile(bfc, BT), (0, 128 - 10 * BT))[None, :]          # (1,128)
    sel1 = []
    for k in range(3):
        m = jnp.zeros((11, 16), F32)
        m = m.at[2 + jnp.arange(7), 2 * jnp.arange(7) + k].set(1.0)
        sel1.append(jnp.pad(m, ((0, 0), (0, 112))))
    sel2 = []
    for k in range(3):
        m = jnp.zeros((3, 7), F32)
        m = m.at[jnp.arange(3), 2 * jnp.arange(3) + k].set(1.0)
        sel2.append(jnp.pad(m, ((0, 0), (0, 121))))
    wcol = jnp.arange(18)
    maskA = jnp.where((wcol >= 1) & (wcol <= 16), 1.0, 0.0).astype(F32)
    maskA = jnp.broadcast_to(maskA[:, None], (18, LANES1))
    wsmall = jnp.concatenate(
        [ebc, taps(w1), taps(w2), taps(w5e), taps(w5o),
         tvec(b1), tvec(b3), bfct] + sel1 + sel2 + [maskA], axis=0)

    # wsmall256 (20,256): block-2 depthwise taps, biases, W-padding mask.
    wecol = jnp.arange(9)
    maskB = jnp.where((wecol >= 1) & (wecol <= 7), 1.0, 0.0).astype(F32)
    maskB = jnp.broadcast_to(maskB[:, None], (9, LANES2))
    wsmall256 = jnp.concatenate([taps(w7), tvec(b6), tvec(b8), maskB], axis=0)

    # wmat128 (384,128): block-diagonal L3 and FC weights.
    wmat128 = jnp.concatenate(
        [jnp.kron(eye, w3),
         jnp.pad(jnp.kron(eye, wfc), ((0, 0), (0, 128 - 10 * BT)))], axis=0)

    # wmat256 (512,256): block-diagonal L6 (even/odd rows) and L8 weights.
    wmat256 = jnp.concatenate(
        [jnp.kron(eye, w6a), jnp.kron(eye, w6b), jnp.kron(eye, w8)], axis=0)

    return (wsmall.astype(F32), wmat128.astype(F32),
            wmat256.astype(F32), wsmall256.astype(F32))


# ----------------------------------------------------------------------------- reference

def reference_forward(raw, x_nchw):
    """Pure-XLA reference with PyTorch layout/semantics (BN inference mode)."""
    def conv(x, w, b, groups, pad):
        y = jax.lax.conv_general_dilated(
            x, w, window_strides=(1, 1), padding=[(pad, pad), (pad, pad)],
            dimension_numbers=('NCHW', 'OIHW', 'NCHW'),
            feature_group_count=groups, precision=jax.lax.Precision.HIGHEST)
        return y + b.reshape(1, -1, 1, 1)

    def bn(x, stats):
        s, sh = _bn_fold(*stats)
        return x * s.reshape(1, -1, 1, 1) + sh.reshape(1, -1, 1, 1)

    def maxpool(x):
        return jax.lax.reduce_window(x, -jnp.inf, jax.lax.max,
                                     (1, 1, 3, 3), (1, 1, 2, 2), 'VALID')

    x = x_nchw.astype(F32)
    x = jnp.maximum(bn(conv(x, raw['W1'], raw['b1'], 1, 1), raw['bn1']), 0.0)
    x = conv(x, raw['W2'], raw['b2'], 16, 1)
    x = jnp.maximum(bn(conv(x, raw['W3'], raw['b3'], 1, 0), raw['bn3']), 0.0)
    x = maxpool(x)
    x = conv(x, raw['W5'], raw['b5'], 16, 1)
    x = jnp.maximum(bn(conv(x, raw['W6'], raw['b6'], 1, 0), raw['bn6']), 0.0)
    x = conv(x, raw['W7'], raw['b7'], 32, 1)
    x = jnp.maximum(bn(conv(x, raw['W8'], raw['b8'], 1, 0), raw['bn8']), 0.0)
    x = maxpool(x)
    g = jnp.mean(x, axis=(2, 3))
    return g @ raw['Wfc'].T + raw['bfc']


# ----------------------------------------------------------------------------- main

if __name__ == "__main__":
    key = jax.random.PRNGKey(0)
    kx, kp = jax.random.split(key)

    # MNIST-like input at small spatial size: (batch=16, channels=1, 16, 16) NCHW.
    # 16 images = 2 grid steps of 8, so both v7x TensorCores get work.
    x = jax.random.normal(kx, (16, 1, 16, 16), F32)
    raw = init_raw_params(kp)
    params = prepare_kernel_params(raw)

    out = jax.block_until_ready(jax.jit(efficientnet_forward)(params, x))

    assert out.shape == (16, 10), out.shape
    assert bool(jnp.all(jnp.isfinite(out)))

    # Correctness check against a pure-XLA reference of the PyTorch module.
    ref = jax.block_until_ready(reference_forward(raw, x))
    assert bool(jnp.allclose(out, ref, atol=1e-2, rtol=1e-2)), (
        float(jnp.max(jnp.abs(out - ref))))

    print("KERNEL_OK")
</pallas_src>

<mosaic_0001>
module attributes {stable_mosaic.version = 11 : i64} {
  func.func @_fused_kernel(%arg0: i32, %arg1: memref<1x432x8xf32, #tpu.memory_space<vmem>>, %arg2: memref<107x128xf32, #tpu.memory_space<vmem>>, %arg3: memref<384x128xf32, #tpu.memory_space<vmem>>, %arg4: memref<512x256xf32, #tpu.memory_space<vmem>>, %arg5: memref<20x256xf32, #tpu.memory_space<vmem>>, %arg6: memref<1x1x128xf32, #tpu.memory_space<vmem>>, %arg7: memref<18x24x128xf32, #tpu.memory_space<vmem>>, %arg8: memref<18x18x128xf32, #tpu.memory_space<vmem>>, %arg9: memref<9x11x128xf32, #tpu.memory_space<vmem>>, %arg10: memref<9x9x256xf32, #tpu.memory_space<vmem>>) attributes {dimension_semantics = [#tpu.dimension_semantics<parallel>], iteration_bounds = array<i64: 2>, scalar_prefetch = 0 : i64, scratch_operands = 4 : i64, tpu.core_type = #tpu.core_type<tc>, window_params = [{transform_indices = @transform_0, window_bounds = array<i64: 1, 432, 8>}, {pipeline_mode = #tpu.pipeline_mode<synchronous>, transform_indices = @transform_1, window_bounds = array<i64: 107, 128>}, {pipeline_mode = #tpu.pipeline_mode<synchronous>, transform_indices = @transform_2, window_bounds = array<i64: 384, 128>}, {pipeline_mode = #tpu.pipeline_mode<synchronous>, transform_indices = @transform_3, window_bounds = array<i64: 512, 256>}, {pipeline_mode = #tpu.pipeline_mode<synchronous>, transform_indices = @transform_4, window_bounds = array<i64: 20, 256>}, {transform_indices = @transform_5, window_bounds = array<i64: 1, 1, 128>}]} {
    %c0 = arith.constant 0 : index
    %c0_0 = arith.constant 0 : index
    %c0_1 = arith.constant 0 : index
    %0 = vector.load %arg1[%c0, %c0_0, %c0_1] : memref<1x432x8xf32, #tpu.memory_space<vmem>>, vector<1x432x8xf32>
    %1 = vector.shape_cast %0 : vector<1x432x8xf32> to vector<432x8xf32>
    %c0_2 = arith.constant 0 : index
    %c0_3 = arith.constant 0 : index
    %2 = vector.load %arg2[%c0_2, %c0_3] : memref<107x128xf32, #tpu.memory_space<vmem>>, vector<8x128xf32>
    %cst = arith.constant dense<0.000000e+00> : vector<432x128xf32>
    %3 = tpu.matmul %1, %2, %cst {dimension_numbers = #tpu.dot_dimension_numbers<[1], [0], [0], [1], [0, 0, 1, 1], [], []>} : vector<432x8xf32>, vector<8x128xf32>, vector<432x128xf32> -> vector<432x128xf32>
    %4 = vector.shape_cast %3 : vector<432x128xf32> to vector<18x24x128xf32>
    %c0_4 = arith.constant 0 : index
    %c0_5 = arith.constant 0 : index
    %c0_6 = arith.constant 0 : index
    %5 = vector.load %arg7[%c0_4, %c0_5, %c0_6] : memref<18x24x128xf32, #tpu.memory_space<vmem>>, vector<18x24x128xf32>
    tpu.vector_store %arg7[%c0_4, %c0_5, %c0_6], %4 {strides = array<i32>} : memref<18x24x128xf32, #tpu.memory_space<vmem>>, vector<18x24x128xf32>,
    %c0_7 = arith.constant 0 : index
    %c0_8 = arith.constant 0 : index
    %c0_9 = arith.constant 0 : index
    %6 = vector.load %arg7[%c0_7, %c0_8, %c0_9] : memref<18x24x128xf32, #tpu.memory_space<vmem>>, vector<16x18x128xf32>
    %c8 = arith.constant 8 : index
    %c0_10 = arith.constant 0 : index
    %7 = vector.load %arg2[%c8, %c0_10] : memref<107x128xf32, #tpu.memory_space<vmem>>, vector<1x128xf32>
    %8 = vector.shape_cast %7 : vector<1x128xf32> to vector<1x1x128xf32>
    %9 = vector.broadcast %8 : vector<1x1x128xf32> to vector<16x18x128xf32>
    %10 = arith.mulf %6, %9 : vector<16x18x128xf32>
    %c0_11 = arith.constant 0 : index
    %c1 = arith.constant 1 : index
    %c0_12 = arith.constant 0 : index
    %11 = vector.load %arg7[%c0_11, %c1, %c0_12] : memref<18x24x128xf32, #tpu.memory_space<vmem>>, vector<16x18x128xf32>
    %c9 = arith.constant 9 : index
    %c0_13 = arith.constant 0 : index
    %12 = vector.load %arg2[%c9, %c0_13] : memref<107x128xf32, #tpu.memory_space<vmem>>, vector<1x128xf32>
    %13 = vector.shape_cast %12 : vector<1x128xf32> to vector<1x1x128xf32>
    %14 = vector.broadcast %13 : vector<1x1x128xf32> to vector<16x18x128xf32>
    %15 = arith.mulf %11, %14 : vector<16x18x128xf32>
    %16 = arith.addf %10, %15 : vector<16x18x128xf32>
    %c0_14 = arith.constant 0 : index
    %c2 = arith.constant 2 : index
    %c0_15 = arith.constant 0 : index
    %17 = vector.load %arg7[%c0_14, %c2, %c0_15] : memref<18x24x128xf32, #tpu.memory_space<vmem>>, vector<16x18x128xf32>
    %c10 = arith.constant 10 : index
    %c0_16 = arith.constant 0 : index
    %18 = vector.load %arg2[%c10, %c0_16] : memref<107x128xf32, #tpu.memory_space<vmem>>, vector<1x128xf32>
    %19 = vector.shape_cast %18 : vector<1x128xf32> to vector<1x1x128xf32>
    %20 = vector.broadcast %19 : vector<1x1x128xf32> to vector<16x18x128xf32>
    %21 = arith.mulf %17, %20 : vector<16x18x128xf32>
    %22 = arith.addf %16, %21 : vector<16x18x128xf32>
    %c1_17 = arith.constant 1 : index
    %c0_18 = arith.constant 0 : index
    %c0_19 = arith.constant 0 : index
    %23 = vector.load %arg7[%c1_17, %c0_18, %c0_19] : memref<18x24x128xf32, #tpu.memory_space<vmem>>, vector<16x18x128xf32>
    %c11 = arith.constant 11 : index
    %c0_20 = arith.constant 0 : index
    %24 = vector.load %arg2[%c11, %c0_20] : memref<107x128xf32, #tpu.memory_space<vmem>>, vector<1x128xf32>
    %25 = vector.shape_cast %24 : vector<1x128xf32> to vector<1x1x128xf32>
    %26 = vector.broadcast %25 : vector<1x1x128xf32> to vector<16x18x128xf32>
    %27 = arith.mulf %23, %26 : vector<16x18x128xf32>
    %28 = arith.addf %22, %27 : vector<16x18x128xf32>
    %c1_21 = arith.constant 1 : index
    %c1_22 = arith.constant 1 : index
    %c0_23 = arith.constant 0 : index
    %29 = vector.load %arg7[%c1_21, %c1_22, %c0_23] : memref<18x24x128xf32, #tpu.memory_space<vmem>>, vector<16x18x128xf32>
    %c12 = arith.constant 12 : index
    %c0_24 = arith.constant 0 : index
    %30 = vector.load %arg2[%c12, %c0_24] : memref<107x128xf32, #tpu.memory_space<vmem>>, vector<1x128xf32>
    %31 = vector.shape_cast %30 : vector<1x128xf32> to vector<1x1x128xf32>
    %32 = vector.broadcast %31 : vector<1x1x128xf32> to vector<16x18x128xf32>
    %33 = arith.mulf %29, %32 : vector<16x18x128xf32>
    %34 = arith.addf %28, %33 : vector<16x18x128xf32>
    %c1_25 = arith.constant 1 : index
    %c2_26 = arith.constant 2 : index
    %c0_27 = arith.constant 0 : index
    %35 = vector.load %arg7[%c1_25, %c2_26, %c0_27] : memref<18x24x128xf32, #tpu.memory_space<vmem>>, vector<16x18x128xf32>
    %c13 = arith.constant 13 : index
    %c0_28 = arith.constant 0 : index
    %36 = vector.load %arg2[%c13, %c0_28] : memref<107x128xf32, #tpu.memory_space<vmem>>, vector<1x128xf32>
    %37 = vector.shape_cast %36 : vector<1x128xf32> to vector<1x1x128xf32>
    %38 = vector.broadcast %37 : vector<1x1x128xf32> to vector<16x18x128xf32>
    %39 = arith.mulf %35, %38 : vector<16x18x128xf32>
    %40 = arith.addf %34, %39 : vector<16x18x128xf32>
    %c2_29 = arith.constant 2 : index
    %c0_30 = arith.constant 0 : index
    %c0_31 = arith.constant 0 : index
    %41 = vector.load %arg7[%c2_29, %c0_30, %c0_31] : memref<18x24x128xf32, #tpu.memory_space<vmem>>, vector<16x18x128xf32>
    %c14 = arith.constant 14 : index
    %c0_32 = arith.constant 0 : index
    %42 = vector.load %arg2[%c14, %c0_32] : memref<107x128xf32, #tpu.memory_space<vmem>>, vector<1x128xf32>
    %43 = vector.shape_cast %42 : vector<1x128xf32> to vector<1x1x128xf32>
    %44 = vector.broadcast %43 : vector<1x1x128xf32> to vector<16x18x128xf32>
    %45 = arith.mulf %41, %44 : vector<16x18x128xf32>
    %46 = arith.addf %40, %45 : vector<16x18x128xf32>
    %c2_33 = arith.constant 2 : index
    %c1_34 = arith.constant 1 : index
    %c0_35 = arith.constant 0 : index
    %47 = vector.load %arg7[%c2_33, %c1_34, %c0_35] : memref<18x24x128xf32, #tpu.memory_space<vmem>>, vector<16x18x128xf32>
    %c15 = arith.constant 15 : index
    %c0_36 = arith.constant 0 : index
    %48 = vector.load %arg2[%c15, %c0_36] : memref<107x128xf32, #tpu.memory_space<vmem>>, vector<1x128xf32>
    %49 = vector.shape_cast %48 : vector<1x128xf32> to vector<1x1x128xf32>
    %50 = vector.broadcast %49 : vector<1x1x128xf32> to vector<16x18x128xf32>
    %51 = arith.mulf %47, %50 : vector<16x18x128xf32>
    %52 = arith.addf %46, %51 : vector<16x18x128xf32>
    %c2_37 = arith.constant 2 : index
    %c2_38 = arith.constant 2 : index
    %c0_39 = arith.constant 0 : index
    %53 = vector.load %arg7[%c2_37, %c2_38, %c0_39] : memref<18x24x128xf32, #tpu.memory_space<vmem>>, vector<16x18x128xf32>
    %c16 = arith.constant 16 : index
    %c0_40 = arith.constant 0 : index
    %54 = vector.load %arg2[%c16, %c0_40] : memref<107x128xf32, #tpu.memory_space<vmem>>, vector<1x128xf32>
    %55 = vector.shape_cast %54 : vector<1x128xf32> to vector<1x1x128xf32>
    %56 = vector.broadcast %55 : vector<1x1x128xf32> to vector<16x18x128xf32>
    %57 = arith.mulf %53, %56 : vector<16x18x128xf32>
    %58 = arith.addf %52, %57 : vector<16x18x128xf32>
    %c44 = arith.constant 44 : index
    %c0_41 = arith.constant 0 : index
    %59 = vector.load %arg2[%c44, %c0_41] : memref<107x128xf32, #tpu.memory_space<vmem>>, vector<1x128xf32>
    %60 = vector.shape_cast %59 : vector<1x128xf32> to vector<1x1x128xf32>
    %61 = vector.broadcast %60 : vector<1x1x128xf32> to vector<16x18x128xf32>
    %62 = arith.addf %58, %61 : vector<16x18x128xf32>
    %cst_42 = arith.constant 0.000000e+00 : f32
    %63 = vector.broadcast %cst_42 : f32 to vector<16x18x128xf32>
    %64 = arith.maximumf %62, %63 : vector<16x18x128xf32>
    %c89 = arith.constant 89 : index
    %c0_43 = arith.constant 0 : index
    %65 = vector.load %arg2[%c89, %c0_43] : memref<107x128xf32, #tpu.memory_space<vmem>>, vector<18x128xf32>
    %66 = vector.shape_cast %65 : vector<18x128xf32> to vector<1x18x128xf32>
    %67 = vector.broadcast %66 : vector<1x18x128xf32> to vector<16x18x128xf32>
    %68 = arith.mulf %64, %67 : vector<16x18x128xf32>
    %cst_44 = arith.constant 0.000000e+00 : f32
    %69 = vector.broadcast %cst_44 : f32 to vector<18x128xf32>
    %c0_45 = arith.constant 0 : index
    %c0_46 = arith.constant 0 : index
    %c0_47 = arith.constant 0 : index
    %70 = vector.load %arg8[%c0_45, %c0_46, %c0_47] : memref<18x18x128xf32, #tpu.memory_space<vmem>>, vector<1x18x128xf32>
    %71 = vector.shape_cast %70 : vector<1x18x128xf32> to vector<18x128xf32>
    %72 = vector.shape_cast %69 : vector<18x128xf32> to vector<1x18x128xf32>
    tpu.vector_store %arg8[%c0_45, %c0_46, %c0_47], %72 {strides = array<i32>} : memref<18x18x128xf32, #tpu.memory_space<vmem>>, vector<1x18x128xf32>,
    %cst_48 = arith.constant 0.000000e+00 : f32
    %73 = vector.broadcast %cst_48 : f32 to vector<18x128xf32>
    %c17 = arith.constant 17 : index
    %c0_49 = arith.constant 0 : index
    %c0_50 = arith.constant 0 : index
    %74 = vector.load %arg8[%c17, %c0_49, %c0_50] : memref<18x18x128xf32, #tpu.memory_space<vmem>>, vector<1x18x128xf32>
    %75 = vector.shape_cast %74 : vector<1x18x128xf32> to vector<18x128xf32>
    %76 = vector.shape_cast %73 : vector<18x128xf32> to vector<1x18x128xf32>
    tpu.vector_store %arg8[%c17, %c0_49, %c0_50], %76 {strides = array<i32>} : memref<18x18x128xf32, #tpu.memory_space<vmem>>, vector<1x18x128xf32>,
    %c1_51 = arith.constant 1 : index
    %c0_52 = arith.constant 0 : index
    %c0_53 = arith.constant 0 : index
    %77 = vector.load %arg8[%c1_51, %c0_52, %c0_53] : memref<18x18x128xf32, #tpu.memory_space<vmem>>, vector<16x18x128xf32>
    tpu.vector_store %arg8[%c1_51, %c0_52, %c0_53], %68 {strides = array<i32>} : memref<18x18x128xf32, #tpu.memory_space<vmem>>, vector<16x18x128xf32>,
    %c0_54 = arith.constant 0 : index
    %c0_55 = arith.constant 0 : index
    %c0_56 = arith.constant 0 : index
    %78 = vector.load %arg8[%c0_54, %c0_55, %c0_56] : memref<18x18x128xf32, #tpu.memory_space<vmem>>, vector<16x16x128xf32>
    %c17_57 = arith.constant 17 : index
    %c0_58 = arith.constant 0 : index
    %79 = vector.load %arg2[%c17_57, %c0_58] : memref<107x128xf32, #tpu.memory_space<vmem>>, vector<1x128xf32>
    %80 = vector.shape_cast %79 : vector<1x128xf32> to vector<1x1x128xf32>
    %81 = vector.broadcast %80 : vector<1x1x128xf32> to vector<16x16x128xf32>
    %82 = arith.mulf %78, %81 : vector<16x16x128xf32>
    %c0_59 = arith.constant 0 : index
    %c1_60 = arith.constant 1 : index
    %c0_61 = arith.constant 0 : index
    %83 = vector.load %arg8[%c0_59, %c1_60, %c0_61] : memref<18x18x128xf32, #tpu.memory_space<vmem>>, vector<16x16x128xf32>
    %c18 = arith.constant 18 : index
    %c0_62 = arith.constant 0 : index
    %84 = vector.load %arg2[%c18, %c0_62] : memref<107x128xf32, #tpu.memory_space<vmem>>, vector<1x128xf32>
    %85 = vector.shape_cast %84 : vector<1x128xf32> to vector<1x1x128xf32>
    %86 = vector.broadcast %85 : vector<1x1x128xf32> to vector<16x16x128xf32>
    %87 = arith.mulf %83, %86 : vector<16x16x128xf32>
    %88 = arith.addf %82, %87 : vector<16x16x128xf32>
    %c0_63 = arith.constant 0 : index
    %c2_64 = arith.constant 2 : index
    %c0_65 = arith.constant 0 : index
    %89 = vector.load %arg8[%c0_63, %c2_64, %c0_65] : memref<18x18x128xf32, #tpu.memory_space<vmem>>, vector<16x16x128xf32>
    %c19 = arith.constant 19 : index
    %c0_66 = arith.constant 0 : index
    %90 = vector.load %arg2[%c19, %c0_66] : memref<107x128xf32, #tpu.memory_space<vmem>>, vector<1x128xf32>
    %91 = vector.shape_cast %90 : vector<1x128xf32> to vector<1x1x128xf32>
    %92 = vector.broadcast %91 : vector<1x1x128xf32> to vector<16x16x128xf32>
    %93 = arith.mulf %89, %92 : vector<16x16x128xf32>
    %94 = arith.addf %88, %93 : vector<16x16x128xf32>
    %c1_67 = arith.constant 1 : index
    %c0_68 = arith.constant 0 : index
    %c0_69 = arith.constant 0 : index
    %95 = vector.load %arg8[%c1_67, %c0_68, %c0_69] : memref<18x18x128xf32, #tpu.memory_space<vmem>>, vector<16x16x128xf32>
    %c20 = arith.constant 20 : index
    %c0_70 = arith.constant 0 : index
    %96 = vector.load %arg2[%c20, %c0_70] : memref<107x128xf32, #tpu.memory_space<vmem>>, vector<1x128xf32>
    %97 = vector.shape_cast %96 : vector<1x128xf32> to vector<1x1x128xf32>
    %98 = vector.broadcast %97 : vector<1x1x128xf32> to vector<16x16x128xf32>
    %99 = arith.mulf %95, %98 : vector<16x16x128xf32>
    %100 = arith.addf %94, %99 : vector<16x16x128xf32>
    %c1_71 = arith.constant 1 : index
    %c1_72 = arith.constant 1 : index
    %c0_73 = arith.constant 0 : index
    %101 = vector.load %arg8[%c1_71, %c1_72, %c0_73] : memref<18x18x128xf32, #tpu.memory_space<vmem>>, vector<16x16x128xf32>
    %c21 = arith.constant 21 : index
    %c0_74 = arith.constant 0 : index
    %102 = vector.load %arg2[%c21, %c0_74] : memref<107x128xf32, #tpu.memory_space<vmem>>, vector<1x128xf32>
    %103 = vector.shape_cast %102 : vector<1x128xf32> to vector<1x1x128xf32>
    %104 = vector.broadcast %103 : vector<1x1x128xf32> to vector<16x16x128xf32>
    %105 = arith.mulf %101, %104 : vector<16x16x128xf32>
    %106 = arith.addf %100, %105 : vector<16x16x128xf32>
    %c1_75 = arith.constant 1 : index
    %c2_76 = arith.constant 2 : index
    %c0_77 = arith.constant 0 : index
    %107 = vector.load %arg8[%c1_75, %c2_76, %c0_77] : memref<18x18x128xf32, #tpu.memory_space<vmem>>, vector<16x16x128xf32>
    %c22 = arith.constant 22 : index
    %c0_78 = arith.constant 0 : index
    %108 = vector.load %arg2[%c22, %c0_78] : memref<107x128xf32, #tpu.memory_space<vmem>>, vector<1x128xf32>
    %109 = vector.shape_cast %108 : vector<1x128xf32> to vector<1x1x128xf32>
    %110 = vector.broadcast %109 : vector<1x1x128xf32> to vector<16x16x128xf32>
    %111 = arith.mulf %107, %110 : vector<16x16x128xf32>
    %112 = arith.addf %106, %111 : vector<16x16x128xf32>
    %c2_79 = arith.constant 2 : index
    %c0_80 = arith.constant 0 : index
    %c0_81 = arith.constant 0 : index
    %113 = vector.load %arg8[%c2_79, %c0_80, %c0_81] : memref<18x18x128xf32, #tpu.memory_space<vmem>>, vector<16x16x128xf32>
    %c23 = arith.constant 23 : index
    %c0_82 = arith.constant 0 : index
    %114 = vector.load %arg2[%c23, %c0_82] : memref<107x128xf32, #tpu.memory_space<vmem>>, vector<1x128xf32>
    %115 = vector.shape_cast %114 : vector<1x128xf32> to vector<1x1x128xf32>
    %116 = vector.broadcast %115 : vector<1x1x128xf32> to vector<16x16x128xf32>
    %117 = arith.mulf %113, %116 : vector<16x16x128xf32>
    %118 = arith.addf %112, %117 : vector<16x16x128xf32>
    %c2_83 = arith.constant 2 : index
    %c1_84 = arith.constant 1 : index
    %c0_85 = arith.constant 0 : index
    %119 = vector.load %arg8[%c2_83, %c1_84, %c0_85] : memref<18x18x128xf32, #tpu.memory_space<vmem>>, vector<16x16x128xf32>
    %c24 = arith.constant 24 : index
    %c0_86 = arith.constant 0 : index
    %120 = vector.load %arg2[%c24, %c0_86] : memref<107x128xf32, #tpu.memory_space<vmem>>, vector<1x128xf32>
    %121 = vector.shape_cast %120 : vector<1x128xf32> to vector<1x1x128xf32>
    %122 = vector.broadcast %121 : vector<1x1x128xf32> to vector<16x16x128xf32>
    %123 = arith.mulf %119, %122 : vector<16x16x128xf32>
    %124 = arith.addf %118, %123 : vector<16x16x128xf32>
    %c2_87 = arith.constant 2 : index
    %c2_88 = arith.constant 2 : index
    %c0_89 = arith.constant 0 : index
    %125 = vector.load %arg8[%c2_87, %c2_88, %c0_89] : memref<18x18x128xf32, #tpu.memory_space<vmem>>, vector<16x16x128xf32>
    %c25 = arith.constant 25 : index
    %c0_90 = arith.constant 0 : index
    %126 = vector.load %arg2[%c25, %c0_90] : memref<107x128xf32, #tpu.memory_space<vmem>>, vector<1x128xf32>
    %127 = vector.shape_cast %126 : vector<1x128xf32> to vector<1x1x128xf32>
    %128 = vector.broadcast %127 : vector<1x1x128xf32> to vector<16x16x128xf32>
    %129 = arith.mulf %125, %128 : vector<16x16x128xf32>
    %130 = arith.addf %124, %129 : vector<16x16x128xf32>
    %131 = vector.shape_cast %130 : vector<16x16x128xf32> to vector<256x128xf32>
    %c0_91 = arith.constant 0 : index
    %c0_92 = arith.constant 0 : index
    %132 = vector.load %arg3[%c0_91, %c0_92] : memref<384x128xf32, #tpu.memory_space<vmem>>, vector<128x128xf32>
    %cst_93 = arith.constant dense<0.000000e+00> : vector<256x128xf32>
    %133 = tpu.matmul %131, %132, %cst_93 {dimension_numbers = #tpu.dot_dimension_numbers<[1], [0], [0], [1], [0, 0, 1, 1], [], []>} : vector<256x128xf32>, vector<128x128xf32>, vector<256x128xf32> -> vector<256x128xf32>
    %c45 = arith.constant 45 : index
    %c0_94 = arith.constant 0 : index
    %134 = vector.load %arg2[%c45, %c0_94] : memref<107x128xf32, #tpu.memory_space<vmem>>, vector<1x128xf32>
    %135 = vector.broadcast %134 : vector<1x128xf32> to vector<256x128xf32>
    %136 = arith.addf %133, %135 : vector<256x128xf32>
    %cst_95 = arith.constant 0.000000e+00 : f32
    %137 = vector.broadcast %cst_95 : f32 to vector<256x128xf32>
    %138 = arith.maximumf %136, %137 : vector<256x128xf32>
    %139 = vector.shape_cast %138 : vector<256x128xf32> to vector<16x16x128xf32>
    %c47 = arith.constant 47 : index
    %c0_96 = arith.constant 0 : index
    %140 = vector.load %arg2[%c47, %c0_96] : memref<107x128xf32, #tpu.memory_space<vmem>>, vector<11x128xf32>
    %141 = vector.extract_strided_slice %140 {offsets = [0, 0], sizes = [11, 16], strides = [1, 1]} : vector<11x128xf32> to vector<11x16xf32>
    %c58 = arith.constant 58 : index
    %c0_97 = arith.constant 0 : index
    %142 = vector.load %arg2[%c58, %c0_97] : memref<107x128xf32, #tpu.memory_space<vmem>>, vector<11x128xf32>
    %143 = vector.extract_strided_slice %142 {offsets = [0, 0], sizes = [11, 16], strides = [1, 1]} : vector<11x128xf32> to vector<11x16xf32>
    %c69 = arith.constant 69 : index
    %c0_98 = arith.constant 0 : index
    %144 = vector.load %arg2[%c69, %c0_98] : memref<107x128xf32, #tpu.memory_space<vmem>>, vector<11x128xf32>
    %145 = vector.extract_strided_slice %144 {offsets = [0, 0], sizes = [11, 16], strides = [1, 1]} : vector<11x128xf32> to vector<11x16xf32>
    %146 = vector.extract_strided_slice %139 {offsets = [0, 0, 0], sizes = [1, 16, 128], strides = [1, 1, 1]} : vector<16x16x128xf32> to vector<1x16x128xf32>
    %147 = vector.shape_cast %146 : vector<1x16x128xf32> to vector<16x128xf32>
    %148 = vector.extract_strided_slice %139 {offsets = [1, 0, 0], sizes = [1, 16, 128], strides = [1, 1, 1]} : vector<16x16x128xf32> to vector<1x16x128xf32>
    %149 = vector.shape_cast %148 : vector<1x16x128xf32> to vector<16x128xf32>
    %150 = arith.maximumf %147, %149 : vector<16x128xf32>
    %151 = vector.extract_strided_slice %139 {offsets = [2, 0, 0], sizes = [1, 16, 128], strides = [1, 1, 1]} : vector<16x16x128xf32> to vector<1x16x128xf32>
    %152 = vector.shape_cast %151 : vector<1x16x128xf32> to vector<16x128xf32>
    %153 = arith.maximumf %150, %152 : vector<16x128xf32>
    %cst_99 = arith.constant dense<0.000000e+00> : vector<11x128xf32>
    %154 = tpu.matmul %141, %153, %cst_99 {dimension_numbers = #tpu.dot_dimension_numbers<[1], [0], [0], [1], [0, 0, 1, 1], [], []>} : vector<11x16xf32>, vector<16x128xf32>, vector<11x128xf32> -> vector<11x128xf32>
    %cst_100 = arith.constant dense<0.000000e+00> : vector<11x128xf32>
    %155 = tpu.matmul %143, %153, %cst_100 {dimension_numbers = #tpu.dot_dimension_numbers<[1], [0], [0], [1], [0, 0, 1, 1], [], []>} : vector<11x16xf32>, vector<16x128xf32>, vector<11x128xf32> -> vector<11x128xf32>
    %156 = arith.maximumf %154, %155 : vector<11x128xf32>
    %cst_101 = arith.constant dense<0.000000e+00> : vector<11x128xf32>
    %157 = tpu.matmul %145, %153, %cst_101 {dimension_numbers = #tpu.dot_dimension_numbers<[1], [0], [0], [1], [0, 0, 1, 1], [], []>} : vector<11x16xf32>, vector<16x128xf32>, vector<11x128xf32> -> vector<11x128xf32>
    %158 = arith.maximumf %156, %157 : vector<11x128xf32>
    %c1_102 = arith.constant 1 : index
    %c0_103 = arith.constant 0 : index
    %c0_104 = arith.constant 0 : index
    %159 = vector.load %arg9[%c1_102, %c0_103, %c0_104] : memref<9x11x128xf32, #tpu.memory_space<vmem>>, vector<1x11x128xf32>
    %160 = vector.shape_cast %159 : vector<1x11x128xf32> to vector<11x128xf32>
    %161 = vector.shape_cast %158 : vector<11x128xf32> to vector<1x11x128xf32>
    tpu.vector_store %arg9[%c1_102, %c0_103, %c0_104], %161 {strides = array<i32>} : memref<9x11x128xf32, #tpu.memory_space<vmem>>, vector<1x11x128xf32>,
    %162 = vector.extract_strided_slice %139 {offsets = [2, 0, 0], sizes = [1, 16, 128], strides = [1, 1, 1]} : vector<16x16x128xf32> to vector<1x16x128xf32>
    %163 = vector.shape_cast %162 : vector<1x16x128xf32> to vector<16x128xf32>
    %164 = vector.extract_strided_slice %139 {offsets = [3, 0, 0], sizes = [1, 16, 128], strides = [1, 1, 1]} : vector<16x16x128xf32> to vector<1x16x128xf32>
    %165 = vector.shape_cast %164 : vector<1x16x128xf32> to vector<16x128xf32>
    %166 = arith.maximumf %163, %165 : vector<16x128xf32>
    %167 = vector.extract_strided_slice %139 {offsets = [4, 0, 0], sizes = [1, 16, 128], strides = [1, 1, 1]} : vector<16x16x128xf32> to vector<1x16x128xf32>
    %168 = vector.shape_cast %167 : vector<1x16x128xf32> to vector<16x128xf32>
    %169 = arith.maximumf %166, %168 : vector<16x128xf32>
    %cst_105 = arith.constant dense<0.000000e+00> : vector<11x128xf32>
    %170 = tpu.matmul %141, %169, %cst_105 {dimension_numbers = #tpu.dot_dimension_numbers<[1], [0], [0], [1], [0, 0, 1, 1], [], []>} : vector<11x16xf32>, vector<16x128xf32>, vector<11x128xf32> -> vector<11x128xf32>
    %cst_106 = arith.constant dense<0.000000e+00> : vector<11x128xf32>
    %171 = tpu.matmul %143, %169, %cst_106 {dimension_numbers = #tpu.dot_dimension_numbers<[1], [0], [0], [1], [0, 0, 1, 1], [], []>} : vector<11x16xf32>, vector<16x128xf32>, vector<11x128xf32> -> vector<11x128xf32>
    %172 = arith.maximumf %170, %171 : vector<11x128xf32>
    %cst_107 = arith.constant dense<0.000000e+00> : vector<11x128xf32>
    %173 = tpu.matmul %145, %169, %cst_107 {dimension_numbers = #tpu.dot_dimension_numbers<[1], [0], [0], [1], [0, 0, 1, 1], [], []>} : vector<11x16xf32>, vector<16x128xf32>, vector<11x128xf32> -> vector<11x128xf32>
    %174 = arith.maximumf %172, %173 : vector<11x128xf32>
    %c2_108 = arith.constant 2 : index
    %c0_109 = arith.constant 0 : index
    %c0_110 = arith.constant 0 : index
    %175 = vector.load %arg9[%c2_108, %c0_109, %c0_110] : memref<9x11x128xf32, #tpu.memory_space<vmem>>, vector<1x11x128xf32>
    %176 = vector.shape_cast %175 : vector<1x11x128xf32> to vector<11x128xf32>
    %177 = vector.shape_cast %174 : vector<11x128xf32> to vector<1x11x128xf32>
    tpu.vector_store %arg9[%c2_108, %c0_109, %c0_110], %177 {strides = array<i32>} : memref<9x11x128xf32, #tpu.memory_space<vmem>>, vector<1x11x128xf32>,
    %178 = vector.extract_strided_slice %139 {offsets = [4, 0, 0], sizes = [1, 16, 128], strides = [1, 1, 1]} : vector<16x16x128xf32> to vector<1x16x128xf32>
    %179 = vector.shape_cast %178 : vector<1x16x128xf32> to vector<16x128xf32>
    %180 = vector.extract_strided_slice %139 {offsets = [5, 0, 0], sizes = [1, 16, 128], strides = [1, 1, 1]} : vector<16x16x128xf32> to vector<1x16x128xf32>
    %181 = vector.shape_cast %180 : vector<1x16x128xf32> to vector<16x128xf32>
    %182 = arith.maximumf %179, %181 : vector<16x128xf32>
    %183 = vector.extract_strided_slice %139 {offsets = [6, 0, 0], sizes = [1, 16, 128], strides = [1, 1, 1]} : vector<16x16x128xf32> to vector<1x16x128xf32>
    %184 = vector.shape_cast %183 : vector<1x16x128xf32> to vector<16x128xf32>
    %185 = arith.maximumf %182, %184 : vector<16x128xf32>
    %cst_111 = arith.constant dense<0.000000e+00> : vector<11x128xf32>
    %186 = tpu.matmul %141, %185, %cst_111 {dimension_numbers = #tpu.dot_dimension_numbers<[1], [0], [0], [1], [0, 0, 1, 1], [], []>} : vector<11x16xf32>, vector<16x128xf32>, vector<11x128xf32> -> vector<11x128xf32>
    %cst_112 = arith.constant dense<0.000000e+00> : vector<11x128xf32>
    %187 = tpu.matmul %143, %185, %cst_112 {dimension_numbers = #tpu.dot_dimension_numbers<[1], [0], [0], [1], [0, 0, 1, 1], [], []>} : vector<11x16xf32>, vector<16x128xf32>, vector<11x128xf32> -> vector<11x128xf32>
    %188 = arith.maximumf %186, %187 : vector<11x128xf32>
    %cst_113 = arith.constant dense<0.000000e+00> : vector<11x128xf32>
    %189 = tpu.matmul %145, %185, %cst_113 {dimension_numbers = #tpu.dot_dimension_numbers<[1], [0], [0], [1], [0, 0, 1, 1], [], []>} : vector<11x16xf32>, vector<16x128xf32>, vector<11x128xf32> -> vector<11x128xf32>
    %190 = arith.maximumf %188, %189 : vector<11x128xf32>
    %c3 = arith.constant 3 : index
    %c0_114 = arith.constant 0 : index
    %c0_115 = arith.constant 0 : index
    %191 = vector.load %arg9[%c3, %c0_114, %c0_115] : memref<9x11x128xf32, #tpu.memory_space<vmem>>, vector<1x11x128xf32>
    %192 = vector.shape_cast %191 : vector<1x11x128xf32> to vector<11x128xf32>
    %193 = vector.shape_cast %190 : vector<11x128xf32> to vector<1x11x128xf32>
    tpu.vector_store %arg9[%c3, %c0_114, %c0_115], %193 {strides = array<i32>} : memref<9x11x128xf32, #tpu.memory_space<vmem>>, vector<1x11x128xf32>,
    %194 = vector.extract_strided_slice %139 {offsets = [6, 0, 0], sizes = [1, 16, 128], strides = [1, 1, 1]} : vector<16x16x128xf32> to vector<1x16x128xf32>
    %195 = vector.shape_cast %194 : vector<1x16x128xf32> to vector<16x128xf32>
    %196 = vector.extract_strided_slice %139 {offsets = [7, 0, 0], sizes = [1, 16, 128], strides = [1, 1, 1]} : vector<16x16x128xf32> to vector<1x16x128xf32>
    %197 = vector.shape_cast %196 : vector<1x16x128xf32> to vector<16x128xf32>
    %198 = arith.maximumf %195, %197 : vector<16x128xf32>
    %199 = vector.extract_strided_slice %139 {offsets = [8, 0, 0], sizes = [1, 16, 128], strides = [1, 1, 1]} : vector<16x16x128xf32> to vector<1x16x128xf32>
    %200 = vector.shape_cast %199 : vector<1x16x128xf32> to vector<16x128xf32>
    %201 = arith.maximumf %198, %200 : vector<16x128xf32>
    %cst_116 = arith.constant dense<0.000000e+00> : vector<11x128xf32>
    %202 = tpu.matmul %141, %201, %cst_116 {dimension_numbers = #tpu.dot_dimension_numbers<[1], [0], [0], [1], [0, 0, 1, 1], [], []>} : vector<11x16xf32>, vector<16x128xf32>, vector<11x128xf32> -> vector<11x128xf32>
    %cst_117 = arith.constant dense<0.000000e+00> : vector<11x128xf32>
    %203 = tpu.matmul %143, %201, %cst_117 {dimension_numbers = #tpu.dot_dimension_numbers<[1], [0], [0], [1], [0, 0, 1, 1], [], []>} : vector<11x16xf32>, vector<16x128xf32>, vector<11x128xf32> -> vector<11x128xf32>
    %204 = arith.maximumf %202, %203 : vector<11x128xf32>
    %cst_118 = arith.constant dense<0.000000e+00> : vector<11x128xf32>
    %205 = tpu.matmul %145, %201, %cst_118 {dimension_numbers = #tpu.dot_dimension_numbers<[1], [0], [0], [1], [0, 0, 1, 1], [], []>} : vector<11x16xf32>, vector<16x128xf32>, vector<11x128xf32> -> vector<11x128xf32>
    %206 = arith.maximumf %204, %205 : vector<11x128xf32>
    %c4 = arith.constant 4 : index
    %c0_119 = arith.constant 0 : index
    %c0_120 = arith.constant 0 : index
    %207 = vector.load %arg9[%c4, %c0_119, %c0_120] : memref<9x11x128xf32, #tpu.memory_space<vmem>>, vector<1x11x128xf32>
    %208 = vector.shape_cast %207 : vector<1x11x128xf32> to vector<11x128xf32>
    %209 = vector.shape_cast %206 : vector<11x128xf32> to vector<1x11x128xf32>
    tpu.vector_store %arg9[%c4, %c0_119, %c0_120], %209 {strides = array<i32>} : memref<9x11x128xf32, #tpu.memory_space<vmem>>, vector<1x11x128xf32>,
    %210 = vector.extract_strided_slice %139 {offsets = [8, 0, 0], sizes = [1, 16, 128], strides = [1, 1, 1]} : vector<16x16x128xf32> to vector<1x16x128xf32>
    %211 = vector.shape_cast %210 : vector<1x16x128xf32> to vector<16x128xf32>
    %212 = vector.extract_strided_slice %139 {offsets = [9, 0, 0], sizes = [1, 16, 128], strides = [1, 1, 1]} : vector<16x16x128xf32> to vector<1x16x128xf32>
    %213 = vector.shape_cast %212 : vector<1x16x128xf32> to vector<16x128xf32>
    %214 = arith.maximumf %211, %213 : vector<16x128xf32>
    %215 = vector.extract_strided_slice %139 {offsets = [10, 0, 0], sizes = [1, 16, 128], strides = [1, 1, 1]} : vector<16x16x128xf32> to vector<1x16x128xf32>
    %216 = vector.shape_cast %215 : vector<1x16x128xf32> to vector<16x128xf32>
    %217 = arith.maximumf %214, %216 : vector<16x128xf32>
    %cst_121 = arith.constant dense<0.000000e+00> : vector<11x128xf32>
    %218 = tpu.matmul %141, %217, %cst_121 {dimension_numbers = #tpu.dot_dimension_numbers<[1], [0], [0], [1], [0, 0, 1, 1], [], []>} : vector<11x16xf32>, vector<16x128xf32>, vector<11x128xf32> -> vector<11x128xf32>
    %cst_122 = arith.constant dense<0.000000e+00> : vector<11x128xf32>
    %219 = tpu.matmul %143, %217, %cst_122 {dimension_numbers = #tpu.dot_dimension_numbers<[1], [0], [0], [1], [0, 0, 1, 1], [], []>} : vector<11x16xf32>, vector<16x128xf32>, vector<11x128xf32> -> vector<11x128xf32>
    %220 = arith.maximumf %218, %219 : vector<11x128xf32>
    %cst_123 = arith.constant dense<0.000000e+00> : vector<11x128xf32>
    %221 = tpu.matmul %145, %217, %cst_123 {dimension_numbers = #tpu.dot_dimension_numbers<[1], [0], [0], [1], [0, 0, 1, 1], [], []>} : vector<11x16xf32>, vector<16x128xf32>, vector<11x128xf32> -> vector<11x128xf32>
    %222 = arith.maximumf %220, %221 : vector<11x128xf32>
    %c5 = arith.constant 5 : index
    %c0_124 = arith.constant 0 : index
    %c0_125 = arith.constant 0 : index
    %223 = vector.load %arg9[%c5, %c0_124, %c0_125] : memref<9x11x128xf32, #tpu.memory_space<vmem>>, vector<1x11x128xf32>
    %224 = vector.shape_cast %223 : vector<1x11x128xf32> to vector<11x128xf32>
    %225 = vector.shape_cast %222 : vector<11x128xf32> to vector<1x11x128xf32>
    tpu.vector_store %arg9[%c5, %c0_124, %c0_125], %225 {strides = array<i32>} : memref<9x11x128xf32, #tpu.memory_space<vmem>>, vector<1x11x128xf32>,
    %226 = vector.extract_strided_slice %139 {offsets = [10, 0, 0], sizes = [1, 16, 128], strides = [1, 1, 1]} : vector<16x16x128xf32> to vector<1x16x128xf32>
    %227 = vector.shape_cast %226 : vector<1x16x128xf32> to vector<16x128xf32>
    %228 = vector.extract_strided_slice %139 {offsets = [11, 0, 0], sizes = [1, 16, 128], strides = [1, 1, 1]} : vector<16x16x128xf32> to vector<1x16x128xf32>
    %229 = vector.shape_cast %228 : vector<1x16x128xf32> to vector<16x128xf32>
    %230 = arith.maximumf %227, %229 : vector<16x128xf32>
    %231 = vector.extract_strided_slice %139 {offsets = [12, 0, 0], sizes = [1, 16, 128], strides = [1, 1, 1]} : vector<16x16x128xf32> to vector<1x16x128xf32>
    %232 = vector.shape_cast %231 : vector<1x16x128xf32> to vector<16x128xf32>
    %233 = arith.maximumf %230, %232 : vector<16x128xf32>
    %cst_126 = arith.constant dense<0.000000e+00> : vector<11x128xf32>
    %234 = tpu.matmul %141, %233, %cst_126 {dimension_numbers = #tpu.dot_dimension_numbers<[1], [0], [0], [1], [0, 0, 1, 1], [], []>} : vector<11x16xf32>, vector<16x128xf32>, vector<11x128xf32> -> vector<11x128xf32>
    %cst_127 = arith.constant dense<0.000000e+00> : vector<11x128xf32>
    %235 = tpu.matmul %143, %233, %cst_127 {dimension_numbers = #tpu.dot_dimension_numbers<[1], [0], [0], [1], [0, 0, 1, 1], [], []>} : vector<11x16xf32>, vector<16x128xf32>, vector<11x128xf32> -> vector<11x128xf32>
    %236 = arith.maximumf %234, %235 : vector<11x128xf32>
    %cst_128 = arith.constant dense<0.000000e+00> : vector<11x128xf32>
    %237 = tpu.matmul %145, %233, %cst_128 {dimension_numbers = #tpu.dot_dimension_numbers<[1], [0], [0], [1], [0, 0, 1, 1], [], []>} : vector<11x16xf32>, vector<16x128xf32>, vector<11x128xf32> -> vector<11x128xf32>
    %238 = arith.maximumf %236, %237 : vector<11x128xf32>
    %c6 = arith.constant 6 : index
    %c0_129 = arith.constant 0 : index
    %c0_130 = arith.constant 0 : index
    %239 = vector.load %arg9[%c6, %c0_129, %c0_130] : memref<9x11x128xf32, #tpu.memory_space<vmem>>, vector<1x11x128xf32>
    %240 = vector.shape_cast %239 : vector<1x11x128xf32> to vector<11x128xf32>
    %241 = vector.shape_cast %238 : vector<11x128xf32> to vector<1x11x128xf32>
    tpu.vector_store %arg9[%c6, %c0_129, %c0_130], %241 {strides = array<i32>} : memref<9x11x128xf32, #tpu.memory_space<vmem>>, vector<1x11x128xf32>,
    %242 = vector.extract_strided_slice %139 {offsets = [12, 0, 0], sizes = [1, 16, 128], strides = [1, 1, 1]} : vector<16x16x128xf32> to vector<1x16x128xf32>
    %243 = vector.shape_cast %242 : vector<1x16x128xf32> to vector<16x128xf32>
    %244 = vector.extract_strided_slice %139 {offsets = [13, 0, 0], sizes = [1, 16, 128], strides = [1, 1, 1]} : vector<16x16x128xf32> to vector<1x16x128xf32>
    %245 = vector.shape_cast %244 : vector<1x16x128xf32> to vector<16x128xf32>
    %246 = arith.maximumf %243, %245 : vector<16x128xf32>
    %247 = vector.extract_strided_slice %139 {offsets = [14, 0, 0], sizes = [1, 16, 128], strides = [1, 1, 1]} : vector<16x16x128xf32> to vector<1x16x128xf32>
    %248 = vector.shape_cast %247 : vector<1x16x128xf32> to vector<16x128xf32>
    %249 = arith.maximumf %246, %248 : vector<16x128xf32>
    %cst_131 = arith.constant dense<0.000000e+00> : vector<11x128xf32>
    %250 = tpu.matmul %141, %249, %cst_131 {dimension_numbers = #tpu.dot_dimension_numbers<[1], [0], [0], [1], [0, 0, 1, 1], [], []>} : vector<11x16xf32>, vector<16x128xf32>, vector<11x128xf32> -> vector<11x128xf32>
    %cst_132 = arith.constant dense<0.000000e+00> : vector<11x128xf32>
    %251 = tpu.matmul %143, %249, %cst_132 {dimension_numbers = #tpu.dot_dimension_numbers<[1], [0], [0], [1], [0, 0, 1, 1], [], []>} : vector<11x16xf32>, vector<16x128xf32>, vector<11x128xf32> -> vector<11x128xf32>
    %252 = arith.maximumf %250, %251 : vector<11x128xf32>
    %cst_133 = arith.constant dense<0.000000e+00> : vector<11x128xf32>
    %253 = tpu.matmul %145, %249, %cst_133 {dimension_numbers = #tpu.dot_dimension_numbers<[1], [0], [0], [1], [0, 0, 1, 1], [], []>} : vector<11x16xf32>, vector<16x128xf32>, vector<11x128xf32> -> vector<11x128xf32>
    %254 = arith.maximumf %252, %253 : vector<11x128xf32>
    %c7 = arith.constant 7 : index
    %c0_134 = arith.constant 0 : index
    %c0_135 = arith.constant 0 : index
    %255 = vector.load %arg9[%c7, %c0_134, %c0_135] : memref<9x11x128xf32, #tpu.memory_space<vmem>>, vector<1x11x128xf32>
    %256 = vector.shape_cast %255 : vector<1x11x128xf32> to vector<11x128xf32>
    %257 = vector.shape_cast %254 : vector<11x128xf32> to vector<1x11x128xf32>
    tpu.vector_store %arg9[%c7, %c0_134, %c0_135], %257 {strides = array<i32>} : memref<9x11x128xf32, #tpu.memory_space<vmem>>, vector<1x11x128xf32>,
    %cst_136 = arith.constant 0.000000e+00 : f32
    %258 = vector.broadcast %cst_136 : f32 to vector<11x128xf32>
    %c0_137 = arith.constant 0 : index
    %c0_138 = arith.constant 0 : index
    %c0_139 = arith.constant 0 : index
    %259 = vector.load %arg9[%c0_137, %c0_138, %c0_139] : memref<9x11x128xf32, #tpu.memory_space<vmem>>, vector<1x11x128xf32>
    %260 = vector.shape_cast %259 : vector<1x11x128xf32> to vector<11x128xf32>
    %261 = vector.shape_cast %258 : vector<11x128xf32> to vector<1x11x128xf32>
    tpu.vector_store %arg9[%c0_137, %c0_138, %c0_139], %261 {strides = array<i32>} : memref<9x11x128xf32, #tpu.memory_space<vmem>>, vector<1x11x128xf32>,
    %cst_140 = arith.constant 0.000000e+00 : f32
    %262 = vector.broadcast %cst_140 : f32 to vector<11x128xf32>
    %c8_141 = arith.constant 8 : index
    %c0_142 = arith.constant 0 : index
    %c0_143 = arith.constant 0 : index
    %263 = vector.load %arg9[%c8_141, %c0_142, %c0_143] : memref<9x11x128xf32, #tpu.memory_space<vmem>>, vector<1x11x128xf32>
    %264 = vector.shape_cast %263 : vector<1x11x128xf32> to vector<11x128xf32>
    %265 = vector.shape_cast %262 : vector<11x128xf32> to vector<1x11x128xf32>
    tpu.vector_store %arg9[%c8_141, %c0_142, %c0_143], %265 {strides = array<i32>} : memref<9x11x128xf32, #tpu.memory_space<vmem>>, vector<1x11x128xf32>,
    %c0_144 = arith.constant 0 : index
    %c0_145 = arith.constant 0 : index
    %c0_146 = arith.constant 0 : index
    %266 = vector.load %arg9[%c0_144, %c0_145, %c0_146] : memref<9x11x128xf32, #tpu.memory_space<vmem>>, vector<7x9x128xf32>
    %c26 = arith.constant 26 : index
    %c0_147 = arith.constant 0 : index
    %267 = vector.load %arg2[%c26, %c0_147] : memref<107x128xf32, #tpu.memory_space<vmem>>, vector<1x128xf32>
    %268 = vector.shape_cast %267 : vector<1x128xf32> to vector<1x1x128xf32>
    %269 = vector.broadcast %268 : vector<1x1x128xf32> to vector<7x9x128xf32>
    %270 = arith.mulf %266, %269 : vector<7x9x128xf32>
    %c35 = arith.constant 35 : index
    %c0_148 = arith.constant 0 : index
    %271 = vector.load %arg2[%c35, %c0_148] : memref<107x128xf32, #tpu.memory_space<vmem>>, vector<1x128xf32>
    %272 = vector.shape_cast %271 : vector<1x128xf32> to vector<1x1x128xf32>
    %273 = vector.broadcast %272 : vector<1x1x128xf32> to vector<7x9x128xf32>
    %274 = arith.mulf %266, %273 : vector<7x9x128xf32>
    %c0_149 = arith.constant 0 : index
    %c1_150 = arith.constant 1 : index
    %c0_151 = arith.constant 0 : index
    %275 = vector.load %arg9[%c0_149, %c1_150, %c0_151] : memref<9x11x128xf32, #tpu.memory_space<vmem>>, vector<7x9x128xf32>
    %c27 = arith.constant 27 : index
    %c0_152 = arith.constant 0 : index
    %276 = vector.load %arg2[%c27, %c0_152] : memref<107x128xf32, #tpu.memory_space<vmem>>, vector<1x128xf32>
    %277 = vector.shape_cast %276 : vector<1x128xf32> to vector<1x1x128xf32>
    %278 = vector.broadcast %277 : vector<1x1x128xf32> to vector<7x9x128xf32>
    %279 = arith.mulf %275, %278 : vector<7x9x128xf32>
    %c36 = arith.constant 36 : index
    %c0_153 = arith.constant 0 : index
    %280 = vector.load %arg2[%c36, %c0_153] : memref<107x128xf32, #tpu.memory_space<vmem>>, vector<1x128xf32>
    %281 = vector.shape_cast %280 : vector<1x128xf32> to vector<1x1x128xf32>
    %282 = vector.broadcast %281 : vector<1x1x128xf32> to vector<7x9x128xf32>
    %283 = arith.mulf %275, %282 : vector<7x9x128xf32>
    %284 = arith.addf %270, %279 : vector<7x9x128xf32>
    %285 = arith.addf %274, %283 : vector<7x9x128xf32>
    %c0_154 = arith.constant 0 : index
    %c2_155 = arith.constant 2 : index
    %c0_156 = arith.constant 0 : index
    %286 = vector.load %arg9[%c0_154, %c2_155, %c0_156] : memref<9x11x128xf32, #tpu.memory_space<vmem>>, vector<7x9x128xf32>
    %c28 = arith.constant 28 : index
    %c0_157 = arith.constant 0 : index
    %287 = vector.load %arg2[%c28, %c0_157] : memref<107x128xf32, #tpu.memory_space<vmem>>, vector<1x128xf32>
    %288 = vector.shape_cast %287 : vector<1x128xf32> to vector<1x1x128xf32>
    %289 = vector.broadcast %288 : vector<1x1x128xf32> to vector<7x9x128xf32>
    %290 = arith.mulf %286, %289 : vector<7x9x128xf32>
    %c37 = arith.constant 37 : index
    %c0_158 = arith.constant 0 : index
    %291 = vector.load %arg2[%c37, %c0_158] : memref<107x128xf32, #tpu.memory_space<vmem>>, vector<1x128xf32>
    %292 = vector.shape_cast %291 : vector<1x128xf32> to vector<1x1x128xf32>
    %293 = vector.broadcast %292 : vector<1x1x128xf32> to vector<7x9x128xf32>
    %294 = arith.mulf %286, %293 : vector<7x9x128xf32>
    %295 = arith.addf %284, %290 : vector<7x9x128xf32>
    %296 = arith.addf %285, %294 : vector<7x9x128xf32>
    %c1_159 = arith.constant 1 : index
    %c0_160 = arith.constant 0 : index
    %c0_161 = arith.constant 0 : index
    %297 = vector.load %arg9[%c1_159, %c0_160, %c0_161] : memref<9x11x128xf32, #tpu.memory_space<vmem>>, vector<7x9x128xf32>
    %c29 = arith.constant 29 : index
    %c0_162 = arith.constant 0 : index
    %298 = vector.load %arg2[%c29, %c0_162] : memref<107x128xf32, #tpu.memory_space<vmem>>, vector<1x128xf32>
    %299 = vector.shape_cast %298 : vector<1x128xf32> to vector<1x1x128xf32>
    %300 = vector.broadcast %299 : vector<1x1x128xf32> to vector<7x9x128xf32>
    %301 = arith.mulf %297, %300 : vector<7x9x128xf32>
    %c38 = arith.constant 38 : index
    %c0_163 = arith.constant 0 : index
    %302 = vector.load %arg2[%c38, %c0_163] : memref<107x128xf32, #tpu.memory_space<vmem>>, vector<1x128xf32>
    %303 = vector.shape_cast %302 : vector<1x128xf32> to vector<1x1x128xf32>
    %304 = vector.broadcast %303 : vector<1x1x128xf32> to vector<7x9x128xf32>
    %305 = arith.mulf %297, %304 : vector<7x9x128xf32>
    %306 = arith.addf %295, %301 : vector<7x9x128xf32>
    %307 = arith.addf %296, %305 : vector<7x9x128xf32>
    %c1_164 = arith.constant 1 : index
    %c1_165 = arith.constant 1 : index
    %c0_166 = arith.constant 0 : index
    %308 = vector.load %arg9[%c1_164, %c1_165, %c0_166] : memref<9x11x128xf32, #tpu.memory_space<vmem>>, vector<7x9x128xf32>
    %c30 = arith.constant 30 : index
    %c0_167 = arith.constant 0 : index
    %309 = vector.load %arg2[%c30, %c0_167] : memref<107x128xf32, #tpu.memory_space<vmem>>, vector<1x128xf32>
    %310 = vector.shape_cast %309 : vector<1x128xf32> to vector<1x1x128xf32>
    %311 = vector.broadcast %310 : vector<1x1x128xf32> to vector<7x9x128xf32>
    %312 = arith.mulf %308, %311 : vector<7x9x128xf32>
    %c39 = arith.constant 39 : index
    %c0_168 = arith.constant 0 : index
    %313 = vector.load %arg2[%c39, %c0_168] : memref<107x128xf32, #tpu.memory_space<vmem>>, vector<1x128xf32>
    %314 = vector.shape_cast %313 : vector<1x128xf32> to vector<1x1x128xf32>
    %315 = vector.broadcast %314 : vector<1x1x128xf32> to vector<7x9x128xf32>
    %316 = arith.mulf %308, %315 : vector<7x9x128xf32>
    %317 = arith.addf %306, %312 : vector<7x9x128xf32>
    %318 = arith.addf %307, %316 : vector<7x9x128xf32>
    %c1_169 = arith.constant 1 : index
    %c2_170 = arith.constant 2 : index
    %c0_171 = arith.constant 0 : index
    %319 = vector.load %arg9[%c1_169, %c2_170, %c0_171] : memref<9x11x128xf32, #tpu.memory_space<vmem>>, vector<7x9x128xf32>
    %c31 = arith.constant 31 : index
    %c0_172 = arith.constant 0 : index
    %320 = vector.load %arg2[%c31, %c0_172] : memref<107x128xf32, #tpu.memory_space<vmem>>, vector<1x128xf32>
    %321 = vector.shape_cast %320 : vector<1x128xf32> to vector<1x1x128xf32>
    %322 = vector.broadcast %321 : vector<1x1x128xf32> to vector<7x9x128xf32>
    %323 = arith.mulf %319, %322 : vector<7x9x128xf32>
    %c40 = arith.constant 40 : index
    %c0_173 = arith.constant 0 : index
    %324 = vector.load %arg2[%c40, %c0_173] : memref<107x128xf32, #tpu.memory_space<vmem>>, vector<1x128xf32>
    %325 = vector.shape_cast %324 : vector<1x128xf32> to vector<1x1x128xf32>
    %326 = vector.broadcast %325 : vector<1x1x128xf32> to vector<7x9x128xf32>
    %327 = arith.mulf %319, %326 : vector<7x9x128xf32>
    %328 = arith.addf %317, %323 : vector<7x9x128xf32>
    %329 = arith.addf %318, %327 : vector<7x9x128xf32>
    %c2_174 = arith.constant 2 : index
    %c0_175 = arith.constant 0 : index
    %c0_176 = arith.constant 0 : index
    %330 = vector.load %arg9[%c2_174, %c0_175, %c0_176] : memref<9x11x128xf32, #tpu.memory_space<vmem>>, vector<7x9x128xf32>
    %c32 = arith.constant 32 : index
    %c0_177 = arith.constant 0 : index
    %331 = vector.load %arg2[%c32, %c0_177] : memref<107x128xf32, #tpu.memory_space<vmem>>, vector<1x128xf32>
    %332 = vector.shape_cast %331 : vector<1x128xf32> to vector<1x1x128xf32>
    %333 = vector.broadcast %332 : vector<1x1x128xf32> to vector<7x9x128xf32>
    %334 = arith.mulf %330, %333 : vector<7x9x128xf32>
    %c41 = arith.constant 41 : index
    %c0_178 = arith.constant 0 : index
    %335 = vector.load %arg2[%c41, %c0_178] : memref<107x128xf32, #tpu.memory_space<vmem>>, vector<1x128xf32>
    %336 = vector.shape_cast %335 : vector<1x128xf32> to vector<1x1x128xf32>
    %337 = vector.broadcast %336 : vector<1x1x128xf32> to vector<7x9x128xf32>
    %338 = arith.mulf %330, %337 : vector<7x9x128xf32>
    %339 = arith.addf %328, %334 : vector<7x9x128xf32>
    %340 = arith.addf %329, %338 : vector<7x9x128xf32>
    %c2_179 = arith.constant 2 : index
    %c1_180 = arith.constant 1 : index
    %c0_181 = arith.constant 0 : index
    %341 = vector.load %arg9[%c2_179, %c1_180, %c0_181] : memref<9x11x128xf32, #tpu.memory_space<vmem>>, vector<7x9x128xf32>
    %c33 = arith.constant 33 : index
    %c0_182 = arith.constant 0 : index
    %342 = vector.load %arg2[%c33, %c0_182] : memref<107x128xf32, #tpu.memory_space<vmem>>, vector<1x128xf32>
    %343 = vector.shape_cast %342 : vector<1x128xf32> to vector<1x1x128xf32>
    %344 = vector.broadcast %343 : vector<1x1x128xf32> to vector<7x9x128xf32>
    %345 = arith.mulf %341, %344 : vector<7x9x128xf32>
    %c42 = arith.constant 42 : index
    %c0_183 = arith.constant 0 : index
    %346 = vector.load %arg2[%c42, %c0_183] : memref<107x128xf32, #tpu.memory_space<vmem>>, vector<1x128xf32>
    %347 = vector.shape_cast %346 : vector<1x128xf32> to vector<1x1x128xf32>
    %348 = vector.broadcast %347 : vector<1x1x128xf32> to vector<7x9x128xf32>
    %349 = arith.mulf %341, %348 : vector<7x9x128xf32>
    %350 = arith.addf %339, %345 : vector<7x9x128xf32>
    %351 = arith.addf %340, %349 : vector<7x9x128xf32>
    %c2_184 = arith.constant 2 : index
    %c2_185 = arith.constant 2 : index
    %c0_186 = arith.constant 0 : index
    %352 = vector.load %arg9[%c2_184, %c2_185, %c0_186] : memref<9x11x128xf32, #tpu.memory_space<vmem>>, vector<7x9x128xf32>
    %c34 = arith.constant 34 : index
    %c0_187 = arith.constant 0 : index
    %353 = vector.load %arg2[%c34, %c0_187] : memref<107x128xf32, #tpu.memory_space<vmem>>, vector<1x128xf32>
    %354 = vector.shape_cast %353 : vector<1x128xf32> to vector<1x1x128xf32>
    %355 = vector.broadcast %354 : vector<1x1x128xf32> to vector<7x9x128xf32>
    %356 = arith.mulf %352, %355 : vector<7x9x128xf32>
    %c43 = arith.constant 43 : index
    %c0_188 = arith.constant 0 : index
    %357 = vector.load %arg2[%c43, %c0_188] : memref<107x128xf32, #tpu.memory_space<vmem>>, vector<1x128xf32>
    %358 = vector.shape_cast %357 : vector<1x128xf32> to vector<1x1x128xf32>
    %359 = vector.broadcast %358 : vector<1x1x128xf32> to vector<7x9x128xf32>
    %360 = arith.mulf %352, %359 : vector<7x9x128xf32>
    %361 = arith.addf %350, %356 : vector<7x9x128xf32>
    %362 = arith.addf %351, %360 : vector<7x9x128xf32>
    %c11_189 = arith.constant 11 : index
    %c0_190 = arith.constant 0 : index
    %363 = vector.load %arg5[%c11_189, %c0_190] : memref<20x256xf32, #tpu.memory_space<vmem>>, vector<9x256xf32>
    %c9_191 = arith.constant 9 : index
    %c0_192 = arith.constant 0 : index
    %364 = vector.load %arg5[%c9_191, %c0_192] : memref<20x256xf32, #tpu.memory_space<vmem>>, vector<1x256xf32>
    %365 = vector.extract_strided_slice %361 {offsets = [0, 0, 0], sizes = [1, 9, 128], strides = [1, 1, 1]} : vector<7x9x128xf32> to vector<1x9x128xf32>
    %366 = vector.shape_cast %365 : vector<1x9x128xf32> to vector<9x128xf32>
    %c0_193 = arith.constant 0 : index
    %c0_194 = arith.constant 0 : index
    %367 = vector.load %arg4[%c0_193, %c0_194] : memref<512x256xf32, #tpu.memory_space<vmem>>, vector<128x256xf32>
    %cst_195 = arith.constant dense<0.000000e+00> : vector<9x256xf32>
    %368 = tpu.matmul %366, %367, %cst_195 {dimension_numbers = #tpu.dot_dimension_numbers<[1], [0], [0], [1], [0, 0, 1, 1], [], []>} : vector<9x128xf32>, vector<128x256xf32>, vector<9x256xf32> -> vector<9x256xf32>
    %369 = vector.extract_strided_slice %362 {offsets = [0, 0, 0], sizes = [1, 9, 128], strides = [1, 1, 1]} : vector<7x9x128xf32> to vector<1x9x128xf32>
    %370 = vector.shape_cast %369 : vector<1x9x128xf32> to vector<9x128xf32>
    %c128 = arith.constant 128 : index
    %c0_196 = arith.constant 0 : index
    %371 = vector.load %arg4[%c128, %c0_196] : memref<512x256xf32, #tpu.memory_space<vmem>>, vector<128x256xf32>
    %cst_197 = arith.constant dense<0.000000e+00> : vector<9x256xf32>
    %372 = tpu.matmul %370, %371, %cst_197 {dimension_numbers = #tpu.dot_dimension_numbers<[1], [0], [0], [1], [0, 0, 1, 1], [], []>} : vector<9x128xf32>, vector<128x256xf32>, vector<9x256xf32> -> vector<9x256xf32>
    %373 = arith.addf %368, %372 : vector<9x256xf32>
    %374 = vector.broadcast %364 : vector<1x256xf32> to vector<9x256xf32>
    %375 = arith.addf %373, %374 : vector<9x256xf32>
    %cst_198 = arith.constant 0.000000e+00 : f32
    %376 = vector.broadcast %cst_198 : f32 to vector<9x256xf32>
    %377 = arith.maximumf %375, %376 : vector<9x256xf32>
    %378 = arith.mulf %377, %363 : vector<9x256xf32>
    %c1_199 = arith.constant 1 : index
    %c0_200 = arith.constant 0 : index
    %c0_201 = arith.constant 0 : index
    %379 = vector.load %arg10[%c1_199, %c0_200, %c0_201] : memref<9x9x256xf32, #tpu.memory_space<vmem>>, vector<1x9x256xf32>
    %380 = vector.shape_cast %379 : vector<1x9x256xf32> to vector<9x256xf32>
    %381 = vector.shape_cast %378 : vector<9x256xf32> to vector<1x9x256xf32>
    tpu.vector_store %arg10[%c1_199, %c0_200, %c0_201], %381 {strides = array<i32>} : memref<9x9x256xf32, #tpu.memory_space<vmem>>, vector<1x9x256xf32>,
    %382 = vector.extract_strided_slice %361 {offsets = [1, 0, 0], sizes = [1, 9, 128], strides = [1, 1, 1]} : vector<7x9x128xf32> to vector<1x9x128xf32>
    %383 = vector.shape_cast %382 : vector<1x9x128xf32> to vector<9x128xf32>
    %c0_202 = arith.constant 0 : index
    %c0_203 = arith.constant 0 : index
    %384 = vector.load %arg4[%c0_202, %c0_203] : memref<512x256xf32, #tpu.memory_space<vmem>>, vector<128x256xf32>
    %cst_204 = arith.constant dense<0.000000e+00> : vector<9x256xf32>
    %385 = tpu.matmul %383, %384, %cst_204 {dimension_numbers = #tpu.dot_dimension_numbers<[1], [0], [0], [1], [0, 0, 1, 1], [], []>} : vector<9x128xf32>, vector<128x256xf32>, vector<9x256xf32> -> vector<9x256xf32>
    %386 = vector.extract_strided_slice %362 {offsets = [1, 0, 0], sizes = [1, 9, 128], strides = [1, 1, 1]} : vector<7x9x128xf32> to vector<1x9x128xf32>
    %387 = vector.shape_cast %386 : vector<1x9x128xf32> to vector<9x128xf32>
    %c128_205 = arith.constant 128 : index
    %c0_206 = arith.constant 0 : index
    %388 = vector.load %arg4[%c128_205, %c0_206] : memref<512x256xf32, #tpu.memory_space<vmem>>, vector<128x256xf32>
    %cst_207 = arith.constant dense<0.000000e+00> : vector<9x256xf32>
    %389 = tpu.matmul %387, %388, %cst_207 {dimension_numbers = #tpu.dot_dimension_numbers<[1], [0], [0], [1], [0, 0, 1, 1], [], []>} : vector<9x128xf32>, vector<128x256xf32>, vector<9x256xf32> -> vector<9x256xf32>
    %390 = arith.addf %385, %389 : vector<9x256xf32>
    %391 = vector.broadcast %364 : vector<1x256xf32> to vector<9x256xf32>
    %392 = arith.addf %390, %391 : vector<9x256xf32>
    %cst_208 = arith.constant 0.000000e+00 : f32
    %393 = vector.broadcast %cst_208 : f32 to vector<9x256xf32>
    %394 = arith.maximumf %392, %393 : vector<9x256xf32>
    %395 = arith.mulf %394, %363 : vector<9x256xf32>
    %c2_209 = arith.constant 2 : index
    %c0_210 = arith.constant 0 : index
    %c0_211 = arith.constant 0 : index
    %396 = vector.load %arg10[%c2_209, %c0_210, %c0_211] : memref<9x9x256xf32, #tpu.memory_space<vmem>>, vector<1x9x256xf32>
    %397 = vector.shape_cast %396 : vector<1x9x256xf32> to vector<9x256xf32>
    %398 = vector.shape_cast %395 : vector<9x256xf32> to vector<1x9x256xf32>
    tpu.vector_store %arg10[%c2_209, %c0_210, %c0_211], %398 {strides = array<i32>} : memref<9x9x256xf32, #tpu.memory_space<vmem>>, vector<1x9x256xf32>,
    %399 = vector.extract_strided_slice %361 {offsets = [2, 0, 0], sizes = [1, 9, 128], strides = [1, 1, 1]} : vector<7x9x128xf32> to vector<1x9x128xf32>
    %400 = vector.shape_cast %399 : vector<1x9x128xf32> to vector<9x128xf32>
    %c0_212 = arith.constant 0 : index
    %c0_213 = arith.constant 0 : index
    %401 = vector.load %arg4[%c0_212, %c0_213] : memref<512x256xf32, #tpu.memory_space<vmem>>, vector<128x256xf32>
    %cst_214 = arith.constant dense<0.000000e+00> : vector<9x256xf32>
    %402 = tpu.matmul %400, %401, %cst_214 {dimension_numbers = #tpu.dot_dimension_numbers<[1], [0], [0], [1], [0, 0, 1, 1], [], []>} : vector<9x128xf32>, vector<128x256xf32>, vector<9x256xf32> -> vector<9x256xf32>
    %403 = vector.extract_strided_slice %362 {offsets = [2, 0, 0], sizes = [1, 9, 128], strides = [1, 1, 1]} : vector<7x9x128xf32> to vector<1x9x128xf32>
    %404 = vector.shape_cast %403 : vector<1x9x128xf32> to vector<9x128xf32>
    %c128_215 = arith.constant 128 : index
    %c0_216 = arith.constant 0 : index
    %405 = vector.load %arg4[%c128_215, %c0_216] : memref<512x256xf32, #tpu.memory_space<vmem>>, vector<128x256xf32>
    %cst_217 = arith.constant dense<0.000000e+00> : vector<9x256xf32>
    %406 = tpu.matmul %404, %405, %cst_217 {dimension_numbers = #tpu.dot_dimension_numbers<[1], [0], [0], [1], [0, 0, 1, 1], [], []>} : vector<9x128xf32>, vector<128x256xf32>, vector<9x256xf32> -> vector<9x256xf32>
    %407 = arith.addf %402, %406 : vector<9x256xf32>
    %408 = vector.broadcast %364 : vector<1x256xf32> to vector<9x256xf32>
    %409 = arith.addf %407, %408 : vector<9x256xf32>
    %cst_218 = arith.constant 0.000000e+00 : f32
    %410 = vector.broadcast %cst_218 : f32 to vector<9x256xf32>
    %411 = arith.maximumf %409, %410 : vector<9x256xf32>
    %412 = arith.mulf %411, %363 : vector<9x256xf32>
    %c3_219 = arith.constant 3 : index
    %c0_220 = arith.constant 0 : index
    %c0_221 = arith.constant 0 : index
    %413 = vector.load %arg10[%c3_219, %c0_220, %c0_221] : memref<9x9x256xf32, #tpu.memory_space<vmem>>, vector<1x9x256xf32>
    %414 = vector.shape_cast %413 : vector<1x9x256xf32> to vector<9x256xf32>
    %415 = vector.shape_cast %412 : vector<9x256xf32> to vector<1x9x256xf32>
    tpu.vector_store %arg10[%c3_219, %c0_220, %c0_221], %415 {strides = array<i32>} : memref<9x9x256xf32, #tpu.memory_space<vmem>>, vector<1x9x256xf32>,
    %416 = vector.extract_strided_slice %361 {offsets = [3, 0, 0], sizes = [1, 9, 128], strides = [1, 1, 1]} : vector<7x9x128xf32> to vector<1x9x128xf32>
    %417 = vector.shape_cast %416 : vector<1x9x128xf32> to vector<9x128xf32>
    %c0_222 = arith.constant 0 : index
    %c0_223 = arith.constant 0 : index
    %418 = vector.load %arg4[%c0_222, %c0_223] : memref<512x256xf32, #tpu.memory_space<vmem>>, vector<128x256xf32>
    %cst_224 = arith.constant dense<0.000000e+00> : vector<9x256xf32>
    %419 = tpu.matmul %417, %418, %cst_224 {dimension_numbers = #tpu.dot_dimension_numbers<[1], [0], [0], [1], [0, 0, 1, 1], [], []>} : vector<9x128xf32>, vector<128x256xf32>, vector<9x256xf32> -> vector<9x256xf32>
    %420 = vector.extract_strided_slice %362 {offsets = [3, 0, 0], sizes = [1, 9, 128], strides = [1, 1, 1]} : vector<7x9x128xf32> to vector<1x9x128xf32>
    %421 = vector.shape_cast %420 : vector<1x9x128xf32> to vector<9x128xf32>
    %c128_225 = arith.constant 128 : index
    %c0_226 = arith.constant 0 : index
    %422 = vector.load %arg4[%c128_225, %c0_226] : memref<512x256xf32, #tpu.memory_space<vmem>>, vector<128x256xf32>
    %cst_227 = arith.constant dense<0.000000e+00> : vector<9x256xf32>
    %423 = tpu.matmul %421, %422, %cst_227 {dimension_numbers = #tpu.dot_dimension_numbers<[1], [0], [0], [1], [0, 0, 1, 1], [], []>} : vector<9x128xf32>, vector<128x256xf32>, vector<9x256xf32> -> vector<9x256xf32>
    %424 = arith.addf %419, %423 : vector<9x256xf32>
    %425 = vector.broadcast %364 : vector<1x256xf32> to vector<9x256xf32>
    %426 = arith.addf %424, %425 : vector<9x256xf32>
    %cst_228 = arith.constant 0.000000e+00 : f32
    %427 = vector.broadcast %cst_228 : f32 to vector<9x256xf32>
    %428 = arith.maximumf %426, %427 : vector<9x256xf32>
    %429 = arith.mulf %428, %363 : vector<9x256xf32>
    %c4_229 = arith.constant 4 : index
    %c0_230 = arith.constant 0 : index
    %c0_231 = arith.constant 0 : index
    %430 = vector.load %arg10[%c4_229, %c0_230, %c0_231] : memref<9x9x256xf32, #tpu.memory_space<vmem>>, vector<1x9x256xf32>
    %431 = vector.shape_cast %430 : vector<1x9x256xf32> to vector<9x256xf32>
    %432 = vector.shape_cast %429 : vector<9x256xf32> to vector<1x9x256xf32>
    tpu.vector_store %arg10[%c4_229, %c0_230, %c0_231], %432 {strides = array<i32>} : memref<9x9x256xf32, #tpu.memory_space<vmem>>, vector<1x9x256xf32>,
    %433 = vector.extract_strided_slice %361 {offsets = [4, 0, 0], sizes = [1, 9, 128], strides = [1, 1, 1]} : vector<7x9x128xf32> to vector<1x9x128xf32>
    %434 = vector.shape_cast %433 : vector<1x9x128xf32> to vector<9x128xf32>
    %c0_232 = arith.constant 0 : index
    %c0_233 = arith.constant 0 : index
    %435 = vector.load %arg4[%c0_232, %c0_233] : memref<512x256xf32, #tpu.memory_space<vmem>>, vector<128x256xf32>
    %cst_234 = arith.constant dense<0.000000e+00> : vector<9x256xf32>
    %436 = tpu.matmul %434, %435, %cst_234 {dimension_numbers = #tpu.dot_dimension_numbers<[1], [0], [0], [1], [0, 0, 1, 1], [], []>} : vector<9x128xf32>, vector<128x256xf32>, vector<9x256xf32> -> vector<9x256xf32>
    %437 = vector.extract_strided_slice %362 {offsets = [4, 0, 0], sizes = [1, 9, 128], strides = [1, 1, 1]} : vector<7x9x128xf32> to vector<1x9x128xf32>
    %438 = vector.shape_cast %437 : vector<1x9x128xf32> to vector<9x128xf32>
    %c128_235 = arith.constant 128 : index
    %c0_236 = arith.constant 0 : index
    %439 = vector.load %arg4[%c128_235, %c0_236] : memref<512x256xf32, #tpu.memory_space<vmem>>, vector<128x256xf32>
    %cst_237 = arith.constant dense<0.000000e+00> : vector<9x256xf32>
    %440 = tpu.matmul %438, %439, %cst_237 {dimension_numbers = #tpu.dot_dimension_numbers<[1], [0], [0], [1], [0, 0, 1, 1], [], []>} : vector<9x128xf32>, vector<128x256xf32>, vector<9x256xf32> -> vector<9x256xf32>
    %441 = arith.addf %436, %440 : vector<9x256xf32>
    %442 = vector.broadcast %364 : vector<1x256xf32> to vector<9x256xf32>
    %443 = arith.addf %441, %442 : vector<9x256xf32>
    %cst_238 = arith.constant 0.000000e+00 : f32
    %444 = vector.broadcast %cst_238 : f32 to vector<9x256xf32>
    %445 = arith.maximumf %443, %444 : vector<9x256xf32>
    %446 = arith.mulf %445, %363 : vector<9x256xf32>
    %c5_239 = arith.constant 5 : index
    %c0_240 = arith.constant 0 : index
    %c0_241 = arith.constant 0 : index
    %447 = vector.load %arg10[%c5_239, %c0_240, %c0_241] : memref<9x9x256xf32, #tpu.memory_space<vmem>>, vector<1x9x256xf32>
    %448 = vector.shape_cast %447 : vector<1x9x256xf32> to vector<9x256xf32>
    %449 = vector.shape_cast %446 : vector<9x256xf32> to vector<1x9x256xf32>
    tpu.vector_store %arg10[%c5_239, %c0_240, %c0_241], %449 {strides = array<i32>} : memref<9x9x256xf32, #tpu.memory_space<vmem>>, vector<1x9x256xf32>,
    %450 = vector.extract_strided_slice %361 {offsets = [5, 0, 0], sizes = [1, 9, 128], strides = [1, 1, 1]} : vector<7x9x128xf32> to vector<1x9x128xf32>
    %451 = vector.shape_cast %450 : vector<1x9x128xf32> to vector<9x128xf32>
    %c0_242 = arith.constant 0 : index
    %c0_243 = arith.constant 0 : index
    %452 = vector.load %arg4[%c0_242, %c0_243] : memref<512x256xf32, #tpu.memory_space<vmem>>, vector<128x256xf32>
    %cst_244 = arith.constant dense<0.000000e+00> : vector<9x256xf32>
    %453 = tpu.matmul %451, %452, %cst_244 {dimension_numbers = #tpu.dot_dimension_numbers<[1], [0], [0], [1], [0, 0, 1, 1], [], []>} : vector<9x128xf32>, vector<128x256xf32>, vector<9x256xf32> -> vector<9x256xf32>
    %454 = vector.extract_strided_slice %362 {offsets = [5, 0, 0], sizes = [1, 9, 128], strides = [1, 1, 1]} : vector<7x9x128xf32> to vector<1x9x128xf32>
    %455 = vector.shape_cast %454 : vector<1x9x128xf32> to vector<9x128xf32>
    %c128_245 = arith.constant 128 : index
    %c0_246 = arith.constant 0 : index
    %456 = vector.load %arg4[%c128_245, %c0_246] : memref<512x256xf32, #tpu.memory_space<vmem>>, vector<128x256xf32>
    %cst_247 = arith.constant dense<0.000000e+00> : vector<9x256xf32>
    %457 = tpu.matmul %455, %456, %cst_247 {dimension_numbers = #tpu.dot_dimension_numbers<[1], [0], [0], [1], [0, 0, 1, 1], [], []>} : vector<9x128xf32>, vector<128x256xf32>, vector<9x256xf32> -> vector<9x256xf32>
    %458 = arith.addf %453, %457 : vector<9x256xf32>
    %459 = vector.broadcast %364 : vector<1x256xf32> to vector<9x256xf32>
    %460 = arith.addf %458, %459 : vector<9x256xf32>
    %cst_248 = arith.constant 0.000000e+00 : f32
    %461 = vector.broadcast %cst_248 : f32 to vector<9x256xf32>
    %462 = arith.maximumf %460, %461 : vector<9x256xf32>
    %463 = arith.mulf %462, %363 : vector<9x256xf32>
    %c6_249 = arith.constant 6 : index
    %c0_250 = arith.constant 0 : index
    %c0_251 = arith.constant 0 : index
    %464 = vector.load %arg10[%c6_249, %c0_250, %c0_251] : memref<9x9x256xf32, #tpu.memory_space<vmem>>, vector<1x9x256xf32>
    %465 = vector.shape_cast %464 : vector<1x9x256xf32> to vector<9x256xf32>
    %466 = vector.shape_cast %463 : vector<9x256xf32> to vector<1x9x256xf32>
    tpu.vector_store %arg10[%c6_249, %c0_250, %c0_251], %466 {strides = array<i32>} : memref<9x9x256xf32, #tpu.memory_space<vmem>>, vector<1x9x256xf32>,
    %467 = vector.extract_strided_slice %361 {offsets = [6, 0, 0], sizes = [1, 9, 128], strides = [1, 1, 1]} : vector<7x9x128xf32> to vector<1x9x128xf32>
    %468 = vector.shape_cast %467 : vector<1x9x128xf32> to vector<9x128xf32>
    %c0_252 = arith.constant 0 : index
    %c0_253 = arith.constant 0 : index
    %469 = vector.load %arg4[%c0_252, %c0_253] : memref<512x256xf32, #tpu.memory_space<vmem>>, vector<128x256xf32>
    %cst_254 = arith.constant dense<0.000000e+00> : vector<9x256xf32>
    %470 = tpu.matmul %468, %469, %cst_254 {dimension_numbers = #tpu.dot_dimension_numbers<[1], [0], [0], [1], [0, 0, 1, 1], [], []>} : vector<9x128xf32>, vector<128x256xf32>, vector<9x256xf32> -> vector<9x256xf32>
    %471 = vector.extract_strided_slice %362 {offsets = [6, 0, 0], sizes = [1, 9, 128], strides = [1, 1, 1]} : vector<7x9x128xf32> to vector<1x9x128xf32>
    %472 = vector.shape_cast %471 : vector<1x9x128xf32> to vector<9x128xf32>
    %c128_255 = arith.constant 128 : index
    %c0_256 = arith.constant 0 : index
    %473 = vector.load %arg4[%c128_255, %c0_256] : memref<512x256xf32, #tpu.memory_space<vmem>>, vector<128x256xf32>
    %cst_257 = arith.constant dense<0.000000e+00> : vector<9x256xf32>
    %474 = tpu.matmul %472, %473, %cst_257 {dimension_numbers = #tpu.dot_dimension_numbers<[1], [0], [0], [1], [0, 0, 1, 1], [], []>} : vector<9x128xf32>, vector<128x256xf32>, vector<9x256xf32> -> vector<9x256xf32>
    %475 = arith.addf %470, %474 : vector<9x256xf32>
    %476 = vector.broadcast %364 : vector<1x256xf32> to vector<9x256xf32>
    %477 = arith.addf %475, %476 : vector<9x256xf32>
    %cst_258 = arith.constant 0.000000e+00 : f32
    %478 = vector.broadcast %cst_258 : f32 to vector<9x256xf32>
    %479 = arith.maximumf %477, %478 : vector<9x256xf32>
    %480 = arith.mulf %479, %363 : vector<9x256xf32>
    %c7_259 = arith.constant 7 : index
    %c0_260 = arith.constant 0 : index
    %c0_261 = arith.constant 0 : index
    %481 = vector.load %arg10[%c7_259, %c0_260, %c0_261] : memref<9x9x256xf32, #tpu.memory_space<vmem>>, vector<1x9x256xf32>
    %482 = vector.shape_cast %481 : vector<1x9x256xf32> to vector<9x256xf32>
    %483 = vector.shape_cast %480 : vector<9x256xf32> to vector<1x9x256xf32>
    tpu.vector_store %arg10[%c7_259, %c0_260, %c0_261], %483 {strides = array<i32>} : memref<9x9x256xf32, #tpu.memory_space<vmem>>, vector<1x9x256xf32>,
    %cst_262 = arith.constant 0.000000e+00 : f32
    %484 = vector.broadcast %cst_262 : f32 to vector<9x256xf32>
    %c0_263 = arith.constant 0 : index
    %c0_264 = arith.constant 0 : index
    %c0_265 = arith.constant 0 : index
    %485 = vector.load %arg10[%c0_263, %c0_264, %c0_265] : memref<9x9x256xf32, #tpu.memory_space<vmem>>, vector<1x9x256xf32>
    %486 = vector.shape_cast %485 : vector<1x9x256xf32> to vector<9x256xf32>
    %487 = vector.shape_cast %484 : vector<9x256xf32> to vector<1x9x256xf32>
    tpu.vector_store %arg10[%c0_263, %c0_264, %c0_265], %487 {strides = array<i32>} : memref<9x9x256xf32, #tpu.memory_space<vmem>>, vector<1x9x256xf32>,
    %cst_266 = arith.constant 0.000000e+00 : f32
    %488 = vector.broadcast %cst_266 : f32 to vector<9x256xf32>
    %c8_267 = arith.constant 8 : index
    %c0_268 = arith.constant 0 : index
    %c0_269 = arith.constant 0 : index
    %489 = vector.load %arg10[%c8_267, %c0_268, %c0_269] : memref<9x9x256xf32, #tpu.memory_space<vmem>>, vector<1x9x256xf32>
    %490 = vector.shape_cast %489 : vector<1x9x256xf32> to vector<9x256xf32>
    %491 = vector.shape_cast %488 : vector<9x256xf32> to vector<1x9x256xf32>
    tpu.vector_store %arg10[%c8_267, %c0_268, %c0_269], %491 {strides = array<i32>} : memref<9x9x256xf32, #tpu.memory_space<vmem>>, vector<1x9x256xf32>,
    %c0_270 = arith.constant 0 : index
    %c0_271 = arith.constant 0 : index
    %c0_272 = arith.constant 0 : index
    %492 = vector.load %arg10[%c0_270, %c0_271, %c0_272] : memref<9x9x256xf32, #tpu.memory_space<vmem>>, vector<7x7x256xf32>
    %c0_273 = arith.constant 0 : index
    %c0_274 = arith.constant 0 : index
    %493 = vector.load %arg5[%c0_273, %c0_274] : memref<20x256xf32, #tpu.memory_space<vmem>>, vector<1x256xf32>
    %494 = vector.shape_cast %493 : vector<1x256xf32> to vector<1x1x256xf32>
    %495 = vector.broadcast %494 : vector<1x1x256xf32> to vector<7x7x256xf32>
    %496 = arith.mulf %492, %495 : vector<7x7x256xf32>
    %c0_275 = arith.constant 0 : index
    %c1_276 = arith.constant 1 : index
    %c0_277 = arith.constant 0 : index
    %497 = vector.load %arg10[%c0_275, %c1_276, %c0_277] : memref<9x9x256xf32, #tpu.memory_space<vmem>>, vector<7x7x256xf32>
    %c1_278 = arith.constant 1 : index
    %c0_279 = arith.constant 0 : index
    %498 = vector.load %arg5[%c1_278, %c0_279] : memref<20x256xf32, #tpu.memory_space<vmem>>, vector<1x256xf32>
    %499 = vector.shape_cast %498 : vector<1x256xf32> to vector<1x1x256xf32>
    %500 = vector.broadcast %499 : vector<1x1x256xf32> to vector<7x7x256xf32>
    %501 = arith.mulf %497, %500 : vector<7x7x256xf32>
    %502 = arith.addf %496, %501 : vector<7x7x256xf32>
    %c0_280 = arith.constant 0 : index
    %c2_281 = arith.constant 2 : index
    %c0_282 = arith.constant 0 : index
    %503 = vector.load %arg10[%c0_280, %c2_281, %c0_282] : memref<9x9x256xf32, #tpu.memory_space<vmem>>, vector<7x7x256xf32>
    %c2_283 = arith.constant 2 : index
    %c0_284 = arith.constant 0 : index
    %504 = vector.load %arg5[%c2_283, %c0_284] : memref<20x256xf32, #tpu.memory_space<vmem>>, vector<1x256xf32>
    %505 = vector.shape_cast %504 : vector<1x256xf32> to vector<1x1x256xf32>
    %506 = vector.broadcast %505 : vector<1x1x256xf32> to vector<7x7x256xf32>
    %507 = arith.mulf %503, %506 : vector<7x7x256xf32>
    %508 = arith.addf %502, %507 : vector<7x7x256xf32>
    %c1_285 = arith.constant 1 : index
    %c0_286 = arith.constant 0 : index
    %c0_287 = arith.constant 0 : index
    %509 = vector.load %arg10[%c1_285, %c0_286, %c0_287] : memref<9x9x256xf32, #tpu.memory_space<vmem>>, vector<7x7x256xf32>
    %c3_288 = arith.constant 3 : index
    %c0_289 = arith.constant 0 : index
    %510 = vector.load %arg5[%c3_288, %c0_289] : memref<20x256xf32, #tpu.memory_space<vmem>>, vector<1x256xf32>
    %511 = vector.shape_cast %510 : vector<1x256xf32> to vector<1x1x256xf32>
    %512 = vector.broadcast %511 : vector<1x1x256xf32> to vector<7x7x256xf32>
    %513 = arith.mulf %509, %512 : vector<7x7x256xf32>
    %514 = arith.addf %508, %513 : vector<7x7x256xf32>
    %c1_290 = arith.constant 1 : index
    %c1_291 = arith.constant 1 : index
    %c0_292 = arith.constant 0 : index
    %515 = vector.load %arg10[%c1_290, %c1_291, %c0_292] : memref<9x9x256xf32, #tpu.memory_space<vmem>>, vector<7x7x256xf32>
    %c4_293 = arith.constant 4 : index
    %c0_294 = arith.constant 0 : index
    %516 = vector.load %arg5[%c4_293, %c0_294] : memref<20x256xf32, #tpu.memory_space<vmem>>, vector<1x256xf32>
    %517 = vector.shape_cast %516 : vector<1x256xf32> to vector<1x1x256xf32>
    %518 = vector.broadcast %517 : vector<1x1x256xf32> to vector<7x7x256xf32>
    %519 = arith.mulf %515, %518 : vector<7x7x256xf32>
    %520 = arith.addf %514, %519 : vector<7x7x256xf32>
    %c1_295 = arith.constant 1 : index
    %c2_296 = arith.constant 2 : index
    %c0_297 = arith.constant 0 : index
    %521 = vector.load %arg10[%c1_295, %c2_296, %c0_297] : memref<9x9x256xf32, #tpu.memory_space<vmem>>, vector<7x7x256xf32>
    %c5_298 = arith.constant 5 : index
    %c0_299 = arith.constant 0 : index
    %522 = vector.load %arg5[%c5_298, %c0_299] : memref<20x256xf32, #tpu.memory_space<vmem>>, vector<1x256xf32>
    %523 = vector.shape_cast %522 : vector<1x256xf32> to vector<1x1x256xf32>
    %524 = vector.broadcast %523 : vector<1x1x256xf32> to vector<7x7x256xf32>
    %525 = arith.mulf %521, %524 : vector<7x7x256xf32>
    %526 = arith.addf %520, %525 : vector<7x7x256xf32>
    %c2_300 = arith.constant 2 : index
    %c0_301 = arith.constant 0 : index
    %c0_302 = arith.constant 0 : index
    %527 = vector.load %arg10[%c2_300, %c0_301, %c0_302] : memref<9x9x256xf32, #tpu.memory_space<vmem>>, vector<7x7x256xf32>
    %c6_303 = arith.constant 6 : index
    %c0_304 = arith.constant 0 : index
    %528 = vector.load %arg5[%c6_303, %c0_304] : memref<20x256xf32, #tpu.memory_space<vmem>>, vector<1x256xf32>
    %529 = vector.shape_cast %528 : vector<1x256xf32> to vector<1x1x256xf32>
    %530 = vector.broadcast %529 : vector<1x1x256xf32> to vector<7x7x256xf32>
    %531 = arith.mulf %527, %530 : vector<7x7x256xf32>
    %532 = arith.addf %526, %531 : vector<7x7x256xf32>
    %c2_305 = arith.constant 2 : index
    %c1_306 = arith.constant 1 : index
    %c0_307 = arith.constant 0 : index
    %533 = vector.load %arg10[%c2_305, %c1_306, %c0_307] : memref<9x9x256xf32, #tpu.memory_space<vmem>>, vector<7x7x256xf32>
    %c7_308 = arith.constant 7 : index
    %c0_309 = arith.constant 0 : index
    %534 = vector.load %arg5[%c7_308, %c0_309] : memref<20x256xf32, #tpu.memory_space<vmem>>, vector<1x256xf32>
    %535 = vector.shape_cast %534 : vector<1x256xf32> to vector<1x1x256xf32>
    %536 = vector.broadcast %535 : vector<1x1x256xf32> to vector<7x7x256xf32>
    %537 = arith.mulf %533, %536 : vector<7x7x256xf32>
    %538 = arith.addf %532, %537 : vector<7x7x256xf32>
    %c2_310 = arith.constant 2 : index
    %c2_311 = arith.constant 2 : index
    %c0_312 = arith.constant 0 : index
    %539 = vector.load %arg10[%c2_310, %c2_311, %c0_312] : memref<9x9x256xf32, #tpu.memory_space<vmem>>, vector<7x7x256xf32>
    %c8_313 = arith.constant 8 : index
    %c0_314 = arith.constant 0 : index
    %540 = vector.load %arg5[%c8_313, %c0_314] : memref<20x256xf32, #tpu.memory_space<vmem>>, vector<1x256xf32>
    %541 = vector.shape_cast %540 : vector<1x256xf32> to vector<1x1x256xf32>
    %542 = vector.broadcast %541 : vector<1x1x256xf32> to vector<7x7x256xf32>
    %543 = arith.mulf %539, %542 : vector<7x7x256xf32>
    %544 = arith.addf %538, %543 : vector<7x7x256xf32>
    %c10_315 = arith.constant 10 : index
    %c0_316 = arith.constant 0 : index
    %545 = vector.load %arg5[%c10_315, %c0_316] : memref<20x256xf32, #tpu.memory_space<vmem>>, vector<1x256xf32>
    %546 = vector.extract_strided_slice %544 {offsets = [0, 0, 0], sizes = [1, 7, 256], strides = [1, 1, 1]} : vector<7x7x256xf32> to vector<1x7x256xf32>
    %547 = vector.shape_cast %546 : vector<1x7x256xf32> to vector<7x256xf32>
    %c256 = arith.constant 256 : index
    %c0_317 = arith.constant 0 : index
    %548 = vector.load %arg4[%c256, %c0_317] : memref<512x256xf32, #tpu.memory_space<vmem>>, vector<256x256xf32>
    %cst_318 = arith.constant dense<0.000000e+00> : vector<7x256xf32>
    %549 = tpu.matmul %547, %548, %cst_318 {dimension_numbers = #tpu.dot_dimension_numbers<[1], [0], [0], [1], [0, 0, 1, 1], [], []>} : vector<7x256xf32>, vector<256x256xf32>, vector<7x256xf32> -> vector<7x256xf32>
    %550 = vector.broadcast %545 : vector<1x256xf32> to vector<7x256xf32>
    %551 = arith.addf %549, %550 : vector<7x256xf32>
    %cst_319 = arith.constant 0.000000e+00 : f32
    %552 = vector.broadcast %cst_319 : f32 to vector<7x256xf32>
    %553 = arith.maximumf %551, %552 : vector<7x256xf32>
    %554 = vector.extract_strided_slice %544 {offsets = [1, 0, 0], sizes = [1, 7, 256], strides = [1, 1, 1]} : vector<7x7x256xf32> to vector<1x7x256xf32>
    %555 = vector.shape_cast %554 : vector<1x7x256xf32> to vector<7x256xf32>
    %c256_320 = arith.constant 256 : index
    %c0_321 = arith.constant 0 : index
    %556 = vector.load %arg4[%c256_320, %c0_321] : memref<512x256xf32, #tpu.memory_space<vmem>>, vector<256x256xf32>
    %cst_322 = arith.constant dense<0.000000e+00> : vector<7x256xf32>
    %557 = tpu.matmul %555, %556, %cst_322 {dimension_numbers = #tpu.dot_dimension_numbers<[1], [0], [0], [1], [0, 0, 1, 1], [], []>} : vector<7x256xf32>, vector<256x256xf32>, vector<7x256xf32> -> vector<7x256xf32>
    %558 = vector.broadcast %545 : vector<1x256xf32> to vector<7x256xf32>
    %559 = arith.addf %557, %558 : vector<7x256xf32>
    %cst_323 = arith.constant 0.000000e+00 : f32
    %560 = vector.broadcast %cst_323 : f32 to vector<7x256xf32>
    %561 = arith.maximumf %559, %560 : vector<7x256xf32>
    %562 = vector.extract_strided_slice %544 {offsets = [2, 0, 0], sizes = [1, 7, 256], strides = [1, 1, 1]} : vector<7x7x256xf32> to vector<1x7x256xf32>
    %563 = vector.shape_cast %562 : vector<1x7x256xf32> to vector<7x256xf32>
    %c256_324 = arith.constant 256 : index
    %c0_325 = arith.constant 0 : index
    %564 = vector.load %arg4[%c256_324, %c0_325] : memref<512x256xf32, #tpu.memory_space<vmem>>, vector<256x256xf32>
    %cst_326 = arith.constant dense<0.000000e+00> : vector<7x256xf32>
    %565 = tpu.matmul %563, %564, %cst_326 {dimension_numbers = #tpu.dot_dimension_numbers<[1], [0], [0], [1], [0, 0, 1, 1], [], []>} : vector<7x256xf32>, vector<256x256xf32>, vector<7x256xf32> -> vector<7x256xf32>
    %566 = vector.broadcast %545 : vector<1x256xf32> to vector<7x256xf32>
    %567 = arith.addf %565, %566 : vector<7x256xf32>
    %cst_327 = arith.constant 0.000000e+00 : f32
    %568 = vector.broadcast %cst_327 : f32 to vector<7x256xf32>
    %569 = arith.maximumf %567, %568 : vector<7x256xf32>
    %570 = vector.extract_strided_slice %544 {offsets = [3, 0, 0], sizes = [1, 7, 256], strides = [1, 1, 1]} : vector<7x7x256xf32> to vector<1x7x256xf32>
    %571 = vector.shape_cast %570 : vector<1x7x256xf32> to vector<7x256xf32>
    %c256_328 = arith.constant 256 : index
    %c0_329 = arith.constant 0 : index
    %572 = vector.load %arg4[%c256_328, %c0_329] : memref<512x256xf32, #tpu.memory_space<vmem>>, vector<256x256xf32>
    %cst_330 = arith.constant dense<0.000000e+00> : vector<7x256xf32>
    %573 = tpu.matmul %571, %572, %cst_330 {dimension_numbers = #tpu.dot_dimension_numbers<[1], [0], [0], [1], [0, 0, 1, 1], [], []>} : vector<7x256xf32>, vector<256x256xf32>, vector<7x256xf32> -> vector<7x256xf32>
    %574 = vector.broadcast %545 : vector<1x256xf32> to vector<7x256xf32>
    %575 = arith.addf %573, %574 : vector<7x256xf32>
    %cst_331 = arith.constant 0.000000e+00 : f32
    %576 = vector.broadcast %cst_331 : f32 to vector<7x256xf32>
    %577 = arith.maximumf %575, %576 : vector<7x256xf32>
    %578 = vector.extract_strided_slice %544 {offsets = [4, 0, 0], sizes = [1, 7, 256], strides = [1, 1, 1]} : vector<7x7x256xf32> to vector<1x7x256xf32>
    %579 = vector.shape_cast %578 : vector<1x7x256xf32> to vector<7x256xf32>
    %c256_332 = arith.constant 256 : index
    %c0_333 = arith.constant 0 : index
    %580 = vector.load %arg4[%c256_332, %c0_333] : memref<512x256xf32, #tpu.memory_space<vmem>>, vector<256x256xf32>
    %cst_334 = arith.constant dense<0.000000e+00> : vector<7x256xf32>
    %581 = tpu.matmul %579, %580, %cst_334 {dimension_numbers = #tpu.dot_dimension_numbers<[1], [0], [0], [1], [0, 0, 1, 1], [], []>} : vector<7x256xf32>, vector<256x256xf32>, vector<7x256xf32> -> vector<7x256xf32>
    %582 = vector.broadcast %545 : vector<1x256xf32> to vector<7x256xf32>
    %583 = arith.addf %581, %582 : vector<7x256xf32>
    %cst_335 = arith.constant 0.000000e+00 : f32
    %584 = vector.broadcast %cst_335 : f32 to vector<7x256xf32>
    %585 = arith.maximumf %583, %584 : vector<7x256xf32>
    %586 = vector.extract_strided_slice %544 {offsets = [5, 0, 0], sizes = [1, 7, 256], strides = [1, 1, 1]} : vector<7x7x256xf32> to vector<1x7x256xf32>
    %587 = vector.shape_cast %586 : vector<1x7x256xf32> to vector<7x256xf32>
    %c256_336 = arith.constant 256 : index
    %c0_337 = arith.constant 0 : index
    %588 = vector.load %arg4[%c256_336, %c0_337] : memref<512x256xf32, #tpu.memory_space<vmem>>, vector<256x256xf32>
    %cst_338 = arith.constant dense<0.000000e+00> : vector<7x256xf32>
    %589 = tpu.matmul %587, %588, %cst_338 {dimension_numbers = #tpu.dot_dimension_numbers<[1], [0], [0], [1], [0, 0, 1, 1], [], []>} : vector<7x256xf32>, vector<256x256xf32>, vector<7x256xf32> -> vector<7x256xf32>
    %590 = vector.broadcast %545 : vector<1x256xf32> to vector<7x256xf32>
    %591 = arith.addf %589, %590 : vector<7x256xf32>
    %cst_339 = arith.constant 0.000000e+00 : f32
    %592 = vector.broadcast %cst_339 : f32 to vector<7x256xf32>
    %593 = arith.maximumf %591, %592 : vector<7x256xf32>
    %594 = vector.extract_strided_slice %544 {offsets = [6, 0, 0], sizes = [1, 7, 256], strides = [1, 1, 1]} : vector<7x7x256xf32> to vector<1x7x256xf32>
    %595 = vector.shape_cast %594 : vector<1x7x256xf32> to vector<7x256xf32>
    %c256_340 = arith.constant 256 : index
    %c0_341 = arith.constant 0 : index
    %596 = vector.load %arg4[%c256_340, %c0_341] : memref<512x256xf32, #tpu.memory_space<vmem>>, vector<256x256xf32>
    %cst_342 = arith.constant dense<0.000000e+00> : vector<7x256xf32>
    %597 = tpu.matmul %595, %596, %cst_342 {dimension_numbers = #tpu.dot_dimension_numbers<[1], [0], [0], [1], [0, 0, 1, 1], [], []>} : vector<7x256xf32>, vector<256x256xf32>, vector<7x256xf32> -> vector<7x256xf32>
    %598 = vector.broadcast %545 : vector<1x256xf32> to vector<7x256xf32>
    %599 = arith.addf %597, %598 : vector<7x256xf32>
    %cst_343 = arith.constant 0.000000e+00 : f32
    %600 = vector.broadcast %cst_343 : f32 to vector<7x256xf32>
    %601 = arith.maximumf %599, %600 : vector<7x256xf32>
    %c80 = arith.constant 80 : index
    %c0_344 = arith.constant 0 : index
    %602 = vector.load %arg2[%c80, %c0_344] : memref<107x128xf32, #tpu.memory_space<vmem>>, vector<3x128xf32>
    %603 = vector.extract_strided_slice %602 {offsets = [0, 0], sizes = [3, 7], strides = [1, 1]} : vector<3x128xf32> to vector<3x7xf32>
    %c83 = arith.constant 83 : index
    %c0_345 = arith.constant 0 : index
    %604 = vector.load %arg2[%c83, %c0_345] : memref<107x128xf32, #tpu.memory_space<vmem>>, vector<3x128xf32>
    %605 = vector.extract_strided_slice %604 {offsets = [0, 0], sizes = [3, 7], strides = [1, 1]} : vector<3x128xf32> to vector<3x7xf32>
    %c86 = arith.constant 86 : index
    %c0_346 = arith.constant 0 : index
    %606 = vector.load %arg2[%c86, %c0_346] : memref<107x128xf32, #tpu.memory_space<vmem>>, vector<3x128xf32>
    %607 = vector.extract_strided_slice %606 {offsets = [0, 0], sizes = [3, 7], strides = [1, 1]} : vector<3x128xf32> to vector<3x7xf32>
    %cst_347 = arith.constant 0.000000e+00 : f32
    %608 = vector.broadcast %cst_347 : f32 to vector<1x256xf32>
    %609 = arith.maximumf %553, %561 : vector<7x256xf32>
    %610 = arith.maximumf %609, %569 : vector<7x256xf32>
    %cst_348 = arith.constant dense<0.000000e+00> : vector<3x256xf32>
    %611 = tpu.matmul %603, %610, %cst_348 {dimension_numbers = #tpu.dot_dimension_numbers<[1], [0], [0], [1], [0, 0, 1, 1], [], []>} : vector<3x7xf32>, vector<7x256xf32>, vector<3x256xf32> -> vector<3x256xf32>
    %cst_349 = arith.constant dense<0.000000e+00> : vector<3x256xf32>
    %612 = tpu.matmul %605, %610, %cst_349 {dimension_numbers = #tpu.dot_dimension_numbers<[1], [0], [0], [1], [0, 0, 1, 1], [], []>} : vector<3x7xf32>, vector<7x256xf32>, vector<3x256xf32> -> vector<3x256xf32>
    %613 = arith.maximumf %611, %612 : vector<3x256xf32>
    %cst_350 = arith.constant dense<0.000000e+00> : vector<3x256xf32>
    %614 = tpu.matmul %607, %610, %cst_350 {dimension_numbers = #tpu.dot_dimension_numbers<[1], [0], [0], [1], [0, 0, 1, 1], [], []>} : vector<3x7xf32>, vector<7x256xf32>, vector<3x256xf32> -> vector<3x256xf32>
    %615 = arith.maximumf %613, %614 : vector<3x256xf32>
    %cst_351 = arith.constant dense<0.000000e+00> : vector<256xf32>
    %616 = vector.multi_reduction <add>, %615, %cst_351 [0] : vector<3x256xf32> to vector<256xf32>
    %617 = vector.shape_cast %616 : vector<256xf32> to vector<1x256xf32>
    %618 = arith.addf %608, %617 : vector<1x256xf32>
    %619 = arith.maximumf %569, %577 : vector<7x256xf32>
    %620 = arith.maximumf %619, %585 : vector<7x256xf32>
    %cst_352 = arith.constant dense<0.000000e+00> : vector<3x256xf32>
    %621 = tpu.matmul %603, %620, %cst_352 {dimension_numbers = #tpu.dot_dimension_numbers<[1], [0], [0], [1], [0, 0, 1, 1], [], []>} : vector<3x7xf32>, vector<7x256xf32>, vector<3x256xf32> -> vector<3x256xf32>
    %cst_353 = arith.constant dense<0.000000e+00> : vector<3x256xf32>
    %622 = tpu.matmul %605, %620, %cst_353 {dimension_numbers = #tpu.dot_dimension_numbers<[1], [0], [0], [1], [0, 0, 1, 1], [], []>} : vector<3x7xf32>, vector<7x256xf32>, vector<3x256xf32> -> vector<3x256xf32>
    %623 = arith.maximumf %621, %622 : vector<3x256xf32>
    %cst_354 = arith.constant dense<0.000000e+00> : vector<3x256xf32>
    %624 = tpu.matmul %607, %620, %cst_354 {dimension_numbers = #tpu.dot_dimension_numbers<[1], [0], [0], [1], [0, 0, 1, 1], [], []>} : vector<3x7xf32>, vector<7x256xf32>, vector<3x256xf32> -> vector<3x256xf32>
    %625 = arith.maximumf %623, %624 : vector<3x256xf32>
    %cst_355 = arith.constant dense<0.000000e+00> : vector<256xf32>
    %626 = vector.multi_reduction <add>, %625, %cst_355 [0] : vector<3x256xf32> to vector<256xf32>
    %627 = vector.shape_cast %626 : vector<256xf32> to vector<1x256xf32>
    %628 = arith.addf %618, %627 : vector<1x256xf32>
    %629 = arith.maximumf %585, %593 : vector<7x256xf32>
    %630 = arith.maximumf %629, %601 : vector<7x256xf32>
    %cst_356 = arith.constant dense<0.000000e+00> : vector<3x256xf32>
    %631 = tpu.matmul %603, %630, %cst_356 {dimension_numbers = #tpu.dot_dimension_numbers<[1], [0], [0], [1], [0, 0, 1, 1], [], []>} : vector<3x7xf32>, vector<7x256xf32>, vector<3x256xf32> -> vector<3x256xf32>
    %cst_357 = arith.constant dense<0.000000e+00> : vector<3x256xf32>
    %632 = tpu.matmul %605, %630, %cst_357 {dimension_numbers = #tpu.dot_dimension_numbers<[1], [0], [0], [1], [0, 0, 1, 1], [], []>} : vector<3x7xf32>, vector<7x256xf32>, vector<3x256xf32> -> vector<3x256xf32>
    %633 = arith.maximumf %631, %632 : vector<3x256xf32>
    %cst_358 = arith.constant dense<0.000000e+00> : vector<3x256xf32>
    %634 = tpu.matmul %607, %630, %cst_358 {dimension_numbers = #tpu.dot_dimension_numbers<[1], [0], [0], [1], [0, 0, 1, 1], [], []>} : vector<3x7xf32>, vector<7x256xf32>, vector<3x256xf32> -> vector<3x256xf32>
    %635 = arith.maximumf %633, %634 : vector<3x256xf32>
    %cst_359 = arith.constant dense<0.000000e+00> : vector<256xf32>
    %636 = vector.multi_reduction <add>, %635, %cst_359 [0] : vector<3x256xf32> to vector<256xf32>
    %637 = vector.shape_cast %636 : vector<256xf32> to vector<1x256xf32>
    %638 = arith.addf %628, %637 : vector<1x256xf32>
    %cst_360 = arith.constant 0.111111112 : f32
    %639 = vector.broadcast %cst_360 : f32 to vector<1x256xf32>
    %640 = arith.mulf %638, %639 : vector<1x256xf32>
    %c128_361 = arith.constant 128 : index
    %c0_362 = arith.constant 0 : index
    %641 = vector.load %arg3[%c128_361, %c0_362] : memref<384x128xf32, #tpu.memory_space<vmem>>, vector<256x128xf32>
    %cst_363 = arith.constant dense<0.000000e+00> : vector<1x128xf32>
    %642 = tpu.matmul %640, %641, %cst_363 {dimension_numbers = #tpu.dot_dimension_numbers<[1], [0], [0], [1], [0, 0, 1, 1], [], []>} : vector<1x256xf32>, vector<256x128xf32>, vector<1x128xf32> -> vector<1x128xf32>
    %c46 = arith.constant 46 : index
    %c0_364 = arith.constant 0 : index
    %643 = vector.load %arg2[%c46, %c0_364] : memref<107x128xf32, #tpu.memory_space<vmem>>, vector<1x128xf32>
    %644 = arith.addf %642, %643 : vector<1x128xf32>
    %c0_365 = arith.constant 0 : index
    %c0_366 = arith.constant 0 : index
    %c0_367 = arith.constant 0 : index
    %645 = vector.load %arg6[%c0_365, %c0_366, %c0_367] : memref<1x1x128xf32, #tpu.memory_space<vmem>>, vector<1x1x128xf32>
    %646 = vector.shape_cast %645 : vector<1x1x128xf32> to vector<1x128xf32>
    %647 = vector.shape_cast %644 : vector<1x128xf32> to vector<1x1x128xf32>
    tpu.vector_store %arg6[%c0_365, %c0_366, %c0_367], %647 {strides = array<i32>} : memref<1x1x128xf32, #tpu.memory_space<vmem>>, vector<1x1x128xf32>,
    return
  }
  func.func @transform_0(%arg0: i32) -> (i32, i32, i32) {
    %c0_i32 = arith.constant 0 : i32
    %c0_i32_0 = arith.constant 0 : i32
    %c0_i32_1 = arith.constant 0 : i32
    return %arg0, %c0_i32, %c0_i32_0 : i32, i32, i32
  }
  func.func @transform_1(%arg0: i32) -> (i32, i32) {
    %c0_i32 = arith.constant 0 : i32
    %c0_i32_0 = arith.constant 0 : i32
    %c0_i32_1 = arith.constant 0 : i32
    return %c0_i32, %c0_i32_0 : i32, i32
  }
  func.func @transform_2(%arg0: i32) -> (i32, i32) {
    %c0_i32 = arith.constant 0 : i32
    %c0_i32_0 = arith.constant 0 : i32
    %c0_i32_1 = arith.constant 0 : i32
    return %c0_i32, %c0_i32_0 : i32, i32
  }
  func.func @transform_3(%arg0: i32) -> (i32, i32) {
    %c0_i32 = arith.constant 0 : i32
    %c0_i32_0 = arith.constant 0 : i32
    %c0_i32_1 = arith.constant 0 : i32
    return %c0_i32, %c0_i32_0 : i32, i32
  }
  func.func @transform_4(%arg0: i32) -> (i32, i32) {
    %c0_i32 = arith.constant 0 : i32
    %c0_i32_0 = arith.constant 0 : i32
    %c0_i32_1 = arith.constant 0 : i32
    return %c0_i32, %c0_i32_0 : i32, i32
  }
  func.func @transform_5(%arg0: i32) -> (i32, i32, i32) {
    %c0_i32 = arith.constant 0 : i32
    %c0_i32_0 = arith.constant 0 : i32
    %c0_i32_1 = arith.constant 0 : i32
    return %arg0, %c0_i32, %c0_i32_0 : i32, i32, i32
  }
}

</mosaic_0001>

<bundles_post_ra>
// kernel: squeeze.3
= control target key start
LH: loop header
LB: loop body
LE: loop exit
PB: predicated region body
PF: predicated region fallthrough
CT: control target
= control target key end

     0   :  { %s135_s0 = inlined_call_operand.vmem [shape: f32[2,80], index: 0, kind: input, shape index: {}]   ;;  %s136_s1 = inlined_call_operand.hbm [shape: f32[16,10], index: 1, kind: output, shape index: {}]  }
   0x1   :  { %v5_v0 = vld [vmem:[%s135_s0] sm:$0x3] }
   0x2   :  { %6 = vst [vmem:[#allocation2] sm:$0x3] %v5_v0 }
   0x3   :  { %2 = vsyncpa [#allocation1], 0  ;;  %s94_s0 = smov 118   ;;  %s95_s8 = smov 98   ;;  %vm8_vm0 = vcmask 80896  }
   0x4   :  { %s96_s9 = smov 108   ;;  %s97_s10 = smov 88  }
   0x5   :  { %s98_s11 = smov 78   ;;  %s99_s12 = smov 68  }
   0x6   :  { %s100_s13 = smov 58   ;;  %s101_s14 = smov [#allocation0]  }
   0x7   :  { %s56_s15 = sshll.u32 %s101_s14, 4  ;;  %s57_s15 = int_to_ptr.vmem [resolvable:$true] %s56_s15 }
   0x8   :  { %s70_s16 = scalar_lea.vmem %s57_s15, 256  ;;  %p75_p1 = scmp.lt.s32.totalorder %s57_s15, %s57_s15 }
   0x9   :  { %v10_v1 = vld [vmem:[#allocation2] sm:$0x3]   ;;  %p71_p0 = scmp.ne.s32.totalorder %s57_s15, %s70_s16  ;;  %p76_p2 = scmp.lt.s32.totalorder %s70_s16, %s70_s16 }
   0xa   :  { %v22_v2 = vld [vmem:[#allocation2] sm:$0x3]   ;;  %11 = vrot.lane.b32.xlu0 %v10_v1, %s94_s0 }
   0xb   :  { %23 = vrot.lane.b32.xlu1 %v22_v2, %s95_s8  ;;  %v16_v3 = vld [vmem:[#allocation2] sm:$0x3]   ;;  %p77_p3 = por %p76_p2, %p75_p1 }
   0xc   :  { %v28_v4 = vld [vmem:[#allocation2] sm:$0x3]  }
   0xd   :  { %v7_v5 = vld [vmem:[#allocation2] sm:$0x3]   ;;  %p78_p4 = pnand %p77_p3, %p71_p0 }
   0xe   :  { %9 = vst.msk [vmem:[#allocation0] ss:$8 sm:$0x3] %vm8_vm0, %v7_v5   ;;  %17 = vrot.lane.b32.xlu0 %v16_v3, %s96_s9  ;;  %v34_v6 = vld [vmem:[#allocation2] sm:$0x3]  }
   0xf   :  { %29 = vrot.lane.b32.xlu1 %v28_v4, %s97_s10  ;;  %v40_v7 = vld [vmem:[#allocation2] sm:$0x3]  }
  0x10   :  { %v46_v8 = vld [vmem:[#allocation2] sm:$0x3]  }
  0x12   :  { %35 = vrot.lane.b32.xlu0 %v34_v6, %s98_s11 }
  0x13   :  { %41 = vrot.lane.b32.xlu1 %v40_v7, %s99_s12 }
  0x16   :  { %47 = vrot.lane.b32.xlu0 %v46_v8, %s100_s13 }
  0x7c   :  { %v12_v9 = vpop.permute.xlu0 %11  }
  0x7d   :  { %v24_v10 = vpop.permute.xlu1 %23   ;;  %15 = vst.msk [vmem:[#allocation0 + $0x1] ss:$8 sm:$0x3] %vm8_vm0, %v12_v9  }
  0x7e   :  { %27 = vst.msk [vmem:[#allocation0 + $0x3] ss:$8 sm:$0x3] %vm8_vm0, %v24_v10  }
  0x80   :  { %v18_v11 = vpop.permute.xlu0 %17  }
  0x81   :  { %v30_v12 = vpop.permute.xlu1 %29   ;;  %21 = vst.msk [vmem:[#allocation0 + $0x2] ss:$8 sm:$0x3] %vm8_vm0, %v18_v11  }
  0x82   :  { %33 = vst.msk [vmem:[#allocation0 + $0x4] ss:$8 sm:$0x3] %vm8_vm0, %v30_v12  }
  0x84   :  { %v36_v13 = vpop.permute.xlu0 %35  }
  0x85   :  { %v42_v14 = vpop.permute.xlu1 %41   ;;  %39 = vst.msk [vmem:[#allocation0 + $0x5] ss:$8 sm:$0x3] %vm8_vm0, %v36_v13  }
  0x86   :  { %45 = vst.msk [vmem:[#allocation0 + $0x6] ss:$8 sm:$0x3] %vm8_vm0, %v42_v14  }
  0x88   :  { %v48_v15 = vpop.permute.xlu0 %47  }
  0x89   :  { %51 = vst.msk [vmem:[#allocation0 + $0x7] ss:$8 sm:$0x3] %vm8_vm0, %v48_v15  }
  0x8a   :  { %81 = shalt.err (!%p78_p4)
}
  0x8b   :  { %s82_s19 = scalar_lea.hbm %s136_s1, 256 }
  0x8c   :  { %p83_p5 = scmp.ne.s32.totalorder %s136_s1, %s82_s19  ;;  %p86_p6 = scmp.lt.u32.totalorder %s82_s19, %s136_s1 }
  0x8e   :  { %p88_p7 = pnand %p86_p6, %p83_p5 }
  0x90   :  { %91 = shalt.err (!%p88_p7)
}
  0x91   :  { %59 = dma.vmem_to_hbm [thread:$0]  %s57_s15, 256, %s136_s1, [#allocation1]  }
  0x92   :  { %92 = dma.done.wait [#allocation1], 256  }
  0x93   :  { %93 = vsyncadd [#allocation1], 4294967040 }
  0x94   :  { %61 = vsyncpa [#allocation1], 1 }

// kernel: efficientnet_forward.1
= control target key start
LH: loop header
LB: loop body
LE: loop exit
PB: predicated region body
PF: predicated region fallthrough
CT: control target
= control target key end

     0   :  { %s11891_s18 = smov 0   ;;  %s17201_s0 = inlined_call_operand.vmem [shape: f32[2,432,8], index: 0, kind: input, shape index: {}]   ;;  %s17202_s1 = inlined_call_operand.vmem [shape: f32[107,128], index: 1, kind: input, shape index: {}]   ;;  %s17203_s2 = inlined_call_operand.vmem [shape: f32[384,128], index: 2, kind: input, shape index: {}]   ;;  %s17204_s3 = inlined_call_operand.vmem [shape: f32[512,256], index: 3, kind: input, shape index: {}]   ;;  %s17205_s4 = inlined_call_operand.vmem [shape: f32[20,256], index: 4, kind: input, shape index: {}]   ;;  %s17206_s5 = inlined_call_operand.vmem [shape: f32[2,1,128], index: 5, kind: output, shape index: {}]  }
   0x1 LB: > { %s9971_s19 = sadd.s32 4294967295, %s11858_s18   ;;  %p9975_p0 = scmp.ge.s32.totalorder %s11858_s18, 1  ;;  %s11858_s18 = sphi %s11891_s18, %s15_s18  }
   0x2   : > { %p187_p1 = scmp.lt.s32.totalorder %s11858_s18, 3 }
   0x4   : > { %p188_p2 = pnand %p9975_p0, %p187_p1 }
   0x6   : > { %191 = sbr.rel (%p188_p2) target bundleno = 2129 (0x851), region = 40 }
   0xd   : > { %v275_v0 = vld [vmem:[%s17202_s1] sm:$0xff]  ;;  %p213_p3 = scmp.lt.s32.totalorder %s9971_s19, 1  ;;  %vm276_vm0 = vcmask 64512   ;;  %v3210_v56 = vld [vmem:[%s17203_s2 + $0x8] sm:$0xff]  ;;  %v3211_v58 = vld [vmem:[%s17203_s2 + $0x10] sm:$0xff]  ;;  %vm3493_vm1 = vcmask 130048  }
   0xe   : > { %10372 = vmatprep.subr.mxu0 %v275_v0  ;;  %v3209_v55 = vld [vmem:[%s17203_s2] sm:$0xff]  ;;  %v3212_v59 = vld [vmem:[%s17203_s2 + $0x18] sm:$0xff]  ;;  %v3214_v62 = vld [vmem:[%s17203_s2 + $0x28] sm:$0xff]  ;;  %vm6104_vm2 = vcmask 1044480   ;;  %vm7777_vm3 = vcmask 1045504   ;;  %vm9085_vm4 = vcmask 1046528  }
   0xf   : > { %10373 = vmatpush3.msra.mxu0 %v275_v0  ;;  %s17803_s19 = smov (!%p213_p3, %s9971_s19), 1  ;;  %v10682_v57 = vpack.c.bf16 %v3210_v56, %v3209_v55  ;;  %v10686_v60 = vpack.c.bf16 %v3212_v59, %v3211_v58  ;;  %v3213_v61 = vld [vmem:[%s17203_s2 + $0x20] sm:$0xff]  ;;  %v3215_v0 = vld [vmem:[%s17203_s2 + $0x30] sm:$0xff]  ;;  %vm9081_vm5 = vcmask 56320   ;;  %vm9315_vm6 = vcmask 1042432  }
  0x10   : > { %s11754_s22 = smul.u32 432, %s17803_s19  ;;  %v10690_v63 = vpack.c.bf16 %v3214_v62, %v3213_v61  ;;  %s220_s11 = scalar_lea.vmem %s17206_s5, %s17803_s19 }
  0x11   : > { %10683 = vmatprep.subr.bf16.mxu1 %v10682_v57 }
  0x12   : > { %s11908_s25 = scalar_lea.vmem %s17201_s0, %s11754_s22  ;;  %10685 = vmatpush3.bf16.msra.mxu1 %v10682_v57 }
  0x13   : > { %v221_v1 = vld [vmem:[%s11908_s25] sm:$0xff]  ;;  %v222_v2 = vld [vmem:[%s11908_s25 + $0x8] sm:$0xff]  ;;  %v223_v3 = vld [vmem:[%s11908_s25 + $0x10] sm:$0xff]  ;;  %10687 = vmatprep.subr.bf16.mxu1 %v10686_v60 }
  0x14   : > { %10374 = vmatprep.mubr.msk.f32.mxu0 %vm276_vm0, %v221_v1  ;;  %v224_v4 = vld [vmem:[%s11908_s25 + $0x18] sm:$0xff]  ;;  %v225_v5 = vld [vmem:[%s11908_s25 + $0x20] sm:$0xff]  ;;  %v226_v6 = vld [vmem:[%s11908_s25 + $0x28] sm:$0xff] }
  0x15   : > { %10375 = vmatmul.mubr.msk.f32.vlgmr.msra.gmra.mrb[0].mxu0 %vm276_vm0, %v222_v2  ;;  %v227_v7 = vld [vmem:[%s11908_s25 + $0x30] sm:$0xff]  ;;  %v228_v8 = vld [vmem:[%s11908_s25 + $0x38] sm:$0xff]  ;;  %v229_v9 = vld [vmem:[%s11908_s25 + $0x40] sm:$0xff] }
  0x16   : > { %10377 = vmatprep.mubr.msk.f32.mxu0 %vm276_vm0, %v223_v3  ;;  %v230_v10 = vld [vmem:[%s11908_s25 + $0x48] sm:$0xff]  ;;  %v231_v11 = vld [vmem:[%s11908_s25 + $0x50] sm:$0xff]  ;;  %v232_v12 = vld [vmem:[%s11908_s25 + $0x58] sm:$0xff]  ;;  %10689 = vmatpush3.bf16.msra.mxu1 %v10686_v60 }
  0x17   : > { %v233_v13 = vld [vmem:[%s11908_s25 + $0x60] sm:$0xff]  ;;  %v234_v14 = vld [vmem:[%s11908_s25 + $0x68] sm:$0xff]  ;;  %v235_v15 = vld [vmem:[%s11908_s25 + $0x70] sm:$0xff]  ;;  %10691 = vmatprep.subr.bf16.mxu1 %v10690_v63 }
  0x18   : > { %v236_v16 = vld [vmem:[%s11908_s25 + $0x78] sm:$0xff]  ;;  %v237_v17 = vld [vmem:[%s11908_s25 + $0x80] sm:$0xff]  ;;  %v238_v18 = vld [vmem:[%s11908_s25 + $0x88] sm:$0xff] }
  0x19   : > { %10378 = vmatmul.mubr.msk.f32.gmra.mrb[2].mxu0 %vm276_vm0, %v224_v4  ;;  %v239_v19 = vld [vmem:[%s11908_s25 + $0x90] sm:$0xff]  ;;  %v240_v20 = vld [vmem:[%s11908_s25 + $0x98] sm:$0xff]  ;;  %v241_v21 = vld [vmem:[%s11908_s25 + $0xa0] sm:$0xff] }
  0x1a   : > { %10380 = vmatprep.mubr.msk.f32.mxu0 %vm276_vm0, %v225_v5  ;;  %v242_v22 = vld [vmem:[%s11908_s25 + $0xa8] sm:$0xff]  ;;  %v243_v23 = vld [vmem:[%s11908_s25 + $0xb0] sm:$0xff]  ;;  %v244_v24 = vld [vmem:[%s11908_s25 + $0xb8] sm:$0xff]  ;;  %10693 = vmatpush3.bf16.msra.mxu1 %v10690_v63 }
  0x1b   : > { %v245_v25 = vld [vmem:[%s11908_s25 + $0xc0] sm:$0xff]  ;;  %v246_v26 = vld [vmem:[%s11908_s25 + $0xc8] sm:$0xff]  ;;  %v247_v27 = vld [vmem:[%s11908_s25 + $0xd0] sm:$0xff] }
  0x1c   : > { %v248_v28 = vld [vmem:[%s11908_s25 + $0xd8] sm:$0xff]  ;;  %v249_v29 = vld [vmem:[%s11908_s25 + $0xe0] sm:$0xff]  ;;  %v250_v30 = vld [vmem:[%s11908_s25 + $0xe8] sm:$0xff] }
  0x1d   : > { %10381 = vmatmul.mubr.msk.f32.gmra.mrb[4].mxu0 %vm276_vm0, %v226_v6  ;;  %v251_v31 = vld [vmem:[%s11908_s25 + $0xf0] sm:$0xff]  ;;  %v252_v32 = vld [vmem:[%s11908_s25 + $0xf8] sm:$0xff]  ;;  %v253_v33 = vld [vmem:[%s11908_s25 + $0x100] sm:$0xff] }
  0x1e   : > { %10383 = vmatprep.mubr.msk.f32.mxu0 %vm276_vm0, %v227_v7  ;;  %v254_v34 = vld [vmem:[%s11908_s25 + $0x108] sm:$0xff]  ;;  %v255_v35 = vld [vmem:[%s11908_s25 + $0x110] sm:$0xff]  ;;  %v256_v36 = vld [vmem:[%s11908_s25 + $0x118] sm:$0xff] }
  0x1f   : > { %v257_v37 = vld [vmem:[%s11908_s25 + $0x120] sm:$0xff]  ;;  %v258_v38 = vld [vmem:[%s11908_s25 + $0x128] sm:$0xff]  ;;  %v259_v39 = vld [vmem:[%s11908_s25 + $0x130] sm:$0xff] }
  0x20   : > { %v260_v40 = vld [vmem:[%s11908_s25 + $0x138] sm:$0xff]  ;;  %v261_v41 = vld [vmem:[%s11908_s25 + $0x140] sm:$0xff]  ;;  %v262_v42 = vld [vmem:[%s11908_s25 + $0x148] sm:$0xff] }
  0x21   : > { %10384 = vmatmul.mubr.msk.f32.gmra.mrb[6].mxu0 %vm276_vm0, %v228_v8  ;;  %v263_v43 = vld [vmem:[%s11908_s25 + $0x150] sm:$0xff]  ;;  %v264_v44 = vld [vmem:[%s11908_s25 + $0x158] sm:$0xff]  ;;  %v265_v45 = vld [vmem:[%s11908_s25 + $0x160] sm:$0xff] }
  0x22   : > { %10386 = vmatprep.mubr.msk.f32.mxu0 %vm276_vm0, %v229_v9  ;;  %v266_v46 = vld [vmem:[%s11908_s25 + $0x168] sm:$0xff]  ;;  %v267_v47 = vld [vmem:[%s11908_s25 + $0x170] sm:$0xff]  ;;  %v268_v48 = vld [vmem:[%s11908_s25 + $0x178] sm:$0xff] }
  0x23   : > { %v269_v49 = vld [vmem:[%s11908_s25 + $0x180] sm:$0xff]  ;;  %v270_v50 = vld [vmem:[%s11908_s25 + $0x188] sm:$0xff]  ;;  %v271_v51 = vld [vmem:[%s11908_s25 + $0x190] sm:$0xff] }
  0x24   : > { %v272_v52 = vld [vmem:[%s11908_s25 + $0x198] sm:$0xff]  ;;  %v273_v53 = vld [vmem:[%s11908_s25 + $0x1a0] sm:$0xff]  ;;  %v274_v54 = vld [vmem:[%s11908_s25 + $0x1a8] sm:$0xff] }
  0x25   : > { %10387 = vmatmul.mubr.msk.f32.gmra.mrb[8].mxu0 %vm276_vm0, %v230_v10  ;;  %v3216_v1 = vld [vmem:[%s17203_s2 + $0x38] sm:$0xff]  ;;  %v3217_v3 = vld [vmem:[%s17203_s2 + $0x40] sm:$0xff]  ;;  %v3218_v4 = vld [vmem:[%s17203_s2 + $0x48] sm:$0xff] }
  0x26   : > { %10389 = vmatprep.mubr.msk.f32.mxu0 %vm276_vm0, %v231_v11  ;;  %v10694_v2 = vpack.c.bf16 %v3216_v1, %v3215_v0  ;;  %v10698_v5 = vpack.c.bf16 %v3218_v4, %v3217_v3  ;;  %v3219_v6 = vld [vmem:[%s17203_s2 + $0x50] sm:$0xff]  ;;  %v3220_v7 = vld [vmem:[%s17203_s2 + $0x58] sm:$0xff]  ;;  %v3221_v9 = vld [vmem:[%s17203_s2 + $0x60] sm:$0xff] }
  0x27   : > { %v10702_v8 = vpack.c.bf16 %v3220_v7, %v3219_v6  ;;  %v3222_v10 = vld [vmem:[%s17203_s2 + $0x68] sm:$0xff] }
  0x28   : > { %10695 = vmatprep.subr.bf16.mxu1 %v10694_v2  ;;  %v10706_v11 = vpack.c.bf16 %v3222_v10, %v3221_v9  ;;  %v12127_v0 = vld [vmem:[%s17202_s1 + $0xc] ss:$0 sm:$0xff]  ;;  %v12132_v1 = vld [vmem:[%s17202_s1 + $0xd] ss:$0 sm:$0xff] }
  0x29   : > { %10390 = vmatmul.mubr.msk.f32.gmra.mrb[10].mxu0 %vm276_vm0, %v232_v12  ;;  %10697 = vmatpush3.bf16.msra.mxu1 %v10694_v2  ;;  %v3223_v12 = vld [vmem:[%s17203_s2 + $0x70] sm:$0xff] }
  0x2a   : > { %10392 = vmatprep.mubr.msk.f32.mxu0 %vm276_vm0, %v233_v13  ;;  %10699 = vmatprep.subr.bf16.mxu1 %v10698_v5  ;;  %v3224_v13 = vld [vmem:[%s17203_s2 + $0x78] sm:$0xff] }
  0x2d   : > { %10393 = vmatmul.mubr.msk.f32.gmra.mrb[12].mxu0 %vm276_vm0, %v234_v14  ;;  %10701 = vmatpush3.bf16.msra.mxu1 %v10698_v5  ;;  %v10710_v14 = vpack.c.bf16 %v3224_v13, %v3223_v12 }
  0x2e   : > { %10395 = vmatprep.mubr.msk.f32.mxu0 %vm276_vm0, %v235_v15  ;;  %10703 = vmatprep.subr.bf16.mxu1 %v10702_v8 }
  0x31   : > { %10396 = vmatmul.mubr.msk.f32.gmra.mrb[14].mxu0 %vm276_vm0, %v236_v16  ;;  %10705 = vmatpush3.bf16.msra.mxu1 %v10702_v8 }
  0x32   : > { %10398 = vmatprep.mubr.msk.f32.mxu0 %vm276_vm0, %v237_v17  ;;  %10707 = vmatprep.subr.bf16.mxu1 %v10706_v11  ;;  %v11860_v17 = vmov 0.0  }
  0x33   : > { %2275 = vst [vmem:[#allocation3] sm:$0xff] %v11860_v17  ;;  %2276 = vst [vmem:[#allocation3 + $0x8] sm:$0xff] %v11860_v17 }
  0x34   : > { %2277 = vst [vmem:[#allocation3 + $0x10] sm:$0x3] %v11860_v17  ;;  %2279 = vst [vmem:[#allocation3 + $0x198] sm:$0xff] %v11860_v17 }
  0x35   : > { %10399 = vmatmul.mubr.msk.f32.gmra.mrb[16].mxu0 %vm276_vm0, %v238_v18  ;;  %10709 = vmatpush3.bf16.msra.mxu1 %v10706_v11  ;;  %2280 = vst [vmem:[#allocation3 + $0x1a0] sm:$0xff] %v11860_v17  ;;  %2281 = vst [vmem:[#allocation3 + $0x1a8] sm:$0x3] %v11860_v17 }
  0x36   : > { %10401 = vmatprep.mubr.msk.f32.mxu0 %vm276_vm0, %v239_v19  ;;  %10711 = vmatprep.subr.bf16.mxu1 %v10710_v14  ;;  %5160 = vst [vmem:[#allocation4] sm:$0xff] %v11860_v17  ;;  %5161 = vst [vmem:[#allocation4 + $0x8] sm:$0x7] %v11860_v17 }
  0x37   : > { %5163 = vst [vmem:[#allocation4 + $0x80] sm:$0xff] %v11860_v17  ;;  %5164 = vst [vmem:[#allocation4 + $0x88] sm:$0x7] %v11860_v17 }
  0x38   : > { %7534 = vst [vmem:[#allocation5] sm:$0xff] %v11860_v17  ;;  %7535 = vst [vmem:[#allocation5 + $0x8] sm:$0xff] %v11860_v17 }
  0x39   : > { %10402 = vmatmul.mubr.msk.f32.gmra.mrb[18].mxu0 %vm276_vm0, %v240_v20  ;;  %10713 = vmatpush3.bf16.msra.mxu1 %v10710_v14  ;;  %7536 = vst [vmem:[#allocation5 + $0x10] sm:$0x1] %v11860_v17  ;;  %7537 = vst [vmem:[#allocation5 + $0x18] sm:$0x1] %v11860_v17  ;;  %v12069_v20 = vld [vmem:[%s17202_s1 + $0x8] ss:$0 sm:$0xff] }
  0x3a   : > { %10404 = vmatprep.mubr.msk.f32.mxu0 %vm276_vm0, %v241_v21  ;;  %7539 = vst [vmem:[#allocation5 + $0x100] sm:$0xff] %v11860_v17  ;;  %7540 = vst [vmem:[#allocation5 + $0x108] sm:$0xff] %v11860_v17  ;;  %v12074_v21 = vld [vmem:[%s17202_s1 + $0x9] ss:$0 sm:$0xff] }
  0x3b   : > { %7541 = vst [vmem:[#allocation5 + $0x110] sm:$0x1] %v11860_v17  ;;  %7542 = vst [vmem:[#allocation5 + $0x118] sm:$0x1] %v11860_v17 }
  0x3d   : > { %10405 = vmatmul.mubr.msk.f32.gmra.mrb[20].mxu0 %vm276_vm0, %v242_v22  ;;  %v12079_v22 = vld [vmem:[%s17202_s1 + $0xb] ss:$0 sm:$0xff] }
  0x3e   : > { %10407 = vmatprep.mubr.msk.f32.mxu0 %vm276_vm0, %v243_v23 }
  0x41   : > { %10408 = vmatmul.mubr.msk.f32.gmra.mrb[22].mxu0 %vm276_vm0, %v244_v24  ;;  %v10041_v24 = vld [vmem:[%s17202_s1 + $0x11] ss:$0 sm:$0xff] }
  0x42   : > { %10410 = vmatprep.mubr.msk.f32.mxu0 %vm276_vm0, %v245_v25  ;;  %v2400_v25 = vld [vmem:[#allocation3 + $0x1] sm:$0xff] }
  0x45   : > { %10411 = vmatmul.mubr.msk.f32.gmra.mrb[24].mxu0 %vm276_vm0, %v246_v26  ;;  %v10042_v26 = vld [vmem:[%s17202_s1 + $0x12] ss:$0 sm:$0xff] }
  0x46   : > { %10413 = vmatprep.mubr.msk.f32.mxu0 %vm276_vm0, %v247_v27 }
  0x49   : > { %10414 = vmatmul.mubr.msk.f32.gmra.mrb[26].mxu0 %vm276_vm0, %v248_v28 }
  0x4a   : > { %10416 = vmatprep.mubr.msk.f32.mxu0 %vm276_vm0, %v249_v29  ;;  %v12090_v29 = vld [vmem:[%s17202_s1 + $0xa] ss:$0 sm:$0xff] }
  0x4d   : > { %10417 = vmatmul.mubr.msk.f32.gmra.mrb[28].mxu0 %vm276_vm0, %v250_v30 }
  0x4e   : > { %10419 = vmatprep.mubr.msk.f32.mxu0 %vm276_vm0, %v251_v31  ;;  %v12092_v31 = vmul.f32 0.0, %v10041_v24 }
  0x51   : > { %10420 = vmatmul.mubr.msk.f32.gmra.mrb[30].mxu0 %vm276_vm0, %v252_v32  ;;  %v2437_v32 = vmul.f32 %v10042_v26, %v2400_v25 }
  0x52   : > { %10422 = vmatprep.mubr.msk.f32.mxu0 %vm276_vm0, %v253_v33 }
  0x55   : > { %10423 = vmatmul.mubr.msk.f32.gmra.mrb[32].mxu0 %vm276_vm0, %v254_v34 }
  0x56   : > { %10425 = vmatprep.mubr.msk.f32.mxu0 %vm276_vm0, %v255_v35  ;;  %v2501_v35 = vld [vmem:[#allocation3 + $0x2] sm:$0xff] }
  0x59   : > { %10426 = vmatmul.mubr.msk.f32.gmra.mrb[34].mxu0 %vm276_vm0, %v256_v36  ;;  %v10043_v36 = vld [vmem:[%s17202_s1 + $0x13] ss:$0 sm:$0xff] }
  0x5a   : > { %10428 = vmatprep.mubr.msk.f32.mxu0 %vm276_vm0, %v257_v37 }
  0x5d   : > { %10429 = vmatmul.mubr.msk.f32.gmra.mrb[36].mxu0 %vm276_vm0, %v258_v38 }
  0x5e   : > { %10431 = vmatprep.mubr.msk.f32.mxu0 %vm276_vm0, %v259_v39  ;;  %v2469_v39 = vadd.f32 %v2437_v32, %v12092_v31 }
  0x61   : > { %10432 = vmatmul.mubr.msk.f32.gmra.mrb[38].mxu0 %vm276_vm0, %v260_v40  ;;  %v2538_v40 = vmul.f32 %v10043_v36, %v2501_v35 }
  0x62   : > { %10434 = vmatprep.mubr.msk.f32.mxu0 %vm276_vm0, %v261_v41  ;;  %v2401_v41 = vld [vmem:[#allocation3 + $0x9] sm:$0xff] }
  0x63   : > { %v2438_v55 = vmul.f32 %v10042_v26, %v2401_v41  ;;  %v12137_v3 = vadd.f32 %v2538_v40, %v2469_v39 }
  0x65   : > { %10435 = vmatmul.mubr.msk.f32.gmra.mrb[40].mxu0 %vm276_vm0, %v262_v42  ;;  %v12152_v36 = vadd.f32 %v2438_v55, %v12092_v31 }
  0x66   : > { %10437 = vmatprep.mubr.msk.f32.mxu0 %vm276_vm0, %v263_v43 }
  0x69   : > { %10438 = vmatmul.mubr.msk.f32.gmra.mrb[42].mxu0 %vm276_vm0, %v264_v44 }
  0x6a   : > { %10440 = vmatprep.mubr.msk.f32.mxu0 %vm276_vm0, %v265_v45 }
  0x6d   : > { %10441 = vmatmul.mubr.msk.f32.gmra.mrb[44].mxu0 %vm276_vm0, %v266_v46 }
  0x6e   : > { %10443 = vmatprep.mubr.msk.f32.mxu0 %vm276_vm0, %v267_v47  ;;  %v12110_v47 = vld [vmem:[%s17202_s1 + $0xe] ss:$0 sm:$0xff] }
  0x71   : > { %10444 = vmatmul.mubr.msk.f32.gmra.mrb[46].mxu0 %vm276_vm0, %v268_v48 }
  0x72   : > { %10446 = vmatprep.mubr.msk.f32.mxu0 %vm276_vm0, %v269_v49 }
  0x75   : > { %10447 = vmatmul.mubr.msk.f32.gmra.mrb[48].mxu0 %vm276_vm0, %v270_v50 }
  0x76   : > { %10449 = vmatprep.mubr.msk.f32.mxu0 %vm276_vm0, %v271_v51 }
  0x79   : > { %10450 = vmatmul.mubr.msk.f32.gmra.mrb[50].mxu0 %vm276_vm0, %v272_v52 }
  0x7a   : > { %10452 = vmatprep.mubr.msk.f32.mxu0 %vm276_vm0, %v273_v53 }
  0x7d   : > { %10453 = vmatmul.mubr.msk.f32.gmra.mrb[52].mxu0 %vm276_vm0, %v274_v54 }
  0xe8   : > { %v10376_v15 = vpop.f32.mrb[0].mxu0 }
  0xe9   : > { %775 = vst [vmem:[#allocation2 + $0x8] sm:$0xff] %v10376_v15  ;;  %v505_v16 = vpop.f32.mrb[1].mxu0  ;;  %v882_v37 = vmul.f32 %v10376_v15, %v12069_v20 }
  0xea   : > { %774 = vst [vmem:[#allocation2] sm:$0xff] %v505_v16  ;;  %v881_v33 = vmul.f32 %v12069_v20, %v505_v16 }
  0xec   : > { %v10379_v18 = vpop.f32.mrb[2].mxu0 }
  0xed   : > { %777 = vst [vmem:[#allocation2 + $0x18] sm:$0xff] %v10379_v18  ;;  %v515_v19 = vpop.f32.mrb[3].mxu0  ;;  %v12101_v38 = vmul.f32 %v10379_v18, %v12069_v20  ;;  %v1281_v44 = vmul.f32 %v10379_v18, %v12079_v22 }
  0xee   : > { %776 = vst [vmem:[#allocation2 + $0x10] sm:$0xff] %v515_v19 }
  0xf0   : > { %v10382_v23 = vpop.f32.mrb[4].mxu0 }
  0xf1   : > { %v929_v27 = vld [vmem:[#allocation2 + $0x1] sm:$0xff]  ;;  %779 = vst [vmem:[#allocation2 + $0x28] sm:$0xff] %v10382_v23  ;;  %v525_v30 = vpop.f32.mrb[5].mxu0 }
  0xf2   : > { %v1078_v28 = vld [vmem:[#allocation2 + $0x2] sm:$0xff]  ;;  %v982_v34 = vmul.f32 %v12074_v21, %v929_v27  ;;  %778 = vst [vmem:[#allocation2 + $0x20] sm:$0xff] %v525_v30  ;;  %v885_v45 = vmul.f32 %v12069_v20, %v525_v30  ;;  %v1282_v51 = vmul.f32 %v12079_v22, %v525_v30 }
  0xf3   : > { %v1131_v43 = vmul.f32 %v12090_v29, %v1078_v28 }
  0xf4   : > { %v1030_v42 = vadd.f32 %v982_v34, %v881_v33  ;;  %v10385_v46 = vpop.f32.mrb[6].mxu0 }
  0xf5   : > { %v830_v48 = vld [vmem:[#allocation2 + $0x10] sm:$0x3]  ;;  %781 = vst [vmem:[#allocation2 + $0x38] sm:$0xff] %v10385_v46  ;;  %v12114_v52 = vmul.f32 %v10385_v46, %v12069_v20  ;;  %v12117_v53 = vmul.f32 %v10385_v46, %v12079_v22  ;;  %v535_v54 = vpop.f32.mrb[7].mxu0  ;;  %v1080_v61 = vld [vmem:[#allocation2 + $0x12] sm:$0x3]  ;;  %v12135_v2 = vmul.f32 %v10385_v46, %v12110_v47 }
  0xf6   : > { %v930_v49 = vld [vmem:[#allocation2 + $0x9] sm:$0xff]  ;;  %v931_v50 = vld [vmem:[#allocation2 + $0x11] sm:$0x3]  ;;  %v1179_v56 = vadd.f32 %v1131_v43, %v1030_v42  ;;  %v883_v57 = vmul.f32 %v12069_v20, %v830_v48  ;;  %780 = vst [vmem:[#allocation2 + $0x30] sm:$0xff] %v535_v54  ;;  %v1133_v63 = vmul.f32 %v12090_v29, %v1080_v61  ;;  %v887_v10 = vmul.f32 %v12069_v20, %v535_v54 }
  0xf7   : > { %v983_v58 = vmul.f32 %v12074_v21, %v930_v49  ;;  %v984_v59 = vmul.f32 %v12074_v21, %v931_v50  ;;  %v1079_v60 = vld [vmem:[#allocation2 + $0xa] sm:$0xff]  ;;  %v1284_v16 = vmul.f32 %v12079_v22, %v535_v54  ;;  %v1729_v17 = vmul.f32 %v12110_v47, %v535_v54 }
  0xf8   : > { %v1132_v62 = vmul.f32 %v12090_v29, %v1079_v60  ;;  %v1329_v4 = vadd.f32 %v1281_v44, %v1179_v56  ;;  %v833_v7 = vld [vmem:[#allocation2 + $0x28] sm:$0x3]  ;;  %v1083_v9 = vld [vmem:[#allocation2 + $0x2a] sm:$0x3]  ;;  %v12146_v28 = vpop.f32.mrb[8].mxu0 }
  0xf9   : > { %v1031_v5 = vadd.f32 %v983_v58, %v882_v37  ;;  %v1032_v6 = vadd.f32 %v984_v59, %v883_v57  ;;  %v934_v8 = vld [vmem:[#allocation2 + $0x29] sm:$0x3]  ;;  %v886_v11 = vmul.f32 %v12069_v20, %v833_v7  ;;  %v1136_v23 = vmul.f32 %v12090_v29, %v1083_v9  ;;  %v932_v25 = vld [vmem:[#allocation2 + $0x19] sm:$0xff]  ;;  %v933_v26 = vld [vmem:[#allocation2 + $0x21] sm:$0xff]  ;;  %783 = vst [vmem:[#allocation2 + $0x48] sm:$0xff] %v12146_v28  ;;  %v545_v35 = vpop.f32.mrb[9].mxu0 }
  0xfa   : > { %v987_v12 = vmul.f32 %v12074_v21, %v934_v8  ;;  %v1230_v13 = vld [vmem:[#allocation2 + $0x28] sm:$0x3]  ;;  %v1528_v15 = vld [vmem:[#allocation2 + $0x2a] sm:$0x3]  ;;  %v1081_v27 = vld [vmem:[#allocation2 + $0x1a] sm:$0xff]  ;;  %v985_v32 = vmul.f32 %v12074_v21, %v932_v25  ;;  %v986_v33 = vmul.f32 %v12074_v21, %v933_v26  ;;  %782 = vst [vmem:[#allocation2 + $0x40] sm:$0xff] %v545_v35  ;;  %v1430_v48 = vmul.f32 %v12127_v0, %v932_v25 }
  0xfb   : > { %v1379_v14 = vld [vmem:[#allocation2 + $0x29] sm:$0x3]  ;;  %v1180_v18 = vadd.f32 %v1132_v62, %v1031_v5  ;;  %v1181_v19 = vadd.f32 %v1133_v63, %v1032_v6  ;;  %v1283_v24 = vmul.f32 %v12079_v22, %v1230_v13  ;;  %v1581_v39 = vmul.f32 %v12132_v1, %v1528_v15  ;;  %v12169_v59 = vld [vmem:[%s17202_s1 + $0xf] ss:$0 sm:$0xff]  ;;  %v12177_v5 = vld [vmem:[%s17202_s1 + $0x10] ss:$0 sm:$0xff] }
  0xfc   : > { %v1035_v30 = vadd.f32 %v987_v12, %v886_v11  ;;  %v1082_v34 = vld [vmem:[#allocation2 + $0x22] sm:$0xff]  ;;  %v1432_v37 = vmul.f32 %v12127_v0, %v1379_v14  ;;  %v1134_v40 = vmul.f32 %v12090_v29, %v1081_v27  ;;  %v10391_v42 = vpop.f32.mrb[10].mxu0  ;;  %v1033_v43 = vadd.f32 %v985_v32, %v12101_v38 }
  0xfd   : > { %v1330_v41 = vadd.f32 %v1282_v51, %v1180_v18  ;;  %v1034_v44 = vadd.f32 %v986_v33, %v885_v45  ;;  %v1135_v46 = vmul.f32 %v12090_v29, %v1082_v34  ;;  %v935_v49 = vld [vmem:[#allocation2 + $0x31] sm:$0xff]  ;;  %785 = vst [vmem:[#allocation2 + $0x58] sm:$0xff] %v10391_v42  ;;  %v12160_v31 = vpop.f32.mrb[11].mxu0  ;;  %v1331_v55 = vadd.f32 %v1283_v24, %v1181_v19  ;;  %v12203_v42 = vld [vmem:[%s17202_s1 + $0x2c] ss:$0 sm:$0xff] }
  0xfe   : > { %v1084_v50 = vld [vmem:[#allocation2 + $0x32] sm:$0xff]  ;;  %v1184_v54 = vadd.f32 %v1136_v23, %v1035_v30  ;;  %v1431_v56 = vmul.f32 %v12127_v0, %v933_v26  ;;  %v1579_v51 = vmul.f32 %v12132_v1, %v1081_v27  ;;  %784 = vst [vmem:[#allocation2 + $0x50] sm:$0xff] %v12160_v31  ;;  %v1182_v57 = vadd.f32 %v1134_v40, %v1033_v43 }
  0xff   : > { %v1183_v38 = vadd.f32 %v1135_v46, %v1034_v44  ;;  %v1478_v45 = vadd.f32 %v1430_v48, %v1329_v4  ;;  %v988_v58 = vmul.f32 %v12074_v21, %v935_v49  ;;  %v1580_v61 = vmul.f32 %v12132_v1, %v1082_v34 }
 0x100   : > { %v1479_v60 = vadd.f32 %v1431_v56, %v1330_v41  ;;  %v1137_v62 = vmul.f32 %v12090_v29, %v1084_v50  ;;  %v1433_v63 = vmul.f32 %v12127_v0, %v935_v49  ;;  %v12179_v4 = vpop.f32.mrb[12].mxu0  ;;  %v1332_v9 = vadd.f32 %v1284_v16, %v1182_v57 }
 0x101   : > { %v1627_v6 = vadd.f32 %v1579_v51, %v1478_v45  ;;  %v1333_v7 = vadd.f32 %v12117_v53, %v1183_v38  ;;  %v1036_v8 = vadd.f32 %v988_v58, %v887_v10  ;;  %787 = vst [vmem:[#allocation2 + $0x68] sm:$0xff] %v12179_v4  ;;  %v12183_v11 = vpop.f32.mrb[13].mxu0  ;;  %v1480_v12 = vadd.f32 %v1432_v37, %v1331_v55  ;;  %v836_v53 = vld [vmem:[#allocation2 + $0x40] sm:$0x3]  ;;  %v1086_v44 = vld [vmem:[#allocation2 + $0x42] sm:$0x3] }
 0x102   : > { %v1628_v13 = vadd.f32 %v1580_v61, %v1479_v60  ;;  %v1582_v14 = vmul.f32 %v12132_v1, %v1084_v50  ;;  %v1878_v15 = vmul.f32 %v12169_v59, %v935_v49  ;;  %786 = vst [vmem:[#allocation2 + $0x60] sm:$0xff] %v12183_v11  ;;  %v1481_v19 = vadd.f32 %v1433_v63, %v1332_v9  ;;  %v936_v10 = vld [vmem:[#allocation2 + $0x39] sm:$0xff]  ;;  %v937_v16 = vld [vmem:[#allocation2 + $0x41] sm:$0x3] }
 0x103   : > { %v1185_v18 = vadd.f32 %v1137_v62, %v1036_v8  ;;  %v1777_v23 = vadd.f32 %v1729_v17, %v1627_v6  ;;  %v2027_v24 = vmul.f32 %v12177_v5, %v1084_v50  ;;  %v1287_v26 = vmul.f32 %v12146_v28, %v12079_v22  ;;  %v1085_v32 = vld [vmem:[#allocation2 + $0x3a] sm:$0xff]  ;;  %v1531_v58 = vld [vmem:[#allocation2 + $0x42] sm:$0x3] }
 0x104   : > { %v1778_v25 = vadd.f32 %v12135_v2, %v1628_v13  ;;  %v1732_v27 = vmul.f32 %v12146_v28, %v12110_v47  ;;  %v889_v30 = vmul.f32 %v12069_v20, %v836_v53  ;;  %v1233_v33 = vld [vmem:[#allocation2 + $0x40] sm:$0x3]  ;;  %v12195_v34 = vpop.f32.mrb[14].mxu0  ;;  %v1630_v17 = vadd.f32 %v1582_v14, %v1481_v19  ;;  %v1976_v6 = vld [vmem:[#allocation2 + $0x42] sm:$0x3] }
 0x105   : > { %v1926_v35 = vadd.f32 %v1878_v15, %v1777_v23  ;;  %v989_v37 = vmul.f32 %v12074_v21, %v936_v10  ;;  %v990_v40 = vmul.f32 %v12074_v21, %v937_v16  ;;  %v1382_v41 = vld [vmem:[#allocation2 + $0x41] sm:$0x3]  ;;  %789 = vst [vmem:[#allocation2 + $0x78] sm:$0xff] %v12195_v34  ;;  %v1629_v2 = vadd.f32 %v1581_v39, %v1480_v12  ;;  %v575_v8 = vpop.f32.mrb[15].mxu0  ;;  %v839_v14 = vld [vmem:[#allocation2 + $0x58] sm:$0x3] }
 0x106   : > { %v12205_v43 = vadd.f32 %v1287_v26, %v1185_v18  ;;  %v1138_v46 = vmul.f32 %v12090_v29, %v1085_v32  ;;  %v1286_v48 = vmul.f32 %v12079_v22, %v1233_v33  ;;  %v12209_v50 = vadd.f32 %v1732_v27, %v1630_v17  ;;  %v1678_v51 = vld [vmem:[#allocation2 + $0x40] sm:$0x3]  ;;  %v940_v15 = vld [vmem:[#allocation2 + $0x59] sm:$0x3]  ;;  %788 = vst [vmem:[#allocation2 + $0x70] sm:$0xff] %v575_v8 }
 0x107   : > { %v2075_v49 = vadd.f32 %v2027_v24, %v1926_v35  ;;  %v1037_v55 = vadd.f32 %v989_v37, %v12114_v52  ;;  %v1038_v56 = vadd.f32 %v990_v40, %v889_v30  ;;  %v12214_v39 = vmul.f32 %v12146_v28, %v12069_v20  ;;  %v1827_v60 = vld [vmem:[#allocation2 + $0x41] sm:$0x3]  ;;  %v2224_v28 = vld [vmem:[%s17202_s1 + $0x59] sm:$0xff] }
 0x108   : > { %v1334_v57 = vadd.f32 %v1286_v48, %v1184_v54  ;;  %v1434_v38 = vmul.f32 %v12127_v0, %v936_v10  ;;  %v1435_v45 = vmul.f32 %v12127_v0, %v1382_v41  ;;  %v1139_v62 = vmul.f32 %v12090_v29, %v1086_v44  ;;  %v10400_v18 = vpop.f32.mrb[16].mxu0  ;;  %v1089_v16 = vld [vmem:[#allocation2 + $0x5a] sm:$0x3]  ;;  %v1236_v26 = vld [vmem:[#allocation2 + $0x58] sm:$0x3] }
 0x109   : > { %v2128_v61 = vadd.f32 %v12203_v42, %v2075_v49  ;;  %v12220_v63 = vadd.f32 %v1138_v46, %v1037_v55  ;;  %v1583_v52 = vmul.f32 %v12132_v1, %v1085_v32  ;;  %v1731_v12 = vmul.f32 %v12110_v47, %v1678_v51  ;;  %791 = vst [vmem:[#allocation2 + $0x88] sm:$0xff] %v10400_v18  ;;  %v12230_v27 = vpop.f32.mrb[17].mxu0  ;;  %v1385_v17 = vld [vmem:[#allocation2 + $0x59] sm:$0x3]  ;;  %v938_v51 = vld [vmem:[#allocation2 + $0x49] sm:$0xff] }
 0x10a   : > { %v1482_v54 = vadd.f32 %v1434_v38, %v1333_v7  ;;  %v1483_v9 = vadd.f32 %v1435_v45, %v1334_v57  ;;  %v1879_v13 = vmul.f32 %v12169_v59, %v936_v10  ;;  %v1187_v23 = vadd.f32 %v1139_v62, %v1038_v56  ;;  %v1681_v35 = vld [vmem:[#allocation2 + $0x58] sm:$0x3]  ;;  %790 = vst [vmem:[#allocation2 + $0x80] sm:$0xff] %v12230_v27  ;;  %v1534_v48 = vld [vmem:[#allocation2 + $0x5a] sm:$0x3] }
 0x10b   : > { %v2176_v19 = vmax.f32 %v2128_v61, 0.0  ;;  %v1584_v24 = vmul.f32 %v12132_v1, %v1531_v58  ;;  %v1880_v53 = vmul.f32 %v12169_v59, %v1827_v60  ;;  %v1779_v30 = vadd.f32 %v1731_v12, %v1629_v2  ;;  %v1830_v56 = vld [vmem:[#allocation2 + $0x59] sm:$0x3]  ;;  %v939_v60 = vld [vmem:[#allocation2 + $0x51] sm:$0xff] }
 0x10c   : > { %v12232_v7 = vadd.f32 %v1583_v52, %v1482_v54  ;;  %v1927_v33 = vadd.f32 %v1879_v13, %v1778_v25  ;;  %v2028_v10 = vmul.f32 %v12177_v5, %v1085_v32  ;;  %v12236_v37 = vpop.f32.mrb[18].mxu0  ;;  %v892_v44 = vmul.f32 %v12069_v20, %v839_v14  ;;  %v1979_v8 = vld [vmem:[#allocation2 + $0x5a] sm:$0x3]  ;;  %v1088_v18 = vld [vmem:[#allocation2 + $0x52] sm:$0xff] }
 0x10d   : > { %v2227_v40 = vmul.f32 %v2224_v28, %v2176_v19  ;;  %v1632_v41 = vadd.f32 %v1584_v24, %v1483_v9  ;;  %v993_v46 = vmul.f32 %v12074_v21, %v940_v15  ;;  %793 = vst [vmem:[#allocation2 + $0x98] sm:$0xff] %v12236_v37  ;;  %v12241_v49 = vpop.f32.mrb[19].mxu0  ;;  %v1928_v25 = vadd.f32 %v1880_v53, %v1779_v30  ;;  %v1087_v28 = vld [vmem:[#allocation2 + $0x4a] sm:$0xff]  ;;  %v2225_v9 = vld [vmem:[%s17202_s1 + $0x61] sm:$0xff] }
 0x10e   : > { %v2029_v32 = vmul.f32 %v12177_v5, %v1976_v6  ;;  %v2076_v2 = vadd.f32 %v2028_v10, %v1927_v33  ;;  %v1289_v55 = vmul.f32 %v12079_v22, %v1236_v26  ;;  %792 = vst [vmem:[#allocation2 + $0x90] sm:$0xff] %v12241_v49  ;;  %v1142_v38 = vmul.f32 %v12090_v29, %v1089_v16  ;;  %v2226_v26 = vld [vmem:[%s17202_s1 + $0x69] sm:$0x3] }
 0x10f   : > { %2283 = vst [vmem:[#allocation3 + $0x18] sm:$0xff] %v2227_v40  ;;  %v1041_v57 = vadd.f32 %v993_v46, %v892_v44  ;;  %v1438_v45 = vmul.f32 %v12127_v0, %v1385_v17  ;;  %v1734_v58 = vmul.f32 %v12110_v47, %v1681_v35  ;;  %v1587_v6 = vmul.f32 %v12132_v1, %v1534_v48 }
 0x110   : > { %v2077_v61 = vadd.f32 %v2029_v32, %v1928_v25  ;;  %v2129_v62 = vadd.f32 %v12203_v42, %v2076_v2  ;;  %v1337_v52 = vadd.f32 %v1289_v55, %v1187_v23  ;;  %v12251_v54 = vpop.f32.mrb[20].mxu0  ;;  %v1883_v13 = vmul.f32 %v12169_v59, %v1830_v56 }
 0x111   : > { %v1782_v12 = vadd.f32 %v1734_v58, %v1632_v41  ;;  %v891_v14 = vmul.f32 %v12069_v20, %v12160_v31  ;;  %v991_v15 = vmul.f32 %v12074_v21, %v938_v51  ;;  %795 = vst [vmem:[#allocation2 + $0xa8] sm:$0xff] %v12251_v54  ;;  %v605_v19 = vpop.f32.mrb[21].mxu0  ;;  %v992_v16 = vmul.f32 %v12074_v21, %v939_v60 }
 0x112   : > { %v2130_v23 = vadd.f32 %v12203_v42, %v2077_v61  ;;  %v2177_v24 = vmax.f32 %v2129_v62, 0.0  ;;  %v1486_v53 = vadd.f32 %v1438_v45, %v1337_v52  ;;  %794 = vst [vmem:[#allocation2 + $0xa0] sm:$0xff] %v605_v19  ;;  %v2032_v33 = vmul.f32 %v12177_v5, %v1979_v8  ;;  %v941_v8 = vld [vmem:[#allocation2 + $0x61] sm:$0xff] }
 0x113   : > { %v1931_v30 = vadd.f32 %v1883_v13, %v1782_v12  ;;  %v1039_v10 = vadd.f32 %v991_v15, %v12214_v39  ;;  %v1140_v17 = vmul.f32 %v12090_v29, %v1087_v28  ;;  %v1040_v41 = vadd.f32 %v992_v16, %v891_v14 }
 0x114   : > { %v2178_v35 = vmax.f32 %v2130_v23, 0.0  ;;  %v2228_v40 = vmul.f32 %v2225_v9, %v2177_v24  ;;  %v1141_v44 = vmul.f32 %v12090_v29, %v1088_v18  ;;  %v12270_v46 = vadd.f32 %v1142_v38, %v1041_v57  ;;  %v10409_v9 = vpop.f32.mrb[22].mxu0 }
 0x115   : > { %v2080_v48 = vadd.f32 %v2032_v33, %v1931_v30  ;;  %v1288_v25 = vmul.f32 %v12079_v22, %v12160_v31  ;;  %v1436_v32 = vmul.f32 %v12127_v0, %v938_v51  ;;  %v12275_v55 = vadd.f32 %v1587_v6, %v1486_v53  ;;  %797 = vst [vmem:[#allocation2 + $0xb8] sm:$0xff] %v10409_v9  ;;  %v1239_v9 = vld [vmem:[#allocation2 + $0x70] sm:$0x3] }
 0x116   : > { %v2229_v2 = vmul.f32 %v2226_v26, %v2178_v35  ;;  %2284 = vst [vmem:[#allocation3 + $0x20] sm:$0xff] %v2228_v40  ;;  %v1188_v39 = vadd.f32 %v1140_v17, %v1039_v10  ;;  %v1189_v56 = vadd.f32 %v1141_v44, %v1040_v41  ;;  %v1437_v57 = vmul.f32 %v12127_v0, %v939_v60 }
 0x117   : > { %v12278_v45 = vadd.f32 %v12203_v42, %v2080_v48  ;;  %v1336_v58 = vadd.f32 %v1288_v25, %v12220_v63  ;;  %v1484_v38 = vadd.f32 %v1436_v32, %v12205_v43  ;;  %v1585_v61 = vmul.f32 %v12132_v1, %v1087_v28  ;;  %v12291_v43 = vpop.f32.mrb[23].mxu0  ;;  %v842_v25 = vld [vmem:[#allocation2 + $0x70] sm:$0x3] }
 0x118   : > { %2285 = vst [vmem:[#allocation3 + $0x28] sm:$0x3] %v2229_v2  ;;  %v1586_v62 = vmul.f32 %v12132_v1, %v1088_v18  ;;  %v1733_v52 = vmul.f32 %v12110_v47, %v12160_v31  ;;  %v1881_v6 = vmul.f32 %v12169_v59, %v938_v51  ;;  %v1882_v63 = vmul.f32 %v12169_v59, %v939_v60  ;;  %v1090_v51 = vld [vmem:[#allocation2 + $0x62] sm:$0xff]  ;;  %v12298_v24 = vpop.f32.mrb[24].mxu0 }
 0x119   : > { %v1485_v13 = vadd.f32 %v1437_v57, %v1336_v58  ;;  %v2030_v14 = vmul.f32 %v12177_v5, %v1087_v28  ;;  %v1633_v15 = vadd.f32 %v1585_v61, %v1484_v38  ;;  %v1291_v31 = vmul.f32 %v12179_v4, %v12079_v22  ;;  %796 = vst [vmem:[#allocation2 + $0xb0] sm:$0xff] %v12291_v43  ;;  %v12312_v40 = vpop.f32.mrb[25].mxu0  ;;  %v942_v32 = vld [vmem:[#allocation2 + $0x69] sm:$0xff]  ;;  %v943_v61 = vld [vmem:[#allocation2 + $0x71] sm:$0x3] }
 0x11a   : > { %v1781_v19 = vadd.f32 %v1733_v52, %v12232_v7  ;;  %v1929_v23 = vadd.f32 %v1881_v6, %v12209_v50  ;;  %v1736_v60 = vmul.f32 %v12179_v4, %v12110_v47  ;;  %v893_v28 = vmul.f32 %v12069_v20, %v12183_v11  ;;  %799 = vst [vmem:[#allocation2 + $0xc8] sm:$0xff] %v12298_v24 }
 0x11b   : > { %v1634_v53 = vadd.f32 %v1586_v62, %v1485_v13  ;;  %v994_v16 = vmul.f32 %v12074_v21, %v941_v8  ;;  %v2031_v7 = vmul.f32 %v12177_v5, %v1088_v18  ;;  %v1339_v30 = vadd.f32 %v1291_v31, %v1189_v56  ;;  %798 = vst [vmem:[#allocation2 + $0xc0] sm:$0xff] %v12312_v40 }
 0x11c   : > { %v1930_v50 = vadd.f32 %v1882_v63, %v1781_v19  ;;  %v2078_v26 = vadd.f32 %v2030_v14, %v1929_v23  ;;  %v1143_v17 = vmul.f32 %v12090_v29, %v1090_v51  ;;  %v1290_v35 = vmul.f32 %v12079_v22, %v12183_v11  ;;  %v12320_v2 = vpop.f32.mrb[26].mxu0  ;;  %v1091_v19 = vld [vmem:[#allocation2 + $0x6a] sm:$0xff] }
 0x11d   : > { %v12307_v33 = vadd.f32 %v1736_v60, %v1634_v53  ;;  %v1042_v10 = vadd.f32 %v994_v16, %v893_v28  ;;  %v894_v44 = vmul.f32 %v12179_v4, %v12069_v20  ;;  %v1439_v48 = vmul.f32 %v12127_v0, %v941_v8  ;;  %801 = vst [vmem:[#allocation2 + $0xd8] sm:$0xff] %v12320_v2  ;;  %v635_v4 = vpop.f32.mrb[27].mxu0  ;;  %v1388_v53 = vld [vmem:[#allocation2 + $0x71] sm:$0x3] }
 0x11e   : > { %v2079_v41 = vadd.f32 %v2031_v7, %v1930_v50  ;;  %v1735_v18 = vmul.f32 %v12110_v47, %v12183_v11  ;;  %v12323_v56 = vadd.f32 %v12203_v42, %v2078_v26  ;;  %v1338_v57 = vadd.f32 %v1290_v35, %v1188_v39  ;;  %800 = vst [vmem:[#allocation2 + $0xd0] sm:$0xff] %v635_v4 }
 0x11f   : > { %v1191_v58 = vadd.f32 %v1143_v17, %v1042_v10  ;;  %v1588_v38 = vmul.f32 %v12132_v1, %v1090_v51  ;;  %v1884_v11 = vmul.f32 %v12169_v59, %v941_v8  ;;  %v2033_v52 = vmul.f32 %v12177_v5, %v1090_v51  ;;  %v1092_v51 = vld [vmem:[#allocation2 + $0x72] sm:$0x3] }
 0x120   : > { %v1783_v62 = vadd.f32 %v1735_v18, %v1633_v15  ;;  %v1293_v6 = vmul.f32 %v12195_v34, %v12079_v22  ;;  %v12332_v13 = vadd.f32 %v12203_v42, %v2079_v41  ;;  %v1487_v39 = vadd.f32 %v1439_v48, %v1338_v57  ;;  %v10418_v7 = vpop.f32.mrb[28].mxu0  ;;  %v1537_v41 = vld [vmem:[#allocation2 + $0x72] sm:$0x3]  ;;  %v1684_v48 = vld [vmem:[#allocation2 + $0x70] sm:$0x3] }
 0x121   : > { %v895_v63 = vmul.f32 %v12069_v20, %v842_v25  ;;  %v995_v14 = vmul.f32 %v12074_v21, %v942_v32  ;;  %v12338_v8 = vmul.f32 %v12195_v34, %v12069_v20  ;;  %v996_v31 = vmul.f32 %v12074_v21, %v943_v61  ;;  %803 = vst [vmem:[#allocation2 + $0xe8] sm:$0xff] %v10418_v7  ;;  %v12348_v18 = vpop.f32.mrb[29].mxu0  ;;  %v1833_v57 = vld [vmem:[#allocation2 + $0x71] sm:$0x3] }
 0x122   : > { %v1932_v23 = vadd.f32 %v1884_v11, %v1783_v62  ;;  %v12340_v15 = vadd.f32 %v1293_v6, %v1191_v58  ;;  %v1636_v60 = vadd.f32 %v1588_v38, %v1487_v39  ;;  %v1738_v28 = vmul.f32 %v12195_v34, %v12110_v47  ;;  %802 = vst [vmem:[#allocation2 + $0xe0] sm:$0xff] %v12348_v18 }
 0x123   : > { %v1043_v16 = vadd.f32 %v995_v14, %v894_v44  ;;  %v1292_v50 = vmul.f32 %v12079_v22, %v1239_v9  ;;  %v1044_v10 = vadd.f32 %v996_v31, %v895_v63  ;;  %v1144_v17 = vmul.f32 %v12090_v29, %v1091_v19  ;;  %v1982_v14 = vld [vmem:[#allocation2 + $0x72] sm:$0x3]  ;;  %v1242_v31 = vld [vmem:[#allocation2 + $0x88] sm:$0x3] }
 0x124   : > { %v2081_v26 = vadd.f32 %v2033_v52, %v1932_v23  ;;  %v1440_v35 = vmul.f32 %v12127_v0, %v942_v32  ;;  %v12350_v25 = vadd.f32 %v1738_v28, %v1636_v60  ;;  %v1145_v58 = vmul.f32 %v12090_v29, %v1092_v51  ;;  %v12356_v38 = vpop.f32.mrb[30].mxu0  ;;  %v845_v52 = vld [vmem:[#allocation2 + $0x88] sm:$0x3]  ;;  %v1095_v28 = vld [vmem:[#allocation2 + $0x8a] sm:$0x3] }
 0x125   : > { %v1340_v34 = vadd.f32 %v1292_v50, %v12270_v46  ;;  %v1441_v44 = vmul.f32 %v12127_v0, %v1388_v53  ;;  %v12361_v4 = vadd.f32 %v1144_v17, %v1043_v16  ;;  %v1589_v11 = vmul.f32 %v12132_v1, %v1091_v19  ;;  %805 = vst [vmem:[#allocation2 + $0xf8] sm:$0xff] %v12356_v38  ;;  %v12365_v6 = vpop.f32.mrb[31].mxu0  ;;  %v946_v23 = vld [vmem:[#allocation2 + $0x89] sm:$0x3] }
 0x126   : > { %v12359_v61 = vadd.f32 %v12203_v42, %v2081_v26  ;;  %v1488_v62 = vadd.f32 %v1440_v35, %v1339_v30  ;;  %v1590_v9 = vmul.f32 %v12132_v1, %v1537_v41  ;;  %v1737_v39 = vmul.f32 %v12110_v47, %v1684_v48  ;;  %804 = vst [vmem:[#allocation2 + $0xf0] sm:$0xff] %v12365_v6  ;;  %v1687_v16 = vld [vmem:[#allocation2 + $0x88] sm:$0x3]  ;;  %v1540_v35 = vld [vmem:[#allocation2 + $0x8a] sm:$0x3] }
 0x127   : > { %v1489_v46 = vadd.f32 %v1441_v44, %v1340_v34  ;;  %v1885_v63 = vmul.f32 %v12169_v59, %v942_v32  ;;  %v1193_v51 = vadd.f32 %v1145_v58, %v1044_v10  ;;  %v1886_v53 = vmul.f32 %v12169_v59, %v1833_v57  ;;  %v1391_v17 = vld [vmem:[#allocation2 + $0x89] sm:$0x3] }
 0x128   : > { %v2034_v60 = vmul.f32 %v12177_v5, %v1091_v19  ;;  %v1785_v7 = vadd.f32 %v1737_v39, %v12275_v55  ;;  %v898_v32 = vmul.f32 %v12069_v20, %v845_v52  ;;  %v12377_v41 = vadd.f32 %v1589_v11, %v1488_v62  ;;  %v1836_v19 = vld [vmem:[#allocation2 + $0x89] sm:$0x3]  ;;  %v12382_v34 = vpop.f32.mrb[32].mxu0  ;;  %v944_v52 = vld [vmem:[#allocation2 + $0x79] sm:$0xff] }
 0x129   : > { %v1638_v50 = vadd.f32 %v1590_v9, %v1489_v46  ;;  %v1933_v26 = vadd.f32 %v1885_v63, %v12307_v33  ;;  %v2035_v48 = vmul.f32 %v12177_v5, %v1982_v14  ;;  %v999_v10 = vmul.f32 %v12074_v21, %v946_v23  ;;  %v945_v46 = vld [vmem:[#allocation2 + $0x81] sm:$0xff]  ;;  %807 = vst [vmem:[#allocation2 + $0x108] sm:$0xff] %v12382_v34  ;;  %v1985_v63 = vld [vmem:[#allocation2 + $0x8a] sm:$0x3] }
 0x12a   : > { %v1295_v58 = vmul.f32 %v12079_v22, %v1242_v31  ;;  %v1934_v44 = vadd.f32 %v1886_v53, %v1785_v7  ;;  %v1148_v55 = vmul.f32 %v12090_v29, %v1095_v28  ;;  %v1740_v33 = vmul.f32 %v12110_v47, %v1687_v16  ;;  %v1094_v28 = vld [vmem:[#allocation2 + $0x82] sm:$0xff] }
 0x12b   : > { %v2082_v57 = vadd.f32 %v2034_v60, %v1933_v26  ;;  %v1047_v62 = vadd.f32 %v999_v10, %v898_v32  ;;  %v1444_v9 = vmul.f32 %v12127_v0, %v1391_v17  ;;  %v1593_v39 = vmul.f32 %v12132_v1, %v1540_v35  ;;  %v1093_v60 = vld [vmem:[#allocation2 + $0x7a] sm:$0xff]  ;;  %v665_v32 = vpop.f32.mrb[33].mxu0  ;;  %v1848_v12 = vld [vmem:[#allocation2 + $0xe9] sm:$0x3] }
 0x12c   : > { %v1343_v11 = vadd.f32 %v1295_v58, %v1193_v51  ;;  %v2083_v14 = vadd.f32 %v2035_v48, %v1934_v44  ;;  %v1788_v31 = vadd.f32 %v1740_v33, %v1638_v50  ;;  %v1889_v53 = vmul.f32 %v12169_v59, %v1836_v19  ;;  %806 = vst [vmem:[#allocation2 + $0x100] sm:$0xff] %v665_v32  ;;  %v10427_v10 = vpop.f32.mrb[34].mxu0 }
 0x12d   : > { %v12390_v23 = vadd.f32 %v12203_v42, %v2082_v57  ;;  %v897_v7 = vmul.f32 %v12069_v20, %v12230_v27  ;;  %v997_v51 = vmul.f32 %v12074_v21, %v944_v52  ;;  %v998_v26 = vmul.f32 %v12074_v21, %v945_v46  ;;  %809 = vst [vmem:[#allocation2 + $0x118] sm:$0xff] %v10427_v10  ;;  %v675_v33 = vpop.f32.mrb[35].mxu0  ;;  %v947_v10 = vld [vmem:[#allocation2 + $0x91] sm:$0xff] }
 0x12e   : > { %v1492_v16 = vadd.f32 %v1444_v9, %v1343_v11  ;;  %v12398_v17 = vadd.f32 %v12203_v42, %v2083_v14  ;;  %v12400_v35 = vadd.f32 %v1148_v55, %v1047_v62  ;;  %v1937_v48 = vadd.f32 %v1889_v53, %v1788_v31  ;;  %808 = vst [vmem:[#allocation2 + $0x110] sm:$0xff] %v675_v33  ;;  %v1100_v11 = vld [vmem:[#allocation2 + $0xb2] sm:$0xff] }
 0x12f   : > { %v2038_v50 = vmul.f32 %v12177_v5, %v1985_v63  ;;  %v1045_v58 = vadd.f32 %v997_v51, %v12338_v8  ;;  %v1046_v19 = vadd.f32 %v998_v26, %v897_v7  ;;  %v1146_v44 = vmul.f32 %v12090_v29, %v1093_v60 }
 0x130   : > { %v1147_v57 = vmul.f32 %v12090_v29, %v1094_v28  ;;  %v1294_v55 = vmul.f32 %v12079_v22, %v12230_v27  ;;  %v1442_v62 = vmul.f32 %v12127_v0, %v944_v52  ;;  %v10430_v63 = vpop.f32.mrb[36].mxu0  ;;  %v12411_v8 = vadd.f32 %v1593_v39, %v1492_v16 }
 0x131   : > { %v2086_v9 = vadd.f32 %v2038_v50, %v1937_v48  ;;  %v1194_v31 = vadd.f32 %v1146_v44, %v1045_v58  ;;  %811 = vst [vmem:[#allocation2 + $0x128] sm:$0xff] %v10430_v63  ;;  %v1443_v26 = vmul.f32 %v12127_v0, %v945_v46  ;;  %v1591_v48 = vmul.f32 %v12132_v1, %v1093_v60  ;;  %v685_v58 = vpop.f32.mrb[37].mxu0 }
 0x132   : > { %v1195_v53 = vadd.f32 %v1147_v57, %v1046_v19  ;;  %v1342_v51 = vadd.f32 %v1294_v55, %v12361_v4  ;;  %v1490_v32 = vadd.f32 %v1442_v62, %v12340_v15  ;;  %v1592_v50 = vmul.f32 %v12132_v1, %v1094_v28  ;;  %810 = vst [vmem:[#allocation2 + $0x120] sm:$0xff] %v685_v58  ;;  %v1690_v19 = vld [vmem:[#allocation2 + $0xa0] sm:$0x3] }
 0x133   : > { %v12414_v7 = vadd.f32 %v12203_v42, %v2086_v9  ;;  %v1739_v39 = vmul.f32 %v12110_v47, %v12230_v27  ;;  %v1887_v16 = vmul.f32 %v12169_v59, %v944_v52  ;;  %v1888_v4 = vmul.f32 %v12169_v59, %v945_v46  ;;  %v1096_v52 = vld [vmem:[#allocation2 + $0x92] sm:$0xff] }
 0x134   : > { %v1491_v44 = vadd.f32 %v1443_v26, %v1342_v51  ;;  %v2036_v57 = vmul.f32 %v12177_v5, %v1093_v60  ;;  %v10433_v15 = vpop.f32.mrb[38].mxu0  ;;  %v1639_v33 = vadd.f32 %v1591_v48, %v1490_v32  ;;  %v1297_v27 = vmul.f32 %v12236_v37, %v12079_v22 }
 0x135   : > { %17439 = vst [vmem:[#allocation6_spill] sm:$0xff] %v12414_v7  ;;  %v1787_v9 = vadd.f32 %v1739_v39, %v12377_v41  ;;  %v1935_v55 = vadd.f32 %v1887_v16, %v12350_v25  ;;  %813 = vst [vmem:[#allocation2 + $0x138] sm:$0xff] %v10433_v15  ;;  %v1742_v63 = vmul.f32 %v12236_v37, %v12110_v47 }
 0x136   : > { %v1640_v62 = vadd.f32 %v1592_v50, %v1491_v44  ;;  %v899_v46 = vmul.f32 %v12069_v20, %v12241_v49  ;;  %v1000_v60 = vmul.f32 %v12074_v21, %v947_v10  ;;  %v2037_v26 = vmul.f32 %v12177_v5, %v1094_v28 }
 0x137   : > { %v1936_v51 = vadd.f32 %v1888_v4, %v1787_v9  ;;  %v2084_v41 = vadd.f32 %v2036_v57, %v1935_v55  ;;  %v1345_v32 = vadd.f32 %v1297_v27, %v1195_v53  ;;  %v1149_v39 = vmul.f32 %v12090_v29, %v1096_v52  ;;  %v848_v4 = vld [vmem:[#allocation2 + $0xa0] sm:$0x3] }
 0x138   : > { %v12437_v25 = vadd.f32 %v1742_v63, %v1640_v62  ;;  %v1048_v48 = vadd.f32 %v1000_v60, %v899_v46  ;;  %v1296_v50 = vmul.f32 %v12079_v22, %v12241_v49  ;;  %v900_v44 = vmul.f32 %v12236_v37, %v12069_v20  ;;  %v948_v55 = vld [vmem:[#allocation2 + $0x99] sm:$0xff]  ;;  %v949_v27 = vld [vmem:[#allocation2 + $0xa1] sm:$0x3] }
 0x139   : > { %v2085_v16 = vadd.f32 %v2037_v26, %v1936_v51  ;;  %v12443_v58 = vadd.f32 %v12203_v42, %v2084_v41  ;;  %v1741_v28 = vmul.f32 %v12110_v47, %v12241_v49  ;;  %v1445_v15 = vmul.f32 %v12127_v0, %v947_v10  ;;  %v1245_v26 = vld [vmem:[#allocation2 + $0xa0] sm:$0x3] }
 0x13a   : > { %v1197_v53 = vadd.f32 %v1149_v39, %v1048_v48  ;;  %v1344_v57 = vadd.f32 %v1296_v50, %v1194_v31  ;;  %v1594_v9 = vmul.f32 %v12132_v1, %v1096_v52  ;;  %v1890_v46 = vmul.f32 %v12169_v59, %v947_v10  ;;  %v1097_v39 = vld [vmem:[#allocation2 + $0x9a] sm:$0xff] }
 0x13b   : > { %17440 = vst [vmem:[#allocation7_spill] sm:$0xff] %v12443_v58  ;;  %v12452_v62 = vadd.f32 %v12203_v42, %v2085_v16  ;;  %v1789_v63 = vadd.f32 %v1741_v28, %v1639_v33  ;;  %v2039_v37 = vmul.f32 %v12177_v5, %v1096_v52  ;;  %v1299_v31 = vmul.f32 %v12251_v54, %v12079_v22  ;;  %v1098_v52 = vld [vmem:[#allocation2 + $0xa2] sm:$0x3] }
 0x13c   : > { %v1493_v49 = vadd.f32 %v1445_v15, %v1344_v57  ;;  %v901_v51 = vmul.f32 %v12069_v20, %v848_v4  ;;  %v12462_v48 = vmul.f32 %v12251_v54, %v12069_v20  ;;  %v1001_v33 = vmul.f32 %v12074_v21, %v948_v55  ;;  %v1394_v57 = vld [vmem:[#allocation2 + $0xa1] sm:$0x3] }
 0x13d   : > { %17441 = vst [vmem:[#allocation8_spill] sm:$0xff] %v12452_v62  ;;  %v1938_v41 = vadd.f32 %v1890_v46, %v1789_v63  ;;  %v1002_v10 = vmul.f32 %v12074_v21, %v949_v27  ;;  %v12467_v28 = vadd.f32 %v1299_v31, %v1197_v53  ;;  %v1744_v4 = vmul.f32 %v12251_v54, %v12110_v47  ;;  %v1543_v53 = vld [vmem:[#allocation2 + $0xa2] sm:$0x3] }
 0x13e   : > { %v1642_v16 = vadd.f32 %v1594_v9, %v1493_v49  ;;  %v1049_v63 = vadd.f32 %v1001_v33, %v900_v44  ;;  %v1298_v20 = vmul.f32 %v12079_v22, %v1245_v26  ;;  %v1150_v21 = vmul.f32 %v12090_v29, %v1097_v39  ;;  %v695_v49 = vpop.f32.mrb[39].mxu0  ;;  %v851_v33 = vld [vmem:[#allocation2 + $0xb8] sm:$0x3] }
 0x13f   : > { %v2087_v15 = vadd.f32 %v2039_v37, %v1938_v41  ;;  %v1050_v46 = vadd.f32 %v1002_v10, %v901_v51  ;;  %v1151_v27 = vmul.f32 %v12090_v29, %v1098_v52  ;;  %v1446_v9 = vmul.f32 %v12127_v0, %v948_v55  ;;  %v1839_v37 = vld [vmem:[#allocation2 + $0xa1] sm:$0x3]  ;;  %812 = vst [vmem:[#allocation2 + $0x130] sm:$0xff] %v695_v49  ;;  %v952_v10 = vld [vmem:[#allocation2 + $0xb9] sm:$0x3] }
 0x140   : > { %v12472_v60 = vadd.f32 %v1744_v4, %v1642_v16  ;;  %v1346_v54 = vadd.f32 %v1298_v20, %v12400_v35  ;;  %v1447_v44 = vmul.f32 %v12127_v0, %v1394_v57  ;;  %v1595_v22 = vmul.f32 %v12132_v1, %v1097_v39  ;;  %v1988_v57 = vld [vmem:[#allocation2 + $0xa2] sm:$0x3] }
 0x141   : > { %v12478_v31 = vadd.f32 %v12203_v42, %v2087_v15  ;;  %v12483_v51 = vadd.f32 %v1150_v21, %v1049_v63  ;;  %v1494_v26 = vadd.f32 %v1446_v9, %v1345_v32  ;;  %v1743_v29 = vmul.f32 %v12110_v47, %v1690_v19  ;;  %v1248_v15 = vld [vmem:[#allocation2 + $0xb8] sm:$0x3]  ;;  %v1101_v21 = vld [vmem:[#allocation2 + $0xba] sm:$0x3] }
 0x142   : > { %v1891_v41 = vmul.f32 %v12169_v59, %v948_v55  ;;  %v1199_v16 = vadd.f32 %v1151_v27, %v1050_v46  ;;  %v1495_v4 = vadd.f32 %v1447_v44, %v1346_v54  ;;  %v1596_v35 = vmul.f32 %v12132_v1, %v1543_v53  ;;  %v1397_v55 = vld [vmem:[#allocation2 + $0xb9] sm:$0x3]  ;;  %v12498_v46 = vld [vmem:[%s17202_s1 + $0x8] ss:$0 sm:$0xff] }
 0x143   : > { %17442 = vst [vmem:[#allocation9_spill] sm:$0xff] %v12478_v31  ;;  %v1791_v20 = vadd.f32 %v1743_v29, %v12411_v8  ;;  %v1892_v63 = vmul.f32 %v12169_v59, %v1839_v37  ;;  %v2040_v19 = vmul.f32 %v12177_v5, %v1097_v39  ;;  %v1693_v9 = vld [vmem:[#allocation2 + $0xb8] sm:$0x3]  ;;  %v12493_v49 = vadd.f32 %v1595_v22, %v1494_v26  ;;  %v12504_v8 = vld [vmem:[%s17202_s1 + $0x9] ss:$0 sm:$0xff] }
 0x144   : > { %v1939_v32 = vadd.f32 %v1891_v41, %v12437_v25  ;;  %v1644_v52 = vadd.f32 %v1596_v35, %v1495_v4  ;;  %v904_v27 = vmul.f32 %v12498_v46, %v851_v33  ;;  %17443 = vst [vmem:[#allocation10_spill] sm:$0xff] %v12504_v8  ;;  %v1005_v25 = vmul.f32 %v12504_v8, %v952_v10  ;;  %v1546_v39 = vld [vmem:[#allocation2 + $0xba] sm:$0x3]  ;;  %v12511_v22 = vld [vmem:[%s17202_s1 + $0xb] ss:$0 sm:$0xff] }
 0x145   : > { %v1940_v53 = vadd.f32 %v1892_v63, %v1791_v20  ;;  %v2041_v54 = vmul.f32 %v12177_v5, %v1988_v57  ;;  %v1301_v37 = vmul.f32 %v12511_v22, %v1248_v15  ;;  %v1842_v26 = vld [vmem:[#allocation2 + $0xb9] sm:$0x3]  ;;  %v950_v41 = vld [vmem:[#allocation2 + $0xa9] sm:$0xff]  ;;  %v1450_v35 = vmul.f32 %v12127_v0, %v1397_v55  ;;  %v951_v20 = vld [vmem:[#allocation2 + $0xb1] sm:$0xff] }
 0x146   : > { %v2088_v44 = vadd.f32 %v2040_v19, %v1939_v32  ;;  %v1991_v29 = vld [vmem:[#allocation2 + $0xba] sm:$0x3]  ;;  %v1053_v33 = vadd.f32 %v1005_v25, %v904_v27  ;;  %v12517_v10 = vld [vmem:[%s17202_s1 + $0xa] ss:$0 sm:$0xff]  ;;  %v1746_v57 = vmul.f32 %v12110_v47, %v1693_v9  ;;  %v1599_v19 = vmul.f32 %v12132_v1, %v1546_v39 }
 0x147   : > { %v1154_v4 = vmul.f32 %v12517_v10, %v1101_v21  ;;  %v2089_v63 = vadd.f32 %v2041_v54, %v1940_v53  ;;  %v1349_v15 = vadd.f32 %v1301_v37, %v1199_v16  ;;  %v1895_v25 = vmul.f32 %v12169_v59, %v1842_v26  ;;  %v1099_v21 = vld [vmem:[#allocation2 + $0xaa] sm:$0xff]  ;;  %v10436_v26 = vpop.f32.mrb[40].mxu0 }
 0x148   : > { %v12523_v32 = vadd.f32 %v12203_v42, %v2088_v44  ;;  %v1794_v27 = vadd.f32 %v1746_v57, %v1644_v52  ;;  %v2044_v50 = vmul.f32 %v12177_v5, %v1991_v29  ;;  %v1003_v14 = vmul.f32 %v12504_v8, %v950_v41  ;;  %815 = vst [vmem:[#allocation2 + $0x148] sm:$0xff] %v10436_v26 }
 0x149   : > { %v12530_v0 = vadd.f32 %v12203_v42, %v2089_v63  ;;  %v1498_v47 = vadd.f32 %v1450_v35, %v1349_v15  ;;  %v903_v55 = vmul.f32 %v12498_v46, %v12291_v43  ;;  %v1004_v16 = vmul.f32 %v12504_v8, %v951_v20 }
 0x14a   : > { %17444 = vst [vmem:[#allocation11_spill] sm:$0xff] %v12523_v32  ;;  %v12536_v52 = vadd.f32 %v1154_v4, %v1053_v33  ;;  %v1943_v9 = vadd.f32 %v1895_v25, %v1794_v27  ;;  %v1051_v39 = vadd.f32 %v1003_v14, %v12462_v48  ;;  %v1152_v54 = vmul.f32 %v12517_v10, %v1099_v21  ;;  %v12549_v33 = vld [vmem:[%s17202_s1 + $0xc] ss:$0 sm:$0xff]  ;;  %v705_v48 = vpop.f32.mrb[41].mxu0 }
 0x14b   : > { %17445 = vst [vmem:[#allocation12_spill] sm:$0xff] %v12530_v0  ;;  %v1052_v53 = vadd.f32 %v1004_v16, %v903_v55  ;;  %v1153_v44 = vmul.f32 %v12517_v10, %v1100_v11  ;;  %v1300_v37 = vmul.f32 %v12511_v22, %v12291_v43  ;;  %v12544_v35 = vadd.f32 %v1599_v19, %v1498_v47  ;;  %v12566_v47 = vld [vmem:[%s17202_s1 + $0xe] ss:$0 sm:$0xff] }
 0x14c   : > { %v2092_v57 = vadd.f32 %v2044_v50, %v1943_v9  ;;  %v1448_v14 = vmul.f32 %v12549_v33, %v950_v41  ;;  %v1200_v4 = vadd.f32 %v1152_v54, %v1051_v39  ;;  %v1449_v27 = vmul.f32 %v12549_v33, %v951_v20  ;;  %814 = vst [vmem:[#allocation2 + $0x140] sm:$0xff] %v705_v48  ;;  %v12560_v50 = vld [vmem:[%s17202_s1 + $0xd] ss:$0 sm:$0xff]  ;;  %v953_v54 = vld [vmem:[#allocation2 + $0xc1] sm:$0xff] }
 0x14d   : > { %v1201_v63 = vadd.f32 %v1153_v44, %v1052_v53  ;;  %v1348_v15 = vadd.f32 %v1300_v37, %v12483_v51  ;;  %v1597_v25 = vmul.f32 %v12560_v50, %v1099_v21  ;;  %v1745_v51 = vmul.f32 %v12566_v47, %v12291_v43 }
 0x14e   : > { %v12555_v19 = vadd.f32 %v12203_v42, %v2092_v57  ;;  %v1893_v55 = vmul.f32 %v12169_v59, %v950_v41  ;;  %v1496_v16 = vadd.f32 %v1448_v14, %v12467_v28  ;;  %v1598_v39 = vmul.f32 %v12560_v50, %v1100_v11  ;;  %v1102_v14 = vld [vmem:[#allocation2 + $0xc2] sm:$0xff] }
 0x14f   : > { %v1497_v9 = vadd.f32 %v1449_v27, %v1348_v15  ;;  %v1894_v53 = vmul.f32 %v12169_v59, %v951_v20  ;;  %v1793_v44 = vadd.f32 %v1745_v51, %v12493_v49  ;;  %v2042_v26 = vmul.f32 %v12177_v5, %v1099_v21 }
 0x150   : > { %17446 = vst [vmem:[#allocation13_spill] sm:$0xff] %v12555_v19  ;;  %v1941_v37 = vadd.f32 %v1893_v55, %v12472_v60  ;;  %v2043_v57 = vmul.f32 %v12177_v5, %v1100_v11  ;;  %v1303_v28 = vmul.f32 %v12511_v22, %v12298_v24  ;;  %v1748_v41 = vmul.f32 %v12566_v47, %v12298_v24 }
 0x151   : > { %v1646_v48 = vadd.f32 %v1598_v39, %v1497_v9  ;;  %v1942_v20 = vadd.f32 %v1894_v53, %v1793_v44  ;;  %v905_v49 = vmul.f32 %v12498_v46, %v12312_v40  ;;  %v1006_v60 = vmul.f32 %v12504_v8, %v953_v54 }
 0x152   : > { %v2090_v15 = vadd.f32 %v2042_v26, %v1941_v37  ;;  %v1645_v21 = vadd.f32 %v1597_v25, %v1496_v16  ;;  %v12586_v27 = vadd.f32 %v1303_v28, %v1201_v63  ;;  %v1302_v51 = vmul.f32 %v12511_v22, %v12312_v40  ;;  %v854_v16 = vld [vmem:[#allocation2 + $0xd0] sm:$0x3] }
 0x153   : > { %v12588_v11 = vadd.f32 %v1748_v41, %v1646_v48  ;;  %v2091_v55 = vadd.f32 %v2043_v57, %v1942_v20  ;;  %v1054_v39 = vadd.f32 %v1006_v60, %v905_v49  ;;  %v1155_v53 = vmul.f32 %v12517_v10, %v1102_v14  ;;  %v954_v26 = vld [vmem:[#allocation2 + $0xc9] sm:$0xff]  ;;  %v955_v20 = vld [vmem:[#allocation2 + $0xd1] sm:$0x3] }
 0x154   : > { %v12593_v9 = vadd.f32 %v12203_v42, %v2090_v15  ;;  %v906_v44 = vmul.f32 %v12498_v46, %v12298_v24  ;;  %v1350_v37 = vadd.f32 %v1302_v51, %v1200_v4  ;;  %v1451_v25 = vmul.f32 %v12549_v33, %v953_v54  ;;  %v1103_v60 = vld [vmem:[#allocation2 + $0xca] sm:$0xff] }
 0x155   : > { %v1747_v63 = vmul.f32 %v12566_v47, %v12312_v40  ;;  %v12602_v48 = vadd.f32 %v12203_v42, %v2091_v55  ;;  %v1203_v57 = vadd.f32 %v1155_v53, %v1054_v39  ;;  %v1600_v28 = vmul.f32 %v12560_v50, %v1102_v14  ;;  %v1104_v40 = vld [vmem:[#allocation2 + $0xd2] sm:$0x3]  ;;  %v1251_v51 = vld [vmem:[#allocation2 + $0xd0] sm:$0x3] }
 0x156   : > { %17447 = vst [vmem:[#allocation14_spill] sm:$0xff] %v12593_v9  ;;  %v1896_v41 = vmul.f32 %v12169_v59, %v953_v54  ;;  %v1499_v24 = vadd.f32 %v1451_v25, %v1350_v37  ;;  %v1305_v49 = vmul.f32 %v12511_v22, %v12320_v2  ;;  %v2045_v43 = vmul.f32 %v12177_v5, %v1102_v14  ;;  %v1400_v37 = vld [vmem:[#allocation2 + $0xd1] sm:$0x3] }
 0x157   : > { %17448 = vst [vmem:[#allocation15_spill] sm:$0xff] %v12602_v48  ;;  %v1795_v4 = vadd.f32 %v1747_v63, %v1645_v21  ;;  %v1750_v55 = vmul.f32 %v12566_v47, %v12320_v2  ;;  %v907_v39 = vmul.f32 %v12498_v46, %v854_v16  ;;  %v1007_v59 = vmul.f32 %v12504_v8, %v954_v26 }
 0x158   : > { %v1648_v54 = vadd.f32 %v1600_v28, %v1499_v24  ;;  %v12614_v15 = vadd.f32 %v1305_v49, %v1203_v57  ;;  %v1008_v21 = vmul.f32 %v12504_v8, %v955_v20  ;;  %v1156_v63 = vmul.f32 %v12517_v10, %v1103_v60  ;;  %v1549_v28 = vld [vmem:[#allocation2 + $0xd2] sm:$0x3] }
 0x159   : > { %v1944_v53 = vadd.f32 %v1896_v41, %v1795_v4  ;;  %v1055_v25 = vadd.f32 %v1007_v59, %v906_v44  ;;  %v1157_v29 = vmul.f32 %v12517_v10, %v1104_v40  ;;  %v1304_v5 = vmul.f32 %v12511_v22, %v1251_v51  ;;  %v1696_v41 = vld [vmem:[#allocation2 + $0xd0] sm:$0x3]  ;;  %v10439_v59 = vpop.f32.mrb[42].mxu0 }
 0x15a   : > { %v12620_v1 = vadd.f32 %v1750_v55, %v1648_v54  ;;  %v1056_v16 = vadd.f32 %v1008_v21, %v907_v39  ;;  %v1452_v30 = vmul.f32 %v12549_v33, %v954_v26  ;;  %v12626_v20 = vmul.f32 %v12498_v46, %v12320_v2  ;;  %v1845_v4 = vld [vmem:[#allocation2 + $0xd1] sm:$0x3]  ;;  %v857_v39 = vld [vmem:[#allocation2 + $0xe8] sm:$0x3]  ;;  %817 = vst [vmem:[#allocation2 + $0x158] sm:$0xff] %v10439_v59 }
 0x15b   : > { %v2093_v14 = vadd.f32 %v2045_v43, %v1944_v53  ;;  %v1352_v44 = vadd.f32 %v1304_v5, %v12536_v52  ;;  %v1453_v24 = vmul.f32 %v12549_v33, %v1400_v37  ;;  %v12633_v49 = vadd.f32 %v1156_v63, %v1055_v25  ;;  %v1994_v55 = vld [vmem:[#allocation2 + $0xd2] sm:$0x3]  ;;  %v12641_v52 = vld [vmem:[%s17202_s1 + $0xf] ss:$0 sm:$0xff]  ;;  %v958_v21 = vld [vmem:[#allocation2 + $0xe9] sm:$0x3] }
 0x15c   : > { %v1205_v40 = vadd.f32 %v1157_v29, %v1056_v16  ;;  %v1601_v51 = vmul.f32 %v12560_v50, %v1103_v60  ;;  %v1602_v2 = vmul.f32 %v12560_v50, %v1549_v28  ;;  %v1749_v53 = vmul.f32 %v12566_v47, %v1696_v41  ;;  %v1254_v37 = vld [vmem:[#allocation2 + $0xe8] sm:$0x3]  ;;  %v1107_v28 = vld [vmem:[#allocation2 + $0xea] sm:$0x3] }
 0x15d   : > { %v12631_v43 = vadd.f32 %v12203_v42, %v2093_v14  ;;  %v1501_v54 = vadd.f32 %v1453_v24, %v1352_v44  ;;  %v1897_v42 = vmul.f32 %v12641_v52, %v954_v26  ;;  %v1403_v29 = vld [vmem:[#allocation2 + $0xe9] sm:$0x3]  ;;  %v1500_v63 = vadd.f32 %v1452_v30, %v12586_v27  ;;  %v12650_v14 = vld [vmem:[%s17202_s1 + $0x10] ss:$0 sm:$0xff] }
 0x15e   : > { %v1898_v5 = vmul.f32 %v12641_v52, %v1845_v4  ;;  %v2046_v16 = vmul.f32 %v12650_v14, %v1103_v60  ;;  %v1699_v41 = vld [vmem:[#allocation2 + $0xe8] sm:$0x3]  ;;  %v1797_v44 = vadd.f32 %v1749_v53, %v12544_v35  ;;  %v910_v59 = vmul.f32 %v12498_v46, %v857_v39  ;;  %v1552_v25 = vld [vmem:[#allocation2 + $0xea] sm:$0x3]  ;;  %v715_v60 = vpop.f32.mrb[43].mxu0 }
 0x15f   : > { %17449 = vst [vmem:[#allocation16_spill] sm:$0xff] %v12631_v43  ;;  %v1650_v26 = vadd.f32 %v1602_v2, %v1501_v54  ;;  %v1945_v24 = vadd.f32 %v1897_v42, %v12588_v11  ;;  %v2047_v30 = vmul.f32 %v12650_v14, %v1994_v55  ;;  %v1011_v27 = vmul.f32 %v12504_v8, %v958_v21  ;;  %v956_v11 = vld [vmem:[#allocation2 + $0xd9] sm:$0xff]  ;;  %v957_v2 = vld [vmem:[#allocation2 + $0xe1] sm:$0xff]  ;;  %v10442_v39 = vpop.f32.mrb[44].mxu0 }
 0x160   : > { %v1307_v4 = vmul.f32 %v12511_v22, %v1254_v37  ;;  %v1456_v57 = vmul.f32 %v12549_v33, %v1403_v29  ;;  %v1946_v43 = vadd.f32 %v1898_v5, %v1797_v44  ;;  %v1160_v54 = vmul.f32 %v12517_v10, %v1107_v28  ;;  %816 = vst [vmem:[#allocation2 + $0x150] sm:$0xff] %v715_v60  ;;  %v1997_v37 = vld [vmem:[#allocation2 + $0xea] sm:$0x3]  ;;  %v12666_v5 = vld [vmem:[%s17202_s1 + $0x2c] ss:$0 sm:$0xff]  ;;  %v1105_v44 = vld [vmem:[#allocation2 + $0xda] sm:$0xff] }
 0x161   : > { %v2094_v19 = vadd.f32 %v2046_v16, %v1945_v24  ;;  %v1752_v35 = vmul.f32 %v12566_v47, %v1699_v41  ;;  %v1649_v53 = vadd.f32 %v1601_v51, %v1500_v63  ;;  %v1059_v55 = vadd.f32 %v1011_v27, %v910_v59  ;;  %819 = vst [vmem:[#allocation2 + $0x168] sm:$0xff] %v10442_v39  ;;  %v1106_v51 = vld [vmem:[#allocation2 + $0xe2] sm:$0xff] }
 0x162   : > { %v1355_v42 = vadd.f32 %v1307_v4, %v1205_v40  ;;  %v1605_v21 = vmul.f32 %v12560_v50, %v1552_v25  ;;  %v2095_v29 = vadd.f32 %v2047_v30, %v1946_v43  ;;  %v1901_v41 = vmul.f32 %v12641_v52, %v1848_v12 }
 0x163   : > { %v12669_v16 = vadd.f32 %v12666_v5, %v2094_v19  ;;  %v1800_v28 = vadd.f32 %v1752_v35, %v1650_v26  ;;  %v909_v40 = vmul.f32 %v12498_v46, %v12348_v18  ;;  %v1009_v25 = vmul.f32 %v12504_v8, %v956_v11 }
 0x164   : > { %v1504_v63 = vadd.f32 %v1456_v57, %v1355_v42  ;;  %v1010_v43 = vmul.f32 %v12504_v8, %v957_v2  ;;  %v12677_v24 = vadd.f32 %v12666_v5, %v2095_v29  ;;  %v12679_v59 = vadd.f32 %v1160_v54, %v1059_v55  ;;  %v12789_v54 = vld [vmem:[%s17202_s1 + $0x13] ss:$0 sm:$0xff] }
 0x165   : > { %17450 = vst [vmem:[#allocation17_spill] sm:$0xff] %v12669_v16  ;;  %v1949_v19 = vadd.f32 %v1901_v41, %v1800_v28  ;;  %v2050_v26 = vmul.f32 %v12650_v14, %v1997_v37  ;;  %v1057_v12 = vadd.f32 %v1009_v25, %v12626_v20  ;;  %v1158_v57 = vmul.f32 %v12517_v10, %v1105_v44 }
 0x166   : > { %17451 = vst [vmem:[#allocation18_spill] sm:$0xff] %v12677_v24  ;;  %v1058_v30 = vadd.f32 %v1010_v43, %v909_v40  ;;  %v1159_v27 = vmul.f32 %v12517_v10, %v1106_v51  ;;  %v1306_v35 = vmul.f32 %v12511_v22, %v12348_v18  ;;  %v1454_v39 = vmul.f32 %v12549_v33, %v956_v11  ;;  %v12705_v43 = vld [vmem:[#allocation3 + $0x18] sm:$0xff] }
 0x167   : > { %v2098_v60 = vadd.f32 %v2050_v26, %v1949_v19  ;;  %v12690_v55 = vadd.f32 %v1605_v21, %v1504_v63  ;;  %v12692_v42 = vadd.f32 %v1158_v57, %v1057_v12  ;;  %v1455_v20 = vmul.f32 %v12549_v33, %v957_v2  ;;  %v12707_v19 = vld [vmem:[#allocation3 + $0x19] sm:$0xff]  ;;  %v12712_v26 = vld [vmem:[%s17202_s1 + $0x15] ss:$0 sm:$0xff] }
 0x168   : > { %v1207_v29 = vadd.f32 %v1159_v27, %v1058_v30  ;;  %v1354_v28 = vadd.f32 %v1306_v35, %v12633_v49  ;;  %v1603_v41 = vmul.f32 %v12560_v50, %v1105_v44  ;;  %v1502_v40 = vadd.f32 %v1454_v39, %v12614_v15  ;;  %v12723_v27 = vld [vmem:[%s17202_s1 + $0x14] ss:$0 sm:$0xff] }
 0x169   : > { %v12696_v37 = vadd.f32 %v12666_v5, %v2098_v60  ;;  %v1751_v25 = vmul.f32 %v12566_v47, %v12348_v18  ;;  %v1899_v21 = vmul.f32 %v12641_v52, %v956_v11  ;;  %v1900_v63 = vmul.f32 %v12641_v52, %v957_v2 }
 0x16a   : > { %v1503_v12 = vadd.f32 %v1455_v20, %v1354_v28  ;;  %v1604_v15 = vmul.f32 %v12560_v50, %v1106_v51  ;;  %v2048_v18 = vmul.f32 %v12650_v14, %v1105_v44  ;;  %v2179_v2 = vmax.f32 %v12323_v56, 0.0  ;;  %v12730_v44 = vld [vmem:[#allocation3 + $0x1a] sm:$0xff]  ;;  %v12735_v56 = vld [vmem:[%s17202_s1 + $0x16] ss:$0 sm:$0xff] }
 0x16b   : > { %17452 = vst [vmem:[#allocation19_spill] sm:$0xff] %v12696_v37  ;;  %v1799_v30 = vadd.f32 %v1751_v25, %v1649_v53  ;;  %v1947_v11 = vadd.f32 %v1899_v21, %v12620_v1  ;;  %v2180_v57 = vmax.f32 %v12332_v13, 0.0  ;;  %v2049_v35 = vmul.f32 %v12650_v14, %v1106_v51  ;;  %v725_v13 = vpop.f32.mrb[45].mxu0  ;;  %v12740_v51 = vld [vmem:[%s17202_s1 + $0x59] sm:$0xff]  ;;  %v12748_v25 = vld [vmem:[%s17202_s1 + $0x61] sm:$0xff] }
 0x16c   : > { %v1652_v60 = vadd.f32 %v1604_v15, %v1503_v12  ;;  %v2639_v39 = vmul.f32 %v12723_v27, %v12705_v43  ;;  %v2740_v53 = vmul.f32 %v12712_v26, %v12707_v19  ;;  %v12743_v28 = vmul.f32 %v12740_v51, %v2179_v2  ;;  %17454 = vst [vmem:[#allocation21_spill] sm:$0xff] %v12748_v25  ;;  %v2502_v12 = vld [vmem:[#allocation3 + $0xa] sm:$0xff]  ;;  %v12763_v2 = vld [vmem:[#allocation3 + $0x20] sm:$0xff] }
 0x16d   : > { %v1948_v1 = vadd.f32 %v1900_v63, %v1799_v30  ;;  %v2096_v20 = vadd.f32 %v2048_v18, %v1947_v11  ;;  %v12751_v21 = vmul.f32 %v12748_v25, %v2180_v57  ;;  %818 = vst [vmem:[#allocation2 + $0x160] sm:$0xff] %v725_v13  ;;  %v1651_v63 = vadd.f32 %v1603_v41, %v1502_v40  ;;  %v12757_v18 = vld [vmem:[%s17202_s1 + $0x17] ss:$0 sm:$0xff]  ;;  %v12775_v41 = vld [vmem:[%s17202_s1 + $0x69] sm:$0x3] }
 0x16e   : > { %17453 = vst [vmem:[#allocation20_spill] sm:$0xff] %v12743_v28  ;;  %v2671_v15 = vadd.f32 %v2639_v39, %v12137_v3  ;;  %v1309_v30 = vmul.f32 %v12511_v22, %v12356_v38  ;;  %v1754_v11 = vmul.f32 %v12566_v47, %v12356_v38  ;;  %2286 = vst [vmem:[#allocation3 + $0x30] sm:$0xff] %v12743_v28  ;;  %v17457_v40 = vmax.f32 %v12278_v45, 0.0  ;;  %v12792_v37 = vld [vmem:[#allocation3 + $0x22] sm:$0xff] }
 0x16f   : > { %17455 = vst [vmem:[#allocation22_spill] sm:$0xff] %v12751_v21  ;;  %v2097_v57 = vadd.f32 %v2049_v35, %v1948_v1  ;;  %v12766_v49 = vadd.f32 %v12666_v5, %v2096_v20  ;;  %2287 = vst [vmem:[#allocation3 + $0x38] sm:$0xff] %v12751_v21  ;;  %v2841_v3 = vmul.f32 %v12735_v56, %v12730_v44  ;;  %v12780_v35 = vld [vmem:[#allocation3 + $0x21] sm:$0xff] }
 0x170   : > { %v2232_v39 = vmul.f32 %v12775_v41, %v17457_v40  ;;  %v2772_v13 = vadd.f32 %v2740_v53, %v2671_v15  ;;  %v12782_v1 = vadd.f32 %v1309_v30, %v1207_v29  ;;  %v12784_v20 = vadd.f32 %v1754_v11, %v1652_v60  ;;  %v959_v53 = vld [vmem:[#allocation2 + $0xf1] sm:$0xff] }
 0x171   : > { %17456 = vst [vmem:[#allocation23_spill] sm:$0xff] %v12766_v49  ;;  %v2539_v4 = vmul.f32 %v12789_v54, %v2502_v12  ;;  %v12795_v45 = vadd.f32 %v12666_v5, %v2097_v57  ;;  %v2943_v40 = vmul.f32 %v12757_v18, %v12743_v28  ;;  %v12801_v29 = vmul.f32 %v12498_v46, %v12356_v38  ;;  %v1108_v57 = vld [vmem:[#allocation2 + $0xf2] sm:$0xff] }
 0x172   : > { %2288 = vst [vmem:[#allocation3 + $0x40] sm:$0x3] %v2232_v39  ;;  %v2640_v60 = vmul.f32 %v12723_v27, %v12763_v2  ;;  %v2873_v12 = vadd.f32 %v2841_v3, %v2772_v13  ;;  %v2741_v11 = vmul.f32 %v12712_v26, %v12780_v35  ;;  %v2842_v24 = vmul.f32 %v12735_v56, %v12792_v37  ;;  %v12818_v3 = vld [vmem:[%s17202_s1 + $0x18] ss:$0 sm:$0xff] }
 0x173   : > { %17458 = vst [vmem:[#allocation24_spill] sm:$0xff] %v12795_v45  ;;  %v2571_v30 = vadd.f32 %v2539_v4, %v12152_v36  ;;  %v911_v38 = vmul.f32 %v12498_v46, %v12365_v6  ;;  %v1012_v39 = vmul.f32 %v12504_v8, %v959_v53  ;;  %v1161_v16 = vmul.f32 %v12517_v10, %v1108_v57 }
 0x174   : > { %v2944_v4 = vmul.f32 %v12757_v18, %v12751_v21  ;;  %v1308_v13 = vmul.f32 %v12511_v22, %v12365_v6  ;;  %v1457_v15 = vmul.f32 %v12549_v33, %v959_v53  ;;  %v2975_v49 = vadd.f32 %v2943_v40, %v2873_v12 }
 0x175   : > { %v2672_v36 = vadd.f32 %v2640_v60, %v2571_v30  ;;  %v1060_v48 = vadd.f32 %v1012_v39, %v911_v38  ;;  %v1753_v9 = vmul.f32 %v12566_v47, %v12365_v6  ;;  %v1902_v0 = vmul.f32 %v12641_v52, %v959_v53  ;;  %v12836_v30 = vld [vmem:[%s17202_s1 + $0x19] ss:$0 sm:$0xff] }
 0x176   : > { %v12829_v31 = vld [vmem:[#allocation3 + $0x31] sm:$0xff]  ;;  %v1356_v40 = vadd.f32 %v1308_v13, %v12692_v42  ;;  %v1606_v12 = vmul.f32 %v12560_v50, %v1108_v57  ;;  %v2051_v39 = vmul.f32 %v12650_v14, %v1108_v57  ;;  %v1756_v42 = vmul.f32 %v12566_v47, %v12382_v34 }
 0x177   : > { %17459 = vst [vmem:[#allocation25_spill] sm:$0xff] %v12829_v31  ;;  %v12831_v60 = vld [vmem:[#allocation3 + $0x32] sm:$0xff]  ;;  %v2773_v7 = vadd.f32 %v2741_v11, %v2672_v36  ;;  %v3044_v6 = vmul.f32 %v12818_v3, %v12829_v31  ;;  %v1209_v53 = vadd.f32 %v1161_v16, %v1060_v48  ;;  %v1801_v38 = vadd.f32 %v1753_v9, %v1651_v63  ;;  %v10445_v36 = vpop.f32.mrb[46].mxu0 }
 0x178   : > { %17460 = vst [vmem:[#allocation26_spill] sm:$0xff] %v12831_v60  ;;  %v1505_v58 = vadd.f32 %v1457_v15, %v1356_v40  ;;  %v1311_v11 = vmul.f32 %v12511_v22, %v12382_v34  ;;  %v3145_v48 = vmul.f32 %v12836_v30, %v12831_v60  ;;  %821 = vst [vmem:[#allocation2 + $0x178] sm:$0xff] %v10445_v36  ;;  %v735_v16 = vpop.f32.mrb[47].mxu0  ;;  %v17462_v57 = vmax.f32 %v12359_v61, 0.0  ;;  %v12875_v61 = vld [vmem:[%s17202_s1 + $0x11] ss:$0 sm:$0xff] }
 0x179   : > { %v2874_v32 = vadd.f32 %v2842_v24, %v2773_v7  ;;  %v12843_v45 = vld [vmem:[#allocation3 + $0x39] sm:$0xff]  ;;  %v3076_v13 = vadd.f32 %v3044_v6, %v2975_v49  ;;  %v1950_v7 = vadd.f32 %v1902_v0, %v1801_v38  ;;  %820 = vst [vmem:[#allocation2 + $0x170] sm:$0xff] %v735_v16  ;;  %v961_v38 = vld [vmem:[#allocation2 + $0x101] sm:$0x3]  ;;  %v2641_v36 = vmul.f32 %v12723_v27, %v12743_v28 }
 0x17a   : > { %17461 = vst [vmem:[#allocation27_spill] sm:$0xff] %v12843_v45  ;;  %v12845_v62 = vld [vmem:[#allocation3 + $0x3a] sm:$0xff]  ;;  %v3045_v9 = vmul.f32 %v12818_v3, %v12843_v45  ;;  %v1654_v63 = vadd.f32 %v1606_v12, %v1505_v58  ;;  %v12855_v15 = vadd.f32 %v1311_v11, %v1209_v53  ;;  %v12860_v40 = vmul.f32 %v12740_v51, %v17462_v57  ;;  %v960_v53 = vld [vmem:[#allocation2 + $0xf9] sm:$0xff]  ;;  %v1406_v16 = vld [vmem:[#allocation2 + $0x101] sm:$0x3] }
 0x17b   : > { %v2976_v24 = vadd.f32 %v2944_v4, %v2874_v32  ;;  %v3177_v49 = vadd.f32 %v3145_v48, %v3076_v13  ;;  %v3146_v6 = vmul.f32 %v12836_v30, %v12845_v62  ;;  %v2099_v21 = vadd.f32 %v2051_v39, %v1950_v7  ;;  %v860_v32 = vld [vmem:[#allocation2 + $0x100] sm:$0x3] }
 0x17c   : > { %17463 = vst [vmem:[#allocation28_spill] sm:$0xff] %v12860_v40  ;;  %v17464_v45 = vmax.f32 %v12390_v23, 0.0  ;;  %v12869_v4 = vadd.f32 %v1756_v42, %v1654_v63  ;;  %2289 = vst [vmem:[#allocation3 + $0x48] sm:$0xff] %v12860_v40  ;;  %v2370_v12 = vmul.f32 %v12875_v61, %v12705_v43  ;;  %v12882_v23 = vld [vmem:[%s17202_s1 + $0x12] ss:$0 sm:$0xff]  ;;  %v1109_v39 = vld [vmem:[#allocation2 + $0xfa] sm:$0xff]  ;;  %v12891_v42 = vmul.f32 %v12498_v46, %v12382_v34 }
 0x17d   : > { %v3077_v58 = vadd.f32 %v3045_v9, %v2976_v24  ;;  %10487 = vmatprep.mubr.f32.mxu1 %v3177_v49  ;;  %v12887_v11 = vadd.f32 %v12666_v5, %v2099_v21  ;;  %v2540_v43 = vmul.f32 %v12789_v54, %v12730_v44  ;;  %v1257_v13 = vld [vmem:[#allocation2 + $0x100] sm:$0x3]  ;;  %v2742_v21 = vmul.f32 %v12712_v26, %v12829_v31 }
 0x17e   : > { %v12867_v0 = vmul.f32 %v12748_v25, %v17464_v45  ;;  %v2439_v45 = vmul.f32 %v12882_v23, %v12707_v19  ;;  %v1110_v19 = vld [vmem:[#allocation2 + $0x102] sm:$0x3]  ;;  %v913_v7 = vmul.f32 %v12498_v46, %v860_v32  ;;  %v2843_v34 = vmul.f32 %v12735_v56, %v12831_v60  ;;  %v1702_v32 = vld [vmem:[#allocation2 + $0x100] sm:$0x3] }
 0x17f   : > { %17465 = vst [vmem:[#allocation29_spill] sm:$0xff] %v12887_v11  ;;  %v3178_v48 = vadd.f32 %v3146_v6, %v3077_v58  ;;  %v1013_v24 = vmul.f32 %v12504_v8, %v960_v53  ;;  %v1014_v44 = vmul.f32 %v12504_v8, %v961_v38  ;;  %v1162_v63 = vmul.f32 %v12517_v10, %v1109_v39  ;;  %v1851_v38 = vld [vmem:[#allocation2 + $0x101] sm:$0x3] }
 0x180   : > { %2290 = vst [vmem:[#allocation3 + $0x50] sm:$0xff] %v12867_v0  ;;  %v2471_v9 = vadd.f32 %v2439_v45, %v2370_v12  ;;  %v1163_v49 = vmul.f32 %v12517_v10, %v1110_v19  ;;  %v1310_v6 = vmul.f32 %v12511_v22, %v1257_v13  ;;  %v1458_v58 = vmul.f32 %v12549_v33, %v960_v53  ;;  %v1555_v12 = vld [vmem:[#allocation2 + $0x102] sm:$0x3] }
 0x181   : > { %10488 = vmatmul.mubr.f32.vlgmr.msra.gmra.mrb[0].mxu1 %v3178_v48  ;;  %v1061_v45 = vadd.f32 %v1013_v24, %v12801_v29  ;;  %v1062_v31 = vadd.f32 %v1014_v44, %v913_v7  ;;  %v1459_v60 = vmul.f32 %v12549_v33, %v1406_v16  ;;  %v1607_v28 = vmul.f32 %v12560_v50, %v1109_v39  ;;  %v2000_v16 = vld [vmem:[#allocation2 + $0x102] sm:$0x3] }
 0x182   : > { %v2572_v57 = vadd.f32 %v2540_v43, %v2471_v9  ;;  %v2945_v43 = vmul.f32 %v12757_v18, %v12860_v40  ;;  %v1358_v19 = vadd.f32 %v1310_v6, %v12679_v59  ;;  %v1506_v13 = vadd.f32 %v1458_v58, %v12782_v1 }
 0x183   : > { %v1608_v9 = vmul.f32 %v12560_v50, %v1555_v12  ;;  %v1755_v29 = vmul.f32 %v12566_v47, %v1702_v32  ;;  %v1903_v7 = vmul.f32 %v12641_v52, %v960_v53  ;;  %v1904_v40 = vmul.f32 %v12641_v52, %v1851_v38  ;;  %v964_v38 = vld [vmem:[#allocation2 + $0x119] sm:$0x3] }
 0x184   : > { %v2673_v25 = vadd.f32 %v2641_v36, %v2572_v57  ;;  %v12922_v36 = vadd.f32 %v1162_v63, %v1061_v45  ;;  %v1507_v57 = vadd.f32 %v1459_v60, %v1358_v19  ;;  %v1211_v1 = vadd.f32 %v1163_v49, %v1062_v31 }
 0x185   : > { %v12927_v6 = vadd.f32 %v1607_v28, %v1506_v13  ;;  %v1803_v58 = vadd.f32 %v1755_v29, %v12690_v55  ;;  %v1951_v12 = vadd.f32 %v1903_v7, %v12784_v20  ;;  %v2052_v53 = vmul.f32 %v12650_v14, %v1109_v39  ;;  %v863_v28 = vld [vmem:[#allocation2 + $0x118] sm:$0x3]  ;;  %v17467_v13 = vld [vmem:[#allocation22_spill] sm:$0xff] }
 0x186   : > { %v2774_v24 = vadd.f32 %v2742_v21, %v2673_v25  ;;  %v2053_v21 = vmul.f32 %v12650_v14, %v2000_v16  ;;  %v17466_v63 = vmax.f32 %v12398_v17, 0.0  ;;  %v2371_v31 = vmul.f32 %v12875_v61, %v12763_v2  ;;  %v1260_v29 = vld [vmem:[#allocation2 + $0x118] sm:$0x3] }
 0x187   : > { %v12920_v44 = vld [vmem:[#allocation3 + $0x49] sm:$0xff]  ;;  %v1952_v60 = vadd.f32 %v1904_v40, %v1803_v58  ;;  %v2440_v55 = vmul.f32 %v12882_v23, %v12780_v35  ;;  %v1656_v49 = vadd.f32 %v1608_v9, %v1507_v57  ;;  %v2100_v39 = vadd.f32 %v2052_v53, %v1951_v12  ;;  %v10448_v58 = vpop.f32.mrb[48].mxu0 }
 0x188   : > { %v12925_v59 = vld [vmem:[#allocation3 + $0x4a] sm:$0xff]  ;;  %v2875_v32 = vadd.f32 %v2843_v34, %v2774_v24  ;;  %v3046_v25 = vmul.f32 %v12818_v3, %v12920_v44  ;;  %v2235_v45 = vmul.f32 %v12775_v41, %v17466_v63  ;;  %v2541_v17 = vmul.f32 %v12789_v54, %v12792_v37  ;;  %823 = vst [vmem:[#allocation2 + $0x188] sm:$0xff] %v10448_v58  ;;  %v745_v48 = vpop.f32.mrb[49].mxu0 }
 0x189   : > { %v3147_v34 = vmul.f32 %v12836_v30, %v12925_v59  ;;  %v2101_v19 = vadd.f32 %v2053_v21, %v1952_v60  ;;  %v2472_v40 = vadd.f32 %v2440_v55, %v2371_v31  ;;  %v2642_v2 = vmul.f32 %v12723_v27, %v17467_v13  ;;  %v1409_v7 = vld [vmem:[#allocation2 + $0x119] sm:$0x3]  ;;  %822 = vst [vmem:[#allocation2 + $0x180] sm:$0xff] %v745_v48 }
 0x18a   : > { %v2977_v20 = vadd.f32 %v2945_v43, %v2875_v32  ;;  %2291 = vst [vmem:[#allocation3 + $0x58] sm:$0x3] %v2235_v45  ;;  %v12949_v43 = vadd.f32 %v12666_v5, %v2100_v39  ;;  %v17469_v16 = vld [vmem:[#allocation27_spill] sm:$0xff]  ;;  %v916_v24 = vmul.f32 %v12498_v46, %v863_v28  ;;  %v2844_v37 = vmul.f32 %v12735_v56, %v12845_v62 }
 0x18b   : > { %v2743_v9 = vmul.f32 %v12712_v26, %v17469_v16  ;;  %v1113_v57 = vld [vmem:[#allocation2 + $0x11a] sm:$0x3]  ;;  %v2573_v12 = vadd.f32 %v2541_v17, %v2472_v40  ;;  %v2946_v32 = vmul.f32 %v12757_v18, %v12867_v0  ;;  %v1017_v53 = vmul.f32 %v12504_v8, %v964_v38  ;;  %v1705_v21 = vld [vmem:[#allocation2 + $0x118] sm:$0x3] }
 0x18c   : > { %v3078_v35 = vadd.f32 %v3046_v25, %v2977_v20  ;;  %17468 = vst [vmem:[#allocation22_spill] sm:$0xff] %v12949_v43  ;;  %v1558_v25 = vld [vmem:[#allocation2 + $0x11a] sm:$0x3]  ;;  %v12960_v45 = vadd.f32 %v12666_v5, %v2101_v19  ;;  %v1313_v31 = vmul.f32 %v12511_v22, %v1260_v29  ;;  %v1462_v55 = vmul.f32 %v12549_v33, %v1409_v7  ;;  %v963_v38 = vld [vmem:[#allocation2 + $0x111] sm:$0xff]  ;;  %v962_v29 = vld [vmem:[#allocation2 + $0x109] sm:$0xff]  ;;  %v10451_v7 = vpop.f32.mrb[50].mxu0 }
 0x18d   : > { %v1854_v60 = vld [vmem:[#allocation2 + $0x119] sm:$0x3]  ;;  %v2674_v39 = vadd.f32 %v2642_v2, %v2573_v12  ;;  %v1065_v40 = vadd.f32 %v1017_v53, %v916_v24  ;;  %v1166_v17 = vmul.f32 %v12517_v10, %v1113_v57  ;;  %v1758_v19 = vmul.f32 %v12566_v47, %v1705_v21  ;;  %v11780_v2 = vld [vmem:[#allocation2 + $0x110] sm:$0xff]  ;;  %825 = vst [vmem:[#allocation2 + $0x198] sm:$0xff] %v10451_v7 }
 0x18e   : > { %v3179_v63 = vadd.f32 %v3147_v34, %v3078_v35  ;;  %17470 = vst [vmem:[#allocation27_spill] sm:$0xff] %v12960_v45  ;;  %v2003_v28 = vld [vmem:[#allocation2 + $0x11a] sm:$0x3]  ;;  %v1361_v11 = vadd.f32 %v1313_v31, %v1211_v1  ;;  %v1611_v34 = vmul.f32 %v12560_v50, %v1558_v25  ;;  %v1907_v35 = vmul.f32 %v12641_v52, %v1854_v60  ;;  %v1111_v12 = vld [vmem:[#allocation2 + $0x10a] sm:$0xff] }
 0x18f   : > { %v2775_v58 = vadd.f32 %v2743_v9, %v2674_v39  ;;  %v2056_v20 = vmul.f32 %v12650_v14, %v2003_v28  ;;  %v915_v24 = vmul.f32 %v11780_v2, %v12498_v46  ;;  %v1015_v57 = vmul.f32 %v12504_v8, %v962_v29  ;;  %v1112_v39 = vld [vmem:[#allocation2 + $0x112] sm:$0xff] }
 0x190   : > { %10490 = vmatprep.mubr.f32.mxu1 %v3179_v63  ;;  %v1510_v25 = vadd.f32 %v1462_v55, %v1361_v11  ;;  %v1806_v21 = vadd.f32 %v1758_v19, %v1656_v49  ;;  %v1016_v60 = vmul.f32 %v12504_v8, %v963_v38  ;;  %v1164_v48 = vmul.f32 %v12517_v10, %v1111_v12 }
 0x191   : > { %v12972_v1 = vld [vmem:[#allocation3 + $0x51] sm:$0xff]  ;;  %v2876_v63 = vadd.f32 %v2844_v37, %v2775_v58  ;;  %v1063_v28 = vadd.f32 %v1015_v57, %v12891_v42  ;;  %v12984_v43 = vadd.f32 %v1166_v17, %v1065_v40  ;;  %v1312_v8 = vmul.f32 %v11780_v2, %v12511_v22 }
 0x192   : > { %v12974_v53 = vld [vmem:[#allocation3 + $0x52] sm:$0xff]  ;;  %v3047_v31 = vmul.f32 %v12818_v3, %v12972_v1  ;;  %v12986_v11 = vadd.f32 %v1611_v34, %v1510_v25  ;;  %v1955_v49 = vadd.f32 %v1907_v35, %v1806_v21  ;;  %v1064_v19 = vadd.f32 %v1016_v60, %v915_v24  ;;  %v755_v25 = vpop.f32.mrb[51].mxu0 }
 0x193   : > { %v3148_v7 = vmul.f32 %v12836_v30, %v12974_v53  ;;  %v2978_v55 = vadd.f32 %v2946_v32, %v2876_v63  ;;  %v1460_v37 = vmul.f32 %v12549_v33, %v962_v29  ;;  %v1165_v9 = vmul.f32 %v12517_v10, %v1112_v39  ;;  %824 = vst [vmem:[#allocation2 + $0x190] sm:$0xff] %v755_v25 }
 0x194   : > { %v2104_v58 = vadd.f32 %v2056_v20, %v1955_v49  ;;  %v12991_v45 = vadd.f32 %v1164_v48, %v1063_v28  ;;  %v1461_v42 = vmul.f32 %v12549_v33, %v963_v38  ;;  %v1360_v40 = vadd.f32 %v1312_v8, %v12922_v36  ;;  %v17475_v49 = vld [vmem:[#allocation8_spill] sm:$0xff] }
 0x195   : > { %v3079_v57 = vadd.f32 %v3047_v31, %v2978_v55  ;;  %v1508_v17 = vadd.f32 %v1460_v37, %v12855_v15  ;;  %v1609_v34 = vmul.f32 %v12560_v50, %v1111_v12  ;;  %v1757_v35 = vmul.f32 %v11780_v2, %v12566_v47  ;;  %v17477_v55 = vld [vmem:[#allocation21_spill] sm:$0xff] }
 0x196   : > { %v12998_v32 = vadd.f32 %v12666_v5, %v2104_v58  ;;  %v1905_v20 = vmul.f32 %v12641_v52, %v962_v29  ;;  %v1906_v24 = vmul.f32 %v12641_v52, %v963_v38  ;;  %v1509_v60 = vadd.f32 %v1461_v42, %v1360_v40  ;;  %v17472_v38 = vld [vmem:[#allocation7_spill] sm:$0xff]  ;;  %v17479_v37 = vld [vmem:[#allocation25_spill] sm:$0xff] }
 0x197   : > { %v3180_v21 = vadd.f32 %v3148_v7, %v3079_v57  ;;  %v1610_v48 = vmul.f32 %v12560_v50, %v1112_v39  ;;  %v2054_v8 = vmul.f32 %v12650_v14, %v1111_v12  ;;  %v1213_v15 = vadd.f32 %v1165_v9, %v1064_v19  ;;  %v17480_v57 = vld [vmem:[#allocation26_spill] sm:$0xff] }
 0x198   : > { %17471 = vst [vmem:[#allocation30_spill] sm:$0xff] %v12998_v32  ;;  %v1805_v36 = vadd.f32 %v1757_v35, %v12927_v6  ;;  %v1953_v63 = vadd.f32 %v1905_v20, %v12869_v4  ;;  %v2055_v31 = vmul.f32 %v12650_v14, %v1112_v39  ;;  %v13009_v2 = vadd.f32 %v1609_v34, %v1508_v17  ;;  %v17478_v4 = vld [vmem:[#allocation20_spill] sm:$0xff] }
 0x199   : > { %10491 = vmatmul.mubr.f32.gmra.mrb[2].mxu1 %v3180_v21  ;;  %v17473_v28 = vmax.f32 %v17472_v38, 0.0  ;;  %v17476_v12 = vmax.f32 %v17475_v49, 0.0  ;;  %v2372_v39 = vmul.f32 %v12875_v61, %v17478_v4  ;;  %v2441_v58 = vmul.f32 %v12882_v23, %v17479_v37  ;;  %v17481_v17 = vld [vmem:[#allocation28_spill] sm:$0xff] }
 0x19a   : > { %v1954_v6 = vadd.f32 %v1906_v24, %v1805_v36  ;;  %v2102_v19 = vadd.f32 %v2054_v8, %v1953_v63  ;;  %v1658_v42 = vadd.f32 %v1610_v48, %v1509_v60  ;;  %v2542_v40 = vmul.f32 %v12789_v54, %v17480_v57  ;;  %v11781_v48 = vld [vmem:[#allocation2 + $0x128] sm:$0xff]  ;;  %v17483_v63 = vld [vmem:[#allocation6_spill] sm:$0xff] }
 0x19b   : > { %v13014_v7 = vmul.f32 %v12740_v51, %v17473_v28  ;;  %v13019_v9 = vmul.f32 %v17477_v55, %v17476_v12  ;;  %v2643_v34 = vmul.f32 %v12723_v27, %v17481_v17  ;;  %v2744_v35 = vmul.f32 %v12712_v26, %v12920_v44  ;;  %v1114_v57 = vld [vmem:[#allocation2 + $0x122] sm:$0xff] }
 0x19c   : > { %v2103_v20 = vadd.f32 %v2055_v31, %v1954_v6  ;;  %v13034_v24 = vadd.f32 %v12666_v5, %v2102_v19  ;;  %v2473_v25 = vadd.f32 %v2441_v58, %v2372_v39  ;;  %v2845_v21 = vmul.f32 %v12735_v56, %v12925_v59  ;;  %v965_v19 = vld [vmem:[#allocation2 + $0x121] sm:$0xff] }
 0x19d   : > { %17474 = vst [vmem:[#allocation7_spill] sm:$0xff] %v13014_v7  ;;  %2292 = vst [vmem:[#allocation3 + $0x60] sm:$0xff] %v13014_v7  ;;  %v2947_v60 = vmul.f32 %v12757_v18, %v13014_v7  ;;  %v1315_v8 = vmul.f32 %v11781_v48, %v12511_v22  ;;  %v1760_v36 = vmul.f32 %v11781_v48, %v12566_v47  ;;  %v17484_v38 = vmax.f32 %v17483_v63, 0.0  ;;  %v11782_v63 = vld [vmem:[#allocation2 + $0x120] sm:$0xff] }
 0x19e   : > { %2293 = vst [vmem:[#allocation3 + $0x68] sm:$0xff] %v13019_v9  ;;  %17482 = vst [vmem:[#allocation8_spill] sm:$0xff] %v13034_v24  ;;  %v13046_v31 = vadd.f32 %v12666_v5, %v2103_v20  ;;  %v2574_v49 = vadd.f32 %v2542_v40, %v2473_v25  ;;  %v2373_v12 = vmul.f32 %v12875_v61, %v17467_v13 }
 0x19f   : > { %v2238_v28 = vmul.f32 %v12775_v41, %v17484_v38  ;;  %v2442_v6 = vmul.f32 %v12882_v23, %v17469_v16  ;;  %v13054_v39 = vmul.f32 %v11781_v48, %v12498_v46  ;;  %v13056_v37 = vadd.f32 %v1315_v8, %v1213_v15 }
 0x1a0   : > { %17485 = vst [vmem:[#allocation20_spill] sm:$0xff] %v13046_v31  ;;  %v13058_v58 = vadd.f32 %v1760_v36, %v1658_v42  ;;  %v2675_v20 = vadd.f32 %v2643_v34, %v2574_v49  ;;  %v2543_v13 = vmul.f32 %v12789_v54, %v12845_v62  ;;  %v2644_v16 = vmul.f32 %v12723_v27, %v12867_v0  ;;  %v17486_v42 = vld [vmem:[#allocation10_spill] sm:$0xff]  ;;  %v10454_v49 = vpop.f32.mrb[52].mxu0  ;;  %v13166_v31 = vld [vmem:[%s17202_s1 + $0xc] ss:$0 sm:$0xff] }
 0x1a1   : > { %2294 = vst [vmem:[#allocation3 + $0x70] sm:$0x3] %v2238_v28  ;;  %v2474_v40 = vadd.f32 %v2442_v6, %v2373_v12  ;;  %v2745_v48 = vmul.f32 %v12712_v26, %v12972_v1  ;;  %v917_v15 = vmul.f32 %v11782_v63, %v12498_v46  ;;  %v1018_v8 = vmul.f32 %v17486_v42, %v965_v19 }
 0x1a2   : > { %v2776_v36 = vadd.f32 %v2744_v35, %v2675_v20  ;;  %v1167_v28 = vmul.f32 %v12517_v10, %v1114_v57  ;;  %v1314_v62 = vmul.f32 %v11782_v63, %v12511_v22  ;;  %v2846_v29 = vmul.f32 %v12735_v56, %v12974_v53  ;;  %827 = vst [vmem:[#allocation2 + $0x1a8] sm:$0xff] %v10454_v49  ;;  %v765_v35 = vpop.f32.mrb[53].mxu0 }
 0x1a3   : > { %v2575_v34 = vadd.f32 %v2543_v13, %v2474_v40  ;;  %v1066_v46 = vadd.f32 %v1018_v8, %v917_v15  ;;  %v1463_v42 = vmul.f32 %v12549_v33, %v965_v19  ;;  %v1612_v22 = vmul.f32 %v12560_v50, %v1114_v57  ;;  %826 = vst [vmem:[#allocation2 + $0x1a0] sm:$0xff] %v765_v35  ;;  %v17492_v35 = vld [vmem:[#allocation11_spill] sm:$0xff] }
 0x1a4   : > { %v2877_v20 = vadd.f32 %v2845_v21, %v2776_v36  ;;  %v1362_v10 = vadd.f32 %v1314_v62, %v12991_v45  ;;  %v2948_v13 = vmul.f32 %v12757_v18, %v13019_v9  ;;  %v1759_v4 = vmul.f32 %v11782_v63, %v12566_v47  ;;  %v13097_v63 = vld [vmem:[%s17202_s1 + $0xb] ss:$0 sm:$0xff] }
 0x1a5   : > { %v13069_v38 = vld [vmem:[#allocation3 + $0x61] sm:$0xff]  ;;  %v2676_v40 = vadd.f32 %v2644_v16, %v2575_v34  ;;  %v1215_v25 = vadd.f32 %v1167_v28, %v1066_v46  ;;  %v1908_v32 = vmul.f32 %v12641_v52, %v965_v19  ;;  %v2057_v36 = vmul.f32 %v12650_v14, %v1114_v57 }
 0x1a6   : > { %17487 = vst [vmem:[#allocation25_spill] sm:$0xff] %v13069_v38  ;;  %v3048_v12 = vmul.f32 %v12818_v3, %v13069_v38  ;;  %v13075_v6 = vld [vmem:[#allocation3 + $0x62] sm:$0xff]  ;;  %v2979_v15 = vadd.f32 %v2947_v60, %v2877_v20  ;;  %v1511_v16 = vadd.f32 %v1463_v42, %v1362_v10  ;;  %v1807_v45 = vadd.f32 %v1759_v4, %v13009_v2  ;;  %v17489_v2 = vld [vmem:[#allocation9_spill] sm:$0xff] }
 0x1a7   : > { %17488 = vst [vmem:[#allocation26_spill] sm:$0xff] %v13075_v6  ;;  %v3149_v33 = vmul.f32 %v12836_v30, %v13075_v6  ;;  %v2777_v8 = vadd.f32 %v2745_v48, %v2676_v40  ;;  %v11784_v60 = vld [vmem:[#allocation2 + $0x138] sm:$0xff]  ;;  %v17490_v4 = vmax.f32 %v17489_v2, 0.0  ;;  %v17493_v20 = vmax.f32 %v17492_v35, 0.0  ;;  %v13118_v10 = vld [vmem:[%s17202_s1 + $0x8] ss:$0 sm:$0xff] }
 0x1a8   : > { %v13088_v21 = vld [vmem:[#allocation3 + $0x69] sm:$0xff]  ;;  %v1317_v19 = vmul.f32 %v11784_v60, %v13097_v63  ;;  %v3080_v34 = vadd.f32 %v3048_v12, %v2979_v15  ;;  %v1660_v62 = vadd.f32 %v1612_v22, %v1511_v16  ;;  %v1762_v49 = vmul.f32 %v11784_v60, %v12566_v47  ;;  %v966_v22 = vld [vmem:[#allocation2 + $0x129] sm:$0xff]  ;;  %v967_v16 = vld [vmem:[#allocation2 + $0x131] sm:$0x3] }
 0x1a9   : > { %v3049_v50 = vmul.f32 %v12818_v3, %v13088_v21  ;;  %v2878_v48 = vadd.f32 %v2846_v29, %v2777_v8  ;;  %v13100_v28 = vld [vmem:[#allocation3 + $0x6a] sm:$0xff]  ;;  %v1956_v46 = vadd.f32 %v1908_v32, %v1807_v45  ;;  %v13108_v57 = vmul.f32 %v12740_v51, %v17490_v4  ;;  %v1115_v45 = vld [vmem:[#allocation2 + $0x12a] sm:$0xff] }
 0x1aa   : > { %v13103_v42 = vadd.f32 %v1317_v19, %v1215_v25  ;;  %v13113_v40 = vmul.f32 %v17477_v55, %v17493_v20  ;;  %v3181_v12 = vadd.f32 %v3149_v33, %v3080_v34  ;;  %v13121_v47 = vmul.f32 %v13118_v10, %v11784_v60  ;;  %v866_v25 = vld [vmem:[#allocation2 + $0x130] sm:$0x3]  ;;  %v13155_v20 = vld [vmem:[%s17202_s1 + $0xa] ss:$0 sm:$0xff] }
 0x1ab   : > { %17491 = vst [vmem:[#allocation28_spill] sm:$0xff] %v13108_v57  ;;  %v2980_v29 = vadd.f32 %v2948_v13, %v2878_v48  ;;  %v13123_v32 = vadd.f32 %v1762_v49, %v1660_v62  ;;  %v3150_v15 = vmul.f32 %v12836_v30, %v13100_v28  ;;  %v2105_v8 = vadd.f32 %v2057_v36, %v1956_v46  ;;  %v1116_v48 = vld [vmem:[#allocation2 + $0x132] sm:$0x3]  ;;  %v1263_v62 = vld [vmem:[#allocation2 + $0x130] sm:$0x3] }
 0x1ac   : > { %2295 = vst [vmem:[#allocation3 + $0x78] sm:$0xff] %v13108_v57  ;;  %2296 = vst [vmem:[#allocation3 + $0x80] sm:$0xff] %v13113_v40  ;;  %v2374_v13 = vmul.f32 %v12875_v61, %v17481_v17  ;;  %v2443_v33 = vmul.f32 %v12882_v23, %v12920_v44  ;;  %10493 = vmatprep.mubr.f32.mxu1 %v3181_v12  ;;  %v2544_v19 = vmul.f32 %v12789_v54, %v12925_v59  ;;  %v1412_v46 = vld [vmem:[#allocation2 + $0x131] sm:$0x3] }
 0x1ad   : > { %v3081_v60 = vadd.f32 %v3049_v50, %v2980_v29  ;;  %v2645_v36 = vmul.f32 %v12723_v27, %v13014_v7  ;;  %v2746_v34 = vmul.f32 %v12712_v26, %v13069_v38  ;;  %v13140_v17 = vadd.f32 %v12666_v5, %v2105_v8  ;;  %v13146_v50 = vld [vmem:[%s17202_s1 + $0x9] ss:$0 sm:$0xff] }
 0x1ae   : > { %v2475_v49 = vadd.f32 %v2443_v33, %v2374_v13  ;;  %v919_v44 = vmul.f32 %v13118_v10, %v866_v25  ;;  %v1019_v59 = vmul.f32 %v13146_v50, %v966_v22  ;;  %v2847_v4 = vmul.f32 %v12735_v56, %v13075_v6  ;;  %v1708_v33 = vld [vmem:[#allocation2 + $0x130] sm:$0x3] }
 0x1af   : > { %17494 = vst [vmem:[#allocation6_spill] sm:$0xff] %v13140_v17  ;;  %v3182_v2 = vadd.f32 %v3150_v15, %v3081_v60  ;;  %v1020_v35 = vmul.f32 %v13146_v50, %v967_v16  ;;  %v1168_v12 = vmul.f32 %v13155_v20, %v1115_v45  ;;  %v1169_v8 = vmul.f32 %v13155_v20, %v1116_v48  ;;  %v1561_v15 = vld [vmem:[#allocation2 + $0x132] sm:$0x3] }
 0x1b0   : > { %v2576_v29 = vadd.f32 %v2544_v19, %v2475_v49  ;;  %v1067_v25 = vadd.f32 %v1019_v59, %v13054_v39  ;;  %v1316_v13 = vmul.f32 %v13097_v63, %v1263_v62  ;;  %v2949_v16 = vmul.f32 %v12757_v18, %v13108_v57  ;;  %v13175_v59 = vld [vmem:[%s17202_s1 + $0xd] ss:$0 sm:$0xff] }
 0x1b1   : > { %10494 = vmatmul.mubr.f32.gmra.mrb[4].mxu1 %v3182_v2  ;;  %v1068_v60 = vadd.f32 %v1020_v35, %v919_v44  ;;  %v1464_v19 = vmul.f32 %v13166_v31, %v966_v22  ;;  %v1465_v39 = vmul.f32 %v13166_v31, %v1412_v46  ;;  %v1613_v44 = vmul.f32 %v13175_v59, %v1115_v45  ;;  %v1857_v2 = vld [vmem:[#allocation2 + $0x131] sm:$0x3] }
 0x1b2   : > { %v2677_v49 = vadd.f32 %v2645_v36, %v2576_v29  ;;  %v1364_v62 = vadd.f32 %v1316_v13, %v12984_v43  ;;  %v13182_v57 = vadd.f32 %v1168_v12, %v1067_v25  ;;  %v1614_v46 = vmul.f32 %v13175_v59, %v1561_v15  ;;  %v13188_v43 = vld [vmem:[%s17202_s1 + $0xe] ss:$0 sm:$0xff]  ;;  %v2006_v13 = vld [vmem:[#allocation2 + $0x132] sm:$0x3] }
 0x1b3   : > { %v13178_v35 = vld [vmem:[#allocation3 + $0x79] sm:$0xff]  ;;  %v1761_v36 = vmul.f32 %v13188_v43, %v1708_v33  ;;  %v1909_v29 = vmul.f32 %v12641_v52, %v966_v22  ;;  %v1217_v17 = vadd.f32 %v1169_v8, %v1068_v60  ;;  %v1512_v6 = vadd.f32 %v1464_v19, %v13056_v37  ;;  %v17495_v37 = vld [vmem:[#allocation12_spill] sm:$0xff] }
 0x1b4   : > { %v13180_v24 = vld [vmem:[#allocation3 + $0x7a] sm:$0xff]  ;;  %v2778_v48 = vadd.f32 %v2746_v34, %v2677_v49  ;;  %v1513_v38 = vadd.f32 %v1465_v39, %v1364_v62  ;;  %v3050_v12 = vmul.f32 %v12818_v3, %v13178_v35  ;;  %v1910_v15 = vmul.f32 %v12641_v52, %v1857_v2 }
 0x1b5   : > { %v1809_v25 = vadd.f32 %v1761_v36, %v12986_v11  ;;  %v1957_v7 = vadd.f32 %v1909_v29, %v13058_v58  ;;  %v3151_v33 = vmul.f32 %v12836_v30, %v13180_v24  ;;  %v2058_v22 = vmul.f32 %v12650_v14, %v1115_v45  ;;  %v869_v58 = vld [vmem:[#allocation2 + $0x148] sm:$0x3] }
 0x1b6   : > { %v2879_v55 = vadd.f32 %v2847_v4, %v2778_v48  ;;  %v2059_v34 = vmul.f32 %v12650_v14, %v2006_v13  ;;  %v17496_v60 = vmax.f32 %v17495_v37, 0.0  ;;  %v2375_v11 = vmul.f32 %v12875_v61, %v12867_v0  ;;  %v970_v45 = vld [vmem:[#allocation2 + $0x149] sm:$0x3] }
 0x1b7   : > { %v1958_v8 = vadd.f32 %v1910_v15, %v1809_v25  ;;  %v2444_v52 = vmul.f32 %v12882_v23, %v12972_v1  ;;  %v13209_v39 = vadd.f32 %v1613_v44, %v1512_v6  ;;  %v1662_v48 = vadd.f32 %v1614_v46, %v1513_v38  ;;  %v1266_v0 = vld [vmem:[#allocation2 + $0x148] sm:$0x3]  ;;  %v1119_v38 = vld [vmem:[#allocation2 + $0x14a] sm:$0x3] }
 0x1b8   : > { %v2241_v19 = vmul.f32 %v12775_v41, %v17496_v60  ;;  %v2981_v4 = vadd.f32 %v2949_v16, %v2879_v55  ;;  %v2106_v49 = vadd.f32 %v2058_v22, %v1957_v7  ;;  %v2545_v2 = vmul.f32 %v12789_v54, %v12974_v53  ;;  %v1415_v29 = vld [vmem:[#allocation2 + $0x149] sm:$0x3]  ;;  %v968_v60 = vld [vmem:[#allocation2 + $0x139] sm:$0xff] }
 0x1b9   : > { %v2107_v62 = vadd.f32 %v2059_v34, %v1958_v8  ;;  %v2476_v14 = vadd.f32 %v2444_v52, %v2375_v11  ;;  %v2646_v36 = vmul.f32 %v12723_v27, %v13019_v9  ;;  %v2747_v55 = vmul.f32 %v12712_v26, %v13088_v21  ;;  %v1564_v46 = vld [vmem:[#allocation2 + $0x14a] sm:$0x3] }
 0x1ba   : > { %2297 = vst [vmem:[#allocation3 + $0x88] sm:$0x3] %v2241_v19  ;;  %v3082_v13 = vadd.f32 %v3050_v12, %v2981_v4  ;;  %v13216_v1 = vadd.f32 %v12666_v5, %v2106_v49  ;;  %v922_v7 = vmul.f32 %v13118_v10, %v869_v58  ;;  %v2848_v16 = vmul.f32 %v12735_v56, %v13100_v28  ;;  %v1711_v12 = vld [vmem:[#allocation2 + $0x148] sm:$0x3]  ;;  %v2009_v37 = vld [vmem:[#allocation2 + $0x14a] sm:$0x3] }
 0x1bb   : > { %v2577_v6 = vadd.f32 %v2545_v2, %v2476_v14  ;;  %v2950_v53 = vmul.f32 %v12757_v18, %v13113_v40  ;;  %v1023_v44 = vmul.f32 %v13146_v50, %v970_v45  ;;  %v1860_v25 = vld [vmem:[#allocation2 + $0x149] sm:$0x3]  ;;  %v13227_v22 = vadd.f32 %v12666_v5, %v2107_v62  ;;  %v969_v4 = vld [vmem:[#allocation2 + $0x141] sm:$0xff]  ;;  %v13238_v62 = vld [vmem:[%s17202_s1 + $0xf] ss:$0 sm:$0xff] }
 0x1bc   : > { %17497 = vst [vmem:[#allocation10_spill] sm:$0xff] %v13216_v1  ;;  %v3183_v15 = vadd.f32 %v3151_v33, %v3082_v13  ;;  %v1319_v34 = vmul.f32 %v13097_v63, %v1266_v0  ;;  %v1468_v8 = vmul.f32 %v13166_v31, %v1415_v29  ;;  %v1172_v58 = vmul.f32 %v13155_v20, %v1119_v38  ;;  %v1117_v49 = vld [vmem:[#allocation2 + $0x13a] sm:$0xff] }
 0x1bd   : > { %17498 = vst [vmem:[#allocation9_spill] sm:$0xff] %v13227_v22  ;;  %v2678_v11 = vadd.f32 %v2646_v36, %v2577_v6  ;;  %v1071_v52 = vadd.f32 %v1023_v44, %v922_v7  ;;  %v1617_v33 = vmul.f32 %v13175_v59, %v1564_v46  ;;  %v1764_v5 = vmul.f32 %v13188_v43, %v1711_v12  ;;  %v13244_v36 = vld [vmem:[%s17202_s1 + $0x10] ss:$0 sm:$0xff] }
 0x1be   : > { %10496 = vmatprep.mubr.f32.mxu1 %v3183_v15  ;;  %v1367_v45 = vadd.f32 %v1319_v34, %v1217_v17  ;;  %v1913_v14 = vmul.f32 %v13238_v62, %v1860_v25  ;;  %v2062_v0 = vmul.f32 %v13244_v36, %v2009_v37  ;;  %v11793_v17 = vld [vmem:[#allocation2 + $0x140] sm:$0xff]  ;;  %v1021_v13 = vmul.f32 %v13146_v50, %v968_v60 }
 0x1bf   : > { %v2779_v2 = vadd.f32 %v2747_v55, %v2678_v11  ;;  %v921_v29 = vmul.f32 %v11793_v17, %v13118_v10  ;;  %v1812_v44 = vadd.f32 %v1764_v5, %v1662_v48  ;;  %v1022_v55 = vmul.f32 %v13146_v50, %v969_v4  ;;  %v1118_v37 = vld [vmem:[#allocation2 + $0x142] sm:$0xff] }
 0x1c0   : > { %v1516_v6 = vadd.f32 %v1468_v8, %v1367_v45  ;;  %v1170_v46 = vmul.f32 %v13155_v20, %v1117_v49  ;;  %v1069_v34 = vadd.f32 %v1021_v13, %v13121_v47  ;;  %v13261_v19 = vadd.f32 %v1172_v58, %v1071_v52 }
 0x1c1   : > { %v13249_v7 = vld [vmem:[#allocation3 + $0x81] sm:$0xff]  ;;  %v2880_v25 = vadd.f32 %v2848_v16, %v2779_v2  ;;  %v1961_v48 = vadd.f32 %v1913_v14, %v1812_v44  ;;  %v1070_v5 = vadd.f32 %v1022_v55, %v921_v29  ;;  %v1318_v1 = vmul.f32 %v11793_v17, %v13097_v63 }
 0x1c2   : > { %v13251_v38 = vld [vmem:[#allocation3 + $0x82] sm:$0xff]  ;;  %v3051_v15 = vmul.f32 %v12818_v3, %v13249_v7  ;;  %v13263_v8 = vadd.f32 %v1617_v33, %v1516_v6  ;;  %v1466_v16 = vmul.f32 %v13166_v31, %v968_v60  ;;  %v1171_v12 = vmul.f32 %v13155_v20, %v1118_v37 }
 0x1c3   : > { %v3152_v11 = vmul.f32 %v12836_v30, %v13251_v38  ;;  %v2982_v45 = vadd.f32 %v2950_v53, %v2880_v25  ;;  %v2110_v2 = vadd.f32 %v2062_v0, %v1961_v48  ;;  %v13268_v22 = vadd.f32 %v1170_v46, %v1069_v34  ;;  %v13277_v53 = vld [vmem:[%s17202_s1 + $0x2c] ss:$0 sm:$0xff]  ;;  %v17502_v48 = vld [vmem:[#allocation15_spill] sm:$0xff] }
 0x1c4   : > { %v1467_v47 = vmul.f32 %v13166_v31, %v969_v4  ;;  %v1366_v52 = vadd.f32 %v1318_v1, %v13182_v57  ;;  %v1514_v58 = vadd.f32 %v1466_v16, %v13103_v42  ;;  %v1615_v33 = vmul.f32 %v13175_v59, %v1117_v49  ;;  %v17506_v16 = vld [vmem:[#allocation25_spill] sm:$0xff] }
 0x1c5   : > { %v3083_v13 = vadd.f32 %v3051_v15, %v2982_v45  ;;  %v13280_v14 = vadd.f32 %v13277_v53, %v2110_v2  ;;  %v1763_v0 = vmul.f32 %v11793_v17, %v13188_v43  ;;  %v1911_v29 = vmul.f32 %v13238_v62, %v968_v60  ;;  %v17500_v60 = vld [vmem:[#allocation14_spill] sm:$0xff] }
 0x1c6   : > { %v1912_v6 = vmul.f32 %v13238_v62, %v969_v4  ;;  %v1515_v57 = vadd.f32 %v1467_v47, %v1366_v52  ;;  %v1616_v42 = vmul.f32 %v13175_v59, %v1118_v37  ;;  %v2060_v1 = vmul.f32 %v13244_v36, %v1117_v49  ;;  %v17504_v49 = vld [vmem:[#allocation21_spill] sm:$0xff]  ;;  %v17508_v52 = vld [vmem:[#allocation28_spill] sm:$0xff] }
 0x1c7   : > { %17499 = vst [vmem:[#allocation11_spill] sm:$0xff] %v13280_v14  ;;  %v3184_v44 = vadd.f32 %v3152_v11, %v3083_v13  ;;  %v1219_v55 = vadd.f32 %v1171_v12, %v1070_v5  ;;  %v1811_v46 = vadd.f32 %v1763_v0, %v13209_v39  ;;  %v1959_v25 = vadd.f32 %v1911_v29, %v13123_v32  ;;  %v17505_v32 = vld [vmem:[#allocation7_spill] sm:$0xff] }
 0x1c8   : > { %v2061_v15 = vmul.f32 %v13244_v36, %v1118_v37  ;;  %v13291_v34 = vadd.f32 %v1615_v33, %v1514_v58  ;;  %v17501_v4 = vmax.f32 %v17500_v60, 0.0  ;;  %v17503_v45 = vmax.f32 %v17502_v48, 0.0 }
 0x1c9   : > { %10497 = vmatmul.mubr.f32.gmra.mrb[6].mxu1 %v3184_v44  ;;  %v1960_v39 = vadd.f32 %v1912_v6, %v1811_v46  ;;  %v2108_v5 = vadd.f32 %v2060_v1, %v1959_v25  ;;  %v2376_v37 = vmul.f32 %v12875_v61, %v17505_v32  ;;  %v2445_v2 = vmul.f32 %v12882_v23, %v17506_v16  ;;  %v971_v32 = vld [vmem:[#allocation2 + $0x151] sm:$0xff] }
 0x1ca   : > { %v13296_v11 = vmul.f32 %v12740_v51, %v17501_v4  ;;  %v13301_v12 = vmul.f32 %v17504_v49, %v17503_v45  ;;  %v1664_v47 = vadd.f32 %v1616_v42, %v1515_v57  ;;  %v17507_v51 = vld [vmem:[#allocation26_spill] sm:$0xff]  ;;  %v2647_v58 = vmul.f32 %v12723_v27, %v17508_v52  ;;  %v11795_v42 = vld [vmem:[#allocation2 + $0x158] sm:$0xff]  ;;  %v17510_v27 = vld [vmem:[#allocation13_spill] sm:$0xff] }
 0x1cb   : > { %v2546_v13 = vmul.f32 %v12789_v54, %v17507_v51  ;;  %v2748_v33 = vmul.f32 %v12712_v26, %v13178_v35  ;;  %v2109_v0 = vadd.f32 %v2061_v15, %v1960_v39  ;;  %v13316_v29 = vadd.f32 %v13277_v53, %v2108_v5 }
 0x1cc   : > { %2298 = vst [vmem:[#allocation3 + $0x90] sm:$0xff] %v13296_v11  ;;  %2299 = vst [vmem:[#allocation3 + $0x98] sm:$0xff] %v13301_v12  ;;  %v2477_v6 = vadd.f32 %v2445_v2, %v2376_v37  ;;  %v2849_v44 = vmul.f32 %v12735_v56, %v13180_v24  ;;  %v2951_v57 = vmul.f32 %v12757_v18, %v13296_v11  ;;  %v17511_v25 = vmax.f32 %v17510_v27, 0.0  ;;  %v13355_v37 = vld [vmem:[%s17202_s1 + $0x15] ss:$0 sm:$0xff] }
 0x1cd   : > { %17509 = vst [vmem:[#allocation12_spill] sm:$0xff] %v13316_v29  ;;  %v1321_v1 = vmul.f32 %v11795_v42, %v13097_v63  ;;  %v1766_v46 = vmul.f32 %v11795_v42, %v13188_v43  ;;  %v13328_v15 = vadd.f32 %v13277_v53, %v2109_v0  ;;  %v2377_v4 = vmul.f32 %v12875_v61, %v13019_v9  ;;  %v13347_v9 = vld [vmem:[%s17202_s1 + $0x14] ss:$0 sm:$0xff]  ;;  %v2012_v29 = vld [vmem:[#allocation2 + $0x162] sm:$0x3] }
 0x1ce   : > { %v2244_v26 = vmul.f32 %v12775_v41, %v17511_v25  ;;  %v2578_v60 = vadd.f32 %v2546_v13, %v2477_v6  ;;  %v2446_v56 = vmul.f32 %v12882_v23, %v13088_v21  ;;  %v13336_v48 = vmul.f32 %v11795_v42, %v13118_v10 }
 0x1cf   : > { %17512 = vst [vmem:[#allocation14_spill] sm:$0xff] %v13328_v15  ;;  %v13338_v45 = vadd.f32 %v1321_v1, %v1219_v55  ;;  %v13340_v49 = vadd.f32 %v1766_v46, %v1664_v47  ;;  %v2547_v5 = vmul.f32 %v12789_v54, %v13100_v28  ;;  %v2648_v21 = vmul.f32 %v13347_v9, %v13113_v40  ;;  %v11798_v54 = vld [vmem:[#allocation2 + $0x150] sm:$0xff] }
 0x1d0   : > { %2300 = vst [vmem:[#allocation3 + $0xa0] sm:$0x3] %v2244_v26  ;;  %v2679_v41 = vadd.f32 %v2647_v58, %v2578_v60  ;;  %v2478_v39 = vadd.f32 %v2446_v56, %v2377_v4  ;;  %v2749_v16 = vmul.f32 %v13355_v37, %v13249_v7  ;;  %v923_v28 = vmul.f32 %v11798_v54, %v13118_v10  ;;  %v1120_v47 = vld [vmem:[#allocation2 + $0x152] sm:$0xff] }
 0x1d1   : > { %v1024_v2 = vmul.f32 %v13146_v50, %v971_v32  ;;  %v1173_v0 = vmul.f32 %v13155_v20, %v1120_v47  ;;  %v1320_v6 = vmul.f32 %v11798_v54, %v13097_v63  ;;  %v13372_v46 = vld [vmem:[%s17202_s1 + $0x16] ss:$0 sm:$0xff]  ;;  %v1469_v25 = vmul.f32 %v13166_v31, %v971_v32 }
 0x1d2   : > { %v2780_v51 = vadd.f32 %v2748_v33, %v2679_v41  ;;  %v2579_v58 = vadd.f32 %v2547_v5, %v2478_v39  ;;  %v2850_v33 = vmul.f32 %v13372_v46, %v13251_v38  ;;  %v1618_v56 = vmul.f32 %v13175_v59, %v1120_v47  ;;  %v13382_v41 = vld [vmem:[%s17202_s1 + $0x17] ss:$0 sm:$0xff] }
 0x1d3   : > { %v13361_v13 = vld [vmem:[#allocation3 + $0x91] sm:$0xff]  ;;  %v1072_v27 = vadd.f32 %v1024_v2, %v923_v28  ;;  %v1368_v4 = vadd.f32 %v1320_v6, %v13268_v22  ;;  %v2952_v39 = vmul.f32 %v13382_v41, %v13301_v12  ;;  %v1765_v17 = vmul.f32 %v11798_v54, %v13188_v43 }
 0x1d4   : > { %v3052_v42 = vmul.f32 %v12818_v3, %v13361_v13  ;;  %v13367_v1 = vld [vmem:[#allocation3 + $0x92] sm:$0xff]  ;;  %v2881_v26 = vadd.f32 %v2849_v44, %v2780_v51  ;;  %v2680_v60 = vadd.f32 %v2648_v21, %v2579_v58  ;;  %v1914_v28 = vmul.f32 %v13238_v62, %v971_v32 }
 0x1d5   : > { %v1221_v5 = vadd.f32 %v1173_v0, %v1072_v27  ;;  %v3153_v44 = vmul.f32 %v12836_v30, %v13367_v1  ;;  %v1517_v51 = vadd.f32 %v1469_v25, %v1368_v4  ;;  %v1813_v6 = vadd.f32 %v1765_v17, %v13291_v34  ;;  %v11801_v0 = vld [vmem:[#allocation2 + $0x168] sm:$0xff]  ;;  %v17514_v17 = vld [vmem:[#allocation16_spill] sm:$0xff] }
 0x1d6   : > { %v2983_v2 = vadd.f32 %v2951_v57, %v2881_v26  ;;  %v2781_v22 = vadd.f32 %v2749_v16, %v2680_v60  ;;  %v2063_v55 = vmul.f32 %v13244_v36, %v1120_v47  ;;  %v1323_v54 = vmul.f32 %v11801_v0, %v13097_v63 }
 0x1d7   : > { %v13390_v21 = vld [vmem:[#allocation3 + $0x99] sm:$0xff]  ;;  %v1666_v26 = vadd.f32 %v1618_v56, %v1517_v51  ;;  %v1768_v16 = vmul.f32 %v11801_v0, %v13188_v43  ;;  %v1962_v60 = vadd.f32 %v1914_v28, %v1813_v6  ;;  %v17515_v34 = vmax.f32 %v17514_v17, 0.0  ;;  %v1418_v17 = vld [vmem:[#allocation2 + $0x161] sm:$0x3] }
 0x1d8   : > { %v3053_v58 = vmul.f32 %v12818_v3, %v13390_v21  ;;  %v3084_v27 = vadd.f32 %v3052_v42, %v2983_v2  ;;  %v2882_v32 = vadd.f32 %v2850_v33, %v2781_v22  ;;  %v13397_v57 = vld [vmem:[#allocation3 + $0x9a] sm:$0xff]  ;;  %v13400_v18 = vadd.f32 %v1323_v54, %v1221_v5  ;;  %v13405_v3 = vld [vmem:[%s17202_s1 + $0x59] sm:$0xff]  ;;  %v13415_v42 = vld [vmem:[%s17202_s1 + $0x61] sm:$0xff] }
 0x1d9   : > { %17513 = vst [vmem:[#allocation15_spill] sm:$0xff] %v13397_v57  ;;  %v13410_v47 = vmul.f32 %v13405_v3, %v17515_v34  ;;  %v17516_v33 = vld [vmem:[#allocation17_spill] sm:$0xff]  ;;  %v13423_v28 = vmul.f32 %v11801_v0, %v13118_v10  ;;  %v13425_v2 = vadd.f32 %v1768_v16, %v1666_v26  ;;  %v872_v22 = vld [vmem:[#allocation2 + $0x160] sm:$0x3]  ;;  %v3154_v51 = vmul.f32 %v12836_v30, %v13397_v57 }
 0x1da   : > { %v17517_v25 = vmax.f32 %v17516_v33, 0.0  ;;  %v3185_v56 = vadd.f32 %v3153_v44, %v3084_v27  ;;  %v2984_v5 = vadd.f32 %v2952_v39, %v2882_v32  ;;  %v2111_v6 = vadd.f32 %v2063_v55, %v1962_v60  ;;  %v973_v44 = vld [vmem:[#allocation2 + $0x161] sm:$0x3]  ;;  %v13438_v27 = vld [vmem:[%s17202_s1 + $0x13] ss:$0 sm:$0xff] }
 0x1db   : > { %2301 = vst [vmem:[#allocation3 + $0xa8] sm:$0xff] %v13410_v47  ;;  %v2378_v54 = vmul.f32 %v12875_v61, %v17508_v52  ;;  %v2447_v39 = vmul.f32 %v12882_v23, %v13178_v35  ;;  %v2548_v30 = vmul.f32 %v13438_v27, %v13180_v24  ;;  %v2649_v55 = vmul.f32 %v13347_v9, %v13296_v11  ;;  %v972_v52 = vld [vmem:[#allocation2 + $0x159] sm:$0xff]  ;;  %v1122_v32 = vld [vmem:[#allocation2 + $0x162] sm:$0x3] }
 0x1dc   : > { %v13420_v4 = vmul.f32 %v13415_v42, %v17517_v25  ;;  %10499 = vmatprep.mubr.f32.mxu1 %v3185_v56  ;;  %v3085_v0 = vadd.f32 %v3053_v58, %v2984_v5  ;;  %v2750_v61 = vmul.f32 %v13355_v37, %v13361_v13  ;;  %v1269_v23 = vld [vmem:[#allocation2 + $0x160] sm:$0x3]  ;;  %v13447_v35 = vadd.f32 %v13277_v53, %v2111_v6 }
 0x1dd   : > { %v2479_v58 = vadd.f32 %v2447_v39, %v2378_v54  ;;  %v925_v26 = vmul.f32 %v13118_v10, %v872_v22  ;;  %v1025_v16 = vmul.f32 %v13146_v50, %v972_v52  ;;  %v1121_v60 = vld [vmem:[#allocation2 + $0x15a] sm:$0xff]  ;;  %v2851_v34 = vmul.f32 %v13372_v46, %v13367_v1  ;;  %v1567_v22 = vld [vmem:[#allocation2 + $0x162] sm:$0x3] }
 0x1de   : > { %17518 = vst [vmem:[#allocation21_spill] sm:$0xff] %v13420_v4  ;;  %2302 = vst [vmem:[#allocation3 + $0xb0] sm:$0xff] %v13420_v4  ;;  %v3186_v24 = vadd.f32 %v3154_v51, %v3085_v0  ;;  %v1026_v33 = vmul.f32 %v13146_v50, %v973_v44  ;;  %v1174_v25 = vmul.f32 %v13155_v20, %v1121_v60  ;;  %v1714_v39 = vld [vmem:[#allocation2 + $0x160] sm:$0x3] }
 0x1df   : > { %17519 = vst [vmem:[#allocation7_spill] sm:$0xff] %v13447_v35  ;;  %v2580_v56 = vadd.f32 %v2548_v30, %v2479_v58  ;;  %v1073_v5 = vadd.f32 %v1025_v16, %v13336_v48  ;;  %v1175_v6 = vmul.f32 %v13155_v20, %v1122_v32  ;;  %v1322_v54 = vmul.f32 %v13097_v63, %v1269_v23  ;;  %v1863_v58 = vld [vmem:[#allocation2 + $0x161] sm:$0x3] }
 0x1e0   : > { %10500 = vmatmul.mubr.f32.gmra.mrb[8].mxu1 %v3186_v24  ;;  %v2953_v51 = vmul.f32 %v13382_v41, %v13410_v47  ;;  %v1074_v0 = vadd.f32 %v1026_v33, %v925_v26  ;;  %v1470_v14 = vmul.f32 %v13166_v31, %v972_v52  ;;  %v1471_v44 = vmul.f32 %v13166_v31, %v1418_v17 }
 0x1e1   : > { %v2681_v30 = vadd.f32 %v2649_v55, %v2580_v56  ;;  %v1370_v48 = vadd.f32 %v1322_v54, %v13261_v19  ;;  %v1619_v32 = vmul.f32 %v13175_v59, %v1121_v60  ;;  %v13469_v24 = vadd.f32 %v1174_v25, %v1073_v5  ;;  %v13478_v54 = vld [vmem:[%s17202_s1 + $0x18] ss:$0 sm:$0xff] }
 0x1e2   : > { %v1620_v26 = vmul.f32 %v13175_v59, %v1567_v22  ;;  %v1767_v33 = vmul.f32 %v13188_v43, %v1714_v39  ;;  %v1915_v17 = vmul.f32 %v13238_v62, %v972_v52  ;;  %v1223_v55 = vadd.f32 %v1175_v6, %v1074_v0 }
 0x1e3   : > { %v2782_v15 = vadd.f32 %v2750_v61, %v2681_v30  ;;  %v1518_v19 = vadd.f32 %v1470_v14, %v13338_v45  ;;  %v1519_v56 = vadd.f32 %v1471_v44, %v1370_v48  ;;  %v1916_v22 = vmul.f32 %v13238_v62, %v1863_v58  ;;  %v13488_v14 = vld [vmem:[%s17202_s1 + $0x19] ss:$0 sm:$0xff]  ;;  %v13505_v44 = vld [vmem:[%s17202_s1 + $0x11] ss:$0 sm:$0xff] }
 0x1e4   : > { %v1815_v5 = vadd.f32 %v1767_v33, %v13263_v8  ;;  %v1963_v52 = vadd.f32 %v1915_v17, %v13340_v49  ;;  %v2064_v61 = vmul.f32 %v13244_v36, %v1121_v60  ;;  %v2065_v6 = vmul.f32 %v13244_v36, %v2012_v29  ;;  %v13497_v8 = vld [vmem:[%s17202_s1 + $0x69] sm:$0x3]  ;;  %v17523_v49 = vld [vmem:[#allocation18_spill] sm:$0xff]  ;;  %v875_v48 = vld [vmem:[#allocation2 + $0x178] sm:$0x3] }
 0x1e5   : > { %v13465_v23 = vld [vmem:[#allocation3 + $0xa9] sm:$0xff]  ;;  %v2883_v39 = vadd.f32 %v2851_v34, %v2782_v15  ;;  %17522 = vst [vmem:[#allocation28_spill] sm:$0xff] %v13497_v8  ;;  %v17524_v15 = vmax.f32 %v17523_v49, 0.0  ;;  %v2379_v60 = vmul.f32 %v13505_v44, %v13113_v40  ;;  %v13512_v29 = vld [vmem:[%s17202_s1 + $0x12] ss:$0 sm:$0xff]  ;;  %v13516_v33 = vadd.f32 %v1619_v32, %v1518_v19 }
 0x1e6   : > { %17520 = vst [vmem:[#allocation25_spill] sm:$0xff] %v13465_v23  ;;  %v13467_v16 = vld [vmem:[#allocation3 + $0xaa] sm:$0xff]  ;;  %v3054_v25 = vmul.f32 %v13478_v54, %v13465_v23  ;;  %v1964_v0 = vadd.f32 %v1916_v22, %v1815_v5  ;;  %v2448_v30 = vmul.f32 %v13512_v29, %v13249_v7  ;;  %v1668_v17 = vadd.f32 %v1620_v26, %v1519_v56 }
 0x1e7   : > { %17521 = vst [vmem:[#allocation26_spill] sm:$0xff] %v13467_v16  ;;  %v3155_v45 = vmul.f32 %v13488_v14, %v13467_v16  ;;  %v2247_v34 = vmul.f32 %v13497_v8, %v17524_v15  ;;  %v2985_v58 = vadd.f32 %v2953_v51, %v2883_v39  ;;  %v2112_v5 = vadd.f32 %v2064_v61, %v1963_v52  ;;  %v976_v22 = vld [vmem:[#allocation2 + $0x179] sm:$0x3] }
 0x1e8   : > { %v2113_v49 = vadd.f32 %v2065_v6, %v1964_v0  ;;  %v2480_v15 = vadd.f32 %v2448_v30, %v2379_v60  ;;  %v2549_v40 = vmul.f32 %v13438_v27, %v13251_v38  ;;  %v2650_v35 = vmul.f32 %v13347_v9, %v13301_v12  ;;  %v1272_v16 = vld [vmem:[#allocation2 + $0x178] sm:$0x3]  ;;  %v1125_v26 = vld [vmem:[#allocation2 + $0x17a] sm:$0x3] }
 0x1e9   : > { %2303 = vst [vmem:[#allocation3 + $0xb8] sm:$0x3] %v2247_v34  ;;  %v1421_v8 = vld [vmem:[#allocation2 + $0x179] sm:$0x3]  ;;  %v3086_v23 = vadd.f32 %v3054_v25, %v2985_v58  ;;  %v13523_v7 = vadd.f32 %v13277_v53, %v2112_v5  ;;  %v2751_v51 = vmul.f32 %v13355_v37, %v13390_v21  ;;  %v928_v32 = vmul.f32 %v13118_v10, %v875_v48  ;;  %v975_v48 = vld [vmem:[#allocation2 + $0x171] sm:$0xff] }
 0x1ea   : > { %v2581_v19 = vadd.f32 %v2549_v40, %v2480_v15  ;;  %v2852_v56 = vmul.f32 %v13372_v46, %v13397_v57  ;;  %v2954_v38 = vmul.f32 %v13382_v41, %v13420_v4  ;;  %v1029_v52 = vmul.f32 %v13146_v50, %v976_v22  ;;  %v1570_v39 = vld [vmem:[#allocation2 + $0x17a] sm:$0x3]  ;;  %v1717_v25 = vld [vmem:[#allocation2 + $0x178] sm:$0x3] }
 0x1eb   : > { %v1866_v61 = vld [vmem:[#allocation2 + $0x179] sm:$0x3]  ;;  %v3187_v6 = vadd.f32 %v3155_v45, %v3086_v23  ;;  %v13534_v0 = vadd.f32 %v13277_v53, %v2113_v49  ;;  %v1325_v34 = vmul.f32 %v13097_v63, %v1272_v16  ;;  %v1474_v60 = vmul.f32 %v13166_v31, %v1421_v8  ;;  %v974_v49 = vld [vmem:[#allocation2 + $0x169] sm:$0xff] }
 0x1ec   : > { %v2015_v30 = vld [vmem:[#allocation2 + $0x17a] sm:$0x3]  ;;  %v2682_v58 = vadd.f32 %v2650_v35, %v2581_v19  ;;  %v1077_v5 = vadd.f32 %v1029_v52, %v928_v32  ;;  %v1178_v15 = vmul.f32 %v13155_v20, %v1125_v26  ;;  %v1623_v40 = vmul.f32 %v13175_v59, %v1570_v39  ;;  %v11810_v8 = vld [vmem:[#allocation2 + $0x170] sm:$0xff] }
 0x1ed   : > { %17525 = vst [vmem:[#allocation13_spill] sm:$0xff] %v13534_v0  ;;  %10502 = vmatprep.mubr.f32.mxu1 %v3187_v6  ;;  %v1373_v22 = vadd.f32 %v1325_v34, %v1223_v55  ;;  %v1770_v23 = vmul.f32 %v13188_v43, %v1717_v25  ;;  %v1919_v45 = vmul.f32 %v13238_v62, %v1866_v61  ;;  %v1123_v32 = vld [vmem:[#allocation2 + $0x16a] sm:$0xff] }
 0x1ee   : > { %v2783_v4 = vadd.f32 %v2751_v51, %v2682_v58  ;;  %v2068_v16 = vmul.f32 %v13244_v36, %v2015_v30  ;;  %v927_v57 = vmul.f32 %v11810_v8, %v13118_v10  ;;  %v1027_v35 = vmul.f32 %v13146_v50, %v974_v49 }
 0x1ef   : > { %v1522_v19 = vadd.f32 %v1474_v60, %v1373_v22  ;;  %v1818_v52 = vadd.f32 %v1770_v23, %v1668_v17  ;;  %v1028_v39 = vmul.f32 %v13146_v50, %v975_v48  ;;  %v1176_v25 = vmul.f32 %v13155_v20, %v1123_v32  ;;  %v1124_v22 = vld [vmem:[#allocation2 + $0x172] sm:$0xff] }
 0x1f0   : > { %v13546_v26 = vld [vmem:[#allocation3 + $0xb1] sm:$0xff]  ;;  %v2884_v61 = vadd.f32 %v2852_v56, %v2783_v4  ;;  %v1075_v6 = vadd.f32 %v1027_v35, %v13423_v28  ;;  %v13558_v30 = vadd.f32 %v1178_v15, %v1077_v5  ;;  %v1324_v23 = vmul.f32 %v11810_v8, %v13097_v63 }
 0x1f1   : > { %v13548_v55 = vld [vmem:[#allocation3 + $0xb2] sm:$0xff]  ;;  %v3055_v10 = vmul.f32 %v13478_v54, %v13546_v26  ;;  %v13560_v58 = vadd.f32 %v1623_v40, %v1522_v19  ;;  %v1967_v17 = vadd.f32 %v1919_v45, %v1818_v52  ;;  %v1076_v50 = vadd.f32 %v1028_v39, %v927_v57 }
 0x1f2   : > { %v3156_v34 = vmul.f32 %v13488_v14, %v13548_v55  ;;  %v2986_v60 = vadd.f32 %v2954_v38, %v2884_v61  ;;  %v1472_v4 = vmul.f32 %v13166_v31, %v974_v49  ;;  %v1177_v51 = vmul.f32 %v13155_v20, %v1124_v22 }
 0x1f3   : > { %v2116_v56 = vadd.f32 %v2068_v16, %v1967_v17  ;;  %v13565_v0 = vadd.f32 %v1176_v25, %v1075_v6  ;;  %v1473_v28 = vmul.f32 %v13166_v31, %v975_v48  ;;  %v1372_v5 = vadd.f32 %v1324_v23, %v13469_v24 }
 0x1f4   : > { %v3087_v35 = vadd.f32 %v3055_v10, %v2986_v60  ;;  %v1520_v15 = vadd.f32 %v1472_v4, %v13400_v18  ;;  %v1621_v38 = vmul.f32 %v13175_v59, %v1123_v32  ;;  %v1769_v40 = vmul.f32 %v11810_v8, %v13188_v43  ;;  %v17531_v4 = vld [vmem:[#allocation25_spill] sm:$0xff] }
 0x1f5   : > { %v13572_v57 = vadd.f32 %v13277_v53, %v2116_v56  ;;  %v1917_v45 = vmul.f32 %v13238_v62, %v974_v49  ;;  %v1918_v20 = vmul.f32 %v13238_v62, %v975_v48  ;;  %v1521_v19 = vadd.f32 %v1473_v28, %v1372_v5  ;;  %v17527_v49 = vld [vmem:[#allocation23_spill] sm:$0xff] }
 0x1f6   : > { %v3188_v16 = vadd.f32 %v3156_v34, %v3087_v35  ;;  %v1622_v52 = vmul.f32 %v13175_v59, %v1124_v22  ;;  %v2066_v39 = vmul.f32 %v13244_v36, %v1123_v32  ;;  %v1225_v24 = vadd.f32 %v1177_v51, %v1076_v50  ;;  %v17529_v34 = vld [vmem:[#allocation24_spill] sm:$0xff] }
 0x1f7   : > { %17526 = vst [vmem:[#allocation16_spill] sm:$0xff] %v13572_v57  ;;  %v1817_v18 = vadd.f32 %v1769_v40, %v13516_v33  ;;  %v1965_v25 = vadd.f32 %v1917_v45, %v13425_v2  ;;  %v2067_v61 = vmul.f32 %v13244_v36, %v1124_v22  ;;  %v1669_v10 = vadd.f32 %v1621_v38, %v1520_v15  ;;  %v17533_v38 = vld [vmem:[#allocation19_spill] sm:$0xff]  ;;  %v17535_v45 = vld [vmem:[#allocation28_spill] sm:$0xff] }
 0x1f8   : > { %10503 = vmatmul.mubr.f32.gmra.mrb[10].mxu1 %v3188_v16  ;;  %v17528_v6 = vmax.f32 %v17527_v49, 0.0  ;;  %v17530_v17 = vmax.f32 %v17529_v34, 0.0  ;;  %v2380_v2 = vmul.f32 %v13505_v44, %v13296_v11  ;;  %v2449_v60 = vmul.f32 %v13512_v29, %v13361_v13  ;;  %v11811_v13 = vld [vmem:[#allocation2 + $0x188] sm:$0xff]  ;;  %v17537_v34 = vld [vmem:[#allocation15_spill] sm:$0xff] }
 0x1f9   : > { %v1966_v51 = vadd.f32 %v1918_v20, %v1817_v18  ;;  %v2114_v33 = vadd.f32 %v2066_v39, %v1965_v25  ;;  %v1670_v50 = vadd.f32 %v1622_v52, %v1521_v19  ;;  %v2550_v22 = vmul.f32 %v13438_v27, %v13367_v1  ;;  %v17536_v52 = vld [vmem:[#allocation26_spill] sm:$0xff] }
 0x1fa   : > { %v13586_v48 = vmul.f32 %v13405_v3, %v17528_v6  ;;  %v13591_v32 = vmul.f32 %v13415_v42, %v17530_v17  ;;  %v2651_v23 = vmul.f32 %v13347_v9, %v13410_v47  ;;  %v2752_v56 = vmul.f32 %v13355_v37, %v17531_v4 }
 0x1fb   : > { %v2115_v28 = vadd.f32 %v2067_v61, %v1966_v51  ;;  %v13606_v11 = vadd.f32 %v13277_v53, %v2114_v33  ;;  %v2481_v35 = vadd.f32 %v2449_v60, %v2380_v2  ;;  %v1327_v5 = vmul.f32 %v11811_v13, %v13097_v63  ;;  %v1422_v61 = vld [vmem:[#allocation2 + $0x181] sm:$0xff] }
 0x1fc   : > { %2304 = vst [vmem:[#allocation3 + $0xc0] sm:$0xff] %v13586_v48  ;;  %2305 = vst [vmem:[#allocation3 + $0xc8] sm:$0xff] %v13591_v32  ;;  %v1772_v15 = vmul.f32 %v11811_v13, %v13188_v43  ;;  %v17534_v40 = vmax.f32 %v17533_v38, 0.0  ;;  %v2381_v20 = vmul.f32 %v13505_v44, %v13301_v12  ;;  %v2450_v16 = vmul.f32 %v13512_v29, %v13390_v21  ;;  %v17538_v33 = vld [vmem:[#allocation21_spill] sm:$0xff] }
 0x1fd   : > { %17532 = vst [vmem:[#allocation17_spill] sm:$0xff] %v13606_v11  ;;  %v2582_v19 = vadd.f32 %v2550_v22, %v2481_v35  ;;  %v2853_v39 = vmul.f32 %v13372_v46, %v17536_v52  ;;  %v2955_v18 = vmul.f32 %v13382_v41, %v13586_v48  ;;  %v13621_v25 = vadd.f32 %v1327_v5, %v1225_v24  ;;  %v1571_v60 = vld [vmem:[#allocation2 + $0x182] sm:$0xff] }
 0x1fe   : > { %v2250_v1 = vmul.f32 %v17535_v45, %v17534_v40  ;;  %v13624_v49 = vadd.f32 %v13277_v53, %v2115_v28  ;;  %v13626_v6 = vadd.f32 %v1772_v15, %v1670_v50  ;;  %v2482_v12 = vadd.f32 %v2450_v16, %v2381_v20  ;;  %v11812_v28 = vld [vmem:[#allocation2 + $0x180] sm:$0xff] }
 0x1ff   : > { %v2551_v21 = vmul.f32 %v13438_v27, %v17537_v34  ;;  %v2683_v51 = vadd.f32 %v2651_v23, %v2582_v19  ;;  %v2652_v2 = vmul.f32 %v13347_v9, %v17538_v33  ;;  %v2753_v24 = vmul.f32 %v13355_v37, %v13546_v26 }
 0x200   : > { %2306 = vst [vmem:[#allocation3 + $0xd0] sm:$0x3] %v2250_v1  ;;  %v2854_v50 = vmul.f32 %v13372_v46, %v13548_v55  ;;  %v1326_v35 = vmul.f32 %v11812_v28, %v13097_v63  ;;  %v1475_v13 = vmul.f32 %v13166_v31, %v1422_v61  ;;  %v2956_v23 = vmul.f32 %v13382_v41, %v13591_v32 }
 0x201   : > { %v2583_v22 = vadd.f32 %v2551_v21, %v2482_v12  ;;  %v2784_v5 = vadd.f32 %v2752_v56, %v2683_v51  ;;  %v1771_v38 = vmul.f32 %v11812_v28, %v13188_v43  ;;  %v1920_v40 = vmul.f32 %v13238_v62, %v1422_v61  ;;  %v11813_v51 = vld [vmem:[#allocation2 + $0x198] sm:$0xff]  ;;  %v17539_v61 = vld [vmem:[#allocation29_spill] sm:$0xff] }
 0x202   : > { %v1374_v16 = vadd.f32 %v1326_v35, %v13565_v0  ;;  %v1624_v19 = vmul.f32 %v13175_v59, %v1571_v60  ;;  %v2069_v21 = vmul.f32 %v13244_v36, %v1571_v60  ;;  %v1774_v8 = vmul.f32 %v11813_v51, %v13188_v43 }
 0x203   : > { %v13639_v15 = vld [vmem:[#allocation3 + $0xc1] sm:$0xff]  ;;  %v2684_v20 = vadd.f32 %v2652_v2, %v2583_v22  ;;  %v2885_v12 = vadd.f32 %v2853_v39, %v2784_v5  ;;  %v1819_v56 = vadd.f32 %v1771_v38, %v1669_v10  ;;  %v17540_v57 = vmax.f32 %v17539_v61, 0.0 }
 0x204   : > { %v3056_v1 = vmul.f32 %v13478_v54, %v13639_v15  ;;  %v13649_v34 = vld [vmem:[#allocation3 + $0xc2] sm:$0xff]  ;;  %v1523_v17 = vadd.f32 %v1475_v13, %v1374_v16  ;;  %v2382_v60 = vmul.f32 %v13505_v44, %v13410_v47  ;;  %v1275_v16 = vld [vmem:[#allocation2 + $0x190] sm:$0x3]  ;;  %v2754_v61 = vmul.f32 %v13355_v37, %v13639_v15 }
 0x205   : > { %v2785_v28 = vadd.f32 %v2753_v24, %v2684_v20  ;;  %v13656_v11 = vmul.f32 %v13405_v3, %v17540_v57  ;;  %v17541_v2 = vld [vmem:[#allocation22_spill] sm:$0xff]  ;;  %v2987_v39 = vadd.f32 %v2955_v18, %v2885_v12  ;;  %v1968_v10 = vadd.f32 %v1920_v40, %v1819_v56 }
 0x206   : > { %v17542_v0 = vmax.f32 %v17541_v2, 0.0  ;;  %v2451_v24 = vmul.f32 %v13512_v29, %v17531_v4  ;;  %v3157_v13 = vmul.f32 %v13488_v14, %v13649_v34  ;;  %v1672_v38 = vadd.f32 %v1624_v19, %v1523_v17  ;;  %v1423_v12 = vld [vmem:[#allocation2 + $0x189] sm:$0xff]  ;;  %v1424_v19 = vld [vmem:[#allocation2 + $0x191] sm:$0x3] }
 0x207   : > { %v13663_v35 = vld [vmem:[#allocation3 + $0xc9] sm:$0xff]  ;;  %v2886_v57 = vadd.f32 %v2854_v50, %v2785_v28  ;;  %2307 = vst [vmem:[#allocation3 + $0xd8] sm:$0xff] %v13656_v11  ;;  %v3088_v18 = vadd.f32 %v3056_v1, %v2987_v39  ;;  %v2117_v20 = vadd.f32 %v2069_v21, %v1968_v10  ;;  %v2552_v4 = vmul.f32 %v13438_v27, %v17536_v52  ;;  %v1572_v52 = vld [vmem:[#allocation2 + $0x18a] sm:$0xff] }
 0x208   : > { %v13661_v22 = vmul.f32 %v13415_v42, %v17542_v0  ;;  %v3057_v5 = vmul.f32 %v13478_v54, %v13663_v35  ;;  %v13675_v40 = vld [vmem:[#allocation3 + $0xca] sm:$0xff]  ;;  %v2483_v47 = vadd.f32 %v2451_v24, %v2382_v60  ;;  %v2216_v50 = vmax.f32 %v13624_v49, 0.0  ;;  %v1720_v39 = vld [vmem:[#allocation2 + $0x190] sm:$0x3] }
 0x209   : > { %v2988_v56 = vadd.f32 %v2956_v23, %v2886_v57  ;;  %v13680_v51 = vadd.f32 %v1774_v8, %v1672_v38  ;;  %v2653_v17 = vmul.f32 %v13347_v9, %v13586_v48  ;;  %v3189_v28 = vadd.f32 %v3157_v13, %v3088_v18  ;;  %v1869_v10 = vld [vmem:[#allocation2 + $0x191] sm:$0x3] }
 0x20a   : > { %2308 = vst [vmem:[#allocation3 + $0xe0] sm:$0xff] %v13661_v22  ;;  %v13685_v1 = vadd.f32 %v13277_v53, %v2117_v20  ;;  %v2584_v21 = vadd.f32 %v2552_v4, %v2483_v47  ;;  %v3158_v0 = vmul.f32 %v13488_v14, %v13675_v40  ;;  %v1328_v8 = vmul.f32 %v13097_v63, %v1275_v16 }
 0x20b   : > { %v3089_v2 = vadd.f32 %v3057_v5, %v2988_v56  ;;  %v1476_v23 = vmul.f32 %v13166_v31, %v1423_v12  ;;  %10505 = vmatprep.mubr.f32.mxu1 %v3189_v28  ;;  %v2855_v24 = vmul.f32 %v13372_v46, %v13649_v34  ;;  %v2957_v13 = vmul.f32 %v13382_v41, %v13656_v11  ;;  %v1573_v5 = vld [vmem:[#allocation2 + $0x192] sm:$0x3] }
 0x20c   : > { %v2685_v60 = vadd.f32 %v2653_v17, %v2584_v21  ;;  %v1477_v57 = vmul.f32 %v13166_v31, %v1424_v19  ;;  %v1376_v63 = vadd.f32 %v1328_v8, %v13558_v30  ;;  %v1625_v20 = vmul.f32 %v13175_v59, %v1572_v52  ;;  %v2018_v31 = vld [vmem:[#allocation2 + $0x192] sm:$0x3] }
 0x20d   : > { %v3190_v38 = vadd.f32 %v3158_v0, %v3089_v2  ;;  %v1773_v56 = vmul.f32 %v13188_v43, %v1720_v39  ;;  %v1921_v17 = vmul.f32 %v13238_v62, %v1423_v12  ;;  %v1922_v28 = vmul.f32 %v13238_v62, %v1869_v10 }
 0x20e   : > { %v2786_v47 = vadd.f32 %v2754_v61, %v2685_v60  ;;  %v1524_v30 = vadd.f32 %v1476_v23, %v13621_v25  ;;  %v1525_v21 = vadd.f32 %v1477_v57, %v1376_v63  ;;  %v1626_v61 = vmul.f32 %v13175_v59, %v1573_v5  ;;  %v17543_v60 = vld [vmem:[#allocation27_spill] sm:$0xff] }
 0x20f   : > { %10506 = vmatmul.mubr.f32.gmra.mrb[12].mxu1 %v3190_v38  ;;  %v1821_v0 = vadd.f32 %v1773_v56, %v13560_v58  ;;  %v1969_v8 = vadd.f32 %v1921_v17, %v13626_v6  ;;  %v2070_v39 = vmul.f32 %v13244_v36, %v1572_v52  ;;  %v2071_v10 = vmul.f32 %v13244_v36, %v2018_v31  ;;  %v1723_v6 = vld [vmem:[#allocation2 + $0x1a8] sm:$0x3]  ;;  %v2021_v56 = vld [vmem:[#allocation2 + $0x1aa] sm:$0x3]  ;;  %v1870_v31 = vld [vmem:[#allocation2 + $0x199] sm:$0xff] }
 0x210   : > { %v2887_v2 = vadd.f32 %v2855_v24, %v2786_v47  ;;  %v17544_v38 = vmax.f32 %v17543_v60, 0.0  ;;  %v2383_v25 = vmul.f32 %v13505_v44, %v17538_v33  ;;  %v2452_v58 = vmul.f32 %v13512_v29, %v13546_v26  ;;  %v1872_v52 = vld [vmem:[#allocation2 + $0x1a9] sm:$0x3]  ;;  %v1871_v26 = vld [vmem:[#allocation2 + $0x1a1] sm:$0xff] }
 0x211   : > { %v13701_v4 = vld [vmem:[#allocation3 + $0xd9] sm:$0xff]  ;;  %v1970_v23 = vadd.f32 %v1922_v28, %v1821_v0  ;;  %v2118_v24 = vadd.f32 %v2070_v39, %v1969_v8  ;;  %v1673_v57 = vadd.f32 %v1625_v20, %v1524_v30  ;;  %v1674_v5 = vadd.f32 %v1626_v61, %v1525_v21  ;;  %v2019_v30 = vld [vmem:[#allocation2 + $0x19a] sm:$0xff] }
 0x212   : > { %v13703_v16 = vld [vmem:[#allocation3 + $0xda] sm:$0xff]  ;;  %v3058_v19 = vmul.f32 %v13478_v54, %v13701_v4  ;;  %v2253_v18 = vmul.f32 %v17535_v45, %v17544_v38  ;;  %v2989_v59 = vadd.f32 %v2957_v13, %v2887_v2  ;;  %v2553_v63 = vmul.f32 %v13438_v27, %v13548_v55  ;;  %v2020_v21 = vld [vmem:[#allocation2 + $0x1a2] sm:$0xff] }
 0x213   : > { %v3159_v12 = vmul.f32 %v13488_v14, %v13703_v16  ;;  %v2654_v47 = vmul.f32 %v13347_v9, %v13591_v32  ;;  %v2119_v33 = vadd.f32 %v2071_v10, %v1970_v23  ;;  %v2484_v13 = vadd.f32 %v2452_v58, %v2383_v25  ;;  %v11814_v10 = vld [vmem:[#allocation2 + $0x1a0] sm:$0xff] }
 0x214   : > { %2309 = vst [vmem:[#allocation3 + $0xe8] sm:$0x3] %v2253_v18  ;;  %v3090_v17 = vadd.f32 %v3058_v19, %v2989_v59  ;;  %v2755_v28 = vmul.f32 %v13355_v37, %v13663_v35  ;;  %v13732_v2 = vadd.f32 %v13277_v53, %v2118_v24  ;;  %v2856_v18 = vmul.f32 %v13372_v46, %v13675_v40 }
 0x215   : > { %v1776_v55 = vmul.f32 %v13188_v43, %v1723_v6  ;;  %v1925_v20 = vmul.f32 %v13238_v62, %v1872_v52  ;;  %v2585_v61 = vadd.f32 %v2553_v63, %v2484_v13  ;;  %v2958_v0 = vmul.f32 %v13382_v41, %v13661_v22 }
 0x216   : > { %v3191_v19 = vadd.f32 %v3159_v12, %v3090_v17  ;;  %v2074_v8 = vmul.f32 %v13244_v36, %v2021_v56  ;;  %v1775_v60 = vmul.f32 %v11814_v10, %v13188_v43  ;;  %v1923_v38 = vmul.f32 %v13238_v62, %v1870_v31  ;;  %v17547_v17 = vld [vmem:[#allocation20_spill] sm:$0xff] }
 0x217   : > { %v1824_v39 = vadd.f32 %v1776_v55, %v1674_v5  ;;  %v1924_v25 = vmul.f32 %v13238_v62, %v1871_v26  ;;  %v13745_v59 = vadd.f32 %v13277_v53, %v2119_v33  ;;  %v2686_v23 = vadd.f32 %v2654_v47, %v2585_v61  ;;  %v17545_v5 = vld [vmem:[#allocation8_spill] sm:$0xff] }
 0x218   : > { %10508 = vmatprep.mubr.f32.mxu1 %v3191_v19  ;;  %v2072_v12 = vmul.f32 %v13244_v36, %v2019_v30  ;;  %v2073_v24 = vmul.f32 %v13244_v36, %v2020_v21  ;;  %v1823_v6 = vadd.f32 %v1775_v60, %v1673_v57  ;;  %v1971_v52 = vadd.f32 %v1923_v38, %v13680_v51 }
 0x219   : > { %v1973_v58 = vadd.f32 %v1925_v20, %v1824_v39  ;;  %v17546_v63 = vmax.f32 %v17545_v5, 0.0  ;;  %v2787_v56 = vadd.f32 %v2755_v28, %v2686_v23  ;;  %v17548_v33 = vmax.f32 %v17547_v17, 0.0 }
 0x21a   : > { %v2384_v36 = vmul.f32 %v13505_v44, %v13586_v48  ;;  %v2453_v57 = vmul.f32 %v13512_v29, %v13639_v15  ;;  %v2219_v51 = vmax.f32 %v13732_v2, 0.0  ;;  %v1972_v28 = vadd.f32 %v1924_v25, %v1823_v6  ;;  %v17549_v25 = vld [vmem:[#allocation30_spill] sm:$0xff] }
 0x21b   : > { %v13753_v43 = vmul.f32 %v13405_v3, %v17546_v63  ;;  %v13755_v62 = vld [vmem:[#allocation3 + $0xe1] sm:$0xff]  ;;  %v13760_v47 = vmul.f32 %v13415_v42, %v17548_v33  ;;  %v2122_v31 = vadd.f32 %v2074_v8, %v1973_v58  ;;  %v2888_v26 = vadd.f32 %v2856_v18, %v2787_v56 }
 0x21c   : > { %v3059_v13 = vmul.f32 %v13478_v54, %v13755_v62  ;;  %v13770_v55 = vld [vmem:[#allocation3 + $0xe2] sm:$0xff]  ;;  %v2120_v20 = vadd.f32 %v2072_v12, %v1971_v52  ;;  %v2485_v30 = vadd.f32 %v2453_v57, %v2384_v36  ;;  %v2554_v48 = vmul.f32 %v13438_v27, %v13649_v34 }
 0x21d   : > { %2310 = vst [vmem:[#allocation3 + $0xf0] sm:$0xff] %v13753_v43  ;;  %2311 = vst [vmem:[#allocation3 + $0xf8] sm:$0xff] %v13760_v47  ;;  %v2220_v15 = vmax.f32 %v13745_v59, 0.0  ;;  %v13777_v21 = vadd.f32 %v13277_v53, %v2122_v31  ;;  %v2121_v19 = vadd.f32 %v2073_v24, %v1972_v28  ;;  %v2655_v61 = vmul.f32 %v13347_v9, %v13656_v11 }
 0x21e   : > { %v2990_v8 = vadd.f32 %v2958_v0, %v2888_v26  ;;  %v13782_v18 = vadd.f32 %v13277_v53, %v2120_v20  ;;  %v2586_v39 = vadd.f32 %v2554_v48, %v2485_v30  ;;  %v2756_v10 = vmul.f32 %v13355_v37, %v13701_v4  ;;  %v17551_v26 = vld [vmem:[#allocation6_spill] sm:$0xff] }
 0x21f   : > { %v3160_v34 = vmul.f32 %v13488_v14, %v13770_v55  ;;  %v13789_v60 = vadd.f32 %v13277_v53, %v2121_v19  ;;  %v2857_v38 = vmul.f32 %v13372_v46, %v13703_v16  ;;  %v17550_v23 = vmax.f32 %v17549_v25, 0.0 }
 0x220   : > { %v3091_v12 = vadd.f32 %v3059_v13, %v2990_v8  ;;  %v2223_v24 = vmax.f32 %v13777_v21, 0.0  ;;  %v2687_v58 = vadd.f32 %v2655_v61, %v2586_v39  ;;  %v2959_v6 = vmul.f32 %v13382_v41, %v13753_v43 }
 0x221   : > { %v2256_v0 = vmul.f32 %v17535_v45, %v17550_v23  ;;  %v2221_v52 = vmax.f32 %v13782_v18, 0.0  ;;  %v2222_v5 = vmax.f32 %v13789_v60, 0.0  ;;  %v2385_v53 = vmul.f32 %v13505_v44, %v13591_v32  ;;  %v14105_v18 = vld [vmem:[%s17202_s1 + $0x12] ss:$0 sm:$0xff] }
 0x222   : > { %v2454_v63 = vmul.f32 %v13512_v29, %v13663_v35  ;;  %v3192_v56 = vadd.f32 %v3160_v34, %v3091_v12  ;;  %v2788_v17 = vadd.f32 %v2756_v10, %v2687_v58  ;;  %v2555_v33 = vmul.f32 %v13438_v27, %v13675_v40  ;;  %v17553_v35 = vld [vmem:[#allocation10_spill] sm:$0xff] }
 0x223   : > { %2312 = vst [vmem:[#allocation3 + $0x100] sm:$0x3] %v2256_v0  ;;  %v2656_v36 = vmul.f32 %v13347_v9, %v13661_v22  ;;  %v2757_v28 = vmul.f32 %v13355_v37, %v13755_v62  ;;  %v17552_v20 = vmax.f32 %v17551_v26, 0.0  ;;  %v17554_v30 = vmax.f32 %v17553_v35, 0.0 }
 0x224   : > { %v3023_v57 = vld [vmem:[#allocation3 + $0xf1] sm:$0xff]  ;;  %v2486_v31 = vadd.f32 %v2454_v63, %v2385_v53  ;;  %10509 = vmatmul.mubr.f32.gmra.mrb[14].mxu1 %v3192_v56  ;;  %v2889_v40 = vadd.f32 %v2857_v38, %v2788_v17  ;;  %v2858_v61 = vmul.f32 %v13372_v46, %v13770_v55  ;;  %v2960_v8 = vmul.f32 %v13382_v41, %v13760_v47 }
 0x225   : > { %v3124_v13 = vld [vmem:[#allocation3 + $0xf2] sm:$0xff]  ;;  %v13814_v32 = vmul.f32 %v13405_v3, %v17552_v20  ;;  %v13819_v48 = vmul.f32 %v13415_v42, %v17554_v30  ;;  %v3060_v19 = vmul.f32 %v13478_v54, %v3023_v57  ;;  %v2386_v34 = vmul.f32 %v13505_v44, %v13656_v11 }
 0x226   : > { %v3161_v39 = vmul.f32 %v13488_v14, %v3124_v13  ;;  %v2587_v10 = vadd.f32 %v2555_v33, %v2486_v31  ;;  %v2455_v38 = vmul.f32 %v13512_v29, %v13701_v4  ;;  %v2991_v25 = vadd.f32 %v2959_v6, %v2889_v40  ;;  %v17555_v56 = vld [vmem:[#allocation9_spill] sm:$0xff] }
 0x227   : > { %2313 = vst [vmem:[#allocation3 + $0x108] sm:$0xff] %v13814_v32  ;;  %2314 = vst [vmem:[#allocation3 + $0x110] sm:$0xff] %v13819_v48  ;;  %v2556_v23 = vmul.f32 %v13438_v27, %v13703_v16  ;;  %v2657_v0 = vmul.f32 %v13347_v9, %v13753_v43  ;;  %v2758_v12 = vmul.f32 %v13355_v37, %v3023_v57  ;;  %v17556_v17 = vmax.f32 %v17555_v56, 0.0  ;;  %v17559_v56 = vld [vmem:[#allocation14_spill] sm:$0xff] }
 0x228   : > { %v2688_v58 = vadd.f32 %v2656_v36, %v2587_v10  ;;  %v2487_v53 = vadd.f32 %v2455_v38, %v2386_v34  ;;  %v2859_v63 = vmul.f32 %v13372_v46, %v3124_v13  ;;  %v3092_v33 = vadd.f32 %v3060_v19, %v2991_v25 }
 0x229   : > { %v2259_v11 = vmul.f32 %v17535_v45, %v17556_v17  ;;  %v2961_v6 = vmul.f32 %v13382_v41, %v13814_v32  ;;  %v2387_v16 = vmul.f32 %v13505_v44, %v13661_v22  ;;  %v2456_v26 = vmul.f32 %v13512_v29, %v13755_v62  ;;  %v17557_v62 = vld [vmem:[#allocation12_spill] sm:$0xff] }
 0x22a   : > { %v3024_v31 = vld [vmem:[#allocation3 + $0xf9] sm:$0xff]  ;;  %v2789_v36 = vadd.f32 %v2757_v28, %v2688_v58  ;;  %v2588_v20 = vadd.f32 %v2556_v23, %v2487_v53  ;;  %v2557_v35 = vmul.f32 %v13438_v27, %v13770_v55  ;;  %v2658_v30 = vmul.f32 %v13347_v9, %v13760_v47 }
 0x22b   : > { %v3125_v4 = vld [vmem:[#allocation3 + $0xfa] sm:$0xff]  ;;  %2315 = vst [vmem:[#allocation3 + $0x118] sm:$0x3] %v2259_v11  ;;  %v3193_v40 = vadd.f32 %v3161_v39, %v3092_v33  ;;  %v3061_v19 = vmul.f32 %v13478_v54, %v3024_v31  ;;  %v2488_v34 = vadd.f32 %v2456_v26, %v2387_v16  ;;  %v2759_v25 = vmul.f32 %v13355_v37, %v3024_v31 }
 0x22c   : > { %v3162_v10 = vmul.f32 %v13488_v14, %v3125_v4  ;;  %v2890_v38 = vadd.f32 %v2858_v61, %v2789_v36  ;;  %v2689_v22 = vadd.f32 %v2657_v0, %v2588_v20  ;;  %v17558_v28 = vmax.f32 %v17557_v62, 0.0 }
 0x22d   : > { %10511 = vmatprep.mubr.f32.mxu1 %v3193_v40  ;;  %v2589_v53 = vadd.f32 %v2557_v35, %v2488_v34  ;;  %v17560_v39 = vmax.f32 %v17559_v56, 0.0  ;;  %v2388_v61 = vmul.f32 %v13505_v44, %v13753_v43  ;;  %v2457_v0 = vmul.f32 %v13512_v29, %v3023_v57 }
 0x22e   : > { %v13858_v23 = vmul.f32 %v13405_v3, %v17558_v28  ;;  %v3025_v55 = vld [vmem:[#allocation3 + $0x109] sm:$0xff]  ;;  %v2992_v11 = vadd.f32 %v2960_v8, %v2890_v38  ;;  %v2790_v33 = vadd.f32 %v2758_v12, %v2689_v22  ;;  %v2860_v16 = vmul.f32 %v13372_v46, %v3125_v4 }
 0x22f   : > { %v3126_v58 = vld [vmem:[#allocation3 + $0x10a] sm:$0xff]  ;;  %v13863_v17 = vmul.f32 %v13415_v42, %v17560_v39  ;;  %v2962_v26 = vmul.f32 %v13382_v41, %v13819_v48  ;;  %v2690_v36 = vadd.f32 %v2658_v30, %v2589_v53  ;;  %v2489_v20 = vadd.f32 %v2457_v0, %v2388_v61 }
 0x230   : > { %2316 = vst [vmem:[#allocation3 + $0x120] sm:$0xff] %v13858_v23  ;;  %v2558_v35 = vmul.f32 %v13438_v27, %v3124_v13  ;;  %v2659_v43 = vmul.f32 %v13347_v9, %v13814_v32  ;;  %v3093_v40 = vadd.f32 %v3061_v19, %v2992_v11  ;;  %v2891_v57 = vadd.f32 %v2859_v63, %v2790_v33  ;;  %v17561_v28 = vld [vmem:[#allocation11_spill] sm:$0xff] }
 0x231   : > { %2317 = vst [vmem:[#allocation3 + $0x128] sm:$0xff] %v13863_v17  ;;  %v3062_v8 = vmul.f32 %v13478_v54, %v3025_v55  ;;  %v3163_v12 = vmul.f32 %v13488_v14, %v3126_v58  ;;  %v2791_v34 = vadd.f32 %v2759_v25, %v2690_v36  ;;  %v2760_v30 = vmul.f32 %v13355_v37, %v3025_v55 }
 0x232   : > { %v3026_v38 = vld [vmem:[#allocation3 + $0x111] sm:$0xff]  ;;  %v2590_v62 = vadd.f32 %v2558_v35, %v2489_v20  ;;  %v17562_v53 = vmax.f32 %v17561_v28, 0.0  ;;  %v3194_v56 = vadd.f32 %v3162_v10, %v3093_v40  ;;  %v2993_v39 = vadd.f32 %v2961_v6, %v2891_v57 }
 0x233   : > { %v13878_v22 = vld [vmem:[#allocation3 + $0x112] sm:$0xff]  ;;  %v3063_v19 = vmul.f32 %v13478_v54, %v3026_v38  ;;  %v2861_v63 = vmul.f32 %v13372_v46, %v3126_v58  ;;  %v2892_v61 = vadd.f32 %v2860_v16, %v2791_v34  ;;  %v2389_v25 = vmul.f32 %v13505_v44, %v13760_v47 }
 0x234   : > { %v2262_v13 = vmul.f32 %v17535_v45, %v17562_v53  ;;  %v2691_v0 = vadd.f32 %v2659_v43, %v2590_v62  ;;  %v2458_v11 = vmul.f32 %v13512_v29, %v3024_v31  ;;  %10512 = vmatmul.mubr.f32.gmra.mrb[16].mxu1 %v3194_v56  ;;  %v3094_v33 = vadd.f32 %v3062_v8, %v2993_v39  ;;  %v17563_v8 = vld [vmem:[#allocation7_spill] sm:$0xff] }
 0x235   : > { %v3164_v36 = vmul.f32 %v13488_v14, %v13878_v22  ;;  %v2963_v6 = vmul.f32 %v13382_v41, %v13858_v23  ;;  %v2559_v10 = vmul.f32 %v13438_v27, %v3125_v4  ;;  %v2994_v20 = vadd.f32 %v2962_v26, %v2892_v61 }
 0x236   : > { %2318 = vst [vmem:[#allocation3 + $0x130] sm:$0x3] %v2262_v13  ;;  %v2792_v35 = vadd.f32 %v2760_v30, %v2691_v0  ;;  %v2490_v16 = vadd.f32 %v2458_v11, %v2389_v25  ;;  %v2660_v43 = vmul.f32 %v13347_v9, %v13819_v48  ;;  %v3195_v40 = vadd.f32 %v3163_v12, %v3094_v33 }
 0x237   : > { %v2761_v57 = vmul.f32 %v13355_v37, %v3026_v38  ;;  %v17564_v34 = vmax.f32 %v17563_v8, 0.0  ;;  %v17565_v4 = vmax.f32 %v13523_v7, 0.0  ;;  %v3095_v30 = vadd.f32 %v3063_v19, %v2994_v20  ;;  %v17566_v20 = vld [vmem:[#allocation13_spill] sm:$0xff] }
 0x238   : > { %v13896_v47 = vld [vmem:[#allocation3 + $0x121] sm:$0xff]  ;;  %v2893_v28 = vadd.f32 %v2861_v63, %v2792_v35  ;;  %v2862_v12 = vmul.f32 %v13372_v46, %v13878_v22  ;;  %10514 = vmatprep.mubr.f32.mxu1 %v3195_v40  ;;  %v2591_v37 = vadd.f32 %v2559_v10, %v2490_v16  ;;  %v2390_v7 = vmul.f32 %v13505_v44, %v13814_v32 }
 0x239   : > { %v13898_v31 = vld [vmem:[#allocation3 + $0x122] sm:$0xff]  ;;  %v13904_v62 = vmul.f32 %v13405_v3, %v17564_v34  ;;  %v13909_v26 = vmul.f32 %v13415_v42, %v17565_v4  ;;  %v3064_v9 = vmul.f32 %v13478_v54, %v13896_v47  ;;  %v2459_v53 = vmul.f32 %v13512_v29, %v3025_v55 }
 0x23a   : > { %v2560_v13 = vmul.f32 %v13438_v27, %v3126_v58  ;;  %v3196_v56 = vadd.f32 %v3164_v36, %v3095_v30  ;;  %v2995_v39 = vadd.f32 %v2963_v6, %v2893_v28  ;;  %v3165_v19 = vmul.f32 %v13488_v14, %v13898_v31  ;;  %v13930_v32 = vld [vmem:[%s17202_s1 + $0x14] ss:$0 sm:$0xff]  ;;  %v13937_v58 = vld [vmem:[%s17202_s1 + $0x15] ss:$0 sm:$0xff] }
 0x23b   : > { %2319 = vst [vmem:[#allocation3 + $0x138] sm:$0xff] %v13904_v62  ;;  %2320 = vst [vmem:[#allocation3 + $0x140] sm:$0xff] %v13909_v26  ;;  %v2964_v63 = vmul.f32 %v13382_v41, %v13863_v17  ;;  %v2692_v61 = vadd.f32 %v2660_v43, %v2591_v37  ;;  %v2491_v11 = vadd.f32 %v2459_v53, %v2390_v7  ;;  %v17567_v35 = vmax.f32 %v17566_v20, 0.0  ;;  %v17568_v53 = vld [vmem:[#allocation17_spill] sm:$0xff] }
 0x23c   : > { %v2661_v55 = vmul.f32 %v13930_v32, %v13858_v23  ;;  %v2762_v33 = vmul.f32 %v13937_v58, %v13896_v47  ;;  %10515 = vmatmul.mubr.f32.gmra.mrb[18].mxu1 %v3196_v56  ;;  %v3096_v36 = vadd.f32 %v3064_v9, %v2995_v39  ;;  %v2863_v6 = vmul.f32 %v13372_v46, %v13898_v31 }
 0x23d   : > { %v3028_v0 = vld [vmem:[#allocation3 + $0x129] sm:$0xff]  ;;  %v2965_v10 = vmul.f32 %v13382_v41, %v13904_v62  ;;  %v2265_v16 = vmul.f32 %v17535_v45, %v17567_v35  ;;  %v2793_v43 = vadd.f32 %v2761_v57, %v2692_v61  ;;  %v2592_v40 = vadd.f32 %v2560_v13, %v2491_v11  ;;  %v13978_v61 = vld [vmem:[%s17202_s1 + $0x16] ss:$0 sm:$0xff] }
 0x23e   : > { %v13925_v25 = vld [vmem:[#allocation3 + $0x12a] sm:$0xff]  ;;  %v2391_v8 = vmul.f32 %v13505_v44, %v13819_v48  ;;  %v2460_v34 = vmul.f32 %v13512_v29, %v3026_v38  ;;  %v3197_v4 = vadd.f32 %v3165_v19, %v3096_v36  ;;  %v3065_v30 = vmul.f32 %v13478_v54, %v3028_v0 }
 0x23f   : > { %v3166_v46 = vmul.f32 %v13488_v14, %v13925_v25  ;;  %2321 = vst [vmem:[#allocation3 + $0x148] sm:$0x3] %v2265_v16  ;;  %v2561_v41 = vmul.f32 %v13438_v27, %v13878_v22  ;;  %v2894_v28 = vadd.f32 %v2862_v12, %v2793_v43  ;;  %v2693_v9 = vadd.f32 %v2661_v55, %v2592_v40  ;;  %v17570_v40 = vld [vmem:[#allocation16_spill] sm:$0xff] }
 0x240   : > { %v2492_v37 = vadd.f32 %v2460_v34, %v2391_v8  ;;  %v2662_v57 = vmul.f32 %v13930_v32, %v13863_v17  ;;  %10517 = vmatprep.mubr.f32.mxu1 %v3197_v4  ;;  %v2763_v7 = vmul.f32 %v13937_v58, %v3028_v0  ;;  %v17569_v13 = vmax.f32 %v17568_v53, 0.0 }
 0x241   : > { %v13971_v22 = vmul.f32 %v13415_v42, %v2216_v50  ;;  %v2392_v12 = vmul.f32 %v13505_v44, %v13858_v23  ;;  %v2996_v39 = vadd.f32 %v2964_v63, %v2894_v28  ;;  %v2794_v19 = vadd.f32 %v2762_v33, %v2693_v9 }
 0x242   : > { %v13958_v48 = vld [vmem:[#allocation3 + $0x139] sm:$0xff]  ;;  %v13966_v56 = vmul.f32 %v13405_v3, %v17569_v13  ;;  %v2864_v11 = vmul.f32 %v13978_v61, %v13925_v25  ;;  %v13985_v3 = vld [vmem:[%s17202_s1 + $0x17] ss:$0 sm:$0xff]  ;;  %v2593_v50 = vadd.f32 %v2561_v41, %v2492_v37  ;;  %v2461_v23 = vmul.f32 %v13512_v29, %v13896_v47 }
 0x243   : > { %v13960_v38 = vld [vmem:[#allocation3 + $0x13a] sm:$0xff]  ;;  %v2966_v42 = vmul.f32 %v13985_v3, %v13909_v26  ;;  %v3066_v49 = vmul.f32 %v13478_v54, %v13958_v48  ;;  %2323 = vst [vmem:[#allocation3 + $0x158] sm:$0xff] %v13971_v22  ;;  %v2562_v63 = vmul.f32 %v13438_v27, %v13898_v31  ;;  %v3097_v55 = vadd.f32 %v3065_v30, %v2996_v39 }
 0x244   : > { %2322 = vst [vmem:[#allocation3 + $0x150] sm:$0xff] %v13966_v56  ;;  %v2895_v33 = vadd.f32 %v2863_v6, %v2794_v19  ;;  %v3167_v36 = vmul.f32 %v13488_v14, %v13960_v38  ;;  %v2663_v20 = vmul.f32 %v13930_v32, %v13904_v62  ;;  %v2694_v35 = vadd.f32 %v2662_v57, %v2593_v50 }
 0x245   : > { %v2493_v16 = vadd.f32 %v2461_v23, %v2392_v12  ;;  %v2764_v43 = vmul.f32 %v13937_v58, %v13958_v48  ;;  %v17571_v8 = vmax.f32 %v17570_v40, 0.0  ;;  %v3198_v34 = vadd.f32 %v3166_v46, %v3097_v55  ;;  %v11820_v23 = vld [vmem:[%s17202_s1 + $0x59] sm:$0xff] }
 0x246   : > { %v2997_v4 = vadd.f32 %v2965_v10, %v2895_v33  ;;  %v3030_v27 = vld [vmem:[#allocation3 + $0x141] sm:$0xff]  ;;  %v2393_v6 = vmul.f32 %v13505_v44, %v13863_v17  ;;  %v2462_v30 = vmul.f32 %v13512_v29, %v3028_v0  ;;  %v2795_v41 = vadd.f32 %v2763_v7, %v2694_v35 }
 0x247   : > { %v2268_v47 = vmul.f32 %v17535_v45, %v17571_v8  ;;  %v3131_v31 = vld [vmem:[#allocation3 + $0x142] sm:$0xff]  ;;  %v2594_v28 = vadd.f32 %v2562_v63, %v2493_v16  ;;  %v2865_v9 = vmul.f32 %v13978_v61, %v13960_v38  ;;  %v2967_v37 = vmul.f32 %v13985_v3, %v13966_v56  ;;  %10518 = vmatmul.mubr.f32.gmra.mrb[20].mxu1 %v3198_v34  ;;  %v11821_v16 = vld [vmem:[%s17202_s1 + $0x61] sm:$0xff] }
 0x248   : > { %v3098_v57 = vadd.f32 %v3066_v49, %v2997_v4  ;;  %v2494_v46 = vadd.f32 %v2462_v30, %v2393_v6  ;;  %v14016_v10 = vld [vmem:[%s17202_s1 + $0x13] ss:$0 sm:$0xff]  ;;  %v2664_v0 = vmul.f32 %v13930_v32, %v13909_v26  ;;  %v2896_v7 = vadd.f32 %v2864_v11, %v2795_v41 }
 0x249   : > { %2324 = vst [vmem:[#allocation3 + $0x160] sm:$0x3] %v2268_v47  ;;  %v2563_v17 = vmul.f32 %v14016_v10, %v13925_v25  ;;  %v3067_v53 = vmul.f32 %v13478_v54, %v3030_v27  ;;  %v3168_v13 = vmul.f32 %v13488_v14, %v3131_v31  ;;  %v2695_v12 = vadd.f32 %v2663_v20, %v2594_v28 }
 0x24a   : > { %v3199_v39 = vadd.f32 %v3167_v36, %v3098_v57  ;;  %v2765_v50 = vmul.f32 %v13937_v58, %v3030_v27  ;;  %v17572_v25 = vmax.f32 %v13685_v1, 0.0  ;;  %v2998_v55 = vadd.f32 %v2966_v42, %v2896_v7 }
 0x24b   : > { %v3031_v19 = vld [vmem:[#allocation3 + $0x151] sm:$0xff]  ;;  %v2595_v49 = vadd.f32 %v2563_v17, %v2494_v46  ;;  %v2796_v11 = vadd.f32 %v2764_v43, %v2695_v12  ;;  %v2866_v35 = vmul.f32 %v13978_v61, %v3131_v31  ;;  %v2968_v36 = vmul.f32 %v13985_v3, %v13971_v22 }
 0x24c   : > { %v14030_v63 = vmul.f32 %v11820_v23, %v17572_v25  ;;  %v3132_v33 = vld [vmem:[#allocation3 + $0x152] sm:$0xff]  ;;  %10520 = vmatprep.mubr.f32.mxu1 %v3199_v39  ;;  %v14040_v40 = vmul.f32 %v11821_v16, %v2219_v51  ;;  %v2394_v1 = vmul.f32 %v13505_v44, %v13904_v62  ;;  %v2463_v42 = vmul.f32 %v13512_v29, %v13958_v48 }
 0x24d   : > { %v2696_v20 = vadd.f32 %v2664_v0, %v2595_v49  ;;  %v3099_v43 = vadd.f32 %v3067_v53, %v2998_v55  ;;  %v2897_v8 = vadd.f32 %v2865_v9, %v2796_v11  ;;  %v3068_v47 = vmul.f32 %v13478_v54, %v3031_v19  ;;  %v14098_v55 = vld [vmem:[%s17202_s1 + $0x11] ss:$0 sm:$0xff] }
 0x24e   : > { %2325 = vst [vmem:[#allocation3 + $0x168] sm:$0xff] %v14030_v63  ;;  %v2564_v34 = vmul.f32 %v14016_v10, %v13960_v38  ;;  %v3169_v4 = vmul.f32 %v13488_v14, %v3132_v33  ;;  %2326 = vst [vmem:[#allocation3 + $0x170] sm:$0xff] %v14040_v40  ;;  %v2495_v6 = vadd.f32 %v2463_v42, %v2394_v1  ;;  %v14063_v14 = vld [vmem:[%s17202_s1 + $0x18] ss:$0 sm:$0xff] }
 0x24f   : > { %v2797_v2 = vadd.f32 %v2765_v50, %v2696_v20  ;;  %v2665_v62 = vmul.f32 %v13930_v32, %v13966_v56  ;;  %v3200_v30 = vadd.f32 %v3168_v13, %v3099_v43  ;;  %v2999_v48 = vadd.f32 %v2967_v37, %v2897_v8  ;;  %v14077_v13 = vld [vmem:[%s17202_s1 + $0x19] ss:$0 sm:$0xff]  ;;  %v11826_v8 = vld [vmem:[%s17202_s1 + $0x69] sm:$0x3] }
 0x250   : > { %v14051_v51 = vld [vmem:[#allocation3 + $0x159] sm:$0xff]  ;;  %v2766_v54 = vmul.f32 %v13937_v58, %v3031_v19  ;;  %v2867_v28 = vmul.f32 %v13978_v61, %v3132_v33  ;;  %v2596_v57 = vadd.f32 %v2564_v34, %v2495_v6  ;;  %v2271_v37 = vmul.f32 %v17535_v45, %v2220_v15 }
 0x251   : > { %v14056_v41 = vld [vmem:[#allocation3 + $0x15a] sm:$0xff]  ;;  %v2898_v38 = vadd.f32 %v2866_v35, %v2797_v2  ;;  %v3069_v9 = vmul.f32 %v14063_v14, %v14051_v51  ;;  %10521 = vmatmul.mubr.f32.gmra.mrb[22].mxu1 %v3200_v30  ;;  %v3100_v46 = vadd.f32 %v3068_v47, %v2999_v48  ;;  %v2395_v17 = vmul.f32 %v13505_v44, %v13909_v26 }
 0x252   : > { %v2464_v0 = vmul.f32 %v13512_v29, %v3030_v27  ;;  %v2565_v7 = vmul.f32 %v14016_v10, %v3131_v31  ;;  %v3170_v59 = vmul.f32 %v14077_v13, %v14056_v41  ;;  %v2697_v12 = vadd.f32 %v2665_v62, %v2596_v57  ;;  %2327 = vst [vmem:[#allocation3 + $0x178] sm:$0x3] %v2271_v37 }
 0x253   : > { %v3000_v53 = vadd.f32 %v2968_v36, %v2898_v38  ;;  %v2969_v45 = vmul.f32 %v13985_v3, %v14030_v63  ;;  %v3201_v15 = vadd.f32 %v3169_v4, %v3100_v46  ;;  %v2666_v29 = vmul.f32 %v13930_v32, %v13971_v22 }
 0x254   : > { %v2496_v44 = vadd.f32 %v2464_v0, %v2395_v17  ;;  %v2767_v26 = vmul.f32 %v13937_v58, %v14051_v51  ;;  %v2798_v31 = vadd.f32 %v2766_v54, %v2697_v12  ;;  %v14089_v39 = vmul.f32 %v11820_v23, %v2221_v52  ;;  %v14125_v34 = vpop.f32.mrb[0].mxu1 }
 0x255   : > { %v3101_v27 = vadd.f32 %v3069_v9, %v3000_v53  ;;  %v14093_v49 = vmul.f32 %v11821_v16, %v2222_v5  ;;  %10523 = vmatprep.mubr.f32.mxu1 %v3201_v15  ;;  %v3033_v50 = vld [vmem:[#allocation3 + $0x169] sm:$0xff]  ;;  %v2396_v11 = vmul.f32 %v14098_v55, %v13966_v56  ;;  %v2465_v60 = vmul.f32 %v14105_v18, %v3031_v19  ;;  %v14131_v48 = vpop.f32.mrb[1].mxu1 }
 0x256   : > { %v2597_v25 = vadd.f32 %v2565_v7, %v2496_v44  ;;  %v2566_v52 = vmul.f32 %v14016_v10, %v3132_v33  ;;  %v2899_v23 = vadd.f32 %v2867_v28, %v2798_v31  ;;  %v3070_v35 = vmul.f32 %v14063_v14, %v3033_v50  ;;  %2328 = vst [vmem:[#allocation3 + $0x180] sm:$0xff] %v14089_v39  ;;  %v3134_v56 = vld [vmem:[#allocation3 + $0x16a] sm:$0xff] }
 0x257   : > { %v3202_v5 = vadd.f32 %v3170_v59, %v3101_v27  ;;  %v2868_v36 = vmul.f32 %v13978_v61, %v14056_v41  ;;  %2329 = vst [vmem:[#allocation3 + $0x188] sm:$0xff] %v14093_v49  ;;  %v2970_v16 = vmul.f32 %v13985_v3, %v14040_v40  ;;  %v2497_v1 = vadd.f32 %v2465_v60, %v2396_v11 }
 0x258   : > { %v2698_v20 = vadd.f32 %v2666_v29, %v2597_v25  ;;  %v2667_v19 = vmul.f32 %v13930_v32, %v14030_v63  ;;  %v3001_v33 = vadd.f32 %v2969_v45, %v2899_v23  ;;  %v3171_v42 = vmul.f32 %v14077_v13, %v3134_v56 }
 0x259   : > { %10524 = vmatmul.mubr.f32.gmra.mrb[24].mxu1 %v3202_v5  ;;  %v2768_v43 = vmul.f32 %v13937_v58, %v3033_v50  ;;  %v2274_v47 = vmul.f32 %v11826_v8, %v2223_v24  ;;  %v3034_v2 = vld [vmem:[#allocation3 + $0x171] sm:$0xff]  ;;  %v2598_v6 = vadd.f32 %v2566_v52, %v2497_v1  ;;  %v2397_v62 = vmul.f32 %v14098_v55, %v13971_v22 }
 0x25a   : > { %v2799_v4 = vadd.f32 %v2767_v26, %v2698_v20  ;;  %v2466_v30 = vmul.f32 %v14105_v18, %v14051_v51  ;;  %v3102_v54 = vadd.f32 %v3070_v35, %v3001_v33  ;;  %v3071_v28 = vmul.f32 %v14063_v14, %v3034_v2  ;;  %v3135_v9 = vld [vmem:[#allocation3 + $0x172] sm:$0xff] }
 0x25b   : > { %v2869_v38 = vmul.f32 %v13978_v61, %v3134_v56  ;;  %2330 = vst [vmem:[#allocation3 + $0x190] sm:$0x3] %v2274_v47  ;;  %v2567_v21 = vmul.f32 %v14016_v10, %v14056_v41  ;;  %v2699_v57 = vadd.f32 %v2667_v19, %v2598_v6  ;;  %v2668_v22 = vmul.f32 %v13930_v32, %v14040_v40 }
 0x25c   : > { %v2900_v24 = vadd.f32 %v2868_v36, %v2799_v4  ;;  %v2498_v37 = vadd.f32 %v2466_v30, %v2397_v62  ;;  %v3203_v46 = vadd.f32 %v3171_v42, %v3102_v54  ;;  %v3172_v51 = vmul.f32 %v14077_v13, %v3135_v9 }
 0x25d   : > { %v2971_v17 = vmul.f32 %v13985_v3, %v14089_v39  ;;  %v2800_v7 = vadd.f32 %v2768_v43, %v2699_v57  ;;  %v2769_v12 = vmul.f32 %v13937_v58, %v3034_v2  ;;  %v2870_v45 = vmul.f32 %v13978_v61, %v3135_v9 }
 0x25e   : > { %v3002_v0 = vadd.f32 %v2970_v16, %v2900_v24  ;;  %v3035_v53 = vld [vmem:[#allocation3 + $0x181] sm:$0xff]  ;;  %v2599_v59 = vadd.f32 %v2567_v21, %v2498_v37  ;;  %10526 = vmatprep.mubr.f32.mxu1 %v3203_v46  ;;  %v2398_v15 = vmul.f32 %v14098_v55, %v14030_v63  ;;  %v2972_v31 = vmul.f32 %v13985_v3, %v14093_v49 }
 0x25f   : > { %v3136_v41 = vld [vmem:[#allocation3 + $0x182] sm:$0xff]  ;;  %v2901_v29 = vadd.f32 %v2869_v38, %v2800_v7  ;;  %v3072_v26 = vmul.f32 %v14063_v14, %v3035_v53  ;;  %v2467_v25 = vmul.f32 %v14105_v18, %v3033_v50  ;;  %v2568_v11 = vmul.f32 %v14016_v10, %v3134_v56 }
 0x260   : > { %v3103_v44 = vadd.f32 %v3071_v28, %v3002_v0  ;;  %v2700_v27 = vadd.f32 %v2668_v22, %v2599_v59  ;;  %v3173_v5 = vmul.f32 %v14077_v13, %v3136_v41  ;;  %v2669_v20 = vmul.f32 %v13930_v32, %v14089_v39  ;;  %v3037_v28 = vld [vmem:[#allocation3 + $0x199] sm:$0xff]  ;;  %v3038_v37 = vld [vmem:[#allocation3 + $0x1a1] sm:$0xff] }
 0x261   : > { %v3003_v52 = vadd.f32 %v2971_v17, %v2901_v29  ;;  %v2499_v63 = vadd.f32 %v2467_v25, %v2398_v15  ;;  %v2770_v50 = vmul.f32 %v13937_v58, %v3035_v53  ;;  %v2399_v56 = vmul.f32 %v14098_v55, %v14040_v40  ;;  %v14167_v40 = vld [vmem:[%s17202_s1 + $0x2f] sm:$0xff] }
 0x262   : > { %v3204_v60 = vadd.f32 %v3172_v51, %v3103_v44  ;;  %v2801_v23 = vadd.f32 %v2769_v12, %v2700_v27  ;;  %v3036_v35 = vld [vmem:[#allocation3 + $0x189] sm:$0xff]  ;;  %v2468_v42 = vmul.f32 %v14105_v18, %v3034_v2  ;;  %v2569_v4 = vmul.f32 %v14016_v10, %v3135_v9  ;;  %v14169_v18 = vld [vmem:[#allocation3] sm:$0xff]  ;;  %10623 = vmatprep.mubr.msk.f32.mxu0 %vm3493_vm1, %v14167_v40 }
 0x263   : > { %v3137_v36 = vld [vmem:[#allocation3 + $0x18a] sm:$0xff]  ;;  %v3104_v16 = vadd.f32 %v3072_v26, %v3003_v52  ;;  %v3073_v19 = vmul.f32 %v14063_v14, %v3036_v35  ;;  %v2600_v33 = vadd.f32 %v2568_v11, %v2499_v63  ;;  %v2871_v6 = vmul.f32 %v13978_v61, %v3136_v41  ;;  %v3139_v51 = vld [vmem:[#allocation3 + $0x1a2] sm:$0xff] }
 0x264   : > { %10527 = vmatmul.mubr.f32.gmra.mrb[26].mxu1 %v3204_v60  ;;  %v2902_v1 = vadd.f32 %v2870_v45, %v2801_v23  ;;  %v3174_v47 = vmul.f32 %v14077_v13, %v3137_v36  ;;  %v2500_v62 = vadd.f32 %v2468_v42, %v2399_v56  ;;  %v2670_v30 = vmul.f32 %v13930_v32, %v14093_v49  ;;  %v3138_v49 = vld [vmem:[#allocation3 + $0x19a] sm:$0xff] }
 0x265   : > { %v3205_v43 = vadd.f32 %v3173_v5, %v3104_v16  ;;  %v2701_v39 = vadd.f32 %v2669_v20, %v2600_v33  ;;  %v2973_v10 = vmul.f32 %v14169_v18, %v13985_v3  ;;  %v2771_v38 = vmul.f32 %v13937_v58, %v3036_v35  ;;  %v14182_v58 = vld [vmem:[%s17202_s1 + $0x2d] ss:$0 sm:$0xff]  ;;  %v14199_v16 = vld [vmem:[%s17202_s1 + $0x37] sm:$0x7]  ;;  %v14218_v33 = vld [vmem:[%s17202_s1 + $0x45] sm:$0xff] }
 0x266   : > { %v3004_v8 = vadd.f32 %v2972_v31, %v2902_v1  ;;  %v2601_v2 = vadd.f32 %v2569_v4, %v2500_v62  ;;  %v3074_v24 = vmul.f32 %v14063_v14, %v3037_v28  ;;  %v2872_v57 = vmul.f32 %v13978_v61, %v3137_v36  ;;  %v14204_v1 = vld [vmem:[%s17202_s1 + $0x3a] sm:$0xff] }
 0x267   : > { %10529 = vmatprep.mubr.f32.mxu1 %v3205_v43  ;;  %v2802_v55 = vadd.f32 %v2770_v50, %v2701_v39  ;;  %v3175_v46 = vmul.f32 %v14077_v13, %v3138_v49  ;;  %v3075_v7 = vmul.f32 %v14063_v14, %v3038_v37  ;;  %v3302_v53 = vadd.f32 %v14125_v34, %v14182_v58  ;;  %v14227_v50 = vld [vmem:[%s17202_s1 + $0x4d] sm:$0x7] }
 0x268   : > { %v3105_v54 = vadd.f32 %v3073_v19, %v3004_v8  ;;  %v2702_v9 = vadd.f32 %v2670_v30, %v2601_v2  ;;  %v3176_v12 = vmul.f32 %v14077_v13, %v3139_v51  ;;  %v3297_v41 = vadd.f32 %v14182_v58, %v14131_v48  ;;  %v14213_v19 = vld [vmem:[%s17202_s1 + $0x42] sm:$0x7] }
 0x269   : > { %v2903_v21 = vadd.f32 %v2871_v6, %v2802_v55  ;;  %v3454_v27 = vmax.f32 %v3302_v53, 0.0 }
 0x26a   : > { %v3206_v32 = vadd.f32 %v3174_v47, %v3105_v54  ;;  %v2803_v3 = vadd.f32 %v2771_v38, %v2702_v9  ;;  %v3453_v25 = vmax.f32 %v3297_v41, 0.0 }
 0x26b   : > { %v3005_v22 = vadd.f32 %v2973_v10, %v2903_v21 }
 0x26c   : > { %10530 = vmatmul.mubr.f32.gmra.mrb[28].mxu1 %v3206_v32  ;;  %v2904_v0 = vadd.f32 %v2872_v57, %v2803_v3  ;;  %v10492_v45 = vpop.f32.mrb[2].mxu1 }
 0x26d   : > { %v3106_v17 = vadd.f32 %v3074_v24, %v3005_v22  ;;  %v3312_v15 = vadd.f32 %v10492_v45, %v14182_v58  ;;  %v3306_v44 = vpop.f32.mrb[3].mxu1 }
 0x26e   : > { %v3006_v59 = vadd.f32 %v2973_v10, %v2904_v0  ;;  %v3307_v26 = vadd.f32 %v14182_v58, %v3306_v44 }
 0x26f   : > { %v3207_v61 = vadd.f32 %v3175_v46, %v3106_v17  ;;  %v3456_v14 = vmax.f32 %v3312_v15, 0.0 }
 0x270   : > { %v3107_v29 = vadd.f32 %v3075_v7, %v3006_v59  ;;  %v3455_v34 = vmax.f32 %v3307_v26, 0.0 }
 0x271   : > { %10532 = vmatprep.mubr.f32.mxu1 %v3207_v61  ;;  %v3490_v11 = vmax.f32 %v3454_v27, %v3456_v14 }
 0x272   : > { %v3208_v31 = vadd.f32 %v3176_v12, %v3107_v29  ;;  %v3489_v60 = vmax.f32 %v3453_v25, %v3455_v34 }
 0x274   : > { %10533 = vmatmul.mubr.f32.gmra.mrb[30].mxu1 %v3208_v31 }
 0x275   : > { %10539 = vmatprep.mubr.msk.f32.mxu1 %vm3493_vm1, %v14167_v40 }
 0x284   : > { %v10495_v13 = vpop.f32.mrb[4].mxu1 }
 0x285   : > { %v3322_v48 = vadd.f32 %v10495_v13, %v14182_v58  ;;  %v3316_v52 = vpop.f32.mrb[5].mxu1 }
 0x286   : > { %v3317_v5 = vadd.f32 %v14182_v58, %v3316_v52 }
 0x287   : > { %v3458_v23 = vmax.f32 %v3322_v48, 0.0 }
 0x288   : > { %v3457_v35 = vmax.f32 %v3317_v5, 0.0 }
 0x289   : > { %v3492_v36 = vmax.f32 %v3490_v11, %v3458_v23 }
 0x28a   : > { %v3491_v63 = vmax.f32 %v3489_v60, %v3457_v35 }
 0x28c   : > { %v10714_v20 = vpack.c.bf16 %v3492_v36, %v3491_v63 }
 0x28e   : > { %10715 = vmatprep.subr.bf16.mxu1 %v10714_v20 }
 0x28f   : > { %10717 = vmatpush3.bf16.msra.mxu1 %v10714_v20 }
 0x290   : > { %10719 = vmatprep.subr.bf16.mxu1 %v10714_v20 }
 0x292   : > { %10540 = vmatmul.mubr.msk.f32.vlgmr.msra.gmra.mrb[32].mxu1 %vm3493_vm1, %v14199_v16 }
 0x293   : > { %10721 = vmatpush3.bf16.msra.mxu1 %v10714_v20  ;;  %10546 = vmatprep.mubr.msk.f32.mxu1 %vm3493_vm1, %v14204_v1 }
 0x294   : > { %10723 = vmatprep.subr.bf16.mxu1 %v10714_v20 }
 0x296   : > { %10547 = vmatmul.mubr.msk.f32.vlgmr.msra.gmra.mrb[34].mxu1 %vm3493_vm1, %v14213_v19 }
 0x297   : > { %10725 = vmatpush3.bf16.msra.mxu1 %v10714_v20  ;;  %10553 = vmatprep.mubr.msk.f32.mxu1 %vm3493_vm1, %v14218_v33 }
 0x29a   : > { %10554 = vmatmul.mubr.msk.f32.vlgmr.msra.gmra.mrb[36].mxu1 %vm3493_vm1, %v14227_v50 }
 0x29b   : > { %10560 = vmatprep.mubr.msk.f32.mxu1 %vm3493_vm1, %v14167_v40 }
 0x29c   : > { %v10498_v56 = vpop.f32.mrb[6].mxu1 }
 0x29d   : > { %v3332_v42 = vadd.f32 %v10498_v56, %v14182_v58  ;;  %v3326_v43 = vpop.f32.mrb[7].mxu1 }
 0x29e   : > { %v3327_v8 = vadd.f32 %v14182_v58, %v3326_v43 }
 0x29f   : > { %v3460_v47 = vmax.f32 %v3332_v42, 0.0 }
 0x2a0   : > { %v3459_v4 = vmax.f32 %v3327_v8, 0.0 }
 0x2a1   : > { %v3745_v39 = vmax.f32 %v3458_v23, %v3460_v47 }
 0x2a2   : > { %v3744_v6 = vmax.f32 %v3457_v35, %v3459_v4 }
 0x2b3   : > { %v10501_v62 = vpop.f32.mrb[8].mxu1 }
 0x2b4   : > { %v3342_v30 = vadd.f32 %v10501_v62, %v14182_v58  ;;  %v3336_v54 = vpop.f32.mrb[9].mxu1 }
 0x2b5   : > { %v3337_v28 = vadd.f32 %v14182_v58, %v3336_v54 }
 0x2b6   : > { %v3462_v55 = vmax.f32 %v3342_v30, 0.0 }
 0x2b7   : > { %v3461_v10 = vmax.f32 %v3337_v28, 0.0 }
 0x2b8   : > { %v3747_v2 = vmax.f32 %v3745_v39, %v3462_v55 }
 0x2b9   : > { %v3746_v38 = vmax.f32 %v3744_v6, %v3461_v10 }
 0x2bb   : > { %v10726_v32 = vpack.c.bf16 %v3747_v2, %v3746_v38 }
 0x2bd   : > { %10727 = vmatprep.subr.bf16.mxu1 %v10726_v32 }
 0x2be   : > { %10729 = vmatpush3.bf16.msra.mxu1 %v10726_v32 }
 0x2bf   : > { %10731 = vmatprep.subr.bf16.mxu1 %v10726_v32 }
 0x2c1   : > { %10561 = vmatmul.mubr.msk.f32.vlgmr.msra.gmra.mrb[38].mxu1 %vm3493_vm1, %v14199_v16 }
 0x2c2   : > { %10733 = vmatpush3.bf16.msra.mxu1 %v10726_v32  ;;  %10567 = vmatprep.mubr.msk.f32.mxu1 %vm3493_vm1, %v14204_v1 }
 0x2c3   : > { %10735 = vmatprep.subr.bf16.mxu1 %v10726_v32 }
 0x2c5   : > { %10568 = vmatmul.mubr.msk.f32.vlgmr.msra.gmra.mrb[40].mxu1 %vm3493_vm1, %v14213_v19 }
 0x2c6   : > { %10737 = vmatpush3.bf16.msra.mxu1 %v10726_v32  ;;  %10574 = vmatprep.mubr.msk.f32.mxu1 %vm3493_vm1, %v14218_v33 }
 0x2c9   : > { %10575 = vmatmul.mubr.msk.f32.vlgmr.msra.gmra.mrb[42].mxu1 %vm3493_vm1, %v14227_v50 }
 0x2ca   : > { %10581 = vmatprep.mubr.msk.f32.mxu1 %vm3493_vm1, %v14167_v40 }
 0x2cb   : > { %v10504_v49 = vpop.f32.mrb[10].mxu1 }
 0x2cc   : > { %v3352_v21 = vadd.f32 %v10504_v49, %v14182_v58  ;;  %v3346_v24 = vpop.f32.mrb[11].mxu1 }
 0x2cd   : > { %v3347_v9 = vadd.f32 %v14182_v58, %v3346_v24 }
 0x2ce   : > { %v3464_v57 = vmax.f32 %v3352_v21, 0.0 }
 0x2cf   : > { %v3463_v37 = vmax.f32 %v3347_v9, 0.0 }
 0x2d0   : > { %v3981_v22 = vmax.f32 %v3462_v55, %v3464_v57 }
 0x2d1   : > { %v3980_v46 = vmax.f32 %v3461_v10, %v3463_v37 }
 0x2e2   : > { %v10507_v3 = vpop.f32.mrb[12].mxu1 }
 0x2e3   : > { %v3362_v51 = vadd.f32 %v10507_v3, %v14182_v58  ;;  %v3356_v17 = vpop.f32.mrb[13].mxu1 }
 0x2e4   : > { %v3357_v0 = vadd.f32 %v14182_v58, %v3356_v17 }
 0x2e5   : > { %v3466_v7 = vmax.f32 %v3362_v51, 0.0 }
 0x2e6   : > { %v3465_v53 = vmax.f32 %v3357_v0, 0.0 }
 0x2e7   : > { %v3983_v61 = vmax.f32 %v3981_v22, %v3466_v7 }
 0x2e8   : > { %v3982_v59 = vmax.f32 %v3980_v46, %v3465_v53 }
 0x2ea   : > { %v10738_v12 = vpack.c.bf16 %v3983_v61, %v3982_v59 }
 0x2ec   : > { %10739 = vmatprep.subr.bf16.mxu1 %v10738_v12 }
 0x2ed   : > { %10741 = vmatpush3.bf16.msra.mxu1 %v10738_v12 }
 0x2ee   : > { %10743 = vmatprep.subr.bf16.mxu1 %v10738_v12 }
 0x2f0   : > { %10582 = vmatmul.mubr.msk.f32.vlgmr.msra.gmra.mrb[44].mxu1 %vm3493_vm1, %v14199_v16 }
 0x2f1   : > { %10745 = vmatpush3.bf16.msra.mxu1 %v10738_v12  ;;  %10588 = vmatprep.mubr.msk.f32.mxu1 %vm3493_vm1, %v14204_v1 }
 0x2f2   : > { %10747 = vmatprep.subr.bf16.mxu1 %v10738_v12 }
 0x2f4   : > { %10589 = vmatmul.mubr.msk.f32.vlgmr.msra.gmra.mrb[46].mxu1 %vm3493_vm1, %v14213_v19 }
 0x2f5   : > { %10749 = vmatpush3.bf16.msra.mxu1 %v10738_v12  ;;  %10595 = vmatprep.mubr.msk.f32.mxu1 %vm3493_vm1, %v14218_v33 }
 0x2f7   : > { %v10510_v41 = vpop.f32.mrb[14].mxu1 }
 0x2f8   : > { %v3372_v45 = vadd.f32 %v10510_v41, %v14182_v58  ;;  %v3366_v15 = vpop.f32.mrb[15].mxu1  ;;  %10596 = vmatmul.mubr.msk.f32.vlgmr.msra.gmra.mrb[48].mxu1 %vm3493_vm1, %v14227_v50 }
 0x2f9   : > { %v3367_v44 = vadd.f32 %v14182_v58, %v3366_v15  ;;  %10602 = vmatprep.mubr.msk.f32.mxu1 %vm3493_vm1, %v14167_v40 }
 0x2fa   : > { %v3468_v29 = vmax.f32 %v3372_v45, 0.0 }
 0x2fb   : > { %v3467_v26 = vmax.f32 %v3367_v44, 0.0 }
 0x2fc   : > { %v4217_v27 = vmax.f32 %v3466_v7, %v3468_v29 }
 0x2fd   : > { %v4216_v14 = vmax.f32 %v3465_v53, %v3467_v26 }
 0x307   : > { %v10513_v31 = vpop.f32.mrb[16].mxu1 }
 0x308   : > { %v3382_v25 = vadd.f32 %v10513_v31, %v14182_v58  ;;  %v3376_v34 = vpop.f32.mrb[17].mxu1 }
 0x309   : > { %v3377_v11 = vadd.f32 %v14182_v58, %v3376_v34  ;;  %v5898_v34 = vld [vmem:[%s17204_s3 + $0x118] sm:$0xff] }
 0x30a   : > { %v3470_v60 = vmax.f32 %v3382_v25, 0.0 }
 0x30b   : > { %v3469_v13 = vmax.f32 %v3377_v11, 0.0 }
 0x30c   : > { %v4219_v48 = vmax.f32 %v4217_v27, %v3470_v60 }
 0x30d   : > { %v4218_v52 = vmax.f32 %v4216_v14, %v3469_v13 }
 0x30f   : > { %v10516_v5 = vpop.f32.mrb[18].mxu1  ;;  %v10750_v23 = vpack.c.bf16 %v4219_v48, %v4218_v52  ;;  %v5900_v48 = vld [vmem:[%s17204_s3 + $0x128] sm:$0xff]  ;;  %v5902_v52 = vld [vmem:[%s17204_s3 + $0x138] sm:$0xff] }
 0x310   : > { %v3392_v35 = vadd.f32 %v10516_v5, %v14182_v58  ;;  %v3386_v36 = vpop.f32.mrb[19].mxu1 }
 0x311   : > { %v3387_v63 = vadd.f32 %v14182_v58, %v3386_v36  ;;  %10751 = vmatprep.subr.bf16.mxu1 %v10750_v23  ;;  %v14340_v36 = vpack.c.bf16 %v5902_v52, %v5900_v48 }
 0x312   : > { %v3472_v20 = vmax.f32 %v3392_v35, 0.0  ;;  %10753 = vmatpush3.bf16.msra.mxu1 %v10750_v23 }
 0x313   : > { %v3471_v56 = vmax.f32 %v3387_v63, 0.0  ;;  %10755 = vmatprep.subr.bf16.mxu1 %v10750_v23  ;;  %v5899_v63 = vld [vmem:[%s17204_s3 + $0x120] sm:$0xff] }
 0x314   : > { %v4453_v42 = vmax.f32 %v3470_v60, %v3472_v20  ;;  %v5901_v20 = vld [vmem:[%s17204_s3 + $0x130] sm:$0xff] }
 0x315   : > { %v4452_v43 = vmax.f32 %v3469_v13, %v3471_v56  ;;  %10603 = vmatmul.mubr.msk.f32.vlgmr.msra.gmra.mrb[50].mxu1 %vm3493_vm1, %v14199_v16  ;;  %v5904_v56 = vld [vmem:[%s17204_s3 + $0x148] sm:$0xff] }
 0x316   : > { %10757 = vmatpush3.bf16.msra.mxu1 %v10750_v23  ;;  %10609 = vmatprep.mubr.msk.f32.mxu1 %vm3493_vm1, %v14204_v1 }
 0x317   : > { %10759 = vmatprep.subr.bf16.mxu1 %v10750_v23 }
 0x319   : > { %10610 = vmatmul.mubr.msk.f32.vlgmr.msra.gmra.mrb[52].mxu1 %vm3493_vm1, %v14213_v19 }
 0x31a   : > { %v10519_v8 = vpop.f32.mrb[20].mxu1  ;;  %10761 = vmatpush3.bf16.msra.mxu1 %v10750_v23  ;;  %10616 = vmatprep.mubr.msk.f32.mxu1 %vm3493_vm1, %v14218_v33 }
 0x31b   : > { %v3402_v47 = vadd.f32 %v10519_v8, %v14182_v58  ;;  %v3396_v4 = vpop.f32.mrb[21].mxu1  ;;  %v5905_v8 = vld [vmem:[%s17204_s3 + $0x150] sm:$0xff] }
 0x31c   : > { %v3397_v39 = vadd.f32 %v14182_v58, %v3396_v4 }
 0x31d   : > { %v3474_v6 = vmax.f32 %v3402_v47, 0.0  ;;  %10617 = vmatmul.mubr.msk.f32.vlgmr.msra.gmra.mrb[54].mxu1 %vm3493_vm1, %v14227_v50  ;;  %v5910_v47 = vld [vmem:[%s17204_s3 + $0x178] sm:$0xff] }
 0x31e   : > { %v3473_v62 = vmax.f32 %v3397_v39, 0.0  ;;  %10630 = vmatprep.mubr.msk.f32.mxu1 %vm3493_vm1, %v14204_v1  ;;  %v5907_v39 = vld [vmem:[%s17204_s3 + $0x160] sm:$0xff] }
 0x31f   : > { %v4455_v30 = vmax.f32 %v4453_v42, %v3474_v6  ;;  %v5906_v42 = vld [vmem:[%s17204_s3 + $0x158] sm:$0xff] }
 0x320   : > { %v4454_v54 = vmax.f32 %v4452_v43, %v3473_v62  ;;  %v14361_v43 = vpack.c.bf16 %v5901_v20, %v5899_v63 }
 0x322   : > { %v10762_v28 = vpack.c.bf16 %v4455_v30, %v4454_v54  ;;  %v5914_v30 = vld [vmem:[%s17204_s3 + $0x198] sm:$0xff] }
 0x324   : > { %v10522_v55 = vpop.f32.mrb[22].mxu1  ;;  %10763 = vmatprep.subr.bf16.mxu0 %v10762_v28  ;;  %10767 = vmatprep.subr.bf16.mxu1 %v10762_v28 }
 0x325   : > { %v3412_v10 = vadd.f32 %v10522_v55, %v14182_v58  ;;  %v3406_v2 = vpop.f32.mrb[23].mxu1  ;;  %10765 = vmatpush3.bf16.msra.mxu0 %v10762_v28  ;;  %10769 = vmatpush3.bf16.msra.mxu1 %v10762_v28  ;;  %v5911_v55 = vld [vmem:[%s17204_s3 + $0x180] sm:$0xff] }
 0x326   : > { %v3407_v38 = vadd.f32 %v14182_v58, %v3406_v2  ;;  %10771 = vmatprep.subr.bf16.mxu0 %v10762_v28  ;;  %v5916_v2 = vld [vmem:[%s17204_s3 + $0x1a8] sm:$0xff] }
 0x327   : > { %v3476_v32 = vmax.f32 %v3412_v10, 0.0  ;;  %v5913_v10 = vld [vmem:[%s17204_s3 + $0x190] sm:$0xff] }
 0x328   : > { %v3475_v49 = vmax.f32 %v3407_v38, 0.0  ;;  %10624 = vmatmul.mubr.msk.f32.vlgmr.msra.gmra.mrb[54].mxu0 %vm3493_vm1, %v14199_v16  ;;  %10631 = vmatmul.mubr.msk.f32.vlgmr.msra.gmra.mrb[56].mxu1 %vm3493_vm1, %v14213_v19  ;;  %v5918_v38 = vld [vmem:[%s17204_s3 + $0x1b8] sm:$0xff] }
 0x329   : > { %v4689_v21 = vmax.f32 %v3474_v6, %v3476_v32  ;;  %10773 = vmatpush3.bf16.msra.mxu0 %v10762_v28  ;;  %10637 = vmatprep.mubr.msk.f32.mxu0 %vm3493_vm1, %v14218_v33  ;;  %v5909_v6 = vld [vmem:[%s17204_s3 + $0x170] sm:$0xff]  ;;  %v14425_v32 = vpack.c.bf16 %v5913_v10, %v5911_v55 }
 0x32a   : > { %v4688_v24 = vmax.f32 %v3473_v62, %v3475_v49  ;;  %10644 = vmatprep.mubr.msk.f32.mxu1 %vm3493_vm1, %v14167_v40  ;;  %v5912_v62 = vld [vmem:[%s17204_s3 + $0x188] sm:$0xff]  ;;  %v14405_v54 = vpack.c.bf16 %v5909_v6, %v5907_v39  ;;  %v14429_v49 = vpack.c.bf16 %v5918_v38, %v5916_v2 }
 0x32b   : > { %v14409_v28 = vpack.c.bf16 %v5914_v30, %v5912_v62  ;;  %v5297_v6 = vld [vmem:[#allocation4 + $0x2] sm:$0xff] }
 0x32c   : > { %v10525_v9 = vpop.f32.mrb[24].mxu1  ;;  %10638 = vmatmul.mubr.msk.f32.vlgmr.msra.gmra.mrb[56].mxu0 %vm3493_vm1, %v14227_v50  ;;  %v14532_v62 = vld [vmem:[%s17202_s1 + $0x25] ss:$0 sm:$0xff]  ;;  %v14536_v2 = vld [vmem:[#allocation4 + $0x8] sm:$0x1] }
 0x32d   : > { %v3422_v57 = vadd.f32 %v10525_v9, %v14182_v58  ;;  %v3416_v37 = vpop.f32.mrb[25].mxu1  ;;  %10651 = vmatprep.mubr.msk.f32.mxu0 %vm3493_vm1, %v14204_v1  ;;  %v5920_v9 = vld [vmem:[%s17204_s3 + $0x1c8] sm:$0xff]  ;;  %v5335_v10 = vmul.f32 %v14532_v62, %v5297_v6 }
 0x32e   : > { %v3417_v22 = vadd.f32 %v14182_v58, %v3416_v37  ;;  %v14538_v38 = vld [vmem:[#allocation4 + $0x9] sm:$0x1] }
 0x32f   : > { %v3478_v46 = vmax.f32 %v3422_v57, 0.0  ;;  %v5922_v57 = vld [vmem:[%s17204_s3 + $0x1d8] sm:$0xff] }
 0x330   : > { %v3477_v3 = vmax.f32 %v3417_v22, 0.0  ;;  %v14449_v22 = vpack.c.bf16 %v5922_v57, %v5920_v9  ;;  %v14548_v9 = vld [vmem:[%s17202_s1 + $0x26] ss:$0 sm:$0xff]  ;;  %v14553_v57 = vld [vmem:[%s17202_s1 + $0x1e] ss:$0 sm:$0xff] }
 0x331   : > { %v4691_v51 = vmax.f32 %v4689_v21, %v3478_v46  ;;  %v5915_v21 = vld [vmem:[%s17204_s3 + $0x1a0] sm:$0xff]  ;;  %17578 = vst [vmem:[#allocation28_spill] sm:$0xff] %v14553_v57 }
 0x332   : > { %v4690_v17 = vmax.f32 %v4688_v24, %v3477_v3  ;;  %v5917_v24 = vld [vmem:[%s17204_s3 + $0x1b0] sm:$0xff] }
 0x333   : > { %v14445_v37 = vpack.c.bf16 %v5917_v24, %v5915_v21  ;;  %v14543_v24 = vld [vmem:[%s17202_s1 + $0x1d] ss:$0 sm:$0xff] }
 0x334   : > { %v10774_v0 = vpack.c.bf16 %v4691_v51, %v4690_v17  ;;  %v5924_v51 = vld [vmem:[%s17204_s3 + $0x1e8] sm:$0xff]  ;;  %v5926_v17 = vld [vmem:[%s17204_s3 + $0x1f8] sm:$0xff] }
 0x336   : > { %10775 = vmatprep.subr.bf16.mxu1 %v10774_v0  ;;  %10779 = vmatprep.subr.bf16.mxu0 %v10774_v0 }
 0x337   : > { %v10528_v7 = vpop.f32.mrb[26].mxu1  ;;  %10777 = vmatpush3.bf16.msra.mxu1 %v10774_v0  ;;  %10781 = vmatpush3.bf16.msra.mxu0 %v10774_v0 }
 0x338   : > { %v3432_v53 = vadd.f32 %v10528_v7, %v14182_v58  ;;  %v3426_v61 = vpop.f32.mrb[27].mxu1  ;;  %10783 = vmatprep.subr.bf16.mxu1 %v10774_v0  ;;  %v14469_v7 = vpack.c.bf16 %v5926_v17, %v5924_v51 }
 0x339   : > { %v3427_v59 = vadd.f32 %v14182_v58, %v3426_v61  ;;  %v5925_v61 = vld [vmem:[%s17204_s3 + $0x1f0] sm:$0xff] }
 0x33a   : > { %v3480_v12 = vmax.f32 %v3432_v53, 0.0  ;;  %10645 = vmatmul.mubr.msk.f32.vlgmr.msra.gmra.mrb[58].mxu1 %vm3493_vm1, %v14199_v16  ;;  %10652 = vmatmul.mubr.msk.f32.vlgmr.msra.gmra.mrb[58].mxu0 %vm3493_vm1, %v14213_v19  ;;  %17574 = vst [vmem:[#allocation23_spill] sm:$0xff] %v14469_v7  ;;  %v5923_v53 = vld [vmem:[%s17204_s3 + $0x1e0] sm:$0xff] }
 0x33b   : > { %v3479_v41 = vmax.f32 %v3427_v59, 0.0  ;;  %10785 = vmatpush3.bf16.msra.mxu1 %v10774_v0  ;;  %10658 = vmatprep.mubr.msk.f32.mxu1 %vm3493_vm1, %v14218_v33  ;;  %v5864_v59 = vld [vmem:[%s17204_s3 + $0x8] sm:$0xff] }
 0x33c   : > { %v4925_v45 = vmax.f32 %v3478_v46, %v3480_v12  ;;  %10665 = vmatprep.mubr.msk.f32.mxu0 %vm3493_vm1, %v14167_v40  ;;  %v5896_v40 = vld [vmem:[%s17204_s3 + $0x108] sm:$0xff]  ;;  %v5919_v46 = vld [vmem:[%s17204_s3 + $0x1c0] sm:$0xff]  ;;  %v5866_v12 = vld [vmem:[%s17204_s3 + $0x18] sm:$0xff] }
 0x33d   : > { %v4924_v15 = vmax.f32 %v3477_v3, %v3479_v41  ;;  %v14323_v13 = vpack.c.bf16 %v5898_v34, %v5896_v40  ;;  %v5921_v3 = vld [vmem:[%s17204_s3 + $0x1d0] sm:$0xff]  ;;  %v14485_v41 = vpack.c.bf16 %v5925_v61, %v5923_v53 }
 0x33e   : > { %10659 = vmatmul.mubr.msk.f32.vlgmr.msra.gmra.mrb[60].mxu1 %vm3493_vm1, %v14227_v50  ;;  %v14465_v0 = vpack.c.bf16 %v5921_v3, %v5919_v46  ;;  %v14558_v46 = vld [vmem:[%s17202_s1 + $0x27] ss:$0 sm:$0xff] }
 0x33f   : > { %v10531_v44 = vpop.f32.mrb[28].mxu1  ;;  %10672 = vmatprep.mubr.msk.f32.mxu1 %vm3493_vm1, %v14204_v1  ;;  %v5895_v1 = vld [vmem:[%s17204_s3 + $0x100] sm:$0xff]  ;;  %17575 = vst [vmem:[#allocation24_spill] sm:$0xff] %v14485_v41 }
 0x340   : > { %v3442_v29 = vadd.f32 %v10531_v44, %v14182_v58  ;;  %v3436_v26 = vpop.f32.mrb[29].mxu1  ;;  %17573 = vst [vmem:[#allocation18_spill] sm:$0xff] %v14465_v0 }
 0x341   : > { %v3437_v27 = vadd.f32 %v14182_v58, %v3436_v26  ;;  %v5897_v58 = vld [vmem:[%s17204_s3 + $0x110] sm:$0xff] }
 0x342   : > { %v3482_v14 = vmax.f32 %v3442_v29, 0.0  ;;  %v14338_v35 = vpack.c.bf16 %v5897_v58, %v5895_v1  ;;  %v14502_v58 = vld [vmem:[%s17202_s1 + $0x1a] ss:$0 sm:$0xff] }
 0x343   : > { %v3481_v31 = vmax.f32 %v3437_v27, 0.0 }
 0x344   : > { %v4927_v25 = vmax.f32 %v4925_v45, %v3482_v14  ;;  %v10830_v45 = vpack.c.bf16 %v5866_v12, %v5864_v59  ;;  %v14566_v12 = vld [vmem:[#allocation4 + $0xa] sm:$0x1] }
 0x345   : > { %v4926_v11 = vmax.f32 %v4924_v15, %v3481_v31 }
 0x347   : > { %v10786_v60 = vpack.c.bf16 %v4927_v25, %v4926_v11  ;;  %v10534_v5 = vpop.f32.mrb[30].mxu1 }
 0x348   : > { %v3446_v23 = vpop.f32.mrb[31].mxu1  ;;  %v14508_v5 = vld [vmem:[%s17202_s1 + $0x1c] ss:$0 sm:$0xff] }
 0x349   : > { %10787 = vmatprep.subr.bf16.mxu0 %v10786_v60  ;;  %10791 = vmatprep.subr.bf16.mxu1 %v10786_v60  ;;  %v5316_v55 = vmul.f32 %v14508_v5, %v5297_v6 }
 0x34a   : > { %10789 = vmatpush3.bf16.msra.mxu0 %v10786_v60  ;;  %10793 = vmatpush3.bf16.msra.mxu1 %v10786_v60 }
 0x34b   : > { %10795 = vmatprep.subr.bf16.mxu0 %v10786_v60  ;;  %10799 = vmatprep.subr.bf16.mxu1 %v14323_v13 }
 0x34d   : > { %10666 = vmatmul.mubr.msk.f32.vlgmr.msra.gmra.mrb[60].mxu0 %vm3493_vm1, %v14199_v16  ;;  %10673 = vmatmul.mubr.msk.f32.vlgmr.msra.gmra.mrb[62].mxu1 %vm3493_vm1, %v14213_v19  ;;  %v14365_v16 = vpack.c.bf16 %v5906_v42, %v5904_v56  ;;  %v5903_v19 = vld [vmem:[%s17204_s3 + $0x140] sm:$0xff] }
 0x34e   : > { %10797 = vmatpush3.bf16.msra.mxu0 %v10786_v60  ;;  %10679 = vmatprep.mubr.msk.f32.mxu0 %vm3493_vm1, %v14218_v33  ;;  %v5908_v33 = vld [vmem:[%s17204_s3 + $0x168] sm:$0xff]  ;;  %v14385_v4 = vpack.c.bf16 %v5905_v8, %v5903_v19  ;;  %v14496_v60 = vld [vmem:[%s17202_s1 + $0x1b] ss:$0 sm:$0xff]  ;;  %v14516_v56 = vld [vmem:[%s17202_s1 + $0x23] ss:$0 sm:$0xff]  ;;  %v5184_v8 = vmul.f32 %v14169_v18, %v14502_v58 }
 0x34f   : > { %10801 = vmatpush1.bf16.msra.mxu1 %v14338_v35  ;;  %10863 = vmatprep.subr.bf16.mxu0 %v14323_v13  ;;  %17576 = vst [vmem:[#allocation25_spill] sm:$0xff] %v14516_v56  ;;  %v5217_v42 = vld [vmem:[#allocation4 + $0x1] sm:$0xff]  ;;  %v5204_v3 = vmul.f32 %v14516_v56, %v14536_v2 }
 0x350   : > { %10803 = vmatprep.subr.bf16.mxu1 %v14340_v36  ;;  %5991 = vmatprep.mubr.f32.mxu1 %v14169_v18  ;;  %v14521_v19 = vld [vmem:[%s17202_s1 + $0x24] ss:$0 sm:$0xff] }
 0x351   : > { %10680 = vmatmul.mubr.msk.f32.vlgmr.msra.gmra.mrb[62].mxu0 %vm3493_vm1, %v14227_v50  ;;  %v14389_v50 = vpack.c.bf16 %v5910_v47, %v5908_v33  ;;  %17577 = vst [vmem:[#allocation19_spill] sm:$0xff] %v14521_v19  ;;  %v5203_v33 = vmul.f32 %v14169_v18, %v14516_v56  ;;  %v5236_v47 = vmul.f32 %v14496_v60, %v5217_v42 }
 0x352   : > { %10865 = vmatpush1.bf16.msra.mxu0 %v14338_v35  ;;  %6252 = vmatprep.mubr.f32.mxu0 %v14169_v18  ;;  %v5255_v39 = vmul.f32 %v14521_v19, %v5217_v42  ;;  %v5256_v51 = vmul.f32 %v14521_v19, %v14538_v38  ;;  %v14579_v42 = vld [vmem:[%s17202_s1 + $0x1f] ss:$0 sm:$0xff] }
 0x353   : > { %10805 = vmatpush1.bf16.msra.mxu1 %v14361_v43  ;;  %10867 = vmatprep.subr.bf16.mxu0 %v14340_v36  ;;  %v5269_v21 = vadd.f32 %v5236_v47, %v5184_v8  ;;  %17579 = vst [vmem:[#allocation26_spill] sm:$0xff] %v14579_v42 }
 0x354   : > { %10807 = vmatprep.subr.bf16.mxu1 %v14365_v16  ;;  %v5283_v30 = vadd.f32 %v5255_v39, %v5203_v33 }
 0x356   : > { %10869 = vmatpush1.bf16.msra.mxu0 %v14361_v43  ;;  %v5363_v53 = vadd.f32 %v5335_v10, %v5283_v30 }
 0x357   : > { %10809 = vmatpush1.bf16.msra.mxu1 %v14385_v4  ;;  %10871 = vmatprep.subr.bf16.mxu0 %v14365_v16 }
 0x358   : > { %10811 = vmatprep.subr.bf16.mxu1 %v14389_v50 }
 0x35a   : > { %10873 = vmatpush1.bf16.msra.mxu0 %v14385_v4 }
 0x35b   : > { %10813 = vmatpush1.bf16.msra.mxu1 %v14405_v54  ;;  %10875 = vmatprep.subr.bf16.mxu0 %v14389_v50 }
 0x35c   : > { %10815 = vmatprep.subr.bf16.mxu1 %v14409_v28 }
 0x35e   : > { %10877 = vmatpush1.bf16.msra.mxu0 %v14405_v54 }
 0x35f   : > { %10817 = vmatpush1.bf16.msra.mxu1 %v14425_v32  ;;  %10879 = vmatprep.subr.bf16.mxu0 %v14409_v28 }
 0x360   : > { %10819 = vmatprep.subr.bf16.mxu1 %v14429_v49 }
 0x362   : > { %10881 = vmatpush1.bf16.msra.mxu0 %v14425_v32 }
 0x363   : > { %10821 = vmatpush1.bf16.msra.mxu1 %v14445_v37  ;;  %10883 = vmatprep.subr.bf16.mxu0 %v14429_v49 }
 0x364   : > { %10823 = vmatprep.subr.bf16.mxu1 %v14449_v22 }
 0x365   : > { %v10541_v15 = vpop.f32.mrb[32].mxu1 }
 0x366   : > { %10885 = vmatpush1.bf16.msra.mxu0 %v14445_v37  ;;  %v3566_v44 = vpop.f32.mrb[33].mxu1 }
 0x367   : > { %10825 = vmatpush1.bf16.msra.mxu1 %v14465_v0  ;;  %10887 = vmatprep.subr.bf16.mxu0 %v14449_v22 }
 0x368   : > { %10827 = vmatprep.subr.bf16.mxu1 %v14469_v7 }
 0x369   : > { %v10548_v29 = vpop.f32.mrb[34].mxu1 }
 0x36a   : > { %10889 = vmatpush1.bf16.msra.mxu0 %v14465_v0  ;;  %v3657_v26 = vmax.f32 %v10541_v15, %v10548_v29  ;;  %v3647_v27 = vpop.f32.mrb[35].mxu1 }
 0x36b   : > { %10829 = vmatpush1.bf16.msra.mxu1 %v14485_v41  ;;  %10891 = vmatprep.subr.bf16.mxu0 %v14469_v7  ;;  %v3656_v14 = vmax.f32 %v3566_v44, %v3647_v27  ;;  %v5284_v27 = vadd.f32 %v5256_v51, %v5204_v3 }
 0x36c   : > { %10831 = vmatprep.subr.bf16.mxu1 %v10830_v45 }
 0x36d   : > { %v10555_v31 = vpop.f32.mrb[36].mxu1 }
 0x36e   : > { %10893 = vmatpush1.bf16.msra.mxu0 %v14485_v41  ;;  %v3740_v25 = vmax.f32 %v3657_v26, %v10555_v31  ;;  %v3730_v40 = vpop.f32.mrb[37].mxu1 }
 0x36f   : > { %10895 = vmatprep.subr.bf16.mxu0 %v10830_v45  ;;  %v3739_v34 = vmax.f32 %v3656_v14, %v3730_v40  ;;  %v5349_v45 = vadd.f32 %v5316_v55, %v5269_v21  ;;  %v5336_v14 = vmul.f32 %v14532_v62, %v14566_v12 }
 0x370   : > { %3743 = vst [vmem:[#allocation4 + $0x18] sm:$0x7] %v3740_v25 }
 0x371   : > { %3742 = vst [vmem:[#allocation4 + $0x10] sm:$0xff] %v3739_v34  ;;  %v5186_v52 = vmul.f32 %v14502_v58, %v3739_v34  ;;  %v5396_v61 = vmul.f32 %v14543_v24, %v3739_v34  ;;  %v5415_v59 = vmul.f32 %v14548_v9, %v3739_v34  ;;  %v5205_v40 = vmul.f32 %v14516_v56, %v3739_v34 }
 0x372   : > { %v5364_v34 = vadd.f32 %v5336_v14, %v5284_v27 }
 0x373   : > { %v5443_v25 = vadd.f32 %v5415_v59, %v5363_v53  ;;  %v14599_v53 = vld [vmem:[%s17202_s1 + $0x29] ss:$0 sm:$0xff] }
 0x378   : > { %v5457_v11 = vld [vmem:[#allocation4 + $0x11] sm:$0xff] }
 0x379   : > { %v5238_v1 = vmul.f32 %v14496_v60, %v5457_v11  ;;  %v5537_v48 = vld [vmem:[#allocation4 + $0x12] sm:$0xff]  ;;  %v5476_v44 = vmul.f32 %v14553_v57, %v5457_v11  ;;  %v5495_v29 = vmul.f32 %v14558_v46, %v5457_v11  ;;  %v5257_v26 = vmul.f32 %v14521_v19, %v5457_v11  ;;  %v14584_v11 = vld [vmem:[%s17202_s1 + $0x28] ss:$0 sm:$0xff] }
 0x37a   : > { %v5318_v23 = vmul.f32 %v14508_v5, %v5537_v48  ;;  %v5556_v55 = vmul.f32 %v14579_v42, %v5537_v48  ;;  %v5575_v10 = vmul.f32 %v14584_v11, %v5537_v48  ;;  %v5337_v21 = vmul.f32 %v14532_v62, %v5537_v48 }
 0x37b   : > { %v5271_v63 = vadd.f32 %v5238_v1, %v5186_v52  ;;  %v14574_v1 = vld [vmem:[#allocation4 + $0x18] sm:$0x1]  ;;  %v5429_v52 = vadd.f32 %v5396_v61, %v5349_v45  ;;  %v5523_v33 = vadd.f32 %v5495_v29, %v5443_v25  ;;  %v5285_v47 = vadd.f32 %v5257_v26, %v5205_v40 }
 0x37c   : > { %v5416_v6 = vmul.f32 %v14548_v9, %v14574_v1 }
 0x37d   : > { %v14511_v20 = vadd.f32 %v5318_v23, %v5271_v63  ;;  %v5509_v39 = vadd.f32 %v5476_v44, %v5429_v52  ;;  %v5603_v59 = vadd.f32 %v5575_v10, %v5523_v33  ;;  %v5365_v45 = vadd.f32 %v5337_v21, %v5285_v47  ;;  %v14619_v33 = vld [vmem:[%s17202_s1 + $0x2a] ss:$0 sm:$0xff]  ;;  %v5863_v21 = vld [vmem:[%s17204_s3] sm:$0xff] }
 0x37e   : > { %v5444_v48 = vadd.f32 %v5416_v6, %v5364_v34 }
 0x37f   : > { %v5589_v44 = vadd.f32 %v5556_v55, %v5509_v39 }
 0x394   : > { %v10562_v17 = vpop.f32.mrb[38].mxu1 }
 0x395   : > { %v3814_v15 = vpop.f32.mrb[39].mxu1 }
 0x398   : > { %v10569_v31 = vpop.f32.mrb[40].mxu1 }
 0x399   : > { %v3899_v23 = vmax.f32 %v10562_v17, %v10569_v31  ;;  %v3889_v63 = vpop.f32.mrb[41].mxu1  ;;  %v14594_v17 = vld [vmem:[%s17202_s1 + $0x20] ss:$0 sm:$0xff] }
 0x39a   : > { %v3898_v8 = vmax.f32 %v3814_v15, %v3889_v63  ;;  %v14601_v15 = vld [vmem:[#allocation4 + $0x19] sm:$0x1]  ;;  %v14614_v63 = vld [vmem:[#allocation4 + $0x1a] sm:$0x1] }
 0x39b   : > { %v5496_v31 = vmul.f32 %v14558_v46, %v14601_v15  ;;  %v5576_v47 = vmul.f32 %v14584_v11, %v14614_v63 }
 0x39c   : > { %v10576_v30 = vpop.f32.mrb[42].mxu1 }
 0x39d   : > { %v3976_v3 = vmax.f32 %v3899_v23, %v10576_v30  ;;  %v3966_v51 = vpop.f32.mrb[43].mxu1 }
 0x39e   : > { %v3975_v61 = vmax.f32 %v3898_v8, %v3966_v51  ;;  %v5524_v8 = vadd.f32 %v5496_v31, %v5444_v48 }
 0x39f   : > { %3979 = vst [vmem:[#allocation4 + $0x28] sm:$0x7] %v3976_v3  ;;  %v5865_v3 = vld [vmem:[%s17204_s3 + $0x10] sm:$0xff] }
 0x3a0   : > { %3978 = vst [vmem:[#allocation4 + $0x20] sm:$0xff] %v3975_v61  ;;  %v5636_v29 = vmul.f32 %v14594_v17, %v3975_v61  ;;  %v5655_v26 = vmul.f32 %v14599_v53, %v3975_v61  ;;  %v5398_v27 = vmul.f32 %v14543_v24, %v3975_v61  ;;  %v5417_v14 = vmul.f32 %v14548_v9, %v3975_v61  ;;  %v5868_v61 = vld [vmem:[%s17204_s3 + $0x28] sm:$0xff] }
 0x3a1   : > { %v5604_v51 = vadd.f32 %v5576_v47, %v5524_v8 }
 0x3a2   : > { %v5683_v25 = vadd.f32 %v5655_v26, %v5603_v59  ;;  %v14609_v40 = vadd.f32 %v5417_v14, %v5365_v45  ;;  %v14611_v52 = vadd.f32 %v5636_v29, %v5589_v44  ;;  %v5431_v23 = vadd.f32 %v5398_v27, %v14511_v20  ;;  %v14634_v20 = vld [vmem:[%s17202_s1 + $0x2b] ss:$0 sm:$0xff]  ;;  %v5870_v59 = vld [vmem:[%s17204_s3 + $0x38] sm:$0xff]  ;;  %v5867_v14 = vld [vmem:[%s17204_s3 + $0x20] sm:$0xff] }
 0x3a3   : > { %v14658_v27 = vpack.c.bf16 %v5865_v3, %v5863_v21  ;;  %v14665_v47 = vpack.c.bf16 %v5870_v59, %v5868_v61 }
 0x3a6   : > { %v14623_v39 = vld [vmem:[#allocation4 + $0x28] sm:$0x1]  ;;  %v14625_v34 = vld [vmem:[#allocation4 + $0x29] sm:$0x1]  ;;  %v14663_v31 = vld [vmem:[#allocation4 + $0x2a] sm:$0x1] }
 0x3a7   : > { %v14627_v6 = vld [vmem:[#allocation4 + $0x21] sm:$0xff]  ;;  %v5656_v55 = vmul.f32 %v14599_v53, %v14623_v39  ;;  %v5736_v45 = vmul.f32 %v14619_v33, %v14625_v34  ;;  %v5816_v61 = vmul.f32 %v14634_v20, %v14663_v31 }
 0x3a8   : > { %v14629_v30 = vld [vmem:[#allocation4 + $0x22] sm:$0xff]  ;;  %v5735_v10 = vmul.f32 %v14619_v33, %v14627_v6  ;;  %v5478_v29 = vmul.f32 %v14553_v57, %v14627_v6 }
 0x3a9   : > { %v5815_v48 = vmul.f32 %v14634_v20, %v14629_v30  ;;  %v5684_v26 = vadd.f32 %v5656_v55, %v5604_v51  ;;  %v5874_v55 = vld [vmem:[%s17204_s3 + $0x58] sm:$0xff]  ;;  %v5169_v3 = vld [vmem:[#allocation4 + $0x20] sm:$0xff]  ;;  %v5558_v51 = vmul.f32 %v14579_v42, %v14629_v30 }
 0x3aa   : > { %v5763_v44 = vadd.f32 %v5735_v10, %v5683_v25  ;;  %v5869_v25 = vld [vmem:[%s17204_s3 + $0x30] sm:$0xff]  ;;  %v5872_v10 = vld [vmem:[%s17204_s3 + $0x48] sm:$0xff]  ;;  %v5511_v59 = vadd.f32 %v5478_v29, %v5431_v23  ;;  %v5207_v29 = vmul.f32 %v14516_v56, %v5169_v3  ;;  %v5188_v41 = vmul.f32 %v14502_v58, %v5169_v3  ;;  %v5882_v3 = vld [vmem:[%s17204_s3 + $0x98] sm:$0xff] }
 0x3ab   : > { %v5764_v21 = vadd.f32 %v5736_v45, %v5684_v26  ;;  %v5871_v45 = vld [vmem:[%s17204_s3 + $0x40] sm:$0xff]  ;;  %v5873_v26 = vld [vmem:[%s17204_s3 + $0x50] sm:$0xff] }
 0x3ac   : > { %v5843_v8 = vadd.f32 %v5815_v48, %v5763_v44  ;;  %v14681_v44 = vpack.c.bf16 %v5869_v25, %v5867_v14  ;;  %v14683_v48 = vpack.c.bf16 %v5874_v55, %v5872_v10  ;;  %v14693_v23 = vadd.f32 %v5558_v51, %v5511_v59  ;;  %v5876_v25 = vld [vmem:[%s17204_s3 + $0x68] sm:$0xff]  ;;  %v5878_v10 = vld [vmem:[%s17204_s3 + $0x78] sm:$0xff] }
 0x3ad   : > { %v5259_v14 = vmul.f32 %v14521_v19, %v14627_v6  ;;  %v5185_v55 = vmul.f32 %v14502_v58, %v14536_v2  ;;  %v14711_v59 = vpack.c.bf16 %v5873_v26, %v5871_v45  ;;  %v14716_v7 = vpack.c.bf16 %v5878_v10, %v5876_v25  ;;  %v5875_v2 = vld [vmem:[%s17204_s3 + $0x60] sm:$0xff] }
 0x3ae   : > { %5992 = vmatmul.mubr.f32.vlgmr.msra.gmra.mrb[64].mxu1 %v5843_v8  ;;  %v5844_v8 = vadd.f32 %v5816_v61, %v5764_v21  ;;  %v5237_v21 = vmul.f32 %v14496_v60, %v14538_v38  ;;  %v5339_v61 = vmul.f32 %v14532_v62, %v14629_v30  ;;  %v5877_v38 = vld [vmem:[%s17204_s3 + $0x70] sm:$0xff]  ;;  %v5240_v45 = vmul.f32 %v14496_v60, %v14627_v6 }
 0x3af   : > { %10833 = vmatpush1.bf16.msra.mxu1 %v14658_v27  ;;  %5997 = vmatprep.mubr.f32.mxu1 %v14169_v18  ;;  %v5287_v51 = vadd.f32 %v5259_v14, %v5207_v29  ;;  %17580 = vst [vmem:[#allocation15_spill] sm:$0xff] %v14711_v59  ;;  %17581 = vst [vmem:[#allocation21_spill] sm:$0xff] %v14716_v7  ;;  %v5317_v29 = vmul.f32 %v14508_v5, %v14566_v12  ;;  %v5881_v12 = vld [vmem:[%s17204_s3 + $0x90] sm:$0xff] }
 0x3b0   : > { %10835 = vmatprep.subr.bf16.mxu1 %v14665_v47  ;;  %v5270_v26 = vadd.f32 %v5237_v21, %v5185_v55  ;;  %v5273_v14 = vadd.f32 %v5240_v45, %v5188_v41  ;;  %v5320_v25 = vmul.f32 %v14508_v5, %v14629_v30  ;;  %v14739_v10 = vpack.c.bf16 %v5877_v38, %v5875_v2  ;;  %v5884_v55 = vld [vmem:[%s17204_s3 + $0xa8] sm:$0xff]  ;;  %v5886_v21 = vld [vmem:[%s17204_s3 + $0xb8] sm:$0xff] }
 0x3b1   : > { %v5397_v38 = vmul.f32 %v14543_v24, %v14574_v1  ;;  %v5888_v1 = vld [vmem:[%s17204_s3 + $0xc8] sm:$0xff] }
 0x3b2   : > { %5998 = vmatmul.mubr.f32.gmra.mrb[66].mxu1 %v5844_v8  ;;  %v14724_v8 = vadd.f32 %v5339_v61, %v5287_v51  ;;  %17582 = vst [vmem:[#allocation29_spill] sm:$0xff] %v14739_v10  ;;  %v5879_v61 = vld [vmem:[%s17204_s3 + $0x80] sm:$0xff]  ;;  %v14750_v41 = vadd.f32 %v5320_v25, %v5273_v14  ;;  %v5350_v2 = vadd.f32 %v5317_v29, %v5270_v26  ;;  %v5885_v14 = vld [vmem:[%s17204_s3 + $0xb0] sm:$0xff]  ;;  %v5890_v26 = vld [vmem:[%s17204_s3 + $0xd8] sm:$0xff] }
 0x3b3   : > { %10837 = vmatpush1.bf16.msra.mxu1 %v14681_v44  ;;  %6068 = vmatprep.mubr.f32.mxu1 %v14169_v18  ;;  %v5880_v18 = vld [vmem:[%s17204_s3 + $0x88] sm:$0xff]  ;;  %v14761_v45 = vpack.c.bf16 %v5881_v12, %v5879_v61  ;;  %v5887_v61 = vld [vmem:[%s17204_s3 + $0xc0] sm:$0xff]  ;;  %v5889_v12 = vld [vmem:[%s17204_s3 + $0xd0] sm:$0xff] }
 0x3b4   : > { %10839 = vmatprep.subr.bf16.mxu1 %v14683_v48  ;;  %v14742_v51 = vpack.c.bf16 %v5882_v3, %v5880_v18  ;;  %v14764_v18 = vpack.c.bf16 %v5886_v21, %v5884_v55  ;;  %v5883_v3 = vld [vmem:[%s17204_s3 + $0xa0] sm:$0xff]  ;;  %v5430_v29 = vadd.f32 %v5397_v38, %v5350_v2  ;;  %v5477_v55 = vmul.f32 %v14553_v57, %v14601_v15  ;;  %v14792_v2 = vld [vmem:[#allocation4 + $0x18] sm:$0x1]  ;;  %v14794_v38 = vld [vmem:[#allocation4 + $0x19] sm:$0x1] }
 0x3b5   : > { %17584 = vst [vmem:[#allocation27_spill] sm:$0xff] %v14761_v45  ;;  %v14779_v25 = vpack.c.bf16 %v5885_v14, %v5883_v3  ;;  %v14790_v21 = vpack.c.bf16 %v5890_v26, %v5888_v1  ;;  %v14799_v3 = vld [vmem:[%s17202_s1 + $0x21] ss:$0 sm:$0xff]  ;;  %v5892_v14 = vld [vmem:[%s17204_s3 + $0xe8] sm:$0xff]  ;;  %v5894_v15 = vld [vmem:[%s17204_s3 + $0xf8] sm:$0xff]  ;;  %v14807_v26 = vpack.c.bf16 %v5889_v12, %v5887_v61  ;;  %v5206_v57 = vmul.f32 %v14516_v56, %v14792_v2 }
 0x3b6   : > { %17583 = vst [vmem:[#allocation22_spill] sm:$0xff] %v14742_v51  ;;  %17585 = vst [vmem:[#allocation8_spill] sm:$0xff] %v14764_v18  ;;  %v5258_v0 = vmul.f32 %v14521_v19, %v14794_v38  ;;  %v5497_v61 = vmul.f32 %v14558_v46, %v14627_v6  ;;  %v14823_v12 = vpack.c.bf16 %v5894_v15, %v5892_v14  ;;  %v14833_v19 = vld [vmem:[#allocation4 + $0x28] sm:$0x1]  ;;  %v14838_v14 = vld [vmem:[%s17202_s1 + $0x22] ss:$0 sm:$0xff] }
 0x3b7   : > { %10841 = vmatpush1.bf16.msra.mxu1 %v14711_v59  ;;  %17586 = vst [vmem:[#allocation20_spill] sm:$0xff] %v14779_v25  ;;  %17587 = vst [vmem:[#allocation30_spill] sm:$0xff] %v14790_v21 }
 0x3b8   : > { %10843 = vmatprep.subr.bf16.mxu1 %v14716_v7  ;;  %17588 = vst [vmem:[#allocation6_spill] sm:$0xff] %v14799_v3  ;;  %17589 = vst [vmem:[#allocation10_spill] sm:$0xff] %v14807_v26  ;;  %v5286_v7 = vadd.f32 %v5258_v0, %v5206_v57  ;;  %v5796_v0 = vmul.f32 %v14838_v14, %v14629_v30  ;;  %v5577_v57 = vmul.f32 %v14584_v11, %v14629_v30 }
 0x3b9   : > { %17590 = vst [vmem:[#allocation9_spill] sm:$0xff] %v14823_v12  ;;  %17591 = vst [vmem:[#allocation12_spill] sm:$0xff] %v14838_v14 }
 0x3bb   : > { %10845 = vmatpush1.bf16.msra.mxu1 %v14739_v10  ;;  %v5637_v10 = vmul.f32 %v14594_v17, %v14623_v39  ;;  %v5893_v39 = vld [vmem:[%s17204_s3 + $0xf0] sm:$0xff] }
 0x3bc   : > { %10847 = vmatprep.subr.bf16.mxu1 %v14742_v51  ;;  %v5557_v51 = vmul.f32 %v14579_v42, %v14614_v63  ;;  %v5891_v63 = vld [vmem:[%s17204_s3 + $0xe0] sm:$0xff]  ;;  %v14831_v42 = vld [vmem:[#allocation4 + $0x1a] sm:$0x1] }
 0x3bd   : > { %v14841_v15 = vpack.c.bf16 %v5893_v39, %v5891_v63  ;;  %v14858_v39 = vld [vmem:[#allocation4 + $0x29] sm:$0x1] }
 0x3bf   : > { %10849 = vmatpush1.bf16.msra.mxu1 %v14761_v45  ;;  %17592 = vst [vmem:[#allocation14_spill] sm:$0xff] %v14841_v15 }
 0x3c0   : > { %10851 = vmatprep.subr.bf16.mxu1 %v14764_v18  ;;  %v5510_v18 = vadd.f32 %v5477_v55, %v5430_v29  ;;  %v5716_v29 = vmul.f32 %v14799_v3, %v14627_v6 }
 0x3c2   : > { %v5590_v55 = vadd.f32 %v5557_v51, %v5510_v18  ;;  %v5525_v51 = vadd.f32 %v5497_v61, %v14609_v40  ;;  %v5749_v18 = vadd.f32 %v5716_v29, %v14611_v52 }
 0x3c3   : > { %v10583_v1 = vpop.f32.mrb[44].mxu1  ;;  %10853 = vmatpush1.bf16.msra.mxu1 %v14779_v25 }
 0x3c4   : > { %v4050_v45 = vpop.f32.mrb[45].mxu1  ;;  %10855 = vmatprep.subr.bf16.mxu1 %v14790_v21  ;;  %v5670_v21 = vadd.f32 %v5637_v10, %v5590_v55  ;;  %v5605_v29 = vadd.f32 %v5577_v57, %v5525_v51  ;;  %v5829_v61 = vadd.f32 %v5796_v0, %v5749_v18  ;;  %v5797_v55 = vmul.f32 %v14838_v14, %v14663_v31  ;;  %v14873_v51 = vld [vmem:[#allocation4 + $0x2a] sm:$0x1] }
 0x3c5   : > { %v5498_v31 = vmul.f32 %v14558_v46, %v14858_v39 }
 0x3c7   : > { %v10590_v25 = vpop.f32.mrb[46].mxu1  ;;  %10857 = vmatpush1.bf16.msra.mxu1 %v14807_v26  ;;  %v5418_v26 = vmul.f32 %v14548_v9, %v14833_v19 }
 0x3c8   : > { %v4135_v56 = vmax.f32 %v10583_v1, %v10590_v25  ;;  %v4125_v6 = vpop.f32.mrb[47].mxu1  ;;  %10859 = vmatprep.subr.bf16.mxu1 %v14823_v12  ;;  %v5717_v25 = vmul.f32 %v14799_v3, %v14625_v34  ;;  %v5338_v1 = vmul.f32 %v14532_v62, %v14831_v42 }
 0x3c9   : > { %v4134_v59 = vmax.f32 %v4050_v45, %v4125_v6 }
 0x3ca   : > { %v5750_v52 = vadd.f32 %v5717_v25, %v5670_v21  ;;  %v5366_v45 = vadd.f32 %v5338_v1, %v5286_v7 }
 0x3cb   : > { %v10597_v63 = vpop.f32.mrb[48].mxu1  ;;  %10861 = vmatpush1.bf16.msra.mxu1 %v14841_v15 }
 0x3cc   : > { %v4212_v40 = vmax.f32 %v4135_v56, %v10597_v63  ;;  %v4202_v10 = vpop.f32.mrb[49].mxu1  ;;  %10927 = vmatprep.subr.bf16.mxu1 %v14323_v13  ;;  %v5446_v6 = vadd.f32 %v5418_v26, %v5366_v45  ;;  %v14867_v13 = vld [vmem:[#allocation3] sm:$0xff]  ;;  %v5830_v21 = vadd.f32 %v5797_v55, %v5750_v52  ;;  %v5578_v63 = vmul.f32 %v14584_v11, %v14873_v51 }
 0x3cd   : > { %v4211_v34 = vmax.f32 %v4134_v59, %v4202_v10  ;;  %v5239_v55 = vmul.f32 %v14496_v60, %v14794_v38  ;;  %v14932_v38 = vld [vmem:[#allocation4 + $0x29] sm:$0x1] }
 0x3ce   : > { %4215 = vst [vmem:[#allocation4 + $0x38] sm:$0x7] %v4212_v40  ;;  %6069 = vmatmul.mubr.f32.vlgmr.msra.gmra.mrb[64].mxu1 %v5829_v61  ;;  %v5526_v1 = vadd.f32 %v5498_v31, %v5446_v6  ;;  %v5399_v31 = vmul.f32 %v14543_v24, %v14833_v19  ;;  %v17600_v19 = vld [vmem:[#allocation28_spill] sm:$0xff] }
 0x3cf   : > { %4214 = vst [vmem:[#allocation4 + $0x30] sm:$0xff] %v4211_v34  ;;  %v5638_v56 = vmul.f32 %v14594_v17, %v4211_v34  ;;  %v5657_v30 = vmul.f32 %v14599_v53, %v4211_v34  ;;  %v5419_v7 = vmul.f32 %v14548_v9, %v4211_v34  ;;  %v5400_v59 = vmul.f32 %v14543_v24, %v4211_v34 }
 0x3d0   : > { %10929 = vmatpush1.bf16.msra.mxu1 %v14338_v35  ;;  %6074 = vmatprep.mubr.f32.mxu1 %v14867_v13  ;;  %v5606_v0 = vadd.f32 %v5578_v63, %v5526_v1  ;;  %v17595_v63 = vld [vmem:[#allocation18_spill] sm:$0xff] }
 0x3d1   : > { %v5685_v26 = vadd.f32 %v5657_v30, %v5605_v29  ;;  %10931 = vmatprep.subr.bf16.mxu1 %v14340_v36  ;;  %v14876_v18 = vadd.f32 %v5638_v56, %v14693_v23  ;;  %v14879_v25 = vadd.f32 %v5419_v7, %v14724_v8  ;;  %v14882_v35 = vadd.f32 %v5400_v59, %v14750_v41  ;;  %v17593_v30 = vld [vmem:[#allocation15_spill] sm:$0xff]  ;;  %v6360_v7 = vld [vmem:[%s17204_s3 + $0x8] sm:$0xff] }
 0x3d2   : > { %6075 = vmatmul.mubr.f32.gmra.mrb[66].mxu1 %v5830_v21  ;;  %v17594_v59 = vld [vmem:[#allocation21_spill] sm:$0xff]  ;;  %v5319_v21 = vmul.f32 %v14508_v5, %v14831_v42 }
 0x3d3   : > { %6487 = vmatprep.mubr.f32.mxu1 %v14867_v13 }
 0x3d4   : > { %10933 = vmatpush1.bf16.msra.mxu1 %v14361_v43 }
 0x3d5   : > { %v14888_v36 = vld [vmem:[#allocation4 + $0x38] sm:$0x1]  ;;  %10935 = vmatprep.subr.bf16.mxu1 %v14365_v16  ;;  %v14897_v57 = vld [vmem:[#allocation4 + $0x39] sm:$0x1]  ;;  %v14907_v45 = vld [vmem:[#allocation4 + $0x3a] sm:$0x1] }
 0x3d6   : > { %v14891_v23 = vld [vmem:[#allocation4 + $0x31] sm:$0xff]  ;;  %v5658_v41 = vmul.f32 %v14599_v53, %v14888_v36  ;;  %v5738_v52 = vmul.f32 %v14619_v33, %v14897_v57  ;;  %v5818_v61 = vmul.f32 %v14634_v20, %v14907_v45 }
 0x3d7   : > { %v14893_v8 = vld [vmem:[#allocation4 + $0x32] sm:$0xff]  ;;  %v5737_v43 = vmul.f32 %v14619_v33, %v14891_v23  ;;  %v5499_v42 = vmul.f32 %v14558_v46, %v14891_v23 }
 0x3d8   : > { %v5686_v40 = vadd.f32 %v5658_v41, %v5606_v0  ;;  %10937 = vmatpush1.bf16.msra.mxu1 %v14385_v4  ;;  %v5817_v16 = vmul.f32 %v14634_v20, %v14893_v8  ;;  %v5322_v56 = vmul.f32 %v14508_v5, %v14893_v8  ;;  %v17596_v0 = vld [vmem:[#allocation25_spill] sm:$0xff] }
 0x3d9   : > { %v5765_v10 = vadd.f32 %v5737_v43, %v5685_v26  ;;  %10939 = vmatprep.subr.bf16.mxu1 %v14389_v50  ;;  %v5171_v50 = vld [vmem:[#allocation4 + $0x30] sm:$0xff]  ;;  %v17597_v43 = vld [vmem:[#allocation19_spill] sm:$0xff] }
 0x3da   : > { %v5766_v29 = vadd.f32 %v5738_v52, %v5686_v40  ;;  %v5260_v40 = vmul.f32 %v17597_v43, %v14932_v38 }
 0x3db   : > { %v5845_v34 = vadd.f32 %v5817_v16, %v5765_v10  ;;  %v17598_v16 = vld [vmem:[#allocation23_spill] sm:$0xff] }
 0x3dc   : > { %10941 = vmatpush1.bf16.msra.mxu1 %v14405_v54  ;;  %v5846_v4 = vadd.f32 %v5818_v61, %v5766_v29  ;;  %v5187_v54 = vmul.f32 %v14502_v58, %v14792_v2  ;;  %v14930_v2 = vld [vmem:[#allocation4 + $0x28] sm:$0x1]  ;;  %v17602_v61 = vld [vmem:[#allocation22_spill] sm:$0xff] }
 0x3dd   : > { %6253 = vmatmul.mubr.f32.vlgmr.msra.gmra.mrb[64].mxu0 %v5845_v34  ;;  %10943 = vmatprep.subr.bf16.mxu1 %v14409_v28  ;;  %v5190_v28 = vmul.f32 %v14502_v58, %v5171_v50  ;;  %v5208_v41 = vmul.f32 %v17596_v0, %v14930_v2  ;;  %v5480_v34 = vmul.f32 %v17600_v19, %v14891_v23  ;;  %v17601_v29 = vld [vmem:[#allocation29_spill] sm:$0xff] }
 0x3de   : > { %10897 = vmatpush1.bf16.msra.mxu0 %v14658_v27  ;;  %6258 = vmatprep.mubr.f32.mxu0 %v14867_v13  ;;  %v5272_v6 = vadd.f32 %v5239_v55, %v5187_v54  ;;  %v14964_v55 = vld [vmem:[#allocation4 + $0x2a] sm:$0x1] }
 0x3df   : > { %10899 = vmatprep.subr.bf16.mxu0 %v14665_v47 }
 0x3e0   : > { %10945 = vmatpush1.bf16.msra.mxu1 %v14425_v32  ;;  %v5242_v32 = vmul.f32 %v14496_v60, %v14891_v23  ;;  %v5352_v10 = vadd.f32 %v5319_v21, %v5272_v6  ;;  %v5527_v21 = vadd.f32 %v5499_v42, %v14879_v25  ;;  %v5579_v25 = vmul.f32 %v14584_v11, %v14893_v8 }
 0x3e1   : > { %6259 = vmatmul.mubr.f32.gmra.mrb[66].mxu0 %v5846_v4  ;;  %10947 = vmatprep.subr.bf16.mxu1 %v14429_v49 }
 0x3e2   : > { %10901 = vmatpush1.bf16.msra.mxu0 %v14681_v44  ;;  %6329 = vmatprep.mubr.f32.mxu0 %v14867_v13  ;;  %v5275_v49 = vadd.f32 %v5242_v32, %v5190_v28  ;;  %v5432_v54 = vadd.f32 %v5399_v31, %v5352_v10  ;;  %v14966_v28 = vld [vmem:[#allocation4 + $0x38] sm:$0x1]  ;;  %v5340_v10 = vmul.f32 %v14532_v62, %v14964_v55 }
 0x3e3   : > { %10903 = vmatprep.subr.bf16.mxu0 %v14683_v48  ;;  %v17604_v31 = vld [vmem:[#allocation27_spill] sm:$0xff] }
 0x3e4   : > { %10949 = vmatpush1.bf16.msra.mxu1 %v14445_v37  ;;  %v6362_v37 = vld [vmem:[%s17204_s3 + $0x18] sm:$0xff]  ;;  %v14948_v26 = vadd.f32 %v5322_v56, %v5275_v49  ;;  %v17603_v49 = vld [vmem:[#allocation24_spill] sm:$0xff]  ;;  %v5288_v56 = vadd.f32 %v5260_v40, %v5208_v41 }
 0x3e5   : > { %10951 = vmatprep.subr.bf16.mxu1 %v14449_v22  ;;  %v14958_v52 = vpack.c.bf16 %v6362_v37, %v6360_v7  ;;  %v5479_v37 = vmul.f32 %v17600_v19, %v14858_v39  ;;  %v17606_v39 = vld [vmem:[#allocation26_spill] sm:$0xff] }
 0x3e6   : > { %10905 = vmatpush1.bf16.msra.mxu0 %v17593_v30  ;;  %v5559_v40 = vmul.f32 %v17606_v39, %v14873_v51  ;;  %v14991_v51 = vld [vmem:[#allocation4 + $0x39] sm:$0x1] }
 0x3e7   : > { %10907 = vmatprep.subr.bf16.mxu0 %v17594_v59  ;;  %17599 = vst [vmem:[#allocation11_spill] sm:$0xff] %v14958_v52  ;;  %v5512_v41 = vadd.f32 %v5479_v37, %v5432_v54  ;;  %v5639_v54 = vmul.f32 %v14594_v17, %v14888_v36  ;;  %v5607_v37 = vadd.f32 %v5579_v25, %v5527_v21  ;;  %v6627_v21 = vld [vmem:[%s17204_s3 + $0x108] sm:$0xff]  ;;  %v15011_v25 = vld [vmem:[#allocation4 + $0x3a] sm:$0x1] }
 0x3e8   : > { %v10604_v22 = vpop.f32.mrb[50].mxu1  ;;  %10953 = vmatpush1.bf16.msra.mxu1 %v17595_v63  ;;  %v5513_v63 = vadd.f32 %v5480_v34, %v14882_v35  ;;  %v5560_v35 = vmul.f32 %v17606_v39, %v14893_v8 }
 0x3e9   : > { %v4286_v1 = vpop.f32.mrb[51].mxu1  ;;  %10955 = vmatprep.subr.bf16.mxu1 %v17598_v16  ;;  %v17605_v16 = vld [vmem:[#allocation8_spill] sm:$0xff] }
 0x3ea   : > { %10909 = vmatpush1.bf16.msra.mxu0 %v17601_v29  ;;  %v5368_v29 = vadd.f32 %v5340_v10, %v5288_v56  ;;  %v17608_v56 = vld [vmem:[#allocation30_spill] sm:$0xff] }
 0x3eb   : > { %10911 = vmatprep.subr.bf16.mxu0 %v17602_v61 }
 0x3ec   : > { %v10611_v4 = vpop.f32.mrb[52].mxu1  ;;  %10957 = vmatpush1.bf16.msra.mxu1 %v17603_v49 }
 0x3ed   : > { %v4371_v32 = vmax.f32 %v10604_v22, %v10611_v4  ;;  %v4361_v6 = vpop.f32.mrb[53].mxu1  ;;  %10959 = vmatprep.subr.bf16.mxu1 %v14958_v52  ;;  %v5420_v22 = vmul.f32 %v14548_v9, %v14966_v28  ;;  %v5209_v4 = vmul.f32 %v17596_v0, %v5171_v50  ;;  %v5593_v52 = vadd.f32 %v5560_v35, %v5513_v63 }
 0x3ee   : > { %v4370_v7 = vmax.f32 %v4286_v1, %v4361_v6  ;;  %10913 = vmatpush1.bf16.msra.mxu0 %v17604_v31  ;;  %v5261_v6 = vmul.f32 %v17597_v43, %v14891_v23  ;;  %v17607_v31 = vld [vmem:[#allocation20_spill] sm:$0xff]  ;;  %v5592_v50 = vadd.f32 %v5559_v40, %v5512_v41  ;;  %v5500_v63 = vmul.f32 %v14558_v46, %v14991_v51 }
 0x3ef   : > { %10915 = vmatprep.subr.bf16.mxu0 %v17605_v16  ;;  %v5718_v16 = vmul.f32 %v14799_v3, %v14891_v23  ;;  %v6629_v23 = vld [vmem:[%s17204_s3 + $0x118] sm:$0xff] }
 0x3f0   : > { %v10618_v1 = vpop.f32.mrb[54].mxu1  ;;  %v5672_v41 = vadd.f32 %v5639_v54, %v5592_v50  ;;  %v6630_v50 = vld [vmem:[%s17204_s3 + $0x120] sm:$0xff] }
 0x3f1   : > { %v4448_v42 = vmax.f32 %v4371_v32, %v10618_v1  ;;  %v4438_v34 = vpop.f32.mrb[55].mxu1  ;;  %v5448_v32 = vadd.f32 %v5420_v22, %v5368_v29  ;;  %v5289_v22 = vadd.f32 %v5261_v6, %v5209_v4  ;;  %v6626_v1 = vld [vmem:[%s17204_s3 + $0x100] sm:$0xff]  ;;  %v5751_v29 = vadd.f32 %v5718_v16, %v14876_v18  ;;  %v6628_v4 = vld [vmem:[%s17204_s3 + $0x110] sm:$0xff]  ;;  %v6631_v6 = vld [vmem:[%s17204_s3 + $0x128] sm:$0xff] }
 0x3f2   : > { %v4447_v49 = vmax.f32 %v4370_v7, %v4438_v34  ;;  %10917 = vmatpush1.bf16.msra.mxu0 %v17607_v31  ;;  %v17610_v34 = vld [vmem:[#allocation10_spill] sm:$0xff]  ;;  %v5719_v18 = vmul.f32 %v14799_v3, %v14897_v57  ;;  %v5798_v16 = vmul.f32 %v14838_v14, %v14893_v8 }
 0x3f3   : > { %4451 = vst [vmem:[#allocation4 + $0x48] sm:$0x7] %v4448_v42  ;;  %10919 = vmatprep.subr.bf16.mxu0 %v17608_v56  ;;  %v5528_v54 = vadd.f32 %v5500_v63, %v5448_v32  ;;  %v6632_v32 = vld [vmem:[%s17204_s3 + $0x130] sm:$0xff] }
 0x3f4   : > { %4450 = vst [vmem:[#allocation4 + $0x40] sm:$0xff] %v4447_v49  ;;  %v5659_v7 = vmul.f32 %v14599_v53, %v4447_v49  ;;  %v5640_v10 = vmul.f32 %v14594_v17, %v4447_v49  ;;  %v5402_v36 = vmul.f32 %v14543_v24, %v4447_v49  ;;  %v5421_v57 = vmul.f32 %v14548_v9, %v4447_v49 }
 0x3f5   : > { %v5831_v56 = vadd.f32 %v5798_v16, %v5751_v29 }
 0x3f6   : > { %v5687_v40 = vadd.f32 %v5659_v7, %v5607_v37  ;;  %v15013_v35 = vadd.f32 %v5640_v10, %v5593_v52  ;;  %v15016_v42 = vadd.f32 %v5402_v36, %v14948_v26  ;;  %10921 = vmatpush1.bf16.msra.mxu0 %v17610_v34  ;;  %v6633_v52 = vld [vmem:[%s17204_s3 + $0x138] sm:$0xff]  ;;  %v5341_v26 = vmul.f32 %v14532_v62, %v14893_v8  ;;  %v6635_v7 = vld [vmem:[%s17204_s3 + $0x148] sm:$0xff] }
 0x3f7   : > { %10923 = vmatprep.subr.bf16.mxu0 %v14823_v12  ;;  %v15032_v37 = vpack.c.bf16 %v6629_v23, %v6627_v21  ;;  %v5580_v10 = vmul.f32 %v14584_v11, %v15011_v25  ;;  %v15050_v21 = vpack.c.bf16 %v6628_v4, %v6626_v1  ;;  %v5752_v8 = vadd.f32 %v5719_v18, %v5672_v41  ;;  %v6637_v1 = vld [vmem:[%s17204_s3 + $0x158] sm:$0xff] }
 0x3f8   : > { %17609 = vst [vmem:[#allocation7_spill] sm:$0xff] %v15013_v35  ;;  %v5369_v36 = vadd.f32 %v5341_v26, %v5289_v22  ;;  %v5799_v23 = vmul.f32 %v14838_v14, %v14907_v45  ;;  %v15054_v63 = vpack.c.bf16 %v6633_v52, %v6631_v6 }
 0x3f9   : > { %17611 = vst [vmem:[#allocation13_spill] sm:$0xff] %v15032_v37  ;;  %v5608_v4 = vadd.f32 %v5580_v10, %v5528_v54 }
 0x3fa   : > { %v15056_v34 = vld [vmem:[#allocation4 + $0x48] sm:$0x1]  ;;  %v15058_v3 = vld [vmem:[#allocation4 + $0x49] sm:$0x1]  ;;  %10925 = vmatpush1.bf16.msra.mxu0 %v14841_v15  ;;  %v15077_v16 = vld [vmem:[#allocation4 + $0x4a] sm:$0x1]  ;;  %v5449_v15 = vadd.f32 %v5421_v57, %v5369_v36 }
 0x3fb   : > { %v10625_v35 = vpop.f32.mrb[54].mxu0  ;;  %v10632_v12 = vpop.f32.mrb[56].mxu1  ;;  %v15064_v41 = vld [vmem:[#allocation4 + $0x41] sm:$0xff]  ;;  %v5660_v6 = vmul.f32 %v14599_v53, %v15056_v34  ;;  %10991 = vmatprep.subr.bf16.mxu0 %v15032_v37  ;;  %v5740_v29 = vmul.f32 %v14619_v33, %v15058_v3  ;;  %v15085_v37 = vpack.c.bf16 %v6637_v1, %v6635_v7  ;;  %v6641_v7 = vld [vmem:[%s17204_s3 + $0x178] sm:$0xff] }
 0x3fc   : > { %v4607_v22 = vmax.f32 %v10625_v35, %v10632_v12  ;;  %v4522_v26 = vpop.f32.mrb[55].mxu0  ;;  %v4597_v49 = vpop.f32.mrb[57].mxu1  ;;  %v15066_v45 = vld [vmem:[#allocation4 + $0x42] sm:$0xff]  ;;  %v5739_v12 = vmul.f32 %v14619_v33, %v15064_v41  ;;  %v5501_v54 = vmul.f32 %v14558_v46, %v15064_v41  ;;  %v15104_v1 = vld [vmem:[#allocation4 + $0x38] sm:$0x1] }
 0x3fd   : > { %v4606_v52 = vmax.f32 %v4522_v26, %v4597_v49  ;;  %v5819_v35 = vmul.f32 %v14634_v20, %v15066_v45  ;;  %v5688_v18 = vadd.f32 %v5660_v6, %v5608_v4  ;;  %v5581_v10 = vmul.f32 %v14584_v11, %v15066_v45  ;;  %6330 = vmatmul.mubr.f32.vlgmr.msra.gmra.mrb[64].mxu0 %v5831_v56  ;;  %v6634_v57 = vld [vmem:[%s17204_s3 + $0x140] sm:$0xff]  ;;  %v6636_v56 = vld [vmem:[%s17204_s3 + $0x150] sm:$0xff] }
 0x3fe   : > { %v15083_v26 = vpack.c.bf16 %v6632_v32, %v6630_v50  ;;  %v5767_v14 = vadd.f32 %v5739_v12, %v5687_v40  ;;  %10993 = vmatpush1.bf16.msra.mxu0 %v15050_v21  ;;  %6335 = vmatprep.mubr.f32.mxu0 %v14867_v13  ;;  %v5832_v4 = vadd.f32 %v5799_v23, %v5752_v8  ;;  %v6639_v40 = vld [vmem:[%s17204_s3 + $0x168] sm:$0xff]  ;;  %v15106_v12 = vld [vmem:[#allocation4 + $0x39] sm:$0x1] }
 0x3ff   : > { %v10639_v49 = vpop.f32.mrb[56].mxu0  ;;  %v5529_v50 = vadd.f32 %v5501_v54, %v5449_v15  ;;  %10995 = vmatprep.subr.bf16.mxu0 %v15054_v63  ;;  %v5768_v23 = vadd.f32 %v5740_v29, %v5688_v18  ;;  %v6640_v29 = vld [vmem:[%s17204_s3 + $0x170] sm:$0xff]  ;;  %v5210_v18 = vmul.f32 %v17596_v0, %v15104_v1  ;;  %v6645_v0 = vld [vmem:[%s17204_s3 + $0x198] sm:$0xff] }
 0x400   : > { %v4684_v6 = vmax.f32 %v4607_v22, %v10639_v49  ;;  %v4674_v36 = vpop.f32.mrb[57].mxu0  ;;  %v5847_v8 = vadd.f32 %v5819_v35, %v5767_v14  ;;  %v5820_v22 = vmul.f32 %v14634_v20, %v15077_v16  ;;  %v15112_v14 = vpack.c.bf16 %v6641_v7, %v6639_v40  ;;  %v6638_v35 = vld [vmem:[%s17204_s3 + $0x160] sm:$0xff] }
 0x401   : > { %v4683_v32 = vmax.f32 %v4606_v52, %v4674_v36  ;;  %v5609_v15 = vadd.f32 %v5581_v10, %v5529_v50  ;;  %6336 = vmatmul.mubr.f32.gmra.mrb[66].mxu0 %v5832_v4  ;;  %v15108_v52 = vpack.c.bf16 %v6636_v56, %v6634_v57  ;;  %v5482_v10 = vmul.f32 %v17600_v19, %v15064_v41  ;;  %v6642_v56 = vld [vmem:[%s17204_s3 + $0x180] sm:$0xff] }
 0x402   : > { %4687 = vst [vmem:[#allocation4 + $0x58] sm:$0x7] %v4684_v6  ;;  %6488 = vmatmul.mubr.f32.vlgmr.msra.gmra.mrb[68].mxu1 %v5847_v8  ;;  %10997 = vmatpush1.bf16.msra.mxu0 %v15083_v26  ;;  %v5848_v49 = vadd.f32 %v5820_v22, %v5768_v23  ;;  %v5262_v6 = vmul.f32 %v17597_v43, %v15106_v12  ;;  %v6373_v8 = vld [vmem:[%s17204_s3 + $0x70] sm:$0xff] }
 0x403   : > { %4686 = vst [vmem:[#allocation4 + $0x50] sm:$0xff] %v4683_v32  ;;  %v5661_v54 = vmul.f32 %v14599_v53, %v4683_v32  ;;  %10961 = vmatpush1.bf16.msra.mxu1 %v14658_v27  ;;  %10999 = vmatprep.subr.bf16.mxu0 %v15085_v37  ;;  %v6643_v27 = vld [vmem:[%s17204_s3 + $0x188] sm:$0xff]  ;;  %v5515_v19 = vadd.f32 %v5482_v10, %v15016_v42  ;;  %v15153_v42 = vld [vmem:[#allocation4 + $0x3a] sm:$0x1] }
 0x404   : > { %6493 = vmatprep.mubr.f32.mxu1 %v14867_v13  ;;  %10963 = vmatprep.subr.bf16.mxu1 %v14665_v47  ;;  %v5562_v36 = vmul.f32 %v17606_v39, %v15066_v45  ;;  %v5642_v57 = vmul.f32 %v14594_v17, %v4683_v32  ;;  %v15143_v43 = vpack.c.bf16 %v6640_v29, %v6638_v35  ;;  %v6644_v47 = vld [vmem:[%s17204_s3 + $0x190] sm:$0xff]  ;;  %v15155_v39 = vld [vmem:[#allocation4 + $0x48] sm:$0x1]  ;;  %v6646_v35 = vld [vmem:[%s17204_s3 + $0x1a0] sm:$0xff] }
 0x405   : > { %v15127_v4 = vadd.f32 %v5661_v54, %v5609_v15  ;;  %6722 = vmatprep.mubr.f32.mxu0 %v14867_v13  ;;  %v5189_v50 = vmul.f32 %v14502_v58, %v14930_v2  ;;  %v5241_v32 = vmul.f32 %v14496_v60, %v14932_v38  ;;  %v15162_v7 = vpack.c.bf16 %v6645_v0, %v6643_v27  ;;  %v6647_v60 = vld [vmem:[%s17204_s3 + $0x1a8] sm:$0xff]  ;;  %v6649_v58 = vld [vmem:[%s17204_s3 + $0x1b8] sm:$0xff]  ;;  %v6648_v29 = vld [vmem:[%s17204_s3 + $0x1b0] sm:$0xff] }
 0x406   : > { %17612 = vst [vmem:[#allocation17_spill] sm:$0xff] %v15143_v43  ;;  %6494 = vmatmul.mubr.f32.gmra.mrb[70].mxu1 %v5848_v49  ;;  %11001 = vmatpush1.bf16.msra.mxu0 %v15108_v52  ;;  %v5595_v40 = vadd.f32 %v5562_v36, %v5515_v19  ;;  %v5290_v23 = vadd.f32 %v5262_v6, %v5210_v18  ;;  %v6651_v0 = vld [vmem:[%s17204_s3 + $0x1c8] sm:$0xff]  ;;  %v6650_v19 = vld [vmem:[%s17204_s3 + $0x1c0] sm:$0xff] }
 0x407   : > { %10965 = vmatpush1.bf16.msra.mxu1 %v14681_v44  ;;  %11003 = vmatprep.subr.bf16.mxu0 %v15112_v14  ;;  %17613 = vst [vmem:[#allocation16_spill] sm:$0xff] %v15162_v7  ;;  %v6371_v44 = vld [vmem:[%s17204_s3 + $0x60] sm:$0xff]  ;;  %v15180_v2 = vpack.c.bf16 %v6644_v47, %v6642_v56  ;;  %v5342_v38 = vmul.f32 %v14532_v62, %v15153_v42  ;;  %v15196_v62 = vld [vmem:[#allocation4 + $0x49] sm:$0x1]  ;;  %v6652_v56 = vld [vmem:[%s17204_s3 + $0x1d0] sm:$0xff] }
 0x408   : > { %10967 = vmatprep.subr.bf16.mxu1 %v14683_v48  ;;  %6564 = vmatprep.mubr.f32.mxu1 %v14867_v13  ;;  %v15178_v48 = vadd.f32 %v5642_v57, %v5595_v40  ;;  %v5422_v22 = vmul.f32 %v14548_v9, %v15155_v39  ;;  %v15194_v18 = vpack.c.bf16 %v6373_v8, %v6371_v44  ;;  %v6655_v47 = vld [vmem:[%s17204_s3 + $0x1e8] sm:$0xff]  ;;  %v6654_v40 = vld [vmem:[%s17204_s3 + $0x1e0] sm:$0xff]  ;;  %v6656_v44 = vld [vmem:[%s17204_s3 + $0x1f0] sm:$0xff] }
 0x409   : > { %17615 = vst [vmem:[#allocation21_spill] sm:$0xff] %v15180_v2  ;;  %17617 = vst [vmem:[#allocation25_spill] sm:$0xff] %v15196_v62  ;;  %v5274_v10 = vadd.f32 %v5241_v32, %v5189_v50  ;;  %v15199_v27 = vpack.c.bf16 %v6649_v58, %v6647_v60  ;;  %v5370_v36 = vadd.f32 %v5342_v38, %v5290_v23  ;;  %v6657_v50 = vld [vmem:[%s17204_s3 + $0x1f8] sm:$0xff]  ;;  %v6594_v8 = vld [vmem:[%s17204_s3] sm:$0xff] }
 0x40a   : > { %17614 = vst [vmem:[#allocation15_spill] sm:$0xff] %v15178_v48  ;;  %11005 = vmatpush1.bf16.msra.mxu0 %v15143_v43  ;;  %17616 = vst [vmem:[#allocation18_spill] sm:$0xff] %v15194_v18  ;;  %v5321_v32 = vmul.f32 %v14508_v5, %v14964_v55  ;;  %v5502_v60 = vmul.f32 %v14558_v46, %v15196_v62  ;;  %v6596_v55 = vld [vmem:[%s17204_s3 + $0x10] sm:$0xff]  ;;  %v6599_v58 = vld [vmem:[%s17204_s3 + $0x28] sm:$0xff] }
 0x40b   : > { %10969 = vmatpush1.bf16.msra.mxu1 %v17593_v30  ;;  %11007 = vmatprep.subr.bf16.mxu0 %v15162_v7  ;;  %17618 = vst [vmem:[#allocation19_spill] sm:$0xff] %v15199_v27  ;;  %v6653_v30 = vld [vmem:[%s17204_s3 + $0x1d8] sm:$0xff]  ;;  %v5450_v23 = vadd.f32 %v5422_v22, %v5370_v36  ;;  %v15273_v36 = vpack.c.bf16 %v6656_v44, %v6654_v40  ;;  %v15398_v48 = vld [vmem:[%s17202_s1 + $0x27] ss:$0 sm:$0xff] }
 0x40c   : > { %10971 = vmatprep.subr.bf16.mxu1 %v17594_v59  ;;  %v5401_v59 = vmul.f32 %v14543_v24, %v14966_v28  ;;  %v15236_v24 = vpack.c.bf16 %v6648_v29, %v6646_v35  ;;  %v15242_v28 = vld [vmem:[#allocation4 + $0x4a] sm:$0x1]  ;;  %v5354_v38 = vadd.f32 %v5321_v32, %v5274_v10  ;;  %v6598_v35 = vld [vmem:[%s17204_s3 + $0x20] sm:$0xff]  ;;  %v6600_v29 = vld [vmem:[%s17204_s3 + $0x30] sm:$0xff]  ;;  %v15275_v32 = vpack.c.bf16 %v6596_v55, %v6594_v8 }
 0x40d   : > { %v10646_v15 = vpop.f32.mrb[58].mxu1  ;;  %v10653_v54 = vpop.f32.mrb[58].mxu0  ;;  %17620 = vst [vmem:[#allocation28_spill] sm:$0xff] %v15242_v28  ;;  %17625 = vst [vmem:[#allocation20_spill] sm:$0xff] %v15273_v36  ;;  %v17626_v40 = vld [vmem:[#allocation27_spill] sm:$0xff] }
 0x40e   : > { %v4843_v9 = vmax.f32 %v10646_v15, %v10653_v54  ;;  %v4758_v49 = vpop.f32.mrb[59].mxu1  ;;  %v4833_v6 = vpop.f32.mrb[59].mxu0  ;;  %11009 = vmatpush1.bf16.msra.mxu0 %v15180_v2  ;;  %17619 = vst [vmem:[#allocation23_spill] sm:$0xff] %v15236_v24  ;;  %v15248_v15 = vpack.c.bf16 %v6653_v30, %v6651_v0  ;;  %v6601_v54 = vld [vmem:[%s17204_s3 + $0x38] sm:$0xff]  ;;  %v6603_v0 = vld [vmem:[%s17204_s3 + $0x48] sm:$0xff]  ;;  %v5434_v30 = vadd.f32 %v5401_v59, %v5354_v38  ;;  %v17629_v38 = vld [vmem:[#allocation8_spill] sm:$0xff] }
 0x40f   : > { %v4842_v57 = vmax.f32 %v4758_v49, %v4833_v6  ;;  %10973 = vmatpush1.bf16.msra.mxu1 %v15194_v18  ;;  %11011 = vmatprep.subr.bf16.mxu0 %v15199_v27  ;;  %v15264_v49 = vpack.c.bf16 %v6657_v50, %v6655_v47  ;;  %v15266_v6 = vld [vmem:[#allocation4 + $0x51] sm:$0xff]  ;;  %v6602_v47 = vld [vmem:[%s17204_s3 + $0x40] sm:$0xff]  ;;  %v15290_v59 = vpack.c.bf16 %v6601_v54, %v6599_v58  ;;  %v15298_v44 = vld [vmem:[%s17202_s1 + $0x1e] ss:$0 sm:$0xff] }
 0x410   : > { %17621 = vst [vmem:[#allocation29_spill] sm:$0xff] %v15248_v15  ;;  %10975 = vmatprep.subr.bf16.mxu1 %v17602_v61  ;;  %v15268_v61 = vld [vmem:[#allocation4 + $0x58] sm:$0x1]  ;;  %v6604_v50 = vld [vmem:[%s17204_s3 + $0x50] sm:$0xff]  ;;  %17627 = vst [vmem:[#allocation27_spill] sm:$0xff] %v15298_v44  ;;  %v5481_v8 = vmul.f32 %v15298_v44, %v14991_v51 }
 0x411   : > { %v10660_v5 = vpop.f32.mrb[60].mxu1  ;;  %17623 = vst [vmem:[#allocation24_spill] sm:$0xff] %v15264_v49  ;;  %17624 = vst [vmem:[#allocation26_spill] sm:$0xff] %v15268_v61  ;;  %v5662_v55 = vmul.f32 %v14599_v53, %v15268_v61  ;;  %v15311_v58 = vld [vmem:[#allocation4 + $0x59] sm:$0x1]  ;;  %v15323_v54 = vpack.c.bf16 %v6604_v50, %v6602_v47 }
 0x412   : > { %v4920_v22 = vmax.f32 %v4843_v9, %v10660_v5  ;;  %v4910_v46 = vpop.f32.mrb[61].mxu1  ;;  %v15262_v9 = vpack.c.bf16 %v6652_v56, %v6650_v19  ;;  %v5582_v19 = vmul.f32 %v14584_v11, %v15242_v28  ;;  %v6605_v56 = vld [vmem:[%s17204_s3 + $0x58] sm:$0xff]  ;;  %11013 = vmatpush1.bf16.msra.mxu0 %v15236_v24  ;;  %v15293_v11 = vpack.c.bf16 %v6600_v29, %v6598_v35  ;;  %v15317_v51 = vld [vmem:[%s17202_s1 + $0x23] ss:$0 sm:$0xff]  ;;  %v15328_v53 = vld [vmem:[%s17202_s1 + $0x24] ss:$0 sm:$0xff] }
 0x413   : > { %v15260_v10 = vmax.f32 %v4842_v57, %v4910_v46  ;;  %v5530_v57 = vadd.f32 %v5502_v60, %v5450_v23  ;;  %10977 = vmatpush1.bf16.msra.mxu1 %v17626_v40  ;;  %v15302_v23 = vld [vmem:[#allocation4 + $0x50] sm:$0xff]  ;;  %11015 = vmatprep.subr.bf16.mxu0 %v15248_v15  ;;  %v5741_v60 = vmul.f32 %v14619_v33, %v15266_v6  ;;  %v15344_v47 = vld [vmem:[%s17202_s1 + $0x25] ss:$0 sm:$0xff]  ;;  %v15362_v15 = vld [vmem:[#allocation4 + $0x5a] sm:$0x1] }
 0x414   : > { %17622 = vst [vmem:[#allocation22_spill] sm:$0xff] %v15262_v9  ;;  %4923 = vst [vmem:[#allocation4 + $0x68] sm:$0x7] %v4920_v22  ;;  %v15307_v5 = vld [vmem:[#allocation4 + $0x52] sm:$0xff]  ;;  %10979 = vmatprep.subr.bf16.mxu1 %v17629_v38  ;;  %v5213_v22 = vmul.f32 %v15317_v51, %v15302_v23  ;;  %v15321_v46 = vpack.c.bf16 %v6605_v56, %v6603_v0  ;;  %v5514_v35 = vadd.f32 %v5481_v8, %v5434_v30  ;;  %v15335_v38 = vld [vmem:[%s17202_s1 + $0x1f] ss:$0 sm:$0xff] }
 0x415   : > { %4922 = vst [vmem:[#allocation4 + $0x60] sm:$0xff] %v15260_v10  ;;  %17628 = vst [vmem:[#allocation31_spill] sm:$0xff] %v15311_v58  ;;  %v5265_v29 = vmul.f32 %v15328_v53, %v15266_v6  ;;  %v5610_v40 = vadd.f32 %v5582_v19, %v5530_v57  ;;  %v5561_v0 = vmul.f32 %v15335_v38, %v15011_v25  ;;  %v5173_v56 = vld [vmem:[#allocation4 + $0x40] sm:$0xff]  ;;  %v17633_v24 = vld [vmem:[#allocation30_spill] sm:$0xff] }
 0x416   : > { %17630 = vst [vmem:[#allocation8_spill] sm:$0xff] %v15317_v51  ;;  %17631 = vst [vmem:[#allocation32_spill] sm:$0xff] %v15328_v53  ;;  %v5641_v30 = vmul.f32 %v14594_v17, %v15056_v34  ;;  %v5345_v57 = vmul.f32 %v15344_v47, %v15307_v5  ;;  %11017 = vmatpush1.bf16.msra.mxu0 %v15262_v9  ;;  %v5821_v19 = vmul.f32 %v14634_v20, %v15307_v5  ;;  %v6607_v17 = vld [vmem:[%s17204_s3 + $0x68] sm:$0xff]  ;;  %v6609_v34 = vld [vmem:[%s17204_s3 + $0x78] sm:$0xff] }
 0x417   : > { %17632 = vst [vmem:[#allocation33_spill] sm:$0xff] %v15335_v38  ;;  %v5742_v25 = vmul.f32 %v14619_v33, %v15311_v58  ;;  %10981 = vmatpush1.bf16.msra.mxu1 %v17607_v31  ;;  %v5293_v50 = vadd.f32 %v5265_v29, %v5213_v22  ;;  %11019 = vmatprep.subr.bf16.mxu0 %v15264_v49  ;;  %v15368_v33 = vld [vmem:[%s17202_s1 + $0x26] ss:$0 sm:$0xff]  ;;  %v17634_v58 = vld [vmem:[#allocation6_spill] sm:$0xff]  ;;  %17638 = vst [vmem:[#allocation35_spill] sm:$0xff] %v15398_v48 }
 0x418   : > { %v5769_v8 = vadd.f32 %v5741_v60, %v15127_v4  ;;  %v5690_v9 = vadd.f32 %v5662_v55, %v5610_v40  ;;  %10983 = vmatprep.subr.bf16.mxu1 %v17633_v24  ;;  %v5425_v31 = vmul.f32 %v15368_v33, %v15260_v10  ;;  %v5720_v22 = vmul.f32 %v17634_v58, %v15064_v41  ;;  %v15379_v4 = vld [vmem:[%s17202_s1 + $0x1a] ss:$0 sm:$0xff]  ;;  %v15385_v60 = vld [vmem:[%s17202_s1 + $0x1b] ss:$0 sm:$0xff]  ;;  %v17641_v28 = vld [vmem:[#allocation9_spill] sm:$0xff] }
 0x419   : > { %v5594_v29 = vadd.f32 %v5561_v0, %v5514_v35  ;;  %17636 = vst [vmem:[#allocation6_spill] sm:$0xff] %v15379_v4  ;;  %v5192_v24 = vmul.f32 %v15379_v4, %v5173_v56  ;;  %v5244_v55 = vmul.f32 %v15385_v60, %v15064_v41  ;;  %v15389_v40 = vpack.c.bf16 %v6609_v34, %v6607_v17  ;;  %v17639_v17 = vld [vmem:[#allocation10_spill] sm:$0xff]  ;;  %v17642_v43 = vld [vmem:[#allocation7_spill] sm:$0xff] }
 0x41a   : > { %v15393_v35 = vmul.f32 %v15379_v4, %v15104_v1  ;;  %v5373_v0 = vadd.f32 %v5345_v57, %v5293_v50  ;;  %11021 = vmatpush1.bf16.msra.mxu0 %v15273_v36  ;;  %v5822_v2 = vmul.f32 %v14634_v20, %v15362_v15  ;;  %v5721_v1 = vmul.f32 %v17634_v58, %v15058_v3  ;;  %v17640_v50 = vld [vmem:[#allocation11_spill] sm:$0xff]  ;;  %v17643_v36 = vld [vmem:[#allocation12_spill] sm:$0xff] }
 0x41b   : > { %17637 = vst [vmem:[#allocation34_spill] sm:$0xff] %v15389_v40  ;;  %10985 = vmatpush1.bf16.msra.mxu1 %v17639_v17  ;;  %v5674_v34 = vadd.f32 %v5641_v30, %v5594_v29  ;;  %v5849_v57 = vadd.f32 %v5821_v19, %v5769_v8  ;;  %11023 = vmatprep.subr.bf16.mxu0 %v17640_v50  ;;  %v17644_v8 = vld [vmem:[#allocation14_spill] sm:$0xff] }
 0x41c   : > { %v15374_v49 = vld [vmem:[#allocation4 + $0x61] sm:$0xff]  ;;  %v5770_v61 = vadd.f32 %v5742_v25, %v5690_v9  ;;  %10987 = vmatprep.subr.bf16.mxu1 %v17641_v28  ;;  %v5453_v7 = vadd.f32 %v5425_v31, %v5373_v0  ;;  %v5800_v62 = vmul.f32 %v17643_v36, %v15066_v45  ;;  %v5211_v17 = vmul.f32 %v15317_v51, %v5173_v56  ;;  %v15450_v0 = vld [vmem:[#allocation4 + $0x49] sm:$0x1] }
 0x41d   : > { %17635 = vst [vmem:[#allocation30_spill] sm:$0xff] %v15374_v49  ;;  %v5505_v27 = vmul.f32 %v15398_v48, %v15374_v49  ;;  %v5753_v49 = vadd.f32 %v5720_v22, %v17642_v43  ;;  %v15414_v30 = vld [vmem:[#allocation4 + $0x62] sm:$0xff]  ;;  %v5277_v29 = vadd.f32 %v5244_v55, %v5192_v24  ;;  %6723 = vmatmul.mubr.f32.vlgmr.msra.gmra.mrb[68].mxu0 %v5849_v57  ;;  %v15441_v22 = vld [vmem:[%s17202_s1 + $0x1d] ss:$0 sm:$0xff] }
 0x41e   : > { %v5263_v28 = vmul.f32 %v15328_v53, %v15064_v41  ;;  %v15421_v43 = vld [vmem:[%s17202_s1 + $0x28] ss:$0 sm:$0xff]  ;;  %11025 = vmatpush1.bf16.msra.mxu0 %v15275_v32  ;;  %6728 = vmatprep.mubr.f32.mxu0 %v14867_v13  ;;  %v15432_v41 = vld [vmem:[%s17202_s1 + $0x1c] ss:$0 sm:$0xff]  ;;  %v5754_v31 = vadd.f32 %v5721_v1, %v5674_v34  ;;  %v5243_v55 = vmul.f32 %v15385_v60, %v15106_v12 }
 0x41f   : > { %v5533_v9 = vadd.f32 %v5505_v27, %v5453_v7  ;;  %v5585_v25 = vmul.f32 %v15421_v43, %v15414_v30  ;;  %v5324_v7 = vmul.f32 %v15432_v41, %v15066_v45  ;;  %v5850_v27 = vadd.f32 %v5822_v2, %v5770_v61  ;;  %11027 = vmatprep.subr.bf16.mxu0 %v15290_v59  ;;  %v17645_v24 = vld [vmem:[#allocation13_spill] sm:$0xff] }
 0x420   : > { %v10667_v48 = vpop.f32.mrb[60].mxu0  ;;  %v10674_v20 = vpop.f32.mrb[62].mxu1  ;;  %10989 = vmatpush1.bf16.msra.mxu1 %v17644_v8  ;;  %v15448_v61 = vld [vmem:[#allocation4 + $0x48] sm:$0x1]  ;;  %v5484_v1 = vmul.f32 %v15298_v44, %v15266_v6 }
 0x421   : > { %v5079_v3 = vmax.f32 %v10667_v48, %v10674_v20  ;;  %v4994_v58 = vpop.f32.mrb[61].mxu0  ;;  %v5069_v19 = vpop.f32.mrb[63].mxu1  ;;  %v5801_v48 = vmul.f32 %v17643_v36, %v15077_v16  ;;  %v5404_v16 = vmul.f32 %v15441_v22, %v15302_v23  ;;  %v5833_v36 = vadd.f32 %v5800_v62, %v5753_v49  ;;  %11055 = vmatprep.subr.bf16.mxu1 %v17645_v24  ;;  %v6611_v12 = vld [vmem:[%s17204_s3 + $0x88] sm:$0xff] }
 0x422   : > { %v5078_v56 = vmax.f32 %v4994_v58, %v5069_v19  ;;  %v5357_v34 = vadd.f32 %v5324_v7, %v5277_v29  ;;  %6729 = vmatmul.mubr.f32.gmra.mrb[70].mxu0 %v5850_v27  ;;  %v5291_v58 = vadd.f32 %v5263_v28, %v5211_v17  ;;  %v5343_v62 = vmul.f32 %v15344_v47, %v15066_v45  ;;  %v6613_v29 = vld [vmem:[%s17204_s3 + $0x98] sm:$0xff]  ;;  %v15488_v27 = vld [vmem:[%s17202_s1 + $0x20] ss:$0 sm:$0xff] }
 0x423   : > { %v5613_v49 = vadd.f32 %v5585_v25, %v5533_v9  ;;  %11029 = vmatpush1.bf16.msra.mxu0 %v15293_v11  ;;  %6565 = vmatmul.mubr.f32.vlgmr.msra.gmra.mrb[68].mxu1 %v5833_v36  ;;  %v5564_v17 = vmul.f32 %v15335_v38, %v15307_v5  ;;  %v5834_v45 = vadd.f32 %v5801_v48, %v5754_v31  ;;  %v15476_v25 = vld [vmem:[#allocation4 + $0x4a] sm:$0x1] }
 0x424   : > { %v10681_v2 = vpop.f32.mrb[62].mxu0  ;;  %11031 = vmatprep.subr.bf16.mxu0 %v15321_v46  ;;  %11057 = vmatpush1.bf16.msra.mxu1 %v15050_v21  ;;  %v5212_v28 = vmul.f32 %v15317_v51, %v15448_v61  ;;  %v5264_v9 = vmul.f32 %v15328_v53, %v15450_v0  ;;  %v5644_v8 = vmul.f32 %v15488_v27, %v15260_v10 }
 0x425   : > { %v5156_v57 = vmax.f32 %v5079_v3, %v10681_v2  ;;  %v5146_v20 = vpop.f32.mrb[63].mxu0  ;;  %v5437_v3 = vadd.f32 %v5404_v16, %v5357_v34  ;;  %6570 = vmatprep.mubr.f32.mxu1 %v14867_v13  ;;  %11059 = vmatprep.subr.bf16.mxu1 %v15054_v63  ;;  %v15492_v31 = vpack.c.bf16 %v6613_v29, %v6611_v12 }
 0x426   : > { %v15463_v19 = vmax.f32 %v5078_v56, %v5146_v20  ;;  %v15481_v56 = vld [vmem:[%s17202_s1 + $0x29] ss:$0 sm:$0xff]  ;;  %6799 = vmatprep.mubr.f32.mxu0 %v14867_v13  ;;  %v5276_v16 = vadd.f32 %v5243_v55, %v15393_v35  ;;  %v5371_v36 = vadd.f32 %v5343_v62, %v5291_v58  ;;  %v5423_v35 = vmul.f32 %v15368_v33, %v15302_v23  ;;  %v6617_v62 = vld [vmem:[%s17204_s3 + $0xb8] sm:$0xff] }
 0x427   : > { %5159 = vst [vmem:[#allocation4 + $0x78] sm:$0x7] %v5156_v57  ;;  %v5517_v7 = vadd.f32 %v5484_v1, %v5437_v3  ;;  %17646 = vst [vmem:[#allocation10_spill] sm:$0xff] %v15492_v31  ;;  %11033 = vmatpush1.bf16.msra.mxu0 %v15323_v54  ;;  %6571 = vmatmul.mubr.f32.gmra.mrb[70].mxu1 %v5834_v45  ;;  %v6610_v1 = vld [vmem:[%s17204_s3 + $0x80] sm:$0xff]  ;;  %v6612_v57 = vld [vmem:[%s17204_s3 + $0x90] sm:$0xff]  ;;  %v5292_v55 = vadd.f32 %v5264_v9, %v5212_v28 }
 0x428   : > { %5158 = vst [vmem:[#allocation4 + $0x70] sm:$0xff] %v15463_v19  ;;  %v5665_v48 = vmul.f32 %v15481_v56, %v15463_v19  ;;  %11035 = vmatprep.subr.bf16.mxu0 %v15389_v40  ;;  %11061 = vmatpush1.bf16.msra.mxu1 %v15083_v26  ;;  %v5344_v20 = vmul.f32 %v15344_v47, %v15476_v25  ;;  %v6615_v58 = vld [vmem:[%s17204_s3 + $0xa8] sm:$0xff]  ;;  %v15529_v45 = vld [vmem:[#allocation4 + $0x58] sm:$0x1] }
 0x429   : > { %v5597_v34 = vadd.f32 %v5564_v17, %v5517_v7  ;;  %11063 = vmatprep.subr.bf16.mxu1 %v15085_v37  ;;  %6957 = vmatprep.mubr.f32.mxu1 %v14867_v13  ;;  %v5194_v12 = vmul.f32 %v15379_v4, %v15302_v23  ;;  %v5246_v29 = vmul.f32 %v15385_v60, %v15266_v6 }
 0x42a   : > { %v15497_v2 = vadd.f32 %v5665_v48, %v5613_v49  ;;  %v5323_v3 = vmul.f32 %v15432_v41, %v15153_v42  ;;  %v5403_v17 = vmul.f32 %v15441_v22, %v15155_v39  ;;  %17649 = vst [vmem:[#allocation7_spill] sm:$0xff] %v15529_v45  ;;  %v5326_v28 = vmul.f32 %v15432_v41, %v15307_v5  ;;  %v6614_v42 = vld [vmem:[%s17204_s3 + $0xa0] sm:$0xff]  ;;  %v6616_v39 = vld [vmem:[%s17204_s3 + $0xb0] sm:$0xff] }
 0x42b   : > { %v15519_v49 = vadd.f32 %v5644_v8, %v5597_v34  ;;  %11037 = vmatpush1.bf16.msra.mxu0 %v15194_v18  ;;  %v15534_v13 = vpack.c.bf16 %v6612_v57, %v6610_v1  ;;  %v5279_v9 = vadd.f32 %v5246_v29, %v5194_v12  ;;  %v15537_v23 = vpack.c.bf16 %v6617_v62, %v6615_v58  ;;  %v6619_v8 = vld [vmem:[%s17204_s3 + $0xc8] sm:$0xff]  ;;  %v6621_v34 = vld [vmem:[%s17204_s3 + $0xd8] sm:$0xff] }
 0x42c   : > { %17647 = vst [vmem:[#allocation11_spill] sm:$0xff] %v15497_v2  ;;  %11039 = vmatprep.subr.bf16.mxu0 %v15492_v31  ;;  %11065 = vmatpush1.bf16.msra.mxu1 %v15108_v52  ;;  %v5356_v48 = vadd.f32 %v5323_v3, %v5276_v16  ;;  %v5406_v7 = vmul.f32 %v15441_v22, %v15260_v10  ;;  %v17652_v57 = vld [vmem:[#allocation35_spill] sm:$0xff]  ;;  %v17653_v29 = vld [vmem:[#allocation25_spill] sm:$0xff]  ;;  %v17655_v31 = vld [vmem:[#allocation30_spill] sm:$0xff] }
 0x42d   : > { %17648 = vst [vmem:[#allocation9_spill] sm:$0xff] %v15519_v49  ;;  %17650 = vst [vmem:[#allocation12_spill] sm:$0xff] %v15534_v13  ;;  %11067 = vmatprep.subr.bf16.mxu1 %v15112_v14  ;;  %v5451_v1 = vadd.f32 %v5423_v35, %v5371_v36  ;;  %v5503_v58 = vmul.f32 %v17652_v57, %v15266_v6  ;;  %v5372_v62 = vadd.f32 %v5344_v20, %v5292_v55  ;;  %v15561_v49 = vld [vmem:[#allocation4 + $0x59] sm:$0x1]  ;;  %v6618_v35 = vld [vmem:[%s17204_s3 + $0xc0] sm:$0xff] }
 0x42e   : > { %17651 = vst [vmem:[#allocation14_spill] sm:$0xff] %v15537_v23  ;;  %v5424_v16 = vmul.f32 %v15368_v33, %v15529_v45  ;;  %v5436_v12 = vadd.f32 %v5403_v17, %v5356_v48  ;;  %v5483_v3 = vmul.f32 %v15298_v44, %v17653_v29  ;;  %17654 = vst [vmem:[#allocation13_spill] sm:$0xff] %v15561_v49  ;;  %v6620_v20 = vld [vmem:[%s17204_s3 + $0xd0] sm:$0xff]  ;;  %v6623_v17 = vld [vmem:[%s17204_s3 + $0xe8] sm:$0xff] }
 0x42f   : > { %v5359_v2 = vadd.f32 %v5326_v28, %v5279_v9  ;;  %v5486_v18 = vmul.f32 %v15298_v44, %v17655_v31  ;;  %11041 = vmatpush1.bf16.msra.mxu0 %v15534_v13  ;;  %v15566_v36 = vpack.c.bf16 %v6616_v39, %v6614_v42  ;;  %v15572_v55 = vpack.c.bf16 %v6621_v34, %v6619_v8  ;;  %v6625_v28 = vld [vmem:[%s17204_s3 + $0xf8] sm:$0xff]  ;;  %v17658_v9 = vld [vmem:[#allocation17_spill] sm:$0xff]  ;;  %v17659_v48 = vld [vmem:[#allocation16_spill] sm:$0xff] }
 0x430   : > { %11043 = vmatprep.subr.bf16.mxu0 %v15537_v23  ;;  %11069 = vmatpush1.bf16.msra.mxu1 %v17658_v9  ;;  %v5566_v39 = vmul.f32 %v15335_v38, %v15414_v30  ;;  %v5531_v8 = vadd.f32 %v5503_v58, %v5451_v1  ;;  %v5583_v34 = vmul.f32 %v15421_v43, %v15307_v5  ;;  %v17660_v44 = vld [vmem:[#allocation28_spill] sm:$0xff]  ;;  %v15593_v45 = vld [vmem:[#allocation4 + $0x5a] sm:$0x1] }
 0x431   : > { %17656 = vst [vmem:[#allocation35_spill] sm:$0xff] %v15566_v36  ;;  %17657 = vst [vmem:[#allocation25_spill] sm:$0xff] %v15572_v55  ;;  %v5439_v42 = vadd.f32 %v5406_v7, %v5359_v2  ;;  %11071 = vmatprep.subr.bf16.mxu1 %v17659_v48  ;;  %v5452_v29 = vadd.f32 %v5424_v16, %v5372_v62  ;;  %v5504_v23 = vmul.f32 %v17652_v57, %v15561_v49  ;;  %v6622_v62 = vld [vmem:[%s17204_s3 + $0xe0] sm:$0xff]  ;;  %v15624_v49 = vld [vmem:[#allocation4 + $0x68] sm:$0x1] }
 0x432   : > { %v5516_v13 = vadd.f32 %v5483_v3, %v5436_v12  ;;  %v5563_v40 = vmul.f32 %v15335_v38, %v17660_v44  ;;  %v5646_v7 = vmul.f32 %v15488_v27, %v15463_v19  ;;  %v15598_v1 = vpack.c.bf16 %v6620_v20, %v6618_v35  ;;  %v6624_v44 = vld [vmem:[%s17204_s3 + $0xf0] sm:$0xff]  ;;  %v17662_v35 = vld [vmem:[#allocation21_spill] sm:$0xff] }
 0x433   : > { %v5519_v2 = vadd.f32 %v5486_v18, %v5439_v42  ;;  %11045 = vmatpush1.bf16.msra.mxu0 %v15566_v36  ;;  %v15600_v58 = vpack.c.bf16 %v6625_v28, %v6623_v17  ;;  %v15612_v18 = vld [vmem:[%s17202_s1 + $0x21] ss:$0 sm:$0xff]  ;;  %v17661_v12 = vld [vmem:[#allocation26_spill] sm:$0xff]  ;;  %v17663_v17 = vld [vmem:[#allocation19_spill] sm:$0xff]  ;;  %v5611_v28 = vadd.f32 %v5583_v34, %v5531_v8  ;;  %v5663_v42 = vmul.f32 %v15481_v56, %v15260_v10 }
 0x434   : > { %11047 = vmatprep.subr.bf16.mxu0 %v15572_v55  ;;  %v5722_v16 = vmul.f32 %v15612_v18, %v15266_v6  ;;  %v5643_v3 = vmul.f32 %v15488_v27, %v17661_v12  ;;  %11073 = vmatpush1.bf16.msra.mxu1 %v17662_v35  ;;  %v5532_v55 = vadd.f32 %v5504_v23, %v5452_v29  ;;  %v17666_v23 = vld [vmem:[#allocation15_spill] sm:$0xff] }
 0x435   : > { %v5599_v20 = vadd.f32 %v5566_v39, %v5519_v2  ;;  %11075 = vmatprep.subr.bf16.mxu1 %v17663_v17  ;;  %v5584_v36 = vmul.f32 %v15421_v43, %v15593_v45  ;;  %v5596_v38 = vadd.f32 %v5563_v40, %v5516_v13  ;;  %v15629_v12 = vpack.c.bf16 %v6624_v44, %v6622_v62  ;;  %v15634_v39 = vld [vmem:[%s17202_s1 + $0x22] ss:$0 sm:$0xff]  ;;  %v17667_v8 = vld [vmem:[#allocation31_spill] sm:$0xff]  ;;  %v17669_v2 = vld [vmem:[#allocation29_spill] sm:$0xff] }
 0x436   : > { %v5802_v10 = vmul.f32 %v15634_v39, %v15307_v5  ;;  %v5755_v40 = vadd.f32 %v5722_v16, %v17666_v23  ;;  %v5723_v34 = vmul.f32 %v15612_v18, %v17667_v8  ;;  %v17668_v29 = vld [vmem:[#allocation23_spill] sm:$0xff]  ;;  %v15647_v62 = vld [vmem:[%s17202_s1 + $0x2a] ss:$0 sm:$0xff]  ;;  %v15653_v16 = vld [vmem:[#allocation4 + $0x69] sm:$0x1]  ;;  %v5803_v23 = vmul.f32 %v15634_v39, %v15362_v15 }
 0x437   : > { %v15626_v6 = vadd.f32 %v5646_v7, %v5599_v20  ;;  %11049 = vmatpush1.bf16.msra.mxu0 %v15598_v1  ;;  %17665 = vst [vmem:[#allocation17_spill] sm:$0xff] %v15629_v12  ;;  %v5676_v13 = vadd.f32 %v5643_v3, %v5596_v38  ;;  %v5691_v7 = vadd.f32 %v5663_v42, %v5611_v28  ;;  %v15656_v3 = vld [vmem:[#allocation4 + $0x58] sm:$0x1]  ;;  %v15658_v20 = vld [vmem:[#allocation4 + $0x59] sm:$0x1]  ;;  %v17670_v8 = vld [vmem:[#allocation22_spill] sm:$0xff] }
 0x438   : > { %11051 = vmatprep.subr.bf16.mxu0 %v15600_v58  ;;  %11077 = vmatpush1.bf16.msra.mxu1 %v17668_v29  ;;  %v5743_v5 = vmul.f32 %v15647_v62, %v17655_v31  ;;  %v5612_v44 = vadd.f32 %v5584_v36, %v5532_v55  ;;  %v5664_v38 = vmul.f32 %v15481_v56, %v15624_v49  ;;  %v17671_v36 = vld [vmem:[#allocation24_spill] sm:$0xff] }
 0x439   : > { %17664 = vst [vmem:[#allocation30_spill] sm:$0xff] %v15626_v6  ;;  %11079 = vmatprep.subr.bf16.mxu1 %v17669_v2  ;;  %v5835_v28 = vadd.f32 %v5802_v10, %v5755_v40  ;;  %v5756_v42 = vadd.f32 %v5723_v34, %v5676_v13  ;;  %v15668_v6 = vld [vmem:[%s17202_s1 + $0x2b] ss:$0 sm:$0xff]  ;;  %v15674_v40 = vld [vmem:[#allocation4 + $0x6a] sm:$0x1]  ;;  %v5214_v15 = vmul.f32 %v15317_v51, %v15656_v3  ;;  %v15681_v34 = vld [vmem:[#allocation3] sm:$0xff] }
 0x43a   : > { %v5771_v55 = vadd.f32 %v5743_v5, %v5691_v7  ;;  %17672 = vst [vmem:[#allocation16_spill] sm:$0xff] %v15668_v6  ;;  %v5692_v10 = vadd.f32 %v5664_v38, %v5612_v44  ;;  %v5266_v13 = vmul.f32 %v15328_v53, %v15658_v20  ;;  %v15684_v7 = vld [vmem:[#allocation4 + $0x5a] sm:$0x1]  ;;  %v17673_v44 = vld [vmem:[#allocation20_spill] sm:$0xff]  ;;  %v5824_v53 = vmul.f32 %v15668_v6, %v15674_v40 }
 0x43b   : > { %11053 = vmatpush1.bf16.msra.mxu0 %v15629_v12  ;;  %v5823_v12 = vmul.f32 %v15668_v6, %v15414_v30  ;;  %v5836_v5 = vadd.f32 %v5803_v23, %v5756_v42  ;;  %v5346_v51 = vmul.f32 %v15344_v47, %v15684_v7  ;;  %v15702_v42 = vld [vmem:[#allocation4 + $0x60] sm:$0xff] }
 0x43c   : > { %11119 = vmatprep.subr.bf16.mxu0 %v17645_v24  ;;  %11081 = vmatpush1.bf16.msra.mxu1 %v17670_v8  ;;  %v5744_v24 = vmul.f32 %v15647_v62, %v15653_v16 }
 0x43d   : > { %11083 = vmatprep.subr.bf16.mxu1 %v17671_v36  ;;  %v5851_v38 = vadd.f32 %v5823_v12, %v5771_v55  ;;  %v5245_v12 = vmul.f32 %v15385_v60, %v15450_v0  ;;  %v5248_v0 = vmul.f32 %v15385_v60, %v17655_v31 }
 0x43e   : > { %6800 = vmatmul.mubr.f32.vlgmr.msra.gmra.mrb[68].mxu0 %v5835_v28  ;;  %v5772_v28 = vadd.f32 %v5744_v24, %v5692_v10  ;;  %v5408_v24 = vmul.f32 %v15441_v22, %v15463_v19 }
 0x43f   : > { %11121 = vmatpush1.bf16.msra.mxu0 %v15050_v21  ;;  %6805 = vmatprep.mubr.f32.mxu0 %v15681_v34  ;;  %v5294_v21 = vadd.f32 %v5266_v13, %v5214_v15 }
 0x440   : > { %11123 = vmatprep.subr.bf16.mxu0 %v15054_v63  ;;  %11085 = vmatpush1.bf16.msra.mxu1 %v17673_v44  ;;  %v15696_v63 = vld [vmem:[#allocation4 + $0x68] sm:$0x1]  ;;  %v5852_v23 = vadd.f32 %v5824_v53, %v5772_v28  ;;  %v15716_v53 = vld [vmem:[#allocation4 + $0x69] sm:$0x1] }
 0x441   : > { %11087 = vmatprep.subr.bf16.mxu1 %v17640_v50  ;;  %v5193_v50 = vmul.f32 %v15379_v4, %v15448_v61  ;;  %v5196_v61 = vmul.f32 %v15379_v4, %v15702_v42  ;;  %v5506_v15 = vmul.f32 %v17652_v57, %v15716_v53 }
 0x442   : > { %6806 = vmatmul.mubr.f32.gmra.mrb[70].mxu0 %v5836_v5 }
 0x443   : > { %11125 = vmatpush1.bf16.msra.mxu0 %v15083_v26  ;;  %6958 = vmatmul.mubr.f32.vlgmr.msra.gmra.mrb[72].mxu1 %v5851_v38  ;;  %v5426_v26 = vmul.f32 %v15368_v33, %v15696_v63  ;;  %v5278_v55 = vadd.f32 %v5245_v12, %v5193_v50  ;;  %v5281_v10 = vadd.f32 %v5248_v0, %v5196_v61  ;;  %v17674_v38 = vld [vmem:[#allocation7_spill] sm:$0xff] }
 0x444   : > { %11127 = vmatprep.subr.bf16.mxu0 %v15085_v37  ;;  %11089 = vmatpush1.bf16.msra.mxu1 %v15275_v32  ;;  %v5374_v37 = vadd.f32 %v5346_v51, %v5294_v21  ;;  %v5328_v51 = vmul.f32 %v15432_v41, %v15414_v30  ;;  %v5405_v28 = vmul.f32 %v15441_v22, %v17674_v38  ;;  %v17675_v21 = vld [vmem:[#allocation34_spill] sm:$0xff] }
 0x445   : > { %6963 = vmatprep.mubr.f32.mxu1 %v15681_v34  ;;  %11091 = vmatprep.subr.bf16.mxu1 %v15290_v59  ;;  %v15745_v0 = vld [vmem:[#allocation4 + $0x71] sm:$0xff] }
 0x446   : > { %7192 = vmatprep.mubr.f32.mxu0 %v15681_v34  ;;  %v5361_v13 = vadd.f32 %v5328_v51, %v5281_v10 }
 0x447   : > { %11129 = vmatpush1.bf16.msra.mxu0 %v15108_v52  ;;  %6964 = vmatmul.mubr.f32.gmra.mrb[74].mxu1 %v5852_v23  ;;  %v5325_v52 = vmul.f32 %v15432_v41, %v15476_v25  ;;  %v15731_v25 = vld [vmem:[#allocation4 + $0x6a] sm:$0x1] }
 0x448   : > { %11131 = vmatprep.subr.bf16.mxu0 %v15112_v14  ;;  %11093 = vmatpush1.bf16.msra.mxu1 %v15293_v11  ;;  %v5454_v14 = vadd.f32 %v5426_v26, %v5374_v37  ;;  %v15736_v50 = vadd.f32 %v5408_v24, %v5361_v13  ;;  %v5586_v12 = vmul.f32 %v15421_v43, %v15731_v25  ;;  %v17678_v37 = vld [vmem:[#allocation13_spill] sm:$0xff]  ;;  %v17679_v26 = vld [vmem:[#allocation27_spill] sm:$0xff] }
 0x449   : > { %11095 = vmatprep.subr.bf16.mxu1 %v15321_v46  ;;  %7034 = vmatprep.mubr.f32.mxu1 %v15681_v34  ;;  %v5358_v5 = vadd.f32 %v5325_v52, %v5278_v55  ;;  %v5485_v61 = vmul.f32 %v17679_v26, %v17678_v37  ;;  %v17680_v55 = vld [vmem:[#allocation10_spill] sm:$0xff]  ;;  %v15748_v52 = vld [vmem:[#allocation4 + $0x78] sm:$0x1]  ;;  %v5745_v24 = vmul.f32 %v15647_v62, %v15745_v0  ;;  %v15766_v13 = vld [vmem:[#allocation4 + $0x79] sm:$0x1] }
 0x44a   : > { %17676 = vst [vmem:[#allocation28_spill] sm:$0xff] %v15736_v50  ;;  %17681 = vst [vmem:[#allocation26_spill] sm:$0xff] %v15748_v52  ;;  %v17686_v50 = vld [vmem:[#allocation35_spill] sm:$0xff] }
 0x44b   : > { %11133 = vmatpush1.bf16.msra.mxu0 %v17658_v9  ;;  %v5534_v9 = vadd.f32 %v5506_v15, %v5454_v14  ;;  %v5438_v23 = vadd.f32 %v5405_v28, %v5358_v5  ;;  %v15759_v14 = vld [vmem:[#allocation4 + $0x72] sm:$0xff]  ;;  %v17683_v5 = vld [vmem:[#allocation12_spill] sm:$0xff] }
 0x44c   : > { %11135 = vmatprep.subr.bf16.mxu0 %v17659_v48  ;;  %11097 = vmatpush1.bf16.msra.mxu1 %v15323_v54  ;;  %v17677_v48 = vld [vmem:[#allocation18_spill] sm:$0xff]  ;;  %v7067_v15 = vld [vmem:[%s17204_s3 + $0x18] sm:$0xff] }
 0x44d   : > { %11099 = vmatprep.subr.bf16.mxu1 %v17675_v21  ;;  %v5614_v51 = vadd.f32 %v5586_v12, %v5534_v9  ;;  %v5518_v38 = vadd.f32 %v5485_v61, %v5438_v23  ;;  %v5746_v9 = vmul.f32 %v15647_v62, %v15766_v13  ;;  %v5645_v12 = vmul.f32 %v15488_v27, %v15624_v49  ;;  %v15781_v61 = vld [vmem:[#allocation4 + $0x7a] sm:$0x1] }
 0x44e   : > { %v7334_v49 = vld [vmem:[%s17204_s3 + $0x118] sm:$0xff] }
 0x44f   : > { %11137 = vmatpush1.bf16.msra.mxu0 %v17662_v35  ;;  %v7065_v35 = vld [vmem:[%s17204_s3 + $0x8] sm:$0xff] }
 0x450   : > { %11139 = vmatprep.subr.bf16.mxu0 %v17663_v17  ;;  %11101 = vmatpush1.bf16.msra.mxu1 %v17677_v48  ;;  %v17682_v17 = vld [vmem:[#allocation33_spill] sm:$0xff]  ;;  %v15773_v28 = vpack.c.bf16 %v7067_v15, %v7065_v35  ;;  %v17685_v48 = vld [vmem:[#allocation11_spill] sm:$0xff]  ;;  %v5724_v35 = vmul.f32 %v15612_v18, %v17655_v31 }
 0x451   : > { %11103 = vmatprep.subr.bf16.mxu1 %v17680_v55  ;;  %v5565_v10 = vmul.f32 %v17682_v17, %v15593_v45  ;;  %v17684_v45 = vld [vmem:[#allocation14_spill] sm:$0xff]  ;;  %v5773_v37 = vadd.f32 %v5745_v24, %v17685_v48  ;;  %v7332_v15 = vld [vmem:[%s17204_s3 + $0x108] sm:$0xff] }
 0x452   : > { %v17688_v48 = vld [vmem:[#allocation9_spill] sm:$0xff] }
 0x453   : > { %11141 = vmatpush1.bf16.msra.mxu0 %v17668_v29  ;;  %v5666_v29 = vmul.f32 %v15481_v56, %v15748_v52  ;;  %v17687_v52 = vld [vmem:[#allocation25_spill] sm:$0xff] }
 0x454   : > { %11143 = vmatprep.subr.bf16.mxu0 %v17669_v2  ;;  %11105 = vmatpush1.bf16.msra.mxu1 %v17683_v5  ;;  %v5825_v2 = vmul.f32 %v15668_v6, %v15759_v14 }
 0x455   : > { %11107 = vmatprep.subr.bf16.mxu1 %v17684_v45  ;;  %v5694_v23 = vadd.f32 %v5666_v29, %v5614_v51  ;;  %v5725_v51 = vmul.f32 %v15612_v18, %v15653_v16  ;;  %v7331_v29 = vld [vmem:[%s17204_s3 + $0x100] sm:$0xff]  ;;  %v5804_v16 = vmul.f32 %v15634_v39, %v15414_v30 }
 0x457   : > { %11145 = vmatpush1.bf16.msra.mxu0 %v17670_v8  ;;  %v5598_v8 = vadd.f32 %v5565_v10, %v5518_v38  ;;  %v5853_v10 = vadd.f32 %v5825_v2, %v5773_v37  ;;  %v5774_v24 = vadd.f32 %v5746_v9, %v5694_v23  ;;  %v11182_v2 = vpack.c.bf16 %v7334_v49, %v7332_v15  ;;  %v7336_v9 = vld [vmem:[%s17204_s3 + $0x128] sm:$0xff]  ;;  %v7338_v37 = vld [vmem:[%s17204_s3 + $0x138] sm:$0xff] }
 0x458   : > { %11147 = vmatprep.subr.bf16.mxu0 %v17671_v36  ;;  %11109 = vmatpush1.bf16.msra.mxu1 %v17686_v50  ;;  %v5826_v36 = vmul.f32 %v15668_v6, %v15781_v61  ;;  %v5757_v6 = vadd.f32 %v5724_v35, %v17688_v48  ;;  %v5805_v23 = vmul.f32 %v15634_v39, %v15674_v40  ;;  %v17689_v49 = vld [vmem:[#allocation17_spill] sm:$0xff] }
 0x459   : > { %11111 = vmatprep.subr.bf16.mxu1 %v17687_v52  ;;  %v5678_v38 = vadd.f32 %v5645_v12, %v5598_v8  ;;  %v7335_v8 = vld [vmem:[%s17204_s3 + $0x120] sm:$0xff]  ;;  %v5195_v35 = vmul.f32 %v15379_v4, %v15656_v3  ;;  %v7340_v40 = vld [vmem:[%s17204_s3 + $0x148] sm:$0xff]  ;;  %v5247_v3 = vmul.f32 %v15385_v60, %v15658_v20 }
 0x45a   : > { %v5854_v15 = vadd.f32 %v5826_v36, %v5774_v24  ;;  %v5837_v36 = vadd.f32 %v5804_v16, %v5757_v6  ;;  %v15842_v48 = vld [vmem:[#allocation4 + $0x68] sm:$0x1]  ;;  %v15844_v4 = vld [vmem:[#allocation4 + $0x69] sm:$0x1]  ;;  %v7076_v20 = vld [vmem:[%s17204_s3 + $0x60] sm:$0xff] }
 0x45b   : > { %11149 = vmatpush1.bf16.msra.mxu0 %v17673_v44  ;;  %v7333_v44 = vld [vmem:[%s17204_s3 + $0x110] sm:$0xff] }
 0x45c   : > { %11151 = vmatprep.subr.bf16.mxu0 %v15773_v28  ;;  %11113 = vmatpush1.bf16.msra.mxu1 %v15598_v1  ;;  %v11184_v12 = vpack.c.bf16 %v7333_v44, %v7331_v29  ;;  %v7342_v29 = vld [vmem:[%s17204_s3 + $0x158] sm:$0xff]  ;;  %v17691_v44 = vld [vmem:[#allocation32_spill] sm:$0xff]  ;;  %v7078_v6 = vld [vmem:[%s17204_s3 + $0x70] sm:$0xff] }
 0x45d   : > { %11115 = vmatprep.subr.bf16.mxu1 %v15600_v58  ;;  %v11190_v16 = vpack.c.bf16 %v7342_v29, %v7340_v40  ;;  %v7343_v40 = vld [vmem:[%s17204_s3 + $0x160] sm:$0xff]  ;;  %v7345_v29 = vld [vmem:[%s17204_s3 + $0x170] sm:$0xff] }
 0x45e   : > { %7193 = vmatmul.mubr.f32.vlgmr.msra.gmra.mrb[72].mxu0 %v5853_v10  ;;  %v5758_v10 = vadd.f32 %v5725_v51, %v5678_v38  ;;  %v17690_v51 = vld [vmem:[#allocation8_spill] sm:$0xff]  ;;  %v5267_v38 = vmul.f32 %v17691_v44, %v17655_v31 }
 0x45f   : > { %11153 = vmatpush1.bf16.msra.mxu0 %v15275_v32  ;;  %7198 = vmatprep.mubr.f32.mxu0 %v15681_v34  ;;  %v7337_v32 = vld [vmem:[%s17204_s3 + $0x130] sm:$0xff]  ;;  %v5215_v24 = vmul.f32 %v17690_v51, %v15702_v42  ;;  %v7339_v31 = vld [vmem:[%s17204_s3 + $0x140] sm:$0xff] }
 0x460   : > { %11155 = vmatprep.subr.bf16.mxu0 %v15290_v59  ;;  %11117 = vmatpush1.bf16.msra.mxu1 %v17689_v49  ;;  %v11186_v59 = vpack.c.bf16 %v7338_v37, %v7336_v9  ;;  %v11188_v42 = vpack.c.bf16 %v7337_v32, %v7335_v8  ;;  %v7341_v9 = vld [vmem:[%s17204_s3 + $0x150] sm:$0xff]  ;;  %v7344_v37 = vld [vmem:[%s17204_s3 + $0x168] sm:$0xff]  ;;  %v7346_v8 = vld [vmem:[%s17204_s3 + $0x178] sm:$0xff] }
 0x461   : > { %11183 = vmatprep.subr.bf16.mxu1 %v11182_v2  ;;  %v5327_v2 = vmul.f32 %v15432_v41, %v15684_v7  ;;  %v5347_v7 = vmul.f32 %v15344_v47, %v15414_v30  ;;  %v11192_v30 = vpack.c.bf16 %v7341_v9, %v7339_v31  ;;  %v11194_v32 = vpack.c.bf16 %v7346_v8, %v7344_v37 }
 0x462   : > { %7199 = vmatmul.mubr.f32.gmra.mrb[74].mxu0 %v5854_v15  ;;  %v5280_v15 = vadd.f32 %v5247_v3, %v5195_v35  ;;  %v15879_v35 = vpack.c.bf16 %v7078_v6, %v7076_v20  ;;  %v5487_v20 = vmul.f32 %v17679_v26, %v15716_v53  ;;  %v5507_v53 = vmul.f32 %v17652_v57, %v15745_v0 }
 0x463   : > { %11157 = vmatpush1.bf16.msra.mxu0 %v15293_v11  ;;  %7035 = vmatmul.mubr.f32.vlgmr.msra.gmra.mrb[72].mxu1 %v5837_v36  ;;  %v5838_v11 = vadd.f32 %v5805_v23, %v5758_v10  ;;  %v5268_v23 = vmul.f32 %v17691_v44, %v15844_v4  ;;  %v15876_v10 = vld [vmem:[#allocation4 + $0x6a] sm:$0x1]  ;;  %v5427_v36 = vmul.f32 %v15368_v33, %v15463_v19 }
 0x464   : > { %11159 = vmatprep.subr.bf16.mxu0 %v15321_v46  ;;  %11185 = vmatpush1.bf16.msra.mxu1 %v11184_v12  ;;  %v5295_v46 = vadd.f32 %v5267_v38, %v5215_v24  ;;  %v5216_v12 = vmul.f32 %v17690_v51, %v15842_v48  ;;  %v5360_v3 = vadd.f32 %v5327_v2, %v5280_v15 }
 0x465   : > { %7040 = vmatprep.mubr.f32.mxu1 %v15681_v34  ;;  %11187 = vmatprep.subr.bf16.mxu1 %v11186_v59  ;;  %v7350_v59 = vld [vmem:[%s17204_s3 + $0x198] sm:$0xff]  ;;  %v5348_v44 = vmul.f32 %v15344_v47, %v15876_v10  ;;  %v11196_v19 = vpack.c.bf16 %v7345_v29, %v7343_v40  ;;  %v7349_v47 = vld [vmem:[%s17204_s3 + $0x190] sm:$0xff]  ;;  %v5567_v9 = vmul.f32 %v17682_v17, %v15731_v25 }
 0x466   : > { %7269 = vmatprep.mubr.f32.mxu0 %v15681_v34  ;;  %v5375_v51 = vadd.f32 %v5347_v7, %v5295_v46  ;;  %v5296_v24 = vadd.f32 %v5268_v23, %v5216_v12  ;;  %v7351_v7 = vld [vmem:[%s17204_s3 + $0x1a0] sm:$0xff]  ;;  %v7358_v12 = vld [vmem:[%s17204_s3 + $0x1d8] sm:$0xff]  ;;  %v17692_v29 = vld [vmem:[#allocation26_spill] sm:$0xff] }
 0x467   : > { %11161 = vmatpush1.bf16.msra.mxu0 %v15323_v54  ;;  %7041 = vmatmul.mubr.f32.gmra.mrb[74].mxu1 %v5838_v11  ;;  %v5407_v54 = vmul.f32 %v15441_v22, %v15696_v63  ;;  %v15901_v63 = vld [vmem:[#allocation4 + $0x78] sm:$0x1]  ;;  %v15923_v11 = vld [vmem:[#allocation4 + $0x79] sm:$0x1]  ;;  %v15945_v23 = vld [vmem:[#allocation4 + $0x7a] sm:$0x1] }
 0x468   : > { %11163 = vmatprep.subr.bf16.mxu0 %v17675_v21  ;;  %11189 = vmatpush1.bf16.msra.mxu1 %v11188_v42  ;;  %v7348_v21 = vld [vmem:[%s17204_s3 + $0x188] sm:$0xff]  ;;  %v7347_v42 = vld [vmem:[%s17204_s3 + $0x180] sm:$0xff]  ;;  %v5455_v31 = vadd.f32 %v5427_v36, %v5375_v51  ;;  %v5376_v26 = vadd.f32 %v5348_v44, %v5296_v24  ;;  %v5428_v2 = vmul.f32 %v15368_v33, %v15901_v63  ;;  %v7353_v33 = vld [vmem:[%s17204_s3 + $0x1b0] sm:$0xff] }
 0x469   : > { %11191 = vmatprep.subr.bf16.mxu1 %v11190_v16  ;;  %7427 = vmatprep.mubr.f32.mxu1 %v15681_v34  ;;  %v5440_v38 = vadd.f32 %v5407_v54, %v5360_v3  ;;  %v11198_v6 = vpack.c.bf16 %v7350_v59, %v7348_v21  ;;  %v7352_v16 = vld [vmem:[%s17204_s3 + $0x1a8] sm:$0xff]  ;;  %v11200_v8 = vpack.c.bf16 %v7349_v47, %v7347_v42  ;;  %v7362_v21 = vld [vmem:[%s17204_s3 + $0x1f8] sm:$0xff] }
 0x46a   : > { %v5535_v46 = vadd.f32 %v5507_v53, %v5455_v31  ;;  %v5456_v25 = vadd.f32 %v5428_v2, %v5376_v26  ;;  %v5508_v17 = vmul.f32 %v17652_v57, %v15923_v11  ;;  %v5667_v57 = vmul.f32 %v15681_v34, %v15481_v56  ;;  %v7360_v36 = vld [vmem:[%s17204_s3 + $0x1e8] sm:$0xff]  ;;  %v8490_v2 = vld [vmem:[%s17204_s3 + $0x210] sm:$0xff] }
 0x46b   : > { %11165 = vmatpush1.bf16.msra.mxu0 %v15879_v35  ;;  %v5520_v37 = vadd.f32 %v5487_v20, %v5440_v38  ;;  %v5647_v3 = vmul.f32 %v15488_v27, %v17692_v29  ;;  %v11204_v54 = vpack.c.bf16 %v7353_v33, %v7351_v7  ;;  %v5588_v24 = vmul.f32 %v15421_v43, %v15945_v23  ;;  %v8489_v44 = vld [vmem:[%s17204_s3 + $0x208] sm:$0xff]  ;;  %v8495_v7 = vld [vmem:[%s17204_s3 + $0x238] sm:$0xff]  ;;  %v7301_v29 = vld [vmem:[%s17204_s3 + $0x10] sm:$0xff] }
 0x46c   : > { %11167 = vmatprep.subr.bf16.mxu0 %v17680_v55  ;;  %11193 = vmatpush1.bf16.msra.mxu1 %v11192_v30  ;;  %v7354_v55 = vld [vmem:[%s17204_s3 + $0x1b8] sm:$0xff]  ;;  %v5726_v30 = vmul.f32 %v15612_v18, %v15745_v0  ;;  %v5536_v51 = vadd.f32 %v5508_v17, %v5456_v25  ;;  %v15975_v38 = vld [vmem:[#allocation4 + $0x81] sm:$0xff]  ;;  %v11210_v47 = vpack.c.bf16 %v7362_v21, %v7360_v36  ;;  %v16044_v21 = vld [vmem:[#allocation4 + $0x8a] sm:$0x1] }
 0x46d   : > { %11195 = vmatprep.subr.bf16.mxu1 %v11194_v32  ;;  %v11202_v15 = vpack.c.bf16 %v7354_v55, %v7352_v16  ;;  %v7355_v32 = vld [vmem:[%s17204_s3 + $0x1c0] sm:$0xff]  ;;  %v5600_v40 = vadd.f32 %v5567_v9, %v5520_v37  ;;  %v15977_v20 = vld [vmem:[#allocation4 + $0x88] sm:$0x1]  ;;  %v17693_v55 = vld [vmem:[#allocation30_spill] sm:$0xff]  ;;  %v5747_v9 = vmul.f32 %v15647_v62, %v15975_v38 }
 0x46e   : > { %v7359_v16 = vld [vmem:[%s17204_s3 + $0x1e0] sm:$0xff]  ;;  %v5759_v31 = vadd.f32 %v5726_v30, %v17693_v55  ;;  %v5616_v37 = vadd.f32 %v5588_v24, %v5536_v51  ;;  %v7305_v55 = vld [vmem:[%s17204_s3 + $0x30] sm:$0xff] }
 0x46f   : > { %11169 = vmatpush1.bf16.msra.mxu0 %v17683_v5  ;;  %v5587_v5 = vmul.f32 %v15421_v43, %v15759_v14  ;;  %v5727_v43 = vmul.f32 %v15612_v18, %v15766_v13  ;;  %v5680_v53 = vadd.f32 %v5647_v3, %v5600_v40  ;;  %v8488_v13 = vld [vmem:[%s17204_s3 + $0x200] sm:$0xff]  ;;  %v7304_v3 = vld [vmem:[%s17204_s3 + $0x28] sm:$0xff] }
 0x470   : > { %11171 = vmatprep.subr.bf16.mxu0 %v17684_v45  ;;  %11197 = vmatpush1.bf16.msra.mxu1 %v11196_v19  ;;  %v7356_v45 = vld [vmem:[%s17204_s3 + $0x1c8] sm:$0xff]  ;;  %v8491_v19 = vld [vmem:[%s17204_s3 + $0x218] sm:$0xff]  ;;  %v16017_v17 = vpack.c.bf16 %v8490_v2, %v8488_v13 }
 0x471   : > { %11199 = vmatprep.subr.bf16.mxu1 %v11198_v6  ;;  %v5615_v59 = vadd.f32 %v5587_v5, %v5535_v46  ;;  %v5806_v6 = vmul.f32 %v15634_v39, %v15759_v14  ;;  %v15992_v26 = vpack.c.bf16 %v8491_v19, %v8489_v44  ;;  %v16010_v33 = vld [vmem:[#allocation4 + $0x82] sm:$0xff]  ;;  %v5807_v5 = vmul.f32 %v15634_v39, %v15781_v61  ;;  %v8494_v61 = vld [vmem:[%s17204_s3 + $0x230] sm:$0xff]  ;;  %v8503_v13 = vld [vmem:[%s17204_s3 + $0x278] sm:$0xff] }
 0x472   : > { %v16012_v46 = vld [vmem:[#allocation4 + $0x89] sm:$0x1]  ;;  %17695 = vst [vmem:[#allocation19_spill] sm:$0xff] %v16017_v17  ;;  %v7303_v19 = vld [vmem:[%s17204_s3 + $0x20] sm:$0xff] }
 0x473   : > { %11173 = vmatpush1.bf16.msra.mxu0 %v17686_v50  ;;  %v7357_v50 = vld [vmem:[%s17204_s3 + $0x1d0] sm:$0xff]  ;;  %17694 = vst [vmem:[#allocation21_spill] sm:$0xff] %v15992_v26  ;;  %v5748_v36 = vmul.f32 %v15647_v62, %v16012_v46 }
 0x474   : > { %11175 = vmatprep.subr.bf16.mxu0 %v17687_v52  ;;  %11201 = vmatpush1.bf16.msra.mxu1 %v11200_v8  ;;  %v11206_v52 = vpack.c.bf16 %v7358_v12, %v7356_v45  ;;  %v11208_v42 = vpack.c.bf16 %v7357_v50, %v7355_v32  ;;  %v5668_v8 = vmul.f32 %v15481_v56, %v15977_v20  ;;  %v7299_v12 = vld [vmem:[%s17204_s3] sm:$0xff] }
 0x475   : > { %11203 = vmatprep.subr.bf16.mxu1 %v11202_v15  ;;  %v8493_v15 = vld [vmem:[%s17204_s3 + $0x228] sm:$0xff]  ;;  %v5839_v56 = vadd.f32 %v5806_v6, %v5759_v31  ;;  %v5760_v45 = vadd.f32 %v5727_v43, %v5680_v53  ;;  %v11216_v62 = vpack.c.bf16 %v7301_v29, %v7299_v12  ;;  %v8496_v6 = vld [vmem:[%s17204_s3 + $0x240] sm:$0xff]  ;;  %v8498_v43 = vld [vmem:[%s17204_s3 + $0x250] sm:$0xff] }
 0x476   : > { %v16023_v30 = vpack.c.bf16 %v8495_v7, %v8493_v15  ;;  %v5696_v50 = vadd.f32 %v5668_v8, %v5616_v37  ;;  %v7308_v31 = vld [vmem:[%s17204_s3 + $0x48] sm:$0xff]  ;;  %v7310_v53 = vld [vmem:[%s17204_s3 + $0x58] sm:$0xff]  ;;  %v16087_v2 = vpack.c.bf16 %v8498_v43, %v8496_v6  ;;  %v7307_v37 = vld [vmem:[%s17204_s3 + $0x40] sm:$0xff] }
 0x477   : > { %11177 = vmatpush1.bf16.msra.mxu0 %v15598_v1  ;;  %v7361_v1 = vld [vmem:[%s17204_s3 + $0x1f0] sm:$0xff]  ;;  %v5840_v24 = vadd.f32 %v5807_v5, %v5760_v45  ;;  %v8500_v7 = vld [vmem:[%s17204_s3 + $0x260] sm:$0xff]  ;;  %v5249_v45 = vmul.f32 %v15385_v60, %v15844_v4  ;;  %v8505_v12 = vld [vmem:[%s17204_s3 + $0x288] sm:$0xff] }
 0x478   : > { %11179 = vmatprep.subr.bf16.mxu0 %v15600_v58  ;;  %11205 = vmatpush1.bf16.msra.mxu1 %v11204_v54  ;;  %v5695_v58 = vadd.f32 %v5667_v57, %v5615_v59  ;;  %v11212_v25 = vpack.c.bf16 %v7361_v1, %v7359_v16  ;;  %17696 = vst [vmem:[#allocation15_spill] sm:$0xff] %v16023_v30  ;;  %v17697_v57 = vld [vmem:[#allocation16_spill] sm:$0xff]  ;;  %v7306_v54 = vld [vmem:[%s17204_s3 + $0x38] sm:$0xff]  ;;  %17700 = vst [vmem:[#allocation29_spill] sm:$0xff] %v16087_v2 }
 0x479   : > { %11207 = vmatprep.subr.bf16.mxu1 %v11206_v52  ;;  %v5827_v40 = vmul.f32 %v17697_v57, %v16010_v33  ;;  %v8497_v52 = vld [vmem:[%s17204_s3 + $0x248] sm:$0xff]  ;;  %v8499_v59 = vld [vmem:[%s17204_s3 + $0x258] sm:$0xff]  ;;  %v11218_v44 = vpack.c.bf16 %v7306_v54, %v7304_v3  ;;  %v5828_v16 = vmul.f32 %v17697_v57, %v16044_v21  ;;  %v17701_v8 = vld [vmem:[#allocation6_spill] sm:$0xff] }
 0x47a   : > { %v5775_v32 = vadd.f32 %v5747_v9, %v5695_v58  ;;  %v16078_v1 = vpack.c.bf16 %v8499_v59, %v8497_v52  ;;  %v11220_v58 = vpack.c.bf16 %v7305_v55, %v7303_v19  ;;  %v11222_v9 = vpack.c.bf16 %v7310_v53, %v7308_v31  ;;  %v8502_v5 = vld [vmem:[%s17204_s3 + $0x270] sm:$0xff]  ;;  %v8511_v52 = vld [vmem:[%s17204_s3 + $0x2b8] sm:$0xff]  ;;  %v7316_v59 = vld [vmem:[%s17204_s3 + $0x88] sm:$0xff] }
 0x47b   : > { %11181 = vmatpush1.bf16.msra.mxu0 %v17689_v49  ;;  %v8492_v49 = vld [vmem:[%s17204_s3 + $0x220] sm:$0xff]  ;;  %v5197_v15 = vmul.f32 %v17701_v8, %v15842_v48  ;;  %v16122_v4 = vpack.c.bf16 %v8502_v5, %v8500_v7  ;;  %v8506_v29 = vld [vmem:[%s17204_s3 + $0x290] sm:$0xff]  ;;  %v5409_v53 = vmul.f32 %v15441_v22, %v15901_v63  ;;  %v11849_v5 = vld [vmem:[%s17202_s1 + $0x1f] ss:$0 sm:$0xff] }
 0x47c   : > { %11209 = vmatpush1.bf16.msra.mxu1 %v11208_v42  ;;  %11247 = vmatprep.subr.bf16.mxu0 %v15992_v26  ;;  %v16054_v51 = vpack.c.bf16 %v8494_v61, %v8492_v49  ;;  %v5855_v42 = vadd.f32 %v5827_v40, %v5775_v32  ;;  %17699 = vst [vmem:[#allocation23_spill] sm:$0xff] %v16078_v1  ;;  %v8507_v49 = vld [vmem:[%s17204_s3 + $0x298] sm:$0xff]  ;;  %v7312_v61 = vld [vmem:[%s17204_s3 + $0x68] sm:$0xff]  ;;  %v8504_v40 = vld [vmem:[%s17204_s3 + $0x280] sm:$0xff] }
 0x47d   : > { %11211 = vmatprep.subr.bf16.mxu1 %v11210_v47  ;;  %v5776_v47 = vadd.f32 %v5748_v36, %v5696_v50  ;;  %v7314_v32 = vld [vmem:[%s17204_s3 + $0x78] sm:$0xff]  ;;  %17703 = vst [vmem:[#allocation24_spill] sm:$0xff] %v16122_v4  ;;  %v16125_v57 = vpack.c.bf16 %v8507_v49, %v8505_v12  ;;  %v5282_v54 = vadd.f32 %v5249_v45, %v5197_v15  ;;  %v8509_v36 = vld [vmem:[%s17204_s3 + $0x2a8] sm:$0xff]  ;;  %v8508_v6 = vld [vmem:[%s17204_s3 + $0x2a0] sm:$0xff] }
 0x47e   : > { %7270 = vmatmul.mubr.f32.vlgmr.msra.gmra.mrb[72].mxu0 %v5839_v56  ;;  %17698 = vst [vmem:[#allocation31_spill] sm:$0xff] %v16054_v51  ;;  %v7309_v56 = vld [vmem:[%s17204_s3 + $0x50] sm:$0xff]  ;;  %v11226_v3 = vpack.c.bf16 %v7314_v32, %v7312_v61  ;;  %v5329_v50 = vmul.f32 %v15432_v41, %v15876_v10  ;;  %v7315_v41 = vld [vmem:[%s17204_s3 + $0x80] sm:$0xff]  ;;  %v16161_v19 = vpack.c.bf16 %v8511_v52, %v8509_v36  ;;  %v8517_v12 = vld [vmem:[%s17204_s3 + $0x2e8] sm:$0xff]  ;;  %v6082_v52 = vlaneseq }
 0x47f   : > { %7275 = vmatprep.mubr.f32.mxu0 %v15681_v34  ;;  %11249 = vmatpush1.bf16.msra.mxu0 %v16017_v17  ;;  %v11224_v60 = vpack.c.bf16 %v7309_v56, %v7307_v37  ;;  %17704 = vst [vmem:[#allocation20_spill] sm:$0xff] %v16125_v57  ;;  %v7317_v10 = vld [vmem:[%s17204_s3 + $0x90] sm:$0xff]  ;;  %v7319_v22 = vld [vmem:[%s17204_s3 + $0xa0] sm:$0xff]  ;;  %v8519_v49 = vld [vmem:[%s17204_s3 + $0x2f8] sm:$0xff] }
 0x480   : > { %11213 = vmatpush1.bf16.msra.mxu1 %v11212_v25  ;;  %11251 = vmatprep.subr.bf16.mxu0 %v16023_v30  ;;  %v5856_v25 = vadd.f32 %v5828_v16, %v5776_v47  ;;  %v8510_v43 = vld [vmem:[%s17204_s3 + $0x2b0] sm:$0xff]  ;;  %v7322_v47 = vld [vmem:[%s17204_s3 + $0xb8] sm:$0xff]  ;;  %v5362_v31 = vadd.f32 %v5329_v50, %v5282_v54  ;;  %v8512_v37 = vld [vmem:[%s17204_s3 + $0x2c0] sm:$0xff]  ;;  %v16236_v54 = vpack.c.bf16 %v8519_v49, %v8517_v12 }
 0x481   : > { %11215 = vmatprep.subr.bf16.mxu1 %v15773_v28  ;;  %v8501_v28 = vld [vmem:[%s17204_s3 + $0x268] sm:$0xff]  ;;  %v11848_v16 = vld [vmem:[%s17202_s1 + $0x1e] ss:$0 sm:$0xff]  ;;  %v8514_v8 = vld [vmem:[%s17204_s3 + $0x2d0] sm:$0xff] }
 0x482   : > { %7276 = vmatmul.mubr.f32.gmra.mrb[74].mxu0 %v5840_v24  ;;  %v16107_v48 = vpack.c.bf16 %v8503_v13, %v8501_v28  ;;  %v7318_v24 = vld [vmem:[%s17204_s3 + $0x98] sm:$0xff]  ;;  %v5488_v55 = vmul.f32 %v11848_v16, %v15745_v0  ;;  %v8513_v28 = vld [vmem:[%s17204_s3 + $0x2c8] sm:$0xff]  ;;  %v17705_v15 = vld [vmem:[#allocation28_spill] sm:$0xff]  ;;  %v5442_v56 = vadd.f32 %v5409_v53, %v5362_v31  ;;  %v5489_v45 = vmul.f32 %v11848_v16, %v15923_v11 }
 0x483   : > { %7428 = vmatmul.mubr.f32.vlgmr.msra.gmra.mrb[76].mxu1 %v5855_v42  ;;  %11253 = vmatpush1.bf16.msra.mxu0 %v16054_v51  ;;  %v11230_v42 = vpack.c.bf16 %v7318_v24, %v7316_v59  ;;  %v8515_v13 = vld [vmem:[%s17204_s3 + $0x2d8] sm:$0xff]  ;;  %v7324_v61 = vld [vmem:[%s17204_s3 + $0xc8] sm:$0xff]  ;;  %v7325_v11 = vld [vmem:[%s17204_s3 + $0xd0] sm:$0xff]  ;;  %17706 = vst [vmem:[#allocation7_spill] sm:$0xff] %v16236_v54 }
 0x484   : > { %11217 = vmatpush1.bf16.msra.mxu1 %v11216_v62  ;;  %7433 = vmatprep.mubr.f32.mxu1 %v15681_v34  ;;  %17702 = vst [vmem:[#allocation22_spill] sm:$0xff] %v16107_v48  ;;  %v16155_v62 = vpack.c.bf16 %v8506_v29, %v8504_v40  ;;  %v16192_v63 = vpack.c.bf16 %v8515_v13, %v8513_v28  ;;  %v7326_v32 = vld [vmem:[%s17204_s3 + $0xd8] sm:$0xff]  ;;  %v7328_v29 = vld [vmem:[%s17204_s3 + $0xe8] sm:$0xff]  ;;  %v8516_v50 = vld [vmem:[%s17204_s3 + $0x2e0] sm:$0xff] }
 0x485   : > { %11219 = vmatprep.subr.bf16.mxu1 %v11218_v44  ;;  %11255 = vmatprep.subr.bf16.mxu0 %v16078_v1  ;;  %v7320_v44 = vld [vmem:[%s17204_s3 + $0xa8] sm:$0xff]  ;;  %v5521_v7 = vadd.f32 %v5488_v55, %v17705_v15  ;;  %v8518_v36 = vld [vmem:[%s17204_s3 + $0x2f0] sm:$0xff]  ;;  %v11238_v59 = vpack.c.bf16 %v7326_v32, %v7324_v61  ;;  %v7330_v24 = vld [vmem:[%s17204_s3 + $0xf8] sm:$0xff]  ;;  %v5808_v61 = vmul.f32 %v15634_v39, %v16010_v33 }
 0x486   : > { %v11234_v0 = vpack.c.bf16 %v7322_v47, %v7320_v44  ;;  %v8521_v44 = vld [vmem:[%s17204_s3 + $0x308] sm:$0xff]  ;;  %v11242_v47 = vpack.c.bf16 %v7330_v24, %v7328_v29  ;;  %v7327_v16 = vld [vmem:[%s17204_s3 + $0xe0] sm:$0xff]  ;;  %v8522_v53 = vld [vmem:[%s17204_s3 + $0x310] sm:$0xff] }
 0x487   : > { %7434 = vmatmul.mubr.f32.gmra.mrb[78].mxu1 %v5856_v25  ;;  %11257 = vmatpush1.bf16.msra.mxu0 %v16087_v2  ;;  %v5568_v25 = vmul.f32 %v11849_v5, %v15759_v14  ;;  %v7323_v14 = vld [vmem:[%s17204_s3 + $0xc0] sm:$0xff]  ;;  %v7329_v28 = vld [vmem:[%s17204_s3 + $0xf0] sm:$0xff]  ;;  %v8531_v29 = vld [vmem:[%s17204_s3 + $0x358] sm:$0xff] }
 0x488   : > { %11221 = vmatpush1.bf16.msra.mxu1 %v11220_v58  ;;  %7504 = vmatprep.mubr.f32.mxu1 %v15681_v34  ;;  %v16185_v58 = vpack.c.bf16 %v8510_v43, %v8508_v6  ;;  %v8523_v6 = vld [vmem:[%s17204_s3 + $0x318] sm:$0xff]  ;;  %v16255_v43 = vpack.c.bf16 %v8518_v36, %v8516_v50  ;;  %v8520_v31 = vld [vmem:[%s17204_s3 + $0x300] sm:$0xff]  ;;  %v8526_v12 = vld [vmem:[%s17204_s3 + $0x330] sm:$0xff] }
 0x489   : > { %11223 = vmatprep.subr.bf16.mxu1 %v11222_v9  ;;  %11259 = vmatprep.subr.bf16.mxu0 %v16107_v48  ;;  %v11232_v9 = vpack.c.bf16 %v7317_v10, %v7315_v41  ;;  %v5522_v41 = vadd.f32 %v5489_v45, %v5442_v56  ;;  %v5569_v10 = vmul.f32 %v11849_v5, %v15945_v23  ;;  %v6083_v23 = vshrl.u32 %v6082_v52, 7  ;;  %v8524_v45 = vld [vmem:[%s17204_s3 + $0x320] sm:$0xff]  ;;  %v5858_v33 = vld [vmem:[%s17205_s4 + $0x18] sm:$0xf8]  ;;  %v8530_v24 = vld [vmem:[%s17204_s3 + $0x350] sm:$0xff] }
 0x48a   : > { %17707 = vst [vmem:[#allocation34_spill] sm:$0xff] %v16255_v43  ;;  %v16261_v55 = vpack.c.bf16 %v8523_v6, %v8521_v44  ;;  %v16288_v15 = vpack.c.bf16 %v8522_v53, %v8520_v31  ;;  %v8533_v6 = vld [vmem:[%s17204_s3 + $0x368] sm:$0xff] }
 0x48b   : > { %11261 = vmatpush1.bf16.msra.mxu0 %v16122_v4  ;;  %v16293_v5 = vsub.s32 0, %v6083_v23 }
 0x48c   : > { %11225 = vmatpush1.bf16.msra.mxu1 %v11224_v60  ;;  %11263 = vmatprep.subr.bf16.mxu0 %v16125_v57  ;;  %v16228_v60 = vpack.c.bf16 %v8514_v8, %v8512_v37  ;;  %17708 = vst [vmem:[#allocation18_spill] sm:$0xff] %v16261_v55  ;;  %v8525_v8 = vld [vmem:[%s17204_s3 + $0x328] sm:$0xff]  ;;  %17709 = vst [vmem:[#allocation13_spill] sm:$0xff] %v16288_v15 }
 0x48d   : > { %11227 = vmatprep.subr.bf16.mxu1 %v11226_v3  ;;  %v5648_v3 = vmul.f32 %v15681_v34, %v15488_v27  ;;  %v5601_v27 = vadd.f32 %v5568_v25, %v5521_v7  ;;  %v11244_v7 = vpack.c.bf16 %v7329_v28, %v7327_v16  ;;  %17710 = vst [vmem:[#allocation27_spill] sm:$0xff] %v16293_v5  ;;  %v16295_v25 = vsub.s32 1, %v6083_v23  ;;  %v8532_v28 = vld [vmem:[%s17204_s3 + $0x360] sm:$0xff] }
 0x48f   : > { %11265 = vmatpush1.bf16.msra.mxu0 %v16155_v62  ;;  %v5681_v13 = vadd.f32 %v5648_v3, %v5601_v27  ;;  %17711 = vst [vmem:[#allocation10_spill] sm:$0xff] %v16295_v25 }
 0x490   : > { %11229 = vmatpush1.bf16.msra.mxu1 %v15879_v35  ;;  %11267 = vmatprep.subr.bf16.mxu0 %v16161_v19  ;;  %v7321_v35 = vld [vmem:[%s17204_s3 + $0xb0] sm:$0xff] }
 0x491   : > { %11231 = vmatprep.subr.bf16.mxu1 %v11230_v42  ;;  %v11236_v40 = vpack.c.bf16 %v7321_v35, %v7319_v22  ;;  %v11240_v42 = vpack.c.bf16 %v7325_v11, %v7323_v14  ;;  %v11850_v22 = vld [vmem:[%s17202_s1 + $0x20] ss:$0 sm:$0xff]  ;;  %v8527_v35 = vld [vmem:[%s17204_s3 + $0x338] sm:$0xff]  ;;  %v5729_v14 = vmul.f32 %v15612_v18, %v16012_v46  ;;  %v16326_v46 = vpack.c.bf16 %v8526_v12, %v8524_v45 }
 0x492   : > { %v5649_v37 = vmul.f32 %v11850_v22, %v15977_v20  ;;  %v5859_v20 = vld [vmem:[%s17205_s4 + $0x20] sm:$0xf]  ;;  %v16298_v56 = vpack.c.bf16 %v8527_v35, %v8525_v8  ;;  %v10111_v11 = vld [vmem:[%s17205_s4 + $0x11] ss:$8 sm:$0x3]  ;;  %v8537_v22 = vld [vmem:[%s17204_s3 + $0x388] sm:$0xff] }
 0x493   : > { %11269 = vmatpush1.bf16.msra.mxu0 %v16185_v58  ;;  %17713 = vst [vmem:[#allocation12_spill] sm:$0xff] %v16326_v46  ;;  %v16329_v3 = vrot.slane %v10111_v11, %v16293_v5  ;;  %v16331_v36 = vrot.slane %v5859_v20, 3  ;;  %v16345_v44 = vrot.slane %v10111_v11, %v16295_v25 }
 0x494   : > { %11233 = vmatpush1.bf16.msra.mxu1 %v11232_v9  ;;  %11271 = vmatprep.subr.bf16.mxu0 %v16192_v63  ;;  %v5728_v9 = vmul.f32 %v15612_v18, %v15975_v38  ;;  %v5857_v38 = vld [vmem:[%s17205_s4 + $0x10] sm:$0xf8]  ;;  %17712 = vst [vmem:[#allocation33_spill] sm:$0xff] %v16298_v56  ;;  %v5860_v18 = vld [vmem:[%s17205_s4 + $0x28] sm:$0xf] }
 0x495   : > { %11235 = vmatprep.subr.bf16.mxu1 %v11234_v0  ;;  %v5602_v0 = vadd.f32 %v5569_v10, %v5522_v41  ;;  %v6105_v50 = vrot.slane %v5857_v38, 3  ;;  %v5809_v10 = vmul.f32 %v15634_v39, %v16044_v21  ;;  %v16354_v16 = vrot.slane %v5860_v18, 3 }
 0x496   : > { %v5761_v49 = vadd.f32 %v5728_v9, %v5681_v13  ;;  %v8534_v13 = vld [vmem:[%s17204_s3 + $0x370] sm:$0xff] }
 0x497   : > { %11273 = vmatpush1.bf16.msra.mxu0 %v16228_v60  ;;  %v5682_v32 = vadd.f32 %v5649_v37, %v5602_v0  ;;  %v16372_v0 = vsel %vm6104_vm2, %v6105_v50, %v16331_v36  ;;  %v8539_v37 = vld [vmem:[%s17204_s3 + $0x398] sm:$0xff]  ;;  %v16388_v20 = vpack.c.bf16 %v8534_v13, %v8532_v28  ;;  %v8546_v28 = vld [vmem:[%s17204_s3 + $0x3d0] sm:$0xff]  ;;  %v8549_v13 = vld [vmem:[%s17204_s3 + $0x3e8] sm:$0xff] }
 0x498   : > { %11237 = vmatpush1.bf16.msra.mxu1 %v11236_v40  ;;  %11275 = vmatprep.subr.bf16.mxu0 %v16236_v54  ;;  %v8529_v40 = vld [vmem:[%s17204_s3 + $0x348] sm:$0xff]  ;;  %v5841_v27 = vadd.f32 %v5808_v61, %v5761_v49  ;;  %v16393_v61 = vpack.c.bf16 %v8539_v37, %v8537_v22  ;;  %v8548_v37 = vld [vmem:[%s17204_s3 + $0x3e0] sm:$0xff] }
 0x499   : > { %11239 = vmatprep.subr.bf16.mxu1 %v11238_v59  ;;  %v16334_v52 = vpack.c.bf16 %v8531_v29, %v8529_v40  ;;  %v8528_v59 = vld [vmem:[%s17204_s3 + $0x340] sm:$0xff]  ;;  %v5762_v41 = vadd.f32 %v5729_v14, %v5682_v32  ;;  %17717 = vst [vmem:[#allocation25_spill] sm:$0xff] %v16388_v20  ;;  %v8538_v14 = vld [vmem:[%s17204_s3 + $0x390] sm:$0xff]  ;;  %v8541_v29 = vld [vmem:[%s17204_s3 + $0x3a8] sm:$0xff] }
 0x49a   : > { %v16357_v39 = vpack.c.bf16 %v8530_v24, %v8528_v59  ;;  %17718 = vst [vmem:[#allocation9_spill] sm:$0xff] %v16393_v61  ;;  %v8536_v32 = vld [vmem:[%s17204_s3 + $0x380] sm:$0xff] }
 0x49b   : > { %11277 = vmatpush1.bf16.msra.mxu0 %v16255_v43  ;;  %17714 = vst [vmem:[#allocation14_spill] sm:$0xff] %v16334_v52  ;;  %v5842_v9 = vadd.f32 %v5809_v10, %v5762_v41  ;;  %v16412_v59 = vpack.c.bf16 %v8538_v14, %v8536_v32  ;;  %v8540_v41 = vld [vmem:[%s17204_s3 + $0x3a0] sm:$0xff]  ;;  %v8542_v10 = vld [vmem:[%s17204_s3 + $0x3b0] sm:$0xff]  ;;  %v7584_v32 = vld [vmem:[#allocation5 + $0x8] sm:$0xfe] }
 0x49c   : > { %11241 = vmatpush1.bf16.msra.mxu1 %v11240_v42  ;;  %11279 = vmatprep.subr.bf16.mxu0 %v16261_v55  ;;  %v8535_v42 = vld [vmem:[%s17204_s3 + $0x378] sm:$0xff]  ;;  %17715 = vst [vmem:[#allocation11_spill] sm:$0xff] %v16357_v39 }
 0x49d   : > { %11243 = vmatprep.subr.bf16.mxu1 %v11242_v47  ;;  %v6108_v47 = vrot.slane %v5858_v33, 3  ;;  %v16362_v53 = vpack.c.bf16 %v8535_v42, %v8533_v6  ;;  %v8543_v33 = vld [vmem:[%s17204_s3 + $0x3b8] sm:$0xff]  ;;  %17719 = vst [vmem:[#allocation17_spill] sm:$0xff] %v16412_v59  ;;  %v8545_v42 = vld [vmem:[%s17204_s3 + $0x3c8] sm:$0xff] }
 0x49f   : > { %11281 = vmatpush1.bf16.msra.mxu0 %v16288_v15  ;;  %17716 = vst [vmem:[#allocation35_spill] sm:$0xff] %v16362_v53  ;;  %v16384_v35 = vsel %vm6104_vm2, %v6108_v47, %v16354_v16  ;;  %v8547_v47 = vld [vmem:[%s17204_s3 + $0x3d8] sm:$0xff] }
 0x4a0   : > { %11245 = vmatpush1.bf16.msra.mxu1 %v11244_v7  ;;  %11283 = vmatprep.subr.bf16.mxu0 %v16298_v56 }
 0x4a1   : > { %11311 = vmatprep.subr.bf16.mxu1 %v15992_v26  ;;  %v6070_v23 = vpop.f32.mrb[64].mxu1 }
 0x4a2   : > { %v6092_v21 = vadd.f32 %v16329_v3, %v6070_v23  ;;  %v6072_v31 = vpop.f32.mrb[65].mxu1  ;;  %v16434_v23 = vpack.c.bf16 %v8542_v10, %v8540_v41 }
 0x4a3   : > { %7505 = vmatmul.mubr.f32.vlgmr.msra.gmra.mrb[76].mxu1 %v5841_v27  ;;  %11285 = vmatpush1.bf16.msra.mxu0 %v16326_v46  ;;  %v16416_v27 = vpack.c.bf16 %v8543_v33, %v8541_v29  ;;  %v7683_v29 = vld [vmem:[#allocation5 + $0x18] sm:$0x1] }
 0x4a4   : > { %7510 = vmatprep.mubr.f32.mxu1 %v15681_v34  ;;  %11287 = vmatprep.subr.bf16.mxu0 %v16334_v52  ;;  %v6093_v34 = vadd.f32 %v16345_v44, %v6072_v31  ;;  %v6096_v8 = vmax.f32 %v6092_v21, 0.0  ;;  %17720 = vst [vmem:[#allocation8_spill] sm:$0xff] %v16434_v23  ;;  %v16437_v21 = vpack.c.bf16 %v8547_v47, %v8545_v42  ;;  %v8544_v31 = vld [vmem:[%s17204_s3 + $0x3c0] sm:$0xff] }
 0x4a5   : > { %11313 = vmatpush1.bf16.msra.mxu1 %v16017_v17  ;;  %v6076_v7 = vpop.f32.mrb[66].mxu1 }
 0x4a6   : > { %11315 = vmatprep.subr.bf16.mxu1 %v16023_v30  ;;  %v6097_v38 = vmax.f32 %v6093_v34, 0.0  ;;  %v6115_v45 = vmul.f32 %v16372_v0, %v6096_v8  ;;  %v6094_v12 = vadd.f32 %v16329_v3, %v6076_v7  ;;  %v6078_v49 = vpop.f32.mrb[67].mxu1  ;;  %17721 = vst [vmem:[#allocation32_spill] sm:$0xff] %v16437_v21  ;;  %v16454_v34 = vpack.c.bf16 %v8546_v28, %v8544_v31  ;;  %v8550_v8 = vld [vmem:[%s17204_s3 + $0x3f0] sm:$0xff] }
 0x4a7   : > { %7511 = vmatmul.mubr.f32.gmra.mrb[78].mxu1 %v5842_v9  ;;  %11289 = vmatpush1.bf16.msra.mxu0 %v16357_v39  ;;  %v6095_v40 = vadd.f32 %v16345_v44, %v6078_v49  ;;  %v8551_v9 = vld [vmem:[%s17204_s3 + $0x3f8] sm:$0xff]  ;;  %v10112_v7 = vld [vmem:[%s17205_s4 + $0x1] ss:$8 sm:$0x3] }
 0x4a8   : > { %11291 = vmatprep.subr.bf16.mxu0 %v16362_v53  ;;  %v6116_v11 = vmul.f32 %v16384_v35, %v6097_v38  ;;  %6120 = vst [vmem:[#allocation5 + $0x20] sm:$0xff] %v6115_v45  ;;  %v6098_v18 = vmax.f32 %v6094_v12, 0.0  ;;  %17722 = vst [vmem:[#allocation26_spill] sm:$0xff] %v16454_v34  ;;  %v16457_v22 = vpack.c.bf16 %v8551_v9, %v8549_v13  ;;  %v10113_v45 = vld [vmem:[%s17205_s4 + $0x2] ss:$8 sm:$0x3] }
 0x4a9   : > { %11317 = vmatpush1.bf16.msra.mxu1 %v16054_v51  ;;  %v6099_v50 = vmax.f32 %v6095_v40, 0.0  ;;  %v16468_v38 = vpack.c.bf16 %v8550_v8, %v8548_v37  ;;  %v16486_v12 = vrot.slane %v10112_v7, %v16295_v25  ;;  %v7557_v49 = vld [vmem:[%s17205_s4] ss:$8 sm:$0x3]  ;;  %v16493_v14 = vrot.slane %v10112_v7, %v16293_v5  ;;  %v7681_v40 = vld [vmem:[#allocation5 + $0x8] sm:$0xfc] }
 0x4aa   : > { %11319 = vmatprep.subr.bf16.mxu1 %v16078_v1  ;;  %6121 = vst [vmem:[#allocation5 + $0x28] sm:$0xff] %v6116_v11  ;;  %v6117_v24 = vmul.f32 %v16331_v36, %v6098_v18  ;;  %17723 = vst [vmem:[#allocation30_spill] sm:$0xff] %v16457_v22  ;;  %v16496_v11 = vrot.slane %v10113_v45, %v16295_v25  ;;  %v16500_v33 = vrot.slane %v10113_v45, %v16293_v5  ;;  %v7583_v18 = vld [vmem:[#allocation5] sm:$0xfe] }
 0x4ab   : > { %11293 = vmatpush1.bf16.msra.mxu0 %v16388_v20  ;;  %v6118_v6 = vmul.f32 %v16354_v16, %v6099_v50  ;;  %17724 = vst [vmem:[#allocation16_spill] sm:$0xff] %v16468_v38  ;;  %17725 = vst [vmem:[#allocation6_spill] sm:$0xff] %v16486_v12  ;;  %v7680_v50 = vld [vmem:[#allocation5] sm:$0xfc]  ;;  %v16503_v41 = vrot.slane %v7557_v49, %v16295_v25  ;;  %v7611_v10 = vmul.f32 %v16486_v12, %v7584_v32 }
 0x4ac   : > { %11295 = vmatprep.subr.bf16.mxu0 %v16393_v61  ;;  %6122 = vst [vmem:[#allocation5 + $0x30] sm:$0x1] %v6117_v24  ;;  %17726 = vst [vmem:[#allocation28_spill] sm:$0xff] %v16493_v14  ;;  %v7682_v24 = vld [vmem:[#allocation5 + $0x10] sm:$0x1]  ;;  %v16508_v42 = vrot.slane %v7557_v49, %v16293_v5  ;;  %v7722_v47 = vmul.f32 %v16496_v11, %v7681_v40  ;;  %v7724_v31 = vmul.f32 %v16496_v11, %v7683_v29 }
 0x4ad   : > { %11321 = vmatpush1.bf16.msra.mxu1 %v16087_v2  ;;  %6123 = vst [vmem:[#allocation5 + $0x38] sm:$0x1] %v6118_v6  ;;  %17727 = vst [vmem:[#allocation36_spill] sm:$0xff] %v16496_v11  ;;  %v7544_v6 = vld [vmem:[#allocation5 + $0x8] sm:$0x7f]  ;;  %v7610_v28 = vmul.f32 %v16493_v14, %v7583_v18  ;;  %v7721_v9 = vmul.f32 %v16500_v33, %v7680_v50  ;;  %v7723_v37 = vmul.f32 %v16500_v33, %v7682_v24 }
 0x4ae   : > { %11323 = vmatprep.subr.bf16.mxu1 %v16107_v48  ;;  %17728 = vst [vmem:[#allocation37_spill] sm:$0xff] %v16500_v33  ;;  %17729 = vst [vmem:[#allocation38_spill] sm:$0xff] %v16503_v41  ;;  %v7543_v13 = vld [vmem:[#allocation5] sm:$0x7f]  ;;  %v7570_v8 = vmul.f32 %v16503_v41, %v7544_v6  ;;  %v7639_v7 = vrot.slane %v7611_v10, 1  ;;  %v7781_v45 = vrot.slane %v7722_v47, 2 }
 0x4af   : > { %11297 = vmatpush1.bf16.msra.mxu0 %v16412_v59  ;;  %17730 = vst [vmem:[#allocation39_spill] sm:$0xff] %v16508_v42  ;;  %v7782_v49 = vrot.slane %v7724_v31, 2  ;;  %v7569_v32 = vmul.f32 %v16508_v42, %v7543_v13  ;;  %v7638_v40 = vrot.slane %v7610_v28, 1  ;;  %v10114_v29 = vld [vmem:[%s17205_s4 + $0x3] ss:$8 sm:$0x3] }
 0x4b0   : > { %11299 = vmatprep.subr.bf16.mxu0 %v16416_v27  ;;  %v7778_v18 = vrot.slane %v7721_v9, 2  ;;  %v7779_v50 = vrot.slane %v7723_v37, 2  ;;  %v10115_v24 = vld [vmem:[%s17205_s4 + $0x4] ss:$8 sm:$0x3]  ;;  %v7667_v6 = vadd.f32 %v7639_v7, %v7570_v8  ;;  %v16530_v13 = vrot.slane %v10114_v29, %v16293_v5 }
 0x4b1   : > { %11325 = vmatpush1.bf16.msra.mxu1 %v16122_v4  ;;  %v7783_v28 = vsel %vm7777_vm3, %v7781_v45, %v7782_v49  ;;  %v10116_v9 = vld [vmem:[%s17205_s4 + $0x5] ss:$8 sm:$0x3]  ;;  %v7666_v37 = vadd.f32 %v7638_v40, %v7569_v32  ;;  %v16538_v8 = vrot.slane %v10115_v24, %v16293_v5  ;;  %v7849_v49 = vld [vmem:[#allocation5 + $0x28] sm:$0x7f] }
 0x4b2   : > { %11327 = vmatprep.subr.bf16.mxu1 %v16125_v57  ;;  %v7780_v7 = vsel %vm7777_vm3, %v7778_v18, %v7779_v50  ;;  %v16551_v18 = vrot.slane %v10116_v9, %v16295_v25 }
 0x4b3   : > { %11301 = vmatpush1.bf16.msra.mxu0 %v16434_v23  ;;  %v8002_v50 = vld [vmem:[#allocation5 + $0x30] sm:$0x1] }
 0x4b4   : > { %11303 = vmatprep.subr.bf16.mxu0 %v16437_v21  ;;  %v8003_v32 = vld [vmem:[#allocation5 + $0x38] sm:$0x1] }
 0x4b5   : > { %11329 = vmatpush1.bf16.msra.mxu1 %v16155_v62 }
 0x4b6   : > { %11331 = vmatprep.subr.bf16.mxu1 %v16161_v19 }
 0x4b7   : > { %11305 = vmatpush1.bf16.msra.mxu0 %v16454_v34 }
 0x4b8   : > { %11307 = vmatprep.subr.bf16.mxu0 %v16457_v22 }
 0x4b9   : > { %11333 = vmatpush1.bf16.msra.mxu1 %v16185_v58 }
 0x4ba   : > { %11335 = vmatprep.subr.bf16.mxu1 %v16192_v63 }
 0x4bb   : > { %11309 = vmatpush1.bf16.msra.mxu0 %v16468_v38 }
 0x4bc   : > { %11375 = vmatprep.subr.bf16.mxu0 %v15992_v26 }
 0x4bd   : > { %11337 = vmatpush1.bf16.msra.mxu1 %v16228_v60 }
 0x4be   : > { %11339 = vmatprep.subr.bf16.mxu1 %v16236_v54 }
 0x4c1   : > { %11341 = vmatpush1.bf16.msra.mxu1 %v16255_v43 }
 0x4c2   : > { %11343 = vmatprep.subr.bf16.mxu1 %v16261_v55  ;;  %v7834_v55 = vadd.f32 %v7780_v7, %v7666_v37  ;;  %v10117_v37 = vld [vmem:[%s17205_s4 + $0x6] ss:$8 sm:$0x3] }
 0x4c5   : > { %11345 = vmatpush1.bf16.msra.mxu1 %v16288_v15  ;;  %v8001_v15 = vld [vmem:[#allocation5 + $0x28] sm:$0xfc] }
 0x4c6   : > { %11347 = vmatprep.subr.bf16.mxu1 %v16298_v56  ;;  %v16548_v56 = vrot.slane %v10116_v9, %v16293_v5  ;;  %v8044_v9 = vmul.f32 %v16551_v18, %v8003_v32 }
 0x4c8   : > { %v8043_v7 = vmul.f32 %v16548_v56, %v8002_v50  ;;  %v16578_v50 = vrot.slane %v10117_v37, %v16293_v5 }
 0x4c9   : > { %11349 = vmatpush1.bf16.msra.mxu1 %v16326_v46  ;;  %v7835_v46 = vadd.f32 %v7783_v28, %v7667_v6 }
 0x4ca   : > { %11351 = vmatprep.subr.bf16.mxu1 %v16334_v52  ;;  %v16545_v52 = vrot.slane %v10115_v24, %v16295_v25 }
 0x4cc   : > { %17731 = vst [vmem:[#allocation40_spill] sm:$0xff] %v16545_v52 }
 0x4cd   : > { %11353 = vmatpush1.bf16.msra.mxu1 %v16357_v39  ;;  %v16542_v39 = vrot.slane %v10114_v29, %v16295_v25 }
 0x4ce   : > { %11355 = vmatprep.subr.bf16.mxu1 %v16362_v53 }
 0x4d0   : > { %v6331_v10 = vpop.f32.mrb[64].mxu0 }
 0x4d1   : > { %11357 = vmatpush1.bf16.msra.mxu1 %v16388_v20  ;;  %v6342_v47 = vadd.f32 %v6331_v10, %v16329_v3  ;;  %v6333_v31 = vpop.f32.mrb[65].mxu0  ;;  %v7848_v10 = vld [vmem:[#allocation5 + $0x20] sm:$0x7f] }
 0x4d2   : > { %11359 = vmatprep.subr.bf16.mxu1 %v16393_v61  ;;  %v6343_v53 = vadd.f32 %v6333_v31, %v16345_v44  ;;  %v7903_v20 = vld [vmem:[#allocation5 + $0x20] sm:$0xfe]  ;;  %v7904_v31 = vld [vmem:[#allocation5 + $0x28] sm:$0xfe] }
 0x4d3   : > { %v6346_v45 = vmax.f32 %v6342_v47, 0.0  ;;  %v7930_v43 = vmul.f32 %v16538_v8, %v7903_v20  ;;  %v7931_v54 = vmul.f32 %v16545_v52, %v7904_v31 }
 0x4d4   : > { %v6347_v40 = vmax.f32 %v6343_v53, 0.0  ;;  %v6337_v61 = vpop.f32.mrb[66].mxu0  ;;  %v7875_v53 = vmul.f32 %v16530_v13, %v7848_v10 }
 0x4d5   : > { %11361 = vmatpush1.bf16.msra.mxu1 %v16412_v59  ;;  %v6350_v29 = vmul.f32 %v6346_v45, %v16372_v0  ;;  %v6344_v47 = vadd.f32 %v6337_v61, %v16329_v3  ;;  %v6339_v24 = vpop.f32.mrb[67].mxu0  ;;  %v8000_v59 = vld [vmem:[#allocation5 + $0x20] sm:$0xfc]  ;;  %v7876_v61 = vmul.f32 %v16542_v39, %v7849_v49  ;;  %v10118_v49 = vld [vmem:[%s17205_s4 + $0x7] ss:$8 sm:$0x3] }
 0x4d6   : > { %11363 = vmatprep.subr.bf16.mxu1 %v16416_v27  ;;  %v6351_v6 = vmul.f32 %v6347_v40, %v16384_v35  ;;  %v6345_v28 = vadd.f32 %v6339_v24, %v16345_v44  ;;  %v8042_v40 = vmul.f32 %v16551_v18, %v8001_v15  ;;  %v8041_v32 = vmul.f32 %v16548_v56, %v8000_v59  ;;  %v10119_v15 = vld [vmem:[%s17205_s4 + $0x10] ss:$8 sm:$0x3] }
 0x4d7   : > { %6355 = vst [vmem:[#allocation5 + $0x40] sm:$0xff] %v6350_v29  ;;  %v6348_v45 = vmax.f32 %v6344_v47, 0.0  ;;  %v8101_v29 = vrot.slane %v8044_v9, 2  ;;  %v7889_v47 = vadd.f32 %v7875_v53, %v7834_v55  ;;  %v7890_v24 = vadd.f32 %v7876_v61, %v7835_v46 }
 0x4d8   : > { %6356 = vst [vmem:[#allocation5 + $0x48] sm:$0xff] %v6351_v6  ;;  %v6349_v10 = vmax.f32 %v6345_v28, 0.0  ;;  %v7959_v6 = vrot.slane %v7931_v54, 1  ;;  %v7958_v28 = vrot.slane %v7930_v43, 1  ;;  %v8100_v59 = vrot.slane %v8042_v40, 2 }
 0x4d9   : > { %11365 = vmatpush1.bf16.msra.mxu1 %v16434_v23  ;;  %v6352_v20 = vmul.f32 %v6348_v45, %v16331_v36  ;;  %v8098_v45 = vrot.slane %v8043_v7, 2  ;;  %v16587_v9 = vrot.slane %v10118_v49, %v16293_v5  ;;  %v16594_v55 = vrot.slane %v10119_v15, %v16293_v5 }
 0x4da   : > { %11367 = vmatprep.subr.bf16.mxu1 %v16437_v21  ;;  %v6353_v31 = vmul.f32 %v6349_v10, %v16354_v16  ;;  %v16584_v21 = vrot.slane %v10117_v37, %v16295_v25  ;;  %v16590_v10 = vrot.slane %v10118_v49, %v16295_v25  ;;  %v8097_v46 = vrot.slane %v8041_v32, 2 }
 0x4db   : > { %6357 = vst [vmem:[#allocation5 + $0x50] sm:$0x1] %v6352_v20  ;;  %v8102_v54 = vsel %vm7777_vm3, %v8100_v59, %v8101_v29  ;;  %v16599_v43 = vrot.slane %v10119_v15, %v16295_v25  ;;  %v7987_v7 = vadd.f32 %v7959_v6, %v7890_v24 }
 0x4dc   : > { %6358 = vst [vmem:[#allocation5 + $0x58] sm:$0x1] %v6353_v31  ;;  %v7986_v31 = vadd.f32 %v7958_v28, %v7889_v47 }
 0x4dd   : > { %11369 = vmatpush1.bf16.msra.mxu1 %v16454_v34  ;;  %v8099_v34 = vsel %vm7777_vm3, %v8097_v46, %v8098_v45  ;;  %v8154_v15 = vadd.f32 %v8102_v54, %v7987_v7 }
 0x4de   : > { %11371 = vmatprep.subr.bf16.mxu1 %v16457_v22  ;;  %v8167_v53 = vld [vmem:[#allocation5 + $0x40] sm:$0x7f]  ;;  %v8153_v47 = vadd.f32 %v8099_v34, %v7986_v31 }
 0x4df   : > { %v8222_v61 = vld [vmem:[#allocation5 + $0x40] sm:$0xfe]  ;;  %v8168_v40 = vld [vmem:[#allocation5 + $0x48] sm:$0x7f]  ;;  %v8194_v22 = vmul.f32 %v16578_v50, %v8167_v53 }
 0x4e0   : > { %v8319_v37 = vld [vmem:[#allocation5 + $0x40] sm:$0xfc]  ;;  %v8223_v20 = vld [vmem:[#allocation5 + $0x48] sm:$0xfe]  ;;  %v8195_v5 = vmul.f32 %v16584_v21, %v8168_v40  ;;  %v8249_v29 = vmul.f32 %v16587_v9, %v8222_v61 }
 0x4e1   : > { %v8320_v49 = vld [vmem:[#allocation5 + $0x48] sm:$0xfc]  ;;  %v8250_v32 = vmul.f32 %v16590_v10, %v8223_v20  ;;  %11373 = vmatpush1.bf16.msra.mxu1 %v16468_v38  ;;  %v8360_v59 = vmul.f32 %v16594_v55, %v8319_v37  ;;  %v8208_v20 = vadd.f32 %v8194_v22, %v8153_v47 }
 0x4e2   : > { %11439 = vmatprep.subr.bf16.mxu1 %v15992_v26  ;;  %v8361_v24 = vmul.f32 %v16599_v43, %v8320_v49  ;;  %v8321_v6 = vld [vmem:[#allocation5 + $0x50] sm:$0x1]  ;;  %v8209_v28 = vadd.f32 %v8195_v5, %v8154_v15  ;;  %v8277_v61 = vrot.slane %v8249_v29, 1  ;;  %v7586_v22 = vld [vmem:[#allocation5 + $0x28] sm:$0xfe] }
 0x4e3   : > { %v8278_v45 = vrot.slane %v8250_v32, 1  ;;  %v8322_v46 = vld [vmem:[#allocation5 + $0x58] sm:$0x1]  ;;  %v8362_v40 = vmul.f32 %v16594_v55, %v8321_v6  ;;  %v8416_v25 = vrot.slane %v8360_v59, 2  ;;  %v7585_v29 = vld [vmem:[#allocation5 + $0x20] sm:$0xfe] }
 0x4e4   : > { %v8363_v53 = vmul.f32 %v16599_v43, %v8322_v46  ;;  %v8419_v54 = vrot.slane %v8361_v24, 2  ;;  %v8305_v34 = vadd.f32 %v8277_v61, %v8208_v20  ;;  %v7687_v32 = vld [vmem:[#allocation5 + $0x38] sm:$0x1]  ;;  %v7686_v15 = vld [vmem:[#allocation5 + $0x30] sm:$0x1]  ;;  %v7612_v24 = vmul.f32 %v16493_v14, %v7585_v29 }
 0x4e5   : > { %v8417_v38 = vrot.slane %v8362_v40, 2  ;;  %v8306_v37 = vadd.f32 %v8278_v45, %v8209_v28  ;;  %v7685_v59 = vld [vmem:[#allocation5 + $0x28] sm:$0xfc]  ;;  %v7727_v47 = vmul.f32 %v16500_v33, %v7686_v15  ;;  %v7545_v45 = vld [vmem:[#allocation5 + $0x20] sm:$0x7f] }
 0x4e6   : > { %v8420_v7 = vrot.slane %v8363_v53, 2  ;;  %v7726_v6 = vmul.f32 %v16496_v11, %v7685_v59  ;;  %v7546_v28 = vld [vmem:[#allocation5 + $0x28] sm:$0x7f]  ;;  %v7640_v61 = vrot.slane %v7612_v24, 1  ;;  %v8007_v15 = vld [vmem:[#allocation5 + $0x58] sm:$0x1] }
 0x4e7   : > { %v8418_v26 = vsel %vm7777_vm3, %v8416_v25, %v8417_v38  ;;  %v7613_v25 = vmul.f32 %v16486_v12, %v7586_v22  ;;  %v7728_v38 = vmul.f32 %v16496_v11, %v7687_v32  ;;  %v7906_v22 = vld [vmem:[#allocation5 + $0x48] sm:$0xfe]  ;;  %v7571_v32 = vmul.f32 %v16508_v42, %v7545_v45  ;;  %v8006_v23 = vld [vmem:[#allocation5 + $0x50] sm:$0x1] }
 0x4e8   : > { %v8421_v49 = vsel %vm7777_vm3, %v8419_v54, %v8420_v7  ;;  %v8472_v5 = vadd.f32 %v8418_v26, %v8305_v34  ;;  %v7684_v26 = vld [vmem:[#allocation5 + $0x20] sm:$0xfc]  ;;  %v7572_v34 = vmul.f32 %v16503_v41, %v7546_v28 }
 0x4e9   : > { %v8473_v31 = vadd.f32 %v8421_v49, %v8306_v37  ;;  %v7725_v46 = vmul.f32 %v16500_v33, %v7684_v26  ;;  %v7641_v53 = vrot.slane %v7613_v25, 1  ;;  %v7788_v20 = vrot.slane %v7728_v38, 2  ;;  %v7850_v25 = vld [vmem:[#allocation5 + $0x40] sm:$0x7f] }
 0x4ea   : > { %v7785_v37 = vrot.slane %v7727_v47, 2 }
 0x4eb   : > { %8627 = vmatprep.mubr.f32.mxu0 %v8473_v31  ;;  %v7787_v31 = vrot.slane %v7726_v6, 2  ;;  %v7784_v59 = vrot.slane %v7725_v46, 2  ;;  %v7669_v26 = vadd.f32 %v7641_v53, %v7572_v34  ;;  %v8004_v34 = vld [vmem:[#allocation5 + $0x40] sm:$0xfc] }
 0x4ec   : > { %8628 = vmatmul.mubr.f32.vlgmr.msra.gmra.mrb[76].mxu0 %v8472_v5  ;;  %v7851_v5 = vld [vmem:[#allocation5 + $0x48] sm:$0x7f] }
 0x4ed   : > { %11377 = vmatpush1.bf16.msra.mxu0 %v16017_v17  ;;  %v7789_v47 = vsel %vm7777_vm3, %v7787_v31, %v7788_v20  ;;  %v7878_v46 = vmul.f32 %v16542_v39, %v7851_v5  ;;  %v7933_v20 = vmul.f32 %v16545_v52, %v7906_v22  ;;  %v8047_v5 = vmul.f32 %v16548_v56, %v8006_v23 }
 0x4ee   : > { %11379 = vmatprep.subr.bf16.mxu0 %v16023_v30 }
 0x4ef   : > { %v7961_v23 = vrot.slane %v7933_v20, 1 }
 0x4f1   : > { %11381 = vmatpush1.bf16.msra.mxu0 %v16054_v51 }
 0x4f2   : > { %11383 = vmatprep.subr.bf16.mxu0 %v16078_v1 }
 0x4f5   : > { %11385 = vmatpush1.bf16.msra.mxu0 %v16087_v2 }
 0x4f6   : > { %v6566_v40 = vpop.f32.mrb[68].mxu1  ;;  %11387 = vmatprep.subr.bf16.mxu0 %v16107_v48 }
 0x4f7   : > { %v6577_v54 = vadd.f32 %v6566_v40, %v16329_v3  ;;  %v6568_v7 = vpop.f32.mrb[69].mxu1  ;;  %v7668_v40 = vadd.f32 %v7640_v61, %v7571_v32  ;;  %v8048_v61 = vmul.f32 %v16551_v18, %v8007_v15  ;;  %v7877_v32 = vmul.f32 %v16530_v13, %v7850_v25 }
 0x4f8   : > { %v6578_v49 = vadd.f32 %v6568_v7, %v16345_v44  ;;  %v7905_v7 = vld [vmem:[#allocation5 + $0x40] sm:$0xfe] }
 0x4f9   : > { %v6581_v29 = vmax.f32 %v6577_v54, 0.0  ;;  %11389 = vmatpush1.bf16.msra.mxu0 %v16122_v4  ;;  %v8005_v54 = vld [vmem:[#allocation5 + $0x48] sm:$0xfc]  ;;  %v7786_v4 = vsel %vm7777_vm3, %v7784_v59, %v7785_v37  ;;  %v7837_v59 = vadd.f32 %v7789_v47, %v7669_v26 }
 0x4fa   : > { %v6582_v38 = vmax.f32 %v6578_v49, 0.0  ;;  %v6572_v24 = vpop.f32.mrb[70].mxu1  ;;  %11391 = vmatprep.subr.bf16.mxu0 %v16125_v57  ;;  %v7836_v15 = vadd.f32 %v7786_v4, %v7668_v40 }
 0x4fb   : > { %v6585_v6 = vmul.f32 %v6581_v29, %v16372_v0  ;;  %v6579_v28 = vadd.f32 %v6572_v24, %v16329_v3  ;;  %v6574_v45 = vpop.f32.mrb[71].mxu1  ;;  %v7932_v29 = vmul.f32 %v16538_v8, %v7905_v7  ;;  %v8045_v24 = vmul.f32 %v16548_v56, %v8004_v34 }
 0x4fc   : > { %v6586_v49 = vmul.f32 %v6582_v38, %v16384_v35  ;;  %v6580_v53 = vadd.f32 %v6574_v45, %v16345_v44  ;;  %v8046_v38 = vmul.f32 %v16551_v18, %v8005_v54  ;;  %v8107_v7 = vrot.slane %v8048_v61, 2 }
 0x4fd   : > { %6590 = vst [vmem:[#allocation5 + $0x60] sm:$0xff] %v6585_v6  ;;  %v6583_v31 = vmax.f32 %v6579_v28, 0.0  ;;  %11393 = vmatpush1.bf16.msra.mxu0 %v16155_v62  ;;  %v7892_v6 = vadd.f32 %v7878_v46, %v7837_v59  ;;  %v7891_v28 = vadd.f32 %v7877_v32, %v7836_v15  ;;  %v7960_v45 = vrot.slane %v7932_v29, 1 }
 0x4fe   : > { %6591 = vst [vmem:[#allocation5 + $0x68] sm:$0xff] %v6586_v49  ;;  %v6584_v37 = vmax.f32 %v6580_v53, 0.0  ;;  %11395 = vmatprep.subr.bf16.mxu0 %v16161_v19  ;;  %v8104_v49 = vrot.slane %v8047_v5, 2  ;;  %v8106_v26 = vrot.slane %v8046_v38, 2  ;;  %v8103_v47 = vrot.slane %v8045_v24, 2  ;;  %v17732_v38 = vld [vmem:[#allocation7_spill] sm:$0xff] }
 0x4ff   : > { %v6587_v22 = vmul.f32 %v6583_v31, %v16331_v36  ;;  %v7989_v34 = vadd.f32 %v7961_v23, %v7892_v6  ;;  %v7988_v20 = vadd.f32 %v7960_v45, %v7891_v28 }
 0x500   : > { %v6588_v25 = vmul.f32 %v6584_v37, %v16354_v16  ;;  %v8108_v4 = vsel %vm7777_vm3, %v8106_v26, %v8107_v7  ;;  %v8105_v32 = vsel %vm7777_vm3, %v8103_v47, %v8104_v49  ;;  %v7588_v7 = vld [vmem:[#allocation5 + $0x48] sm:$0xfe]  ;;  %v7691_v26 = vld [vmem:[#allocation5 + $0x58] sm:$0x1]  ;;  %v17733_v47 = vld [vmem:[#allocation34_spill] sm:$0xff] }
 0x501   : > { %6592 = vst [vmem:[#allocation5 + $0x70] sm:$0x1] %v6587_v22  ;;  %11397 = vmatpush1.bf16.msra.mxu0 %v16185_v58  ;;  %v8156_v22 = vadd.f32 %v8108_v4, %v7989_v34  ;;  %v7587_v4 = vld [vmem:[#allocation5 + $0x40] sm:$0xfe]  ;;  %v7690_v34 = vld [vmem:[#allocation5 + $0x50] sm:$0x1] }
 0x502   : > { %6593 = vst [vmem:[#allocation5 + $0x78] sm:$0x1] %v6588_v25  ;;  %11399 = vmatprep.subr.bf16.mxu0 %v16192_v63  ;;  %v8155_v25 = vadd.f32 %v8105_v32, %v7988_v20 }
 0x504   : > { %v8169_v40 = vld [vmem:[#allocation5 + $0x60] sm:$0x7f] }
 0x505   : > { %v8224_v54 = vld [vmem:[#allocation5 + $0x60] sm:$0xfe]  ;;  %v8170_v46 = vld [vmem:[#allocation5 + $0x68] sm:$0x7f]  ;;  %11401 = vmatpush1.bf16.msra.mxu0 %v16228_v60  ;;  %v8196_v37 = vmul.f32 %v16578_v50, %v8169_v40 }
 0x506   : > { %v8323_v53 = vld [vmem:[#allocation5 + $0x60] sm:$0xfc]  ;;  %v8225_v61 = vld [vmem:[#allocation5 + $0x68] sm:$0xfe]  ;;  %v8197_v29 = vmul.f32 %v16584_v21, %v8170_v46  ;;  %v8251_v59 = vmul.f32 %v16587_v9, %v8224_v54  ;;  %11403 = vmatprep.subr.bf16.mxu0 %v17732_v38 }
 0x507   : > { %v8324_v31 = vld [vmem:[#allocation5 + $0x68] sm:$0xfc]  ;;  %v8252_v5 = vmul.f32 %v16590_v10, %v8225_v61  ;;  %v8364_v15 = vmul.f32 %v16594_v55, %v8323_v53  ;;  %v8210_v54 = vadd.f32 %v8196_v37, %v8155_v25  ;;  %v17734_v53 = vld [vmem:[#allocation18_spill] sm:$0xff]  ;;  %v7614_v37 = vmul.f32 %v16493_v14, %v7587_v4  ;;  %v17735_v25 = vld [vmem:[#allocation13_spill] sm:$0xff] }
 0x508   : > { %v8365_v24 = vmul.f32 %v16599_v43, %v8324_v31  ;;  %v8325_v6 = vld [vmem:[#allocation5 + $0x70] sm:$0x1]  ;;  %v8211_v23 = vadd.f32 %v8197_v29, %v8156_v22  ;;  %v8279_v46 = vrot.slane %v8251_v59, 1  ;;  %v7615_v29 = vmul.f32 %v16486_v12, %v7588_v7  ;;  %v7548_v7 = vld [vmem:[#allocation5 + $0x48] sm:$0x7f] }
 0x509   : > { %v8280_v28 = vrot.slane %v8252_v5, 1  ;;  %v8326_v45 = vld [vmem:[#allocation5 + $0x78] sm:$0x1]  ;;  %v8366_v49 = vmul.f32 %v16594_v55, %v8325_v6  ;;  %11405 = vmatpush1.bf16.msra.mxu0 %v17733_v47  ;;  %v8422_v61 = vrot.slane %v8364_v15, 2  ;;  %v7689_v5 = vld [vmem:[#allocation5 + $0x48] sm:$0xfc]  ;;  %v7732_v22 = vmul.f32 %v16496_v11, %v7691_v26 }
 0x50a   : > { %v8367_v40 = vmul.f32 %v16599_v43, %v8326_v45  ;;  %11407 = vmatprep.subr.bf16.mxu0 %v17734_v53  ;;  %v8425_v20 = vrot.slane %v8365_v24, 2  ;;  %v7688_v6 = vld [vmem:[#allocation5 + $0x40] sm:$0xfc]  ;;  %v7731_v59 = vmul.f32 %v16500_v33, %v7690_v34  ;;  %v8307_v45 = vadd.f32 %v8279_v46, %v8210_v54  ;;  %v17736_v24 = vld [vmem:[#allocation33_spill] sm:$0xff] }
 0x50b   : > { %v8423_v31 = vrot.slane %v8366_v49, 2  ;;  %v8308_v38 = vadd.f32 %v8280_v28, %v8211_v23  ;;  %v7729_v26 = vmul.f32 %v16500_v33, %v7688_v6  ;;  %v7643_v28 = vrot.slane %v7615_v29, 1  ;;  %v7853_v29 = vld [vmem:[#allocation5 + $0x68] sm:$0x7f] }
 0x50c   : > { %v8426_v32 = vrot.slane %v8367_v40, 2  ;;  %v7730_v40 = vmul.f32 %v16496_v11, %v7689_v5  ;;  %v7794_v4 = vrot.slane %v7732_v22, 2  ;;  %v7642_v34 = vrot.slane %v7614_v37, 1  ;;  %v7908_v5 = vld [vmem:[#allocation5 + $0x68] sm:$0xfe] }
 0x50d   : > { %v8424_v47 = vsel %vm7777_vm3, %v8422_v61, %v8423_v31  ;;  %11409 = vmatpush1.bf16.msra.mxu0 %v17735_v25  ;;  %v7547_v61 = vld [vmem:[#allocation5 + $0x40] sm:$0x7f]  ;;  %v7791_v14 = vrot.slane %v7731_v59, 2  ;;  %v7790_v6 = vrot.slane %v7729_v26, 2  ;;  %v17739_v26 = vld [vmem:[#allocation11_spill] sm:$0xff] }
 0x50e   : > { %v8427_v15 = vsel %vm7777_vm3, %v8425_v20, %v8426_v32  ;;  %11411 = vmatprep.subr.bf16.mxu0 %v17736_v24  ;;  %v8474_v23 = vadd.f32 %v8424_v47, %v8307_v45  ;;  %v17737_v20 = vld [vmem:[#allocation12_spill] sm:$0xff]  ;;  %v17738_v32 = vld [vmem:[#allocation14_spill] sm:$0xff]  ;;  %v7793_v47 = vrot.slane %v7730_v40, 2  ;;  %v7573_v22 = vmul.f32 %v16508_v42, %v7547_v61 }
 0x50f   : > { %v8475_v49 = vadd.f32 %v8427_v15, %v8308_v38  ;;  %v7574_v38 = vmul.f32 %v16503_v41, %v7548_v7  ;;  %v8011_v15 = vld [vmem:[#allocation5 + $0x78] sm:$0x1]  ;;  %v7852_v45 = vld [vmem:[#allocation5 + $0x60] sm:$0x7f]  ;;  %v8010_v40 = vld [vmem:[#allocation5 + $0x70] sm:$0x1] }
 0x511   : > { %v6801_v31 = vpop.f32.mrb[68].mxu0  ;;  %8700 = vmatprep.mubr.f32.mxu1 %v8475_v49  ;;  %11413 = vmatpush1.bf16.msra.mxu0 %v17737_v20  ;;  %v7671_v59 = vadd.f32 %v7643_v28, %v7574_v38  ;;  %v7880_v28 = vmul.f32 %v16542_v39, %v7853_v29  ;;  %v7935_v38 = vmul.f32 %v16545_v52, %v7908_v5  ;;  %v17741_v52 = vld [vmem:[#allocation25_spill] sm:$0xff] }
 0x512   : > { %v6812_v25 = vadd.f32 %v6801_v31, %v16329_v3  ;;  %v6803_v54 = vpop.f32.mrb[69].mxu0  ;;  %8701 = vmatmul.mubr.f32.vlgmr.msra.gmra.mrb[80].mxu1 %v8474_v23  ;;  %11415 = vmatprep.subr.bf16.mxu0 %v17738_v32  ;;  %v7795_v23 = vsel %vm7777_vm3, %v7793_v47, %v7794_v4  ;;  %v7670_v31 = vadd.f32 %v7642_v34, %v7573_v22  ;;  %v7907_v32 = vld [vmem:[#allocation5 + $0x60] sm:$0xfe]  ;;  %v17740_v34 = vld [vmem:[#allocation35_spill] sm:$0xff] }
 0x513   : > { %v6813_v46 = vadd.f32 %v6803_v54, %v16345_v44  ;;  %11441 = vmatpush1.bf16.msra.mxu1 %v16017_v17  ;;  %v7792_v54 = vsel %vm7777_vm3, %v7790_v6, %v7791_v14  ;;  %v8052_v14 = vmul.f32 %v16551_v18, %v8011_v15  ;;  %v8008_v47 = vld [vmem:[#allocation5 + $0x60] sm:$0xfc]  ;;  %v7879_v29 = vmul.f32 %v16530_v13, %v7852_v45 }
 0x514   : > { %v6816_v37 = vmax.f32 %v6812_v25, 0.0  ;;  %11443 = vmatprep.subr.bf16.mxu1 %v16023_v30  ;;  %v7934_v5 = vmul.f32 %v16538_v8, %v7907_v32  ;;  %v8051_v6 = vmul.f32 %v16548_v56, %v8010_v40  ;;  %v7838_v15 = vadd.f32 %v7792_v54, %v7670_v31  ;;  %v17743_v31 = vld [vmem:[#allocation17_spill] sm:$0xff] }
 0x515   : > { %v6817_v49 = vmax.f32 %v6813_v46, 0.0  ;;  %v6807_v7 = vpop.f32.mrb[70].mxu0  ;;  %11417 = vmatpush1.bf16.msra.mxu0 %v17739_v26  ;;  %v8009_v46 = vld [vmem:[#allocation5 + $0x68] sm:$0xfc]  ;;  %v8113_v45 = vrot.slane %v8052_v14, 2  ;;  %v17744_v14 = vld [vmem:[#allocation24_spill] sm:$0xff] }
 0x516   : > { %v6820_v41 = vmul.f32 %v6816_v37, %v16372_v0  ;;  %v6814_v61 = vadd.f32 %v6807_v7, %v16329_v3  ;;  %v6809_v25 = vpop.f32.mrb[71].mxu0  ;;  %11419 = vmatprep.subr.bf16.mxu0 %v17740_v34  ;;  %v8050_v7 = vmul.f32 %v16551_v18, %v8009_v46  ;;  %v17742_v34 = vld [vmem:[#allocation9_spill] sm:$0xff]  ;;  %v8110_v40 = vrot.slane %v8051_v6, 2 }
 0x517   : > { %v6821_v42 = vmul.f32 %v6817_v49, %v16384_v35  ;;  %v6815_v4 = vadd.f32 %v6809_v25, %v16345_v44  ;;  %11445 = vmatpush1.bf16.msra.mxu1 %v16054_v51  ;;  %v7839_v49 = vadd.f32 %v7795_v23, %v7671_v59  ;;  %v7893_v59 = vadd.f32 %v7879_v29, %v7838_v15 }
 0x518   : > { %6825 = vst [vmem:[#allocation5 + $0x80] sm:$0xff] %v6820_v41  ;;  %v6818_v22 = vmax.f32 %v6814_v61, 0.0  ;;  %11447 = vmatprep.subr.bf16.mxu1 %v16078_v1  ;;  %v8049_v41 = vmul.f32 %v16548_v56, %v8008_v47  ;;  %v7962_v23 = vrot.slane %v7934_v5, 1  ;;  %v8112_v46 = vrot.slane %v8050_v7, 2 }
 0x519   : > { %6826 = vst [vmem:[#allocation5 + $0x88] sm:$0xff] %v6821_v42  ;;  %v6819_v37 = vmax.f32 %v6815_v4, 0.0  ;;  %11421 = vmatpush1.bf16.msra.mxu0 %v17741_v52  ;;  %v7894_v32 = vadd.f32 %v7880_v28, %v7839_v49  ;;  %v7963_v42 = vrot.slane %v7935_v38, 1 }
 0x51a   : > { %v6822_v25 = vmul.f32 %v6818_v22, %v16331_v36  ;;  %11423 = vmatprep.subr.bf16.mxu0 %v17742_v34  ;;  %v8109_v54 = vrot.slane %v8049_v41, 2  ;;  %v8114_v4 = vsel %vm7777_vm3, %v8112_v46, %v8113_v45 }
 0x51b   : > { %v6823_v61 = vmul.f32 %v6819_v37, %v16354_v16  ;;  %11449 = vmatpush1.bf16.msra.mxu1 %v16087_v2  ;;  %v7991_v38 = vadd.f32 %v7963_v42, %v7894_v32  ;;  %v7990_v37 = vadd.f32 %v7962_v23, %v7893_v59  ;;  %v17746_v42 = vld [vmem:[#allocation32_spill] sm:$0xff] }
 0x51c   : > { %6827 = vst [vmem:[#allocation5 + $0x90] sm:$0x1] %v6822_v25  ;;  %11451 = vmatprep.subr.bf16.mxu1 %v16107_v48  ;;  %v8111_v49 = vsel %vm7777_vm3, %v8109_v54, %v8110_v40 }
 0x51d   : > { %6828 = vst [vmem:[#allocation5 + $0x98] sm:$0x1] %v6823_v61  ;;  %11425 = vmatpush1.bf16.msra.mxu0 %v17743_v31  ;;  %v17745_v61 = vld [vmem:[#allocation8_spill] sm:$0xff]  ;;  %v8158_v45 = vadd.f32 %v8114_v4, %v7991_v38  ;;  %v8157_v23 = vadd.f32 %v8111_v49, %v7990_v37 }
 0x51e   : > { %11427 = vmatprep.subr.bf16.mxu0 %v16416_v27 }
 0x51f   : > { %v8171_v47 = vld [vmem:[#allocation5 + $0x80] sm:$0x7f]  ;;  %11453 = vmatpush1.bf16.msra.mxu1 %v17744_v14 }
 0x520   : > { %v8226_v22 = vld [vmem:[#allocation5 + $0x80] sm:$0xfe]  ;;  %v8172_v29 = vld [vmem:[#allocation5 + $0x88] sm:$0x7f]  ;;  %11455 = vmatprep.subr.bf16.mxu1 %v16125_v57  ;;  %v8198_v15 = vmul.f32 %v16578_v50, %v8171_v47 }
 0x521   : > { %v8327_v28 = vld [vmem:[#allocation5 + $0x80] sm:$0xfc]  ;;  %v8227_v5 = vld [vmem:[#allocation5 + $0x88] sm:$0xfe]  ;;  %v8199_v7 = vmul.f32 %v16584_v21, %v8172_v29  ;;  %v8253_v41 = vmul.f32 %v16587_v9, %v8226_v22  ;;  %11429 = vmatpush1.bf16.msra.mxu0 %v17745_v61 }
 0x522   : > { %v8328_v6 = vld [vmem:[#allocation5 + $0x88] sm:$0xfc]  ;;  %v8254_v25 = vmul.f32 %v16590_v10, %v8227_v5  ;;  %v8368_v32 = vmul.f32 %v16594_v55, %v8327_v28  ;;  %11431 = vmatprep.subr.bf16.mxu0 %v17746_v42  ;;  %v8212_v4 = vadd.f32 %v8198_v15, %v8157_v23  ;;  %v17747_v28 = vld [vmem:[#allocation26_spill] sm:$0xff]  ;;  %v17749_v15 = vld [vmem:[#allocation16_spill] sm:$0xff] }
 0x523   : > { %v8369_v59 = vmul.f32 %v16599_v43, %v8328_v6  ;;  %v8329_v40 = vld [vmem:[#allocation5 + $0x90] sm:$0x1]  ;;  %11457 = vmatpush1.bf16.msra.mxu1 %v16155_v62  ;;  %v8213_v46 = vadd.f32 %v8199_v7, %v8158_v45  ;;  %v8281_v38 = vrot.slane %v8253_v41, 1  ;;  %v17748_v6 = vld [vmem:[#allocation30_spill] sm:$0xff]  ;;  %v17750_v23 = vld [vmem:[#allocation21_spill] sm:$0xff] }
 0x524   : > { %v8282_v54 = vrot.slane %v8254_v25, 1  ;;  %v8330_v29 = vld [vmem:[#allocation5 + $0x98] sm:$0x1]  ;;  %v8370_v47 = vmul.f32 %v16594_v55, %v8329_v40  ;;  %11459 = vmatprep.subr.bf16.mxu1 %v16161_v19  ;;  %v8428_v5 = vrot.slane %v8368_v32, 2 }
 0x525   : > { %v8371_v22 = vmul.f32 %v16599_v43, %v8330_v29  ;;  %11433 = vmatpush1.bf16.msra.mxu0 %v17747_v28  ;;  %v8431_v37 = vrot.slane %v8369_v59, 2  ;;  %v8309_v40 = vadd.f32 %v8281_v38, %v8212_v4  ;;  %v17751_v59 = vld [vmem:[#allocation7_spill] sm:$0xff]  ;;  %v7589_v29 = vld [vmem:[#allocation5 + $0x60] sm:$0xfe] }
 0x526   : > { %v8429_v42 = vrot.slane %v8370_v47, 2  ;;  %11435 = vmatprep.subr.bf16.mxu0 %v17748_v6  ;;  %v8310_v7 = vadd.f32 %v8282_v54, %v8213_v46  ;;  %v17752_v46 = vld [vmem:[#allocation34_spill] sm:$0xff]  ;;  %v7695_v54 = vld [vmem:[#allocation5 + $0x78] sm:$0x1]  ;;  %v7694_v47 = vld [vmem:[#allocation5 + $0x70] sm:$0x1] }
 0x527   : > { %v8432_v49 = vrot.slane %v8371_v22, 2  ;;  %11461 = vmatpush1.bf16.msra.mxu1 %v16185_v58  ;;  %v7693_v4 = vld [vmem:[#allocation5 + $0x68] sm:$0xfc]  ;;  %v7692_v38 = vld [vmem:[#allocation5 + $0x60] sm:$0xfc] }
 0x528   : > { %v8430_v25 = vsel %vm7777_vm3, %v8428_v5, %v8429_v42  ;;  %11463 = vmatprep.subr.bf16.mxu1 %v16192_v63  ;;  %v7590_v42 = vld [vmem:[#allocation5 + $0x68] sm:$0xfe]  ;;  %v7736_v5 = vmul.f32 %v16496_v11, %v7695_v54 }
 0x529   : > { %v8433_v45 = vsel %vm7777_vm3, %v8431_v37, %v8432_v49  ;;  %11437 = vmatpush1.bf16.msra.mxu0 %v17749_v15  ;;  %v8476_v32 = vadd.f32 %v8430_v25, %v8309_v40  ;;  %v7617_v22 = vmul.f32 %v16486_v12, %v7590_v42  ;;  %v17753_v37 = vld [vmem:[#allocation28_spill] sm:$0xff]  ;;  %v17754_v25 = vld [vmem:[#allocation13_spill] sm:$0xff]  ;;  %v7734_v40 = vmul.f32 %v16496_v11, %v7693_v4  ;;  %v7549_v42 = vld [vmem:[#allocation5 + $0x60] sm:$0x7f] }
 0x52a   : > { %v8477_v41 = vadd.f32 %v8433_v45, %v8310_v7  ;;  %11503 = vmatprep.subr.bf16.mxu0 %v17750_v23  ;;  %v7616_v49 = vmul.f32 %v17753_v37, %v7589_v29  ;;  %v7735_v7 = vmul.f32 %v16500_v33, %v7694_v47  ;;  %v7550_v45 = vld [vmem:[#allocation5 + $0x68] sm:$0x7f] }
 0x52b   : > { %11465 = vmatpush1.bf16.msra.mxu1 %v16228_v60  ;;  %v7855_v15 = vld [vmem:[#allocation5 + $0x88] sm:$0x7f] }
 0x52c   : > { %8773 = vmatprep.mubr.f32.mxu0 %v8477_v41  ;;  %11467 = vmatprep.subr.bf16.mxu1 %v17751_v59  ;;  %v7733_v41 = vmul.f32 %v16500_v33, %v7692_v38  ;;  %v7644_v29 = vrot.slane %v7616_v49, 1  ;;  %v17756_v38 = vld [vmem:[#allocation14_spill] sm:$0xff] }
 0x52d   : > { %8774 = vmatmul.mubr.f32.vlgmr.msra.gmra.mrb[78].mxu0 %v8476_v32  ;;  %v7645_v32 = vrot.slane %v7617_v22, 1  ;;  %v7799_v22 = vrot.slane %v7734_v40, 2  ;;  %v7854_v33 = vld [vmem:[#allocation5 + $0x80] sm:$0x7f]  ;;  %v8014_v40 = vld [vmem:[#allocation5 + $0x90] sm:$0x1] }
 0x52e   : > { %11505 = vmatpush1.bf16.msra.mxu0 %v16017_v17  ;;  %v17755_v17 = vld [vmem:[#allocation38_spill] sm:$0xff]  ;;  %v7796_v49 = vrot.slane %v7733_v41, 2 }
 0x52f   : > { %11507 = vmatprep.subr.bf16.mxu0 %v16023_v30  ;;  %11469 = vmatpush1.bf16.msra.mxu1 %v17752_v46  ;;  %v7797_v30 = vrot.slane %v7735_v7, 2  ;;  %v7576_v23 = vmul.f32 %v17755_v17, %v7550_v45 }
 0x530   : > { %11471 = vmatprep.subr.bf16.mxu1 %v17734_v53 }
 0x532   : > { %11509 = vmatpush1.bf16.msra.mxu0 %v16054_v51  ;;  %v7800_v51 = vrot.slane %v7736_v5, 2 }
 0x533   : > { %11511 = vmatprep.subr.bf16.mxu0 %v16078_v1  ;;  %11473 = vmatpush1.bf16.msra.mxu1 %v17754_v25  ;;  %v7673_v25 = vadd.f32 %v7645_v32, %v7576_v23  ;;  %v7882_v32 = vmul.f32 %v16542_v39, %v7855_v15  ;;  %v8055_v15 = vmul.f32 %v16548_v56, %v8014_v40 }
 0x534   : > { %11475 = vmatprep.subr.bf16.mxu1 %v17736_v24  ;;  %v17757_v24 = vld [vmem:[#allocation39_spill] sm:$0xff]  ;;  %v7801_v45 = vsel %vm7777_vm3, %v7799_v22, %v7800_v51 }
 0x535   : > { %v7575_v5 = vmul.f32 %v17757_v24, %v7549_v42 }
 0x536   : > { %11513 = vmatpush1.bf16.msra.mxu0 %v16087_v2  ;;  %v7036_v54 = vpop.f32.mrb[72].mxu1  ;;  %v7910_v2 = vld [vmem:[#allocation5 + $0x88] sm:$0xfe] }
 0x537   : > { %11515 = vmatprep.subr.bf16.mxu0 %v16107_v48  ;;  %v7047_v47 = vadd.f32 %v7036_v54, %v16329_v3  ;;  %v7038_v1 = vpop.f32.mrb[73].mxu1  ;;  %11477 = vmatpush1.bf16.msra.mxu1 %v17737_v20  ;;  %v8015_v48 = vld [vmem:[#allocation5 + $0x98] sm:$0x1]  ;;  %v7672_v17 = vadd.f32 %v7644_v29, %v7575_v5  ;;  %v17758_v29 = vld [vmem:[#allocation35_spill] sm:$0xff] }
 0x538   : > { %v7048_v4 = vadd.f32 %v7038_v1, %v16345_v44  ;;  %11479 = vmatprep.subr.bf16.mxu1 %v17756_v38  ;;  %v7798_v1 = vsel %vm7777_vm3, %v7796_v49, %v7797_v30  ;;  %v7909_v38 = vld [vmem:[#allocation5 + $0x80] sm:$0xfe]  ;;  %v17759_v30 = vld [vmem:[#allocation40_spill] sm:$0xff]  ;;  %v8056_v5 = vmul.f32 %v16551_v18, %v8015_v48 }
 0x539   : > { %v7051_v7 = vmax.f32 %v7047_v47, 0.0  ;;  %v8013_v47 = vld [vmem:[#allocation5 + $0x88] sm:$0xfc]  ;;  %v7937_v22 = vmul.f32 %v17759_v30, %v7910_v2  ;;  %v8012_v49 = vld [vmem:[#allocation5 + $0x80] sm:$0xfc]  ;;  %v7840_v48 = vadd.f32 %v7798_v1, %v7672_v17 }
 0x53a   : > { %11517 = vmatpush1.bf16.msra.mxu0 %v17744_v14  ;;  %v7052_v54 = vmax.f32 %v7048_v4, 0.0  ;;  %v7042_v20 = vpop.f32.mrb[74].mxu1  ;;  %v8054_v14 = vmul.f32 %v16551_v18, %v8013_v47  ;;  %v8116_v47 = vrot.slane %v8055_v15, 2 }
 0x53b   : > { %11519 = vmatprep.subr.bf16.mxu0 %v16125_v57  ;;  %v7055_v42 = vmul.f32 %v7051_v7, %v16372_v0  ;;  %v7049_v41 = vadd.f32 %v7042_v20, %v16329_v3  ;;  %v7044_v23 = vpop.f32.mrb[75].mxu1  ;;  %11481 = vmatpush1.bf16.msra.mxu1 %v17739_v26  ;;  %v7881_v20 = vmul.f32 %v16530_v13, %v7854_v33 }
 0x53c   : > { %v7056_v4 = vmul.f32 %v7052_v54, %v16384_v35  ;;  %v7050_v51 = vadd.f32 %v7044_v23, %v16345_v44  ;;  %11483 = vmatprep.subr.bf16.mxu1 %v17758_v29  ;;  %v7936_v57 = vmul.f32 %v16538_v8, %v7909_v38  ;;  %v7841_v23 = vadd.f32 %v7801_v45, %v7673_v25 }
 0x53d   : > { %7060 = vst [vmem:[#allocation5 + $0xa0] sm:$0xff] %v7055_v42  ;;  %v7053_v7 = vmax.f32 %v7049_v41, 0.0  ;;  %v8053_v33 = vmul.f32 %v16548_v56, %v8012_v49  ;;  %v8119_v42 = vrot.slane %v8056_v5, 2  ;;  %v7965_v41 = vrot.slane %v7937_v22, 1 }
 0x53e   : > { %11521 = vmatpush1.bf16.msra.mxu0 %v16155_v62  ;;  %7061 = vst [vmem:[#allocation5 + $0xa8] sm:$0xff] %v7056_v4  ;;  %v7054_v54 = vmax.f32 %v7050_v51, 0.0  ;;  %v7896_v40 = vadd.f32 %v7882_v32, %v7841_v23  ;;  %v7895_v25 = vadd.f32 %v7881_v20, %v7840_v48  ;;  %v7964_v45 = vrot.slane %v7936_v57, 1 }
 0x53f   : > { %11523 = vmatprep.subr.bf16.mxu0 %v16161_v19  ;;  %v7057_v2 = vmul.f32 %v7053_v7, %v16331_v36  ;;  %11485 = vmatpush1.bf16.msra.mxu1 %v17741_v52  ;;  %v8118_v4 = vrot.slane %v8054_v14, 2  ;;  %v8115_v17 = vrot.slane %v8053_v33, 2 }
 0x540   : > { %v7058_v38 = vmul.f32 %v7054_v54, %v16354_v16  ;;  %11487 = vmatprep.subr.bf16.mxu1 %v17742_v34  ;;  %v7993_v22 = vadd.f32 %v7965_v41, %v7896_v40  ;;  %v7992_v20 = vadd.f32 %v7964_v45, %v7895_v25  ;;  %v7592_v25 = vld [vmem:[#allocation5 + $0x88] sm:$0xfe] }
 0x541   : > { %7062 = vst [vmem:[#allocation5 + $0xb0] sm:$0x1] %v7057_v2  ;;  %v8120_v1 = vsel %vm7777_vm3, %v8118_v4, %v8119_v42  ;;  %v8117_v15 = vsel %vm7777_vm3, %v8115_v17, %v8116_v47 }
 0x542   : > { %11525 = vmatpush1.bf16.msra.mxu0 %v16185_v58  ;;  %7063 = vst [vmem:[#allocation5 + $0xb8] sm:$0x1] %v7058_v38  ;;  %v8160_v48 = vadd.f32 %v8120_v1, %v7993_v22  ;;  %v17760_v38 = vld [vmem:[#allocation32_spill] sm:$0xff]  ;;  %v8159_v42 = vadd.f32 %v8117_v15, %v7992_v20 }
 0x543   : > { %11527 = vmatprep.subr.bf16.mxu0 %v16192_v63  ;;  %11489 = vmatpush1.bf16.msra.mxu1 %v17743_v31 }
 0x544   : > { %11491 = vmatprep.subr.bf16.mxu1 %v16416_v27  ;;  %v8173_v32 = vld [vmem:[#allocation5 + $0xa0] sm:$0x7f] }
 0x545   : > { %v8228_v51 = vld [vmem:[#allocation5 + $0xa0] sm:$0xfe]  ;;  %v8174_v49 = vld [vmem:[#allocation5 + $0xa8] sm:$0x7f]  ;;  %v8200_v23 = vmul.f32 %v16578_v50, %v8173_v32  ;;  %v7699_v32 = vld [vmem:[#allocation5 + $0x98] sm:$0x1] }
 0x546   : > { %v8331_v5 = vld [vmem:[#allocation5 + $0xa0] sm:$0xfc]  ;;  %v8229_v57 = vld [vmem:[#allocation5 + $0xa8] sm:$0xfe]  ;;  %11529 = vmatpush1.bf16.msra.mxu0 %v16228_v60  ;;  %v8201_v14 = vmul.f32 %v16584_v21, %v8174_v49  ;;  %v8255_v2 = vmul.f32 %v16587_v9, %v8228_v51  ;;  %v7698_v49 = vld [vmem:[#allocation5 + $0x90] sm:$0x1] }
 0x547   : > { %v8332_v7 = vld [vmem:[#allocation5 + $0xa8] sm:$0xfc]  ;;  %v8256_v54 = vmul.f32 %v16590_v10, %v8229_v57  ;;  %11531 = vmatprep.subr.bf16.mxu0 %v17751_v59  ;;  %11493 = vmatpush1.bf16.msra.mxu1 %v17745_v61  ;;  %v8372_v33 = vmul.f32 %v16594_v55, %v8331_v5  ;;  %v8214_v1 = vadd.f32 %v8200_v23, %v8159_v42  ;;  %v7591_v5 = vld [vmem:[#allocation5 + $0x80] sm:$0xfe] }
 0x548   : > { %11495 = vmatprep.subr.bf16.mxu1 %v17760_v38  ;;  %v8373_v40 = vmul.f32 %v16599_v43, %v8332_v7  ;;  %v8333_v41 = vld [vmem:[#allocation5 + $0xb0] sm:$0x1]  ;;  %v8215_v45 = vadd.f32 %v8201_v14, %v8160_v48  ;;  %v8283_v22 = vrot.slane %v8255_v2, 1  ;;  %v7619_v14 = vmul.f32 %v16486_v12, %v7592_v25  ;;  %v7552_v12 = vld [vmem:[#allocation5 + $0x88] sm:$0x7f] }
 0x549   : > { %v8284_v47 = vrot.slane %v8256_v54, 1  ;;  %v8334_v4 = vld [vmem:[#allocation5 + $0xb8] sm:$0x1]  ;;  %v8374_v17 = vmul.f32 %v16594_v55, %v8333_v41  ;;  %v8434_v57 = vrot.slane %v8372_v33, 2  ;;  %v7697_v54 = vld [vmem:[#allocation5 + $0x88] sm:$0xfc]  ;;  %v7740_v48 = vmul.f32 %v16496_v11, %v7699_v32 }
 0x54a   : > { %11533 = vmatpush1.bf16.msra.mxu0 %v17752_v46  ;;  %v8375_v51 = vmul.f32 %v16599_v43, %v8334_v4  ;;  %v8437_v20 = vrot.slane %v8373_v40, 2  ;;  %v7696_v41 = vld [vmem:[#allocation5 + $0x80] sm:$0xfc]  ;;  %v7618_v42 = vmul.f32 %v17753_v37, %v7591_v5  ;;  %v17761_v4 = vld [vmem:[#allocation37_spill] sm:$0xff]  ;;  %v7738_v32 = vmul.f32 %v16496_v11, %v7697_v54 }
 0x54b   : > { %11535 = vmatprep.subr.bf16.mxu0 %v17734_v53  ;;  %11497 = vmatpush1.bf16.msra.mxu1 %v17747_v28  ;;  %v8435_v7 = vrot.slane %v8374_v17, 2  ;;  %v8312_v23 = vadd.f32 %v8284_v47, %v8215_v45  ;;  %v7739_v53 = vmul.f32 %v17761_v4, %v7698_v49  ;;  %v17762_v46 = vld [vmem:[#allocation13_spill] sm:$0xff]  ;;  %v8311_v17 = vadd.f32 %v8283_v22, %v8214_v1  ;;  %v7551_v49 = vld [vmem:[#allocation5 + $0x80] sm:$0x7f] }
 0x54c   : > { %11499 = vmatprep.subr.bf16.mxu1 %v17748_v6  ;;  %v8438_v15 = vrot.slane %v8375_v51, 2  ;;  %v17763_v40 = vld [vmem:[#allocation33_spill] sm:$0xff]  ;;  %v17764_v51 = vld [vmem:[#allocation16_spill] sm:$0xff]  ;;  %v7737_v45 = vmul.f32 %v17761_v4, %v7696_v41  ;;  %v7647_v5 = vrot.slane %v7619_v14, 1  ;;  %v7805_v14 = vrot.slane %v7738_v32, 2 }
 0x54d   : > { %v8436_v2 = vsel %vm7777_vm3, %v8434_v57, %v8435_v7  ;;  %v17765_v57 = vld [vmem:[#allocation21_spill] sm:$0xff]  ;;  %v7803_v1 = vrot.slane %v7739_v53, 2  ;;  %v8018_v32 = vld [vmem:[#allocation5 + $0xb0] sm:$0x1] }
 0x54e   : > { %11537 = vmatpush1.bf16.msra.mxu0 %v17762_v46  ;;  %v8439_v33 = vsel %vm7777_vm3, %v8437_v20, %v8438_v15  ;;  %v8478_v47 = vadd.f32 %v8436_v2, %v8311_v17  ;;  %v7806_v46 = vrot.slane %v7740_v48, 2  ;;  %v7646_v20 = vrot.slane %v7618_v42, 1  ;;  %v17766_v15 = vld [vmem:[#allocation12_spill] sm:$0xff]  ;;  %v17768_v2 = vld [vmem:[#allocation14_spill] sm:$0xff]  ;;  %v17769_v17 = vld [vmem:[#allocation19_spill] sm:$0xff] }
 0x54f   : > { %11539 = vmatprep.subr.bf16.mxu0 %v17763_v40  ;;  %11501 = vmatpush1.bf16.msra.mxu1 %v17764_v51  ;;  %v8479_v25 = vadd.f32 %v8439_v33, %v8312_v23  ;;  %v17767_v33 = vld [vmem:[#allocation38_spill] sm:$0xff]  ;;  %v7857_v40 = vld [vmem:[#allocation5 + $0xa8] sm:$0x7f]  ;;  %v7577_v48 = vmul.f32 %v17757_v24, %v7551_v49  ;;  %v7802_v53 = vrot.slane %v7737_v45, 2  ;;  %v8019_v4 = vld [vmem:[#allocation5 + $0xb8] sm:$0x1] }
 0x550   : > { %11567 = vmatprep.subr.bf16.mxu1 %v17765_v57  ;;  %v7578_v54 = vmul.f32 %v17767_v33, %v7552_v12 }
 0x551   : > { %v7271_v7 = vpop.f32.mrb[72].mxu0  ;;  %8846 = vmatprep.mubr.f32.mxu1 %v8479_v25  ;;  %v7912_v25 = vld [vmem:[#allocation5 + $0xa8] sm:$0xfe]  ;;  %v7674_v33 = vadd.f32 %v7646_v20, %v7577_v48 }
 0x552   : > { %v7282_v22 = vadd.f32 %v7271_v7, %v16329_v3  ;;  %11541 = vmatpush1.bf16.msra.mxu0 %v17766_v15  ;;  %v7273_v23 = vpop.f32.mrb[73].mxu0  ;;  %8847 = vmatmul.mubr.f32.vlgmr.msra.gmra.mrb[82].mxu1 %v8478_v47  ;;  %v17770_v7 = vld [vmem:[#allocation15_spill] sm:$0xff]  ;;  %v7675_v15 = vadd.f32 %v7647_v5, %v7578_v54  ;;  %v7856_v47 = vld [vmem:[#allocation5 + $0xa0] sm:$0x7f]  ;;  %v7884_v5 = vmul.f32 %v16542_v39, %v7857_v40 }
 0x553   : > { %v7283_v41 = vadd.f32 %v7273_v23, %v16345_v44  ;;  %11543 = vmatprep.subr.bf16.mxu0 %v17768_v2  ;;  %11569 = vmatpush1.bf16.msra.mxu1 %v17769_v17  ;;  %v7807_v23 = vsel %vm7777_vm3, %v7805_v14, %v7806_v46  ;;  %v7804_v2 = vsel %vm7777_vm3, %v7802_v53, %v7803_v1  ;;  %v7911_v17 = vld [vmem:[#allocation5 + $0xa0] sm:$0xfe]  ;;  %v8017_v54 = vld [vmem:[#allocation5 + $0xa8] sm:$0xfc] }
 0x554   : > { %v7286_v42 = vmax.f32 %v7282_v22, 0.0  ;;  %11571 = vmatprep.subr.bf16.mxu1 %v17770_v7  ;;  %v7939_v22 = vmul.f32 %v17759_v30, %v7912_v25  ;;  %v17771_v20 = vld [vmem:[#allocation31_spill] sm:$0xff]  ;;  %v8060_v1 = vmul.f32 %v16551_v18, %v8019_v4  ;;  %v8016_v14 = vld [vmem:[#allocation5 + $0xa0] sm:$0xfc]  ;;  %v7883_v40 = vmul.f32 %v16530_v13, %v7856_v47  ;;  %v17773_v47 = vld [vmem:[#allocation29_spill] sm:$0xff] }
 0x555   : > { %v7287_v37 = vmax.f32 %v7283_v41, 0.0  ;;  %v7277_v12 = vpop.f32.mrb[74].mxu0  ;;  %v17772_v53 = vld [vmem:[#allocation23_spill] sm:$0xff]  ;;  %v7938_v25 = vmul.f32 %v16538_v8, %v7911_v17  ;;  %v7842_v4 = vadd.f32 %v7804_v2, %v7674_v33 }
 0x556   : > { %v7290_v11 = vmul.f32 %v7286_v42, %v16372_v0  ;;  %v7284_v49 = vadd.f32 %v7277_v12, %v16329_v3  ;;  %11545 = vmatpush1.bf16.msra.mxu0 %v17739_v26  ;;  %v7279_v45 = vpop.f32.mrb[75].mxu0  ;;  %v8059_v42 = vmul.f32 %v16548_v56, %v8018_v32  ;;  %v7843_v12 = vadd.f32 %v7807_v23, %v7675_v15 }
 0x557   : > { %v7291_v41 = vmul.f32 %v7287_v37, %v16384_v35  ;;  %v7285_v46 = vadd.f32 %v7279_v45, %v16345_v44  ;;  %11547 = vmatprep.subr.bf16.mxu0 %v17758_v29  ;;  %11573 = vmatpush1.bf16.msra.mxu1 %v17771_v20  ;;  %v8058_v45 = vmul.f32 %v16551_v18, %v8017_v54  ;;  %v8125_v32 = vrot.slane %v8060_v1, 2  ;;  %v17775_v1 = vld [vmem:[#allocation24_spill] sm:$0xff] }
 0x558   : > { %7295 = vst [vmem:[#allocation5 + $0xc0] sm:$0xff] %v7290_v11  ;;  %v7288_v48 = vmax.f32 %v7284_v49, 0.0  ;;  %11575 = vmatprep.subr.bf16.mxu1 %v17772_v53  ;;  %v8057_v11 = vmul.f32 %v16548_v56, %v8016_v14  ;;  %v7898_v17 = vadd.f32 %v7884_v5, %v7843_v12  ;;  %v7897_v15 = vadd.f32 %v7883_v40, %v7842_v4 }
 0x559   : > { %7296 = vst [vmem:[#allocation5 + $0xc8] sm:$0xff] %v7291_v41  ;;  %v7289_v37 = vmax.f32 %v7285_v46, 0.0  ;;  %v7967_v41 = vrot.slane %v7939_v22, 1  ;;  %v7966_v23 = vrot.slane %v7938_v25, 1  ;;  %v8122_v54 = vrot.slane %v8059_v42, 2  ;;  %v17774_v46 = vld [vmem:[#allocation22_spill] sm:$0xff] }
 0x55a   : > { %v7292_v29 = vmul.f32 %v7288_v48, %v16331_v36  ;;  %11549 = vmatpush1.bf16.msra.mxu0 %v17741_v52  ;;  %v8124_v48 = vrot.slane %v8058_v45, 2  ;;  %v8121_v33 = vrot.slane %v8057_v11, 2  ;;  %v17776_v45 = vld [vmem:[#allocation20_spill] sm:$0xff] }
 0x55b   : > { %v7293_v49 = vmul.f32 %v7289_v37, %v16354_v16  ;;  %11551 = vmatprep.subr.bf16.mxu0 %v17742_v34  ;;  %11577 = vmatpush1.bf16.msra.mxu1 %v17773_v47  ;;  %v7994_v42 = vadd.f32 %v7966_v23, %v7897_v15 }
 0x55c   : > { %7297 = vst [vmem:[#allocation5 + $0xd0] sm:$0x1] %v7292_v29  ;;  %11579 = vmatprep.subr.bf16.mxu1 %v17774_v46  ;;  %v8126_v2 = vsel %vm7777_vm3, %v8124_v48, %v8125_v32  ;;  %v7995_v29 = vadd.f32 %v7967_v41, %v7898_v17  ;;  %v8123_v12 = vsel %vm7777_vm3, %v8121_v33, %v8122_v54 }
 0x55d   : > { %7298 = vst [vmem:[#allocation5 + $0xd8] sm:$0x1] %v7293_v49  ;;  %v8161_v15 = vadd.f32 %v8123_v12, %v7994_v42 }
 0x55e   : > { %11553 = vmatpush1.bf16.msra.mxu0 %v17743_v31  ;;  %v8162_v48 = vadd.f32 %v8126_v2, %v7995_v29 }
 0x55f   : > { %11555 = vmatprep.subr.bf16.mxu0 %v16416_v27  ;;  %v8175_v14 = vld [vmem:[#allocation5 + $0xc0] sm:$0x7f]  ;;  %11581 = vmatpush1.bf16.msra.mxu1 %v17775_v1 }
 0x560   : > { %v8230_v37 = vld [vmem:[#allocation5 + $0xc0] sm:$0xfe]  ;;  %v8176_v22 = vld [vmem:[#allocation5 + $0xc8] sm:$0x7f]  ;;  %11583 = vmatprep.subr.bf16.mxu1 %v17776_v45  ;;  %v8202_v49 = vmul.f32 %v16578_v50, %v8175_v14 }
 0x561   : > { %v8335_v5 = vld [vmem:[#allocation5 + $0xc0] sm:$0xfc]  ;;  %v8231_v40 = vld [vmem:[#allocation5 + $0xc8] sm:$0xfe]  ;;  %v8203_v4 = vmul.f32 %v16584_v21, %v8176_v22  ;;  %v8257_v32 = vmul.f32 %v16587_v9, %v8230_v37 }
 0x562   : > { %v8336_v25 = vld [vmem:[#allocation5 + $0xc8] sm:$0xfc]  ;;  %v8258_v11 = vmul.f32 %v16590_v10, %v8231_v40  ;;  %11557 = vmatpush1.bf16.msra.mxu0 %v17745_v61  ;;  %v8376_v17 = vmul.f32 %v16594_v55, %v8335_v5  ;;  %v8216_v2 = vadd.f32 %v8202_v49, %v8161_v15 }
 0x563   : > { %11559 = vmatprep.subr.bf16.mxu0 %v17760_v38  ;;  %v8377_v41 = vmul.f32 %v16599_v43, %v8336_v25  ;;  %v8337_v23 = vld [vmem:[#allocation5 + $0xd0] sm:$0x1]  ;;  %11585 = vmatpush1.bf16.msra.mxu1 %v16155_v62  ;;  %v8217_v54 = vadd.f32 %v8203_v4, %v8162_v48  ;;  %v8285_v29 = vrot.slane %v8257_v32, 1  ;;  %v7703_v32 = vld [vmem:[#allocation5 + $0xb8] sm:$0x1] }
 0x564   : > { %v8286_v33 = vrot.slane %v8258_v11, 1  ;;  %v8338_v22 = vld [vmem:[#allocation5 + $0xd8] sm:$0x1]  ;;  %v8378_v14 = vmul.f32 %v16594_v55, %v8337_v23  ;;  %11587 = vmatprep.subr.bf16.mxu1 %v16161_v19  ;;  %v8440_v5 = vrot.slane %v8376_v17, 2  ;;  %v7701_v15 = vld [vmem:[#allocation5 + $0xa8] sm:$0xfc] }
 0x565   : > { %v8379_v37 = vmul.f32 %v16599_v43, %v8338_v22  ;;  %v8443_v25 = vrot.slane %v8377_v41, 2  ;;  %v8313_v48 = vadd.f32 %v8285_v29, %v8216_v2  ;;  %v7594_v41 = vld [vmem:[#allocation5 + $0xa8] sm:$0xfe]  ;;  %v17777_v23 = vld [vmem:[#allocation36_spill] sm:$0xff] }
 0x566   : > { %11561 = vmatpush1.bf16.msra.mxu0 %v17747_v28  ;;  %v8441_v40 = vrot.slane %v8378_v14, 2  ;;  %v8314_v12 = vadd.f32 %v8286_v33, %v8217_v54  ;;  %v7744_v54 = vmul.f32 %v17777_v23, %v7703_v32  ;;  %v7593_v33 = vld [vmem:[#allocation5 + $0xa0] sm:$0xfe]  ;;  %v17778_v22 = vld [vmem:[#allocation19_spill] sm:$0xff]  ;;  %v7702_v2 = vld [vmem:[#allocation5 + $0xb0] sm:$0x1]  ;;  %v7742_v29 = vmul.f32 %v17777_v23, %v7701_v15 }
 0x567   : > { %11563 = vmatprep.subr.bf16.mxu0 %v17748_v6  ;;  %v8444_v42 = vrot.slane %v8379_v37, 2  ;;  %11589 = vmatpush1.bf16.msra.mxu1 %v16185_v58  ;;  %v17779_v14 = vld [vmem:[#allocation6_spill] sm:$0xff]  ;;  %v17784_v32 = vld [vmem:[#allocation13_spill] sm:$0xff]  ;;  %v8021_v6 = vld [vmem:[#allocation5 + $0xc8] sm:$0xfc] }
 0x568   : > { %v8442_v4 = vsel %vm7777_vm3, %v8440_v5, %v8441_v40  ;;  %11591 = vmatprep.subr.bf16.mxu1 %v16192_v63  ;;  %v7621_v37 = vmul.f32 %v17779_v14, %v7594_v41  ;;  %v17781_v5 = vld [vmem:[#allocation18_spill] sm:$0xff]  ;;  %v17782_v40 = vld [vmem:[#allocation28_spill] sm:$0xff]  ;;  %v17785_v15 = vld [vmem:[#allocation33_spill] sm:$0xff] }
 0x569   : > { %v8445_v11 = vsel %vm7777_vm3, %v8443_v25, %v8444_v42  ;;  %v8480_v17 = vadd.f32 %v8442_v4, %v8313_v48  ;;  %v7620_v25 = vmul.f32 %v17782_v40, %v7593_v33  ;;  %v7700_v42 = vld [vmem:[#allocation5 + $0xa0] sm:$0xfc]  ;;  %v7812_v4 = vrot.slane %v7744_v54, 2  ;;  %v7859_v40 = vld [vmem:[#allocation5 + $0xc8] sm:$0x7f] }
 0x56a   : > { %11565 = vmatpush1.bf16.msra.mxu0 %v17764_v51  ;;  %v8481_v49 = vadd.f32 %v8445_v11, %v8314_v12  ;;  %v7554_v12 = vld [vmem:[#allocation5 + $0xa8] sm:$0x7f]  ;;  %v17783_v11 = vld [vmem:[#allocation37_spill] sm:$0xff] }
 0x56b   : > { %11631 = vmatprep.subr.bf16.mxu0 %v17765_v57  ;;  %11593 = vmatpush1.bf16.msra.mxu1 %v16228_v60  ;;  %v17780_v57 = vld [vmem:[#allocation34_spill] sm:$0xff]  ;;  %v7743_v48 = vmul.f32 %v17783_v11, %v7702_v2  ;;  %v7741_v41 = vmul.f32 %v17783_v11, %v7700_v42  ;;  %v7648_v51 = vrot.slane %v7620_v25, 1  ;;  %v8023_v25 = vld [vmem:[#allocation5 + $0xd8] sm:$0x1] }
 0x56c   : > { %8919 = vmatprep.mubr.f32.mxu0 %v8481_v49  ;;  %11595 = vmatprep.subr.bf16.mxu1 %v17751_v59  ;;  %v7649_v49 = vrot.slane %v7621_v37, 1  ;;  %v7707_v28 = vld [vmem:[#allocation5 + $0xd8] sm:$0x1] }
 0x56d   : > { %8920 = vmatmul.mubr.f32.vlgmr.msra.gmra.mrb[80].mxu0 %v8480_v17  ;;  %v7553_v17 = vld [vmem:[#allocation5 + $0xa0] sm:$0x7f]  ;;  %v7809_v2 = vrot.slane %v7743_v48, 2 }
 0x56e   : > { %11633 = vmatpush1.bf16.msra.mxu0 %v17778_v22  ;;  %v17786_v22 = vld [vmem:[#allocation38_spill] sm:$0xff] }
 0x56f   : > { %11635 = vmatprep.subr.bf16.mxu0 %v17770_v7  ;;  %11597 = vmatpush1.bf16.msra.mxu1 %v17780_v57  ;;  %v7811_v7 = vrot.slane %v7742_v29, 2  ;;  %v7580_v33 = vmul.f32 %v17786_v22, %v7554_v12  ;;  %v7579_v29 = vmul.f32 %v17757_v24, %v7553_v17  ;;  %v7808_v12 = vrot.slane %v7741_v41, 2  ;;  %v7913_v24 = vld [vmem:[#allocation5 + $0xc0] sm:$0xfe] }
 0x570   : > { %11599 = vmatprep.subr.bf16.mxu1 %v17781_v5  ;;  %v7886_v17 = vmul.f32 %v16542_v39, %v7859_v40 }
 0x571   : > { %v7813_v54 = vsel %vm7777_vm3, %v7811_v7, %v7812_v4  ;;  %v7677_v37 = vadd.f32 %v7649_v49, %v7580_v33  ;;  %v7858_v4 = vld [vmem:[#allocation5 + $0xc0] sm:$0x7f]  ;;  %v7676_v49 = vadd.f32 %v7648_v51, %v7579_v29  ;;  %v8022_v33 = vld [vmem:[#allocation5 + $0xd0] sm:$0x1]  ;;  %v7705_v29 = vld [vmem:[#allocation5 + $0xc8] sm:$0xfc] }
 0x572   : > { %11637 = vmatpush1.bf16.msra.mxu0 %v17771_v20  ;;  %v17788_v7 = vld [vmem:[#allocation14_spill] sm:$0xff]  ;;  %v7885_v51 = vmul.f32 %v16530_v13, %v7858_v4 }
 0x573   : > { %11639 = vmatprep.subr.bf16.mxu0 %v17772_v53  ;;  %11601 = vmatpush1.bf16.msra.mxu1 %v17784_v32  ;;  %v7914_v53 = vld [vmem:[#allocation5 + $0xc8] sm:$0xfe]  ;;  %v17787_v32 = vld [vmem:[#allocation12_spill] sm:$0xff] }
 0x574   : > { %11603 = vmatprep.subr.bf16.mxu1 %v17785_v15 }
 0x576   : > { %11641 = vmatpush1.bf16.msra.mxu0 %v17773_v47  ;;  %v7506_v20 = vpop.f32.mrb[76].mxu1  ;;  %v7845_v47 = vadd.f32 %v7813_v54, %v7677_v37  ;;  %v8020_v54 = vld [vmem:[#allocation5 + $0xc0] sm:$0xfc]  ;;  %v7596_v37 = vld [vmem:[#allocation5 + $0xc8] sm:$0xfe] }
 0x577   : > { %11643 = vmatprep.subr.bf16.mxu0 %v17774_v46  ;;  %v7517_v42 = vadd.f32 %v7506_v20, %v16329_v3  ;;  %v7508_v15 = vpop.f32.mrb[77].mxu1  ;;  %11605 = vmatpush1.bf16.msra.mxu1 %v17787_v32  ;;  %v7941_v46 = vmul.f32 %v17759_v30, %v7914_v53  ;;  %v7810_v20 = vsel %vm7777_vm3, %v7808_v12, %v7809_v2 }
 0x578   : > { %v7518_v48 = vadd.f32 %v7508_v15, %v16345_v44  ;;  %11607 = vmatprep.subr.bf16.mxu1 %v17788_v7  ;;  %v8062_v15 = vmul.f32 %v16551_v18, %v8021_v6  ;;  %v8064_v7 = vmul.f32 %v16551_v18, %v8023_v25  ;;  %v17789_v25 = vld [vmem:[#allocation35_spill] sm:$0xff]  ;;  %v7940_v12 = vmul.f32 %v16538_v8, %v7913_v24 }
 0x579   : > { %v7521_v11 = vmax.f32 %v7517_v42, 0.0 }
 0x57a   : > { %11645 = vmatpush1.bf16.msra.mxu0 %v17775_v1  ;;  %v7522_v41 = vmax.f32 %v7518_v48, 0.0  ;;  %v7512_v32 = vpop.f32.mrb[78].mxu1  ;;  %v8063_v1 = vmul.f32 %v16548_v56, %v8022_v33  ;;  %v8131_v48 = vrot.slane %v8064_v7, 2 }
 0x57b   : > { %11647 = vmatprep.subr.bf16.mxu0 %v17776_v45  ;;  %v7525_v40 = vmul.f32 %v7521_v11, %v16372_v0  ;;  %v7519_v2 = vadd.f32 %v7512_v32, %v16329_v3  ;;  %v7514_v53 = vpop.f32.mrb[79].mxu1  ;;  %11609 = vmatpush1.bf16.msra.mxu1 %v17739_v26  ;;  %v7748_v45 = vmul.f32 %v17777_v23, %v7707_v28  ;;  %v7969_v28 = vrot.slane %v7941_v46, 1 }
 0x57c   : > { %v7526_v6 = vmul.f32 %v7522_v41, %v16384_v35  ;;  %v7520_v42 = vadd.f32 %v7514_v53, %v16345_v44  ;;  %11611 = vmatprep.subr.bf16.mxu1 %v17789_v25  ;;  %v7844_v11 = vadd.f32 %v7810_v20, %v7676_v49  ;;  %v8061_v3 = vmul.f32 %v16548_v56, %v8020_v54  ;;  %v8344_v20 = vld [vmem:[#allocation5 + $0x108] sm:$0xfc] }
 0x57d   : > { %7530 = vst [vmem:[#allocation5 + $0xe0] sm:$0xff] %v7525_v40  ;;  %v7523_v0 = vmax.f32 %v7519_v2, 0.0  ;;  %v7623_v32 = vmul.f32 %v17779_v14, %v7596_v37  ;;  %v7900_v35 = vadd.f32 %v7886_v17, %v7845_v47  ;;  %v7746_v44 = vmul.f32 %v17777_v23, %v7705_v29  ;;  %v7556_v47 = vld [vmem:[#allocation5 + $0xc8] sm:$0x7f] }
 0x57e   : > { %11649 = vmatpush1.bf16.msra.mxu0 %v16155_v62  ;;  %7531 = vst [vmem:[#allocation5 + $0xe8] sm:$0xff] %v7526_v6  ;;  %v7524_v4 = vmax.f32 %v7520_v42, 0.0  ;;  %v8130_v49 = vrot.slane %v8062_v15, 2  ;;  %v8128_v33 = vrot.slane %v8063_v1, 2  ;;  %v7899_v62 = vadd.f32 %v7885_v51, %v7844_v11  ;;  %v8235_v54 = vld [vmem:[#allocation5 + $0x108] sm:$0xfe] }
 0x57f   : > { %11651 = vmatprep.subr.bf16.mxu0 %v16161_v19  ;;  %v7527_v24 = vmul.f32 %v7523_v0, %v16331_v36  ;;  %11613 = vmatpush1.bf16.msra.mxu1 %v17741_v52  ;;  %v7968_v41 = vrot.slane %v7940_v12, 1  ;;  %v7818_v7 = vrot.slane %v7748_v45, 2  ;;  %v8127_v23 = vrot.slane %v8061_v3, 2  ;;  %v8180_v19 = vld [vmem:[#allocation5 + $0x108] sm:$0x7f] }
 0x580   : > { %v7528_v14 = vmul.f32 %v7524_v4, %v16354_v16  ;;  %11615 = vmatprep.subr.bf16.mxu1 %v17742_v34  ;;  %v7651_v17 = vrot.slane %v7623_v32, 1  ;;  %v8132_v36 = vsel %vm7777_vm3, %v8130_v49, %v8131_v48  ;;  %v7817_v46 = vrot.slane %v7746_v44, 2  ;;  %v8346_v15 = vld [vmem:[#allocation5 + $0x118] sm:$0x1] }
 0x581   : > { %7532 = vst [vmem:[#allocation5 + $0xf0] sm:$0x1] %v7527_v24  ;;  %v16928_v16 = vmul.f32 %v16599_v43, %v8344_v20  ;;  %v7997_v51 = vadd.f32 %v7969_v28, %v7900_v35  ;;  %v8129_v37 = vsel %vm7777_vm3, %v8127_v23, %v8128_v33  ;;  %v7582_v40 = vmul.f32 %v17786_v22, %v7556_v47  ;;  %v7706_v47 = vld [vmem:[#allocation5 + $0xd0] sm:$0x1] }
 0x582   : > { %11653 = vmatpush1.bf16.msra.mxu0 %v16185_v58  ;;  %7533 = vst [vmem:[#allocation5 + $0xf8] sm:$0x1] %v7528_v14  ;;  %v7996_v58 = vadd.f32 %v7968_v41, %v7899_v62  ;;  %v7819_v29 = vsel %vm7777_vm3, %v7817_v46, %v7818_v7  ;;  %v16937_v6 = vmul.f32 %v16584_v21, %v8180_v19 }
 0x583   : > { %11655 = vmatprep.subr.bf16.mxu0 %v16192_v63  ;;  %11617 = vmatpush1.bf16.msra.mxu1 %v17743_v31  ;;  %v16940_v63 = vmul.f32 %v16590_v10, %v8235_v54  ;;  %v8164_v42 = vadd.f32 %v8132_v36, %v7997_v51  ;;  %v7679_v11 = vadd.f32 %v7651_v17, %v7582_v40 }
 0x584   : > { %11619 = vmatprep.subr.bf16.mxu1 %v16416_v27  ;;  %v8177_v2 = vld [vmem:[#allocation5 + $0xe0] sm:$0x7f]  ;;  %v16944_v3 = vmul.f32 %v16599_v43, %v8346_v15  ;;  %v8163_v35 = vadd.f32 %v8129_v37, %v7996_v58 }
 0x585   : > { %v8232_v53 = vld [vmem:[#allocation5 + $0xe0] sm:$0xfe]  ;;  %v8178_v12 = vld [vmem:[#allocation5 + $0xe8] sm:$0x7f]  ;;  %v8204_v22 = vmul.f32 %v16578_v50, %v8177_v2  ;;  %v7847_v33 = vadd.f32 %v7819_v29, %v7679_v11  ;;  %v17791_v2 = vld [vmem:[#allocation37_spill] sm:$0xff] }
 0x586   : > { %v8339_v1 = vld [vmem:[#allocation5 + $0xe0] sm:$0xfc]  ;;  %v8233_v45 = vld [vmem:[#allocation5 + $0xe8] sm:$0xfe]  ;;  %11657 = vmatpush1.bf16.msra.mxu0 %v16228_v60  ;;  %v8205_v32 = vmul.f32 %v16584_v21, %v8178_v12  ;;  %v8259_v48 = vmul.f32 %v16587_v9, %v8232_v53  ;;  %v8455_v60 = vrot.slane %v16928_v16, 2  ;;  %v8456_v40 = vrot.slane %v16944_v3, 2 }
 0x587   : > { %v8340_v0 = vld [vmem:[#allocation5 + $0xe8] sm:$0xfc]  ;;  %v8260_v4 = vmul.f32 %v16590_v10, %v8233_v45  ;;  %11659 = vmatprep.subr.bf16.mxu0 %v17751_v59  ;;  %11621 = vmatpush1.bf16.msra.mxu1 %v17745_v61  ;;  %v8380_v49 = vmul.f32 %v16594_v55, %v8339_v1  ;;  %v8218_v14 = vadd.f32 %v8204_v22, %v8163_v35  ;;  %v7595_v16 = vld [vmem:[#allocation5 + $0xc0] sm:$0xfe]  ;;  %v17794_v22 = vld [vmem:[#allocation13_spill] sm:$0xff] }
 0x588   : > { %v7861_v44 = vld [vmem:[#allocation5 + $0xe8] sm:$0x7f]  ;;  %11623 = vmatprep.subr.bf16.mxu1 %v17760_v38  ;;  %v8219_v21 = vadd.f32 %v8205_v32, %v8164_v42  ;;  %v8381_v10 = vmul.f32 %v16599_v43, %v8340_v0  ;;  %v8341_v62 = vld [vmem:[#allocation5 + $0xf0] sm:$0x1]  ;;  %v8287_v36 = vrot.slane %v8259_v48, 1  ;;  %v7747_v53 = vmul.f32 %v17791_v2, %v7706_v47  ;;  %v17792_v1 = vld [vmem:[#allocation30_spill] sm:$0xff] }
 0x589   : > { %v7916_v24 = vld [vmem:[#allocation5 + $0xe8] sm:$0xfe]  ;;  %v7888_v20 = vmul.f32 %v16542_v39, %v7861_v44  ;;  %v8288_v59 = vrot.slane %v8260_v4, 1  ;;  %v8342_v7 = vld [vmem:[#allocation5 + $0xf8] sm:$0x1]  ;;  %v8382_v23 = vmul.f32 %v16594_v55, %v8341_v62  ;;  %v8446_v51 = vrot.slane %v8380_v49, 2 }
 0x58a   : > { %v8025_v28 = vld [vmem:[#allocation5 + $0xe8] sm:$0xfc]  ;;  %v7943_v41 = vmul.f32 %v17759_v30, %v7916_v24  ;;  %v8027_v19 = vld [vmem:[#allocation5 + $0xf8] sm:$0x1]  ;;  %11661 = vmatpush1.bf16.msra.mxu0 %v17780_v57  ;;  %v8383_v54 = vmul.f32 %v16599_v43, %v8342_v7  ;;  %v17790_v30 = vld [vmem:[#allocation26_spill] sm:$0xff]  ;;  %v8449_v57 = vrot.slane %v8381_v10, 2  ;;  %v8315_v3 = vadd.f32 %v8287_v36, %v8218_v14 }
 0x58b   : > { %v7902_v17 = vadd.f32 %v7888_v20, %v7847_v33  ;;  %v8066_v39 = vmul.f32 %v16551_v18, %v8025_v28  ;;  %v8068_v15 = vmul.f32 %v16551_v18, %v8027_v19  ;;  %11663 = vmatprep.subr.bf16.mxu0 %v17781_v5  ;;  %11625 = vmatpush1.bf16.msra.mxu1 %v17790_v30  ;;  %v8447_v37 = vrot.slane %v8382_v23, 2  ;;  %v7704_v58 = vld [vmem:[#allocation5 + $0xc0] sm:$0xfc]  ;;  %v17793_v5 = vld [vmem:[#allocation28_spill] sm:$0xff]  ;;  %v17795_v35 = vld [vmem:[#allocation33_spill] sm:$0xff] }
 0x58c   : > { %v7971_v46 = vrot.slane %v7943_v41, 1  ;;  %11627 = vmatprep.subr.bf16.mxu1 %v17792_v1  ;;  %v8450_v43 = vrot.slane %v8383_v54, 2  ;;  %v8316_v12 = vadd.f32 %v8288_v59, %v8219_v21  ;;  %v7622_v0 = vmul.f32 %v17793_v5, %v7595_v16  ;;  %v17796_v48 = vld [vmem:[#allocation16_spill] sm:$0xff]  ;;  %v7555_v33 = vld [vmem:[#allocation5 + $0xc0] sm:$0x7f] }
 0x58d   : > { %v8136_v29 = vrot.slane %v8066_v39, 2  ;;  %v8137_v42 = vrot.slane %v8068_v15, 2  ;;  %v8448_v18 = vsel %vm7777_vm3, %v8446_v51, %v8447_v37  ;;  %v7745_v4 = vmul.f32 %v17791_v2, %v7704_v58  ;;  %v8026_v14 = vld [vmem:[#allocation5 + $0xf0] sm:$0x1]  ;;  %v7860_v59 = vld [vmem:[#allocation5 + $0xe0] sm:$0x7f] }
 0x58e   : > { %v7999_v45 = vadd.f32 %v7971_v46, %v7902_v17  ;;  %11665 = vmatpush1.bf16.msra.mxu0 %v17794_v22  ;;  %v8451_v11 = vsel %vm7777_vm3, %v8449_v57, %v8450_v43  ;;  %v8290_v28 = vrot.slane %v16940_v63, 1  ;;  %v8482_v49 = vadd.f32 %v8448_v18, %v8315_v3  ;;  %v17797_v62 = vld [vmem:[#allocation12_spill] sm:$0xff]  ;;  %v7915_v7 = vld [vmem:[#allocation5 + $0xe0] sm:$0xfe]  ;;  %v17799_v63 = vld [vmem:[#allocation39_spill] sm:$0xff] }
 0x58f   : > { %v8138_v32 = vsel %vm7777_vm3, %v8136_v29, %v8137_v42  ;;  %11667 = vmatprep.subr.bf16.mxu0 %v17795_v35  ;;  %11629 = vmatpush1.bf16.msra.mxu1 %v17796_v48  ;;  %v8483_v44 = vadd.f32 %v8451_v11, %v8316_v12  ;;  %v7815_v20 = vrot.slane %v7747_v53, 2  ;;  %v7650_v10 = vrot.slane %v7622_v0, 1  ;;  %v17798_v23 = vld [vmem:[#allocation14_spill] sm:$0xff]  ;;  %v8345_v29 = vld [vmem:[#allocation5 + $0x110] sm:$0x1] }
 0x590   : > { %v8166_v24 = vadd.f32 %v8138_v32, %v7999_v45  ;;  %v8457_v41 = vsel %vm7777_vm3, %v8455_v60, %v8456_v40  ;;  %v7814_v47 = vrot.slane %v7745_v4, 2  ;;  %v7581_v19 = vmul.f32 %v17799_v63, %v7555_v33  ;;  %v8024_v39 = vld [vmem:[#allocation5 + $0xe0] sm:$0xfc] }
 0x591   : > { %8992 = vmatprep.mubr.f32.mxu1 %v8483_v44  ;;  %v16982_v54 = vld [vmem:[#allocation3] sm:$0xff]  ;;  %v8067_v36 = vmul.f32 %v16548_v56, %v8026_v14  ;;  %v7887_v60 = vmul.f32 %v16530_v13, %v7860_v59  ;;  %v7942_v16 = vmul.f32 %v16538_v8, %v7915_v7  ;;  %v8065_v51 = vmul.f32 %v16548_v56, %v8024_v39 }
 0x592   : > { %v8221_v21 = vadd.f32 %v16937_v6, %v8166_v24  ;;  %11669 = vmatpush1.bf16.msra.mxu0 %v17797_v62  ;;  %8993 = vmatmul.mubr.f32.vlgmr.msra.gmra.mrb[84].mxu1 %v8482_v49  ;;  %v7816_v6 = vsel %vm7777_vm3, %v7814_v47, %v7815_v20  ;;  %v7678_v15 = vadd.f32 %v7650_v10, %v7581_v19  ;;  %v8179_v57 = vld [vmem:[#allocation5 + $0x100] sm:$0x7f] }
 0x593   : > { %11671 = vmatprep.subr.bf16.mxu0 %v17798_v23  ;;  %9156 = vmatprep.mubr.f32.mxu1 %v16982_v54  ;;  %v8134_v40 = vrot.slane %v8067_v36, 2  ;;  %v7970_v2 = vrot.slane %v7942_v16, 1  ;;  %v8133_v53 = vrot.slane %v8065_v51, 2  ;;  %v8234_v8 = vld [vmem:[#allocation5 + $0x100] sm:$0xfe] }
 0x594   : > { %v8318_v17 = vadd.f32 %v8290_v28, %v8221_v21  ;;  %v7846_v37 = vadd.f32 %v7816_v6, %v7678_v15  ;;  %v8261_v42 = vmul.f32 %v16587_v9, %v8234_v8  ;;  %v17026_v7 = vld [vmem:[%s17202_s1 + $0x50] sm:$0x7]  ;;  %v17033_v23 = vld [vmem:[%s17202_s1 + $0x53] sm:$0x7] }
 0x595   : > { %v8135_v13 = vsel %vm7777_vm3, %v8133_v53, %v8134_v40 }
 0x596   : > { %v8485_v46 = vadd.f32 %v8457_v41, %v8318_v17  ;;  %11673 = vmatpush1.bf16.msra.mxu0 %v17739_v26  ;;  %v7901_v58 = vadd.f32 %v7887_v60, %v7846_v37  ;;  %v8343_v26 = vld [vmem:[#allocation5 + $0x100] sm:$0xfc]  ;;  %v8289_v18 = vrot.slane %v8261_v42, 1 }
 0x597   : > { %11675 = vmatprep.subr.bf16.mxu0 %v17789_v25  ;;  %v8206_v25 = vmul.f32 %v16578_v50, %v8179_v57  ;;  %v17046_v17 = vld [vmem:[%s17202_s1 + $0x56] sm:$0x7] }
 0x598   : > { %9065 = vmatprep.mubr.f32.mxu0 %v8485_v46  ;;  %v7998_v43 = vadd.f32 %v7970_v2, %v7901_v58 }
 0x59a   : > { %11677 = vmatpush1.bf16.msra.mxu0 %v17741_v52  ;;  %v8165_v56 = vadd.f32 %v8135_v13, %v7998_v43  ;;  %v8384_v52 = vmul.f32 %v16594_v55, %v8343_v26 }
 0x59b   : > { %11679 = vmatprep.subr.bf16.mxu0 %v17742_v34  ;;  %v8386_v34 = vmul.f32 %v16594_v55, %v8345_v29 }
 0x59c   : > { %v8220_v12 = vadd.f32 %v8206_v25, %v8165_v56  ;;  %v8452_v45 = vrot.slane %v8384_v52, 2 }
 0x59d   : > { %v8453_v5 = vrot.slane %v8386_v34, 2 }
 0x59e   : > { %11681 = vmatpush1.bf16.msra.mxu0 %v17743_v31 }
 0x59f   : > { %11683 = vmatprep.subr.bf16.mxu0 %v16416_v27  ;;  %v8317_v27 = vadd.f32 %v8289_v18, %v8220_v12  ;;  %v8454_v50 = vsel %vm7777_vm3, %v8452_v45, %v8453_v5 }
 0x5a1   : > { %v8484_v9 = vadd.f32 %v8454_v50, %v8317_v27  ;;  %v9836_v50 = vld [vmem:[%s17203_s2 + $0x100] sm:$0xff] }
 0x5a2   : > { %11685 = vmatpush1.bf16.msra.mxu0 %v17745_v61  ;;  %v10120_v61 = vld [vmem:[%s17205_s4 + $0x12] ss:$8 sm:$0x3] }
 0x5a3   : > { %11687 = vmatprep.subr.bf16.mxu0 %v17760_v38  ;;  %v17800_v38 = vld [vmem:[#allocation27_spill] sm:$0xff] }
 0x5a4   : > { %v17012_v0 = vrot.slane %v10120_v61, %v17800_v38 }
 0x5a6   : > { %11689 = vmatpush1.bf16.msra.mxu0 %v17790_v30  ;;  %v17801_v30 = vld [vmem:[#allocation10_spill] sm:$0xff] }
 0x5a7   : > { %11691 = vmatprep.subr.bf16.mxu0 %v17792_v1  ;;  %v17015_v1 = vrot.slane %v10120_v61, %v17801_v30  ;;  %v9821_v61 = vld [vmem:[%s17203_s2 + $0x88] sm:$0xff]  ;;  %v9838_v30 = vld [vmem:[%s17203_s2 + $0x110] sm:$0xff] }
 0x5aa   : > { %11693 = vmatpush1.bf16.msra.mxu0 %v17796_v48 }
 0x5ad   : > { %9066 = vmatmul.mubr.f32.vlgmr.msra.gmra.mrb[82].mxu0 %v8484_v9  ;;  %v9837_v9 = vld [vmem:[%s17203_s2 + $0x108] sm:$0xff] }
 0x5ae   : > { %9230 = vmatprep.mubr.f32.mxu0 %v16982_v54  ;;  %v11694_v38 = vpack.c.bf16 %v9837_v9, %v9836_v50 }
 0x5bf   : > { %v8629_v55 = vpop.f32.mrb[76].mxu0 }
 0x5c0   : > { %v8631_v31 = vpop.f32.mrb[77].mxu0  ;;  %v8630_v22 = vadd.f32 %v8629_v55, %v17012_v0 }
 0x5c1   : > { %v8632_v11 = vadd.f32 %v8631_v31, %v17015_v1  ;;  %v9820_v31 = vld [vmem:[%s17203_s2 + $0x80] sm:$0xff] }
 0x5c2   : > { %v8634_v48 = vmax.f32 %v8630_v22, 0.0 }
 0x5c3   : > { %v8635_v24 = vmax.f32 %v8632_v11, 0.0  ;;  %v9822_v11 = vld [vmem:[%s17203_s2 + $0x90] sm:$0xff] }
 0x5e5   : > { %v8702_v3 = vpop.f32.mrb[80].mxu1 }
 0x5e6   : > { %v8703_v32 = vadd.f32 %v8702_v3, %v17012_v0  ;;  %v8704_v4 = vpop.f32.mrb[81].mxu1 }
 0x5e7   : > { %v8705_v35 = vadd.f32 %v8704_v4, %v17015_v1 }
 0x5e8   : > { %v8707_v44 = vmax.f32 %v8703_v32, 0.0 }
 0x5e9   : > { %v8708_v28 = vmax.f32 %v8705_v35, 0.0 }
 0x5ea   : > { %v9077_v49 = vmax.f32 %v8634_v48, %v8707_v44 }
 0x5eb   : > { %v9078_v33 = vmax.f32 %v8635_v24, %v8708_v28  ;;  %v9840_v24 = vld [vmem:[%s17203_s2 + $0x120] sm:$0xff]  ;;  %v9841_v28 = vld [vmem:[%s17203_s2 + $0x128] sm:$0xff] }
 0x600   : > { %v8775_v20 = vpop.f32.mrb[78].mxu0 }
 0x601   : > { %v8776_v21 = vadd.f32 %v8775_v20, %v17012_v0  ;;  %v8777_v10 = vpop.f32.mrb[79].mxu0  ;;  %v9824_v20 = vld [vmem:[%s17203_s2 + $0xa0] sm:$0xff] }
 0x602   : > { %v8778_v14 = vadd.f32 %v8777_v10, %v17015_v1 }
 0x603   : > { %v8780_v62 = vmax.f32 %v8776_v21, 0.0  ;;  %v9825_v21 = vld [vmem:[%s17203_s2 + $0xa8] sm:$0xff] }
 0x604   : > { %v8781_v41 = vmax.f32 %v8778_v14, 0.0  ;;  %v11704_v14 = vpack.c.bf16 %v9825_v21, %v9824_v20 }
 0x605   : > { %v9079_v47 = vmax.f32 %v9077_v49, %v8780_v62 }
 0x606   : > { %v9080_v59 = vmax.f32 %v9078_v33, %v8781_v41  ;;  %v11702_v33 = vpack.c.bf16 %v9841_v28, %v9840_v24 }
 0x608   : > { %10121 = vmatprep.subr.msk.mxu1 %vm9085_vm4, %v9080_v59  ;;  %10124 = vmatprep.subr.msk.mxu0 %vm9085_vm4, %v9080_v59 }
 0x609   : > { %10122 = vmatpush1.msk.msra.mxu1 %vm9085_vm4, %v9079_v47  ;;  %10125 = vmatpush1.msk.msra.mxu0 %vm9085_vm4, %v9079_v47 }
 0x60a   : > { %10127 = vmatprep.subr.msk.mxu1 %vm9085_vm4, %v9080_v59  ;;  %10123 = vmatmul.mubr.msk.f32.vlgmr.msra.gmra.mrb[86].mxu1 %vm9081_vm5, %v17026_v7  ;;  %v9842_v59 = vld [vmem:[%s17203_s2 + $0x130] sm:$0xff] }
 0x60b   : > { %10128 = vmatpush1.msk.msra.mxu1 %vm9085_vm4, %v9079_v47  ;;  %10126 = vmatmul.mubr.msk.f32.vlgmr.msra.gmra.mrb[84].mxu0 %vm9081_vm5, %v17033_v23 }
 0x60c   : > { %9306 = vmatprep.mubr.f32.mxu1 %v16982_v54  ;;  %9406 = vmatprep.mubr.f32.mxu0 %v16982_v54 }
 0x60e   : > { %10129 = vmatmul.mubr.msk.f32.vlgmr.msra.gmra.mrb[88].mxu1 %vm9081_vm5, %v17046_v17 }
 0x60f   : > { %9477 = vmatprep.mubr.f32.mxu1 %v16982_v54 }
 0x625   : > { %v8848_v63 = vpop.f32.mrb[82].mxu1 }
 0x626   : > { %v8849_v19 = vadd.f32 %v8848_v63, %v17012_v0  ;;  %v8850_v39 = vpop.f32.mrb[83].mxu1  ;;  %v9827_v63 = vld [vmem:[%s17203_s2 + $0xb8] sm:$0xff] }
 0x627   : > { %v8851_v6 = vadd.f32 %v8850_v39, %v17015_v1  ;;  %v9845_v39 = vld [vmem:[%s17203_s2 + $0x148] sm:$0xff] }
 0x628   : > { %v8853_v36 = vmax.f32 %v8849_v19, 0.0  ;;  %v9844_v19 = vld [vmem:[%s17203_s2 + $0x140] sm:$0xff] }
 0x629   : > { %v8854_v46 = vmax.f32 %v8851_v6, 0.0 }
 0x62a   : > { %v9332_v15 = vmax.f32 %v8780_v62, %v8853_v36  ;;  %v11710_v36 = vpack.c.bf16 %v9845_v39, %v9844_v19 }
 0x62b   : > { %v9333_v60 = vmax.f32 %v8781_v41, %v8854_v46  ;;  %v9828_v46 = vld [vmem:[%s17203_s2 + $0xc0] sm:$0xff] }
 0x640   : > { %v8921_v16 = vpop.f32.mrb[80].mxu0 }
 0x641   : > { %v8922_v51 = vadd.f32 %v8921_v16, %v17012_v0  ;;  %v8923_v37 = vpop.f32.mrb[81].mxu0  ;;  %v9847_v16 = vld [vmem:[%s17203_s2 + $0x158] sm:$0xff] }
 0x642   : > { %v8924_v40 = vadd.f32 %v8923_v37, %v17015_v1 }
 0x643   : > { %v8926_v58 = vmax.f32 %v8922_v51, 0.0 }
 0x644   : > { %v8927_v2 = vmax.f32 %v8924_v40, 0.0  ;;  %v9830_v40 = vld [vmem:[%s17203_s2 + $0xd0] sm:$0xff] }
 0x645   : > { %v9334_v53 = vmax.f32 %v9332_v15, %v8926_v58  ;;  %v9829_v15 = vld [vmem:[%s17203_s2 + $0xc8] sm:$0xff] }
 0x646   : > { %v9335_v13 = vmax.f32 %v9333_v60, %v8927_v2  ;;  %v9846_v60 = vld [vmem:[%s17203_s2 + $0x150] sm:$0xff]  ;;  %v11712_v51 = vpack.c.bf16 %v9829_v15, %v9828_v46 }
 0x647   : > { %v11714_v37 = vpack.c.bf16 %v9847_v16, %v9846_v60 }
 0x648   : > { %10130 = vmatprep.subr.msk.mxu0 %vm9085_vm4, %v9335_v13  ;;  %10133 = vmatprep.subr.msk.mxu1 %vm9085_vm4, %v9335_v13 }
 0x649   : > { %10131 = vmatpush1.msk.msra.mxu0 %vm9085_vm4, %v9334_v53  ;;  %10134 = vmatpush1.msk.msra.mxu1 %vm9085_vm4, %v9334_v53 }
 0x64a   : > { %10136 = vmatprep.subr.msk.mxu0 %vm9085_vm4, %v9335_v13  ;;  %10132 = vmatmul.mubr.msk.f32.vlgmr.msra.gmra.mrb[86].mxu0 %vm9081_vm5, %v17026_v7 }
 0x64b   : > { %10137 = vmatpush1.msk.msra.mxu0 %vm9085_vm4, %v9334_v53  ;;  %10135 = vmatmul.mubr.msk.f32.vlgmr.msra.gmra.mrb[90].mxu1 %vm9081_vm5, %v17033_v23  ;;  %v9849_v53 = vld [vmem:[%s17203_s2 + $0x168] sm:$0xff] }
 0x64c   : > { %9550 = vmatprep.mubr.f32.mxu0 %v16982_v54  ;;  %9649 = vmatprep.mubr.f32.mxu1 %v16982_v54 }
 0x64e   : > { %10138 = vmatmul.mubr.msk.f32.vlgmr.msra.gmra.mrb[88].mxu0 %vm9081_vm5, %v17046_v17 }
 0x64f   : > { %9720 = vmatprep.mubr.f32.mxu0 %v16982_v54 }
 0x665   : > { %v8994_v57 = vpop.f32.mrb[84].mxu1 }
 0x666   : > { %v8995_v8 = vadd.f32 %v8994_v57, %v17012_v0  ;;  %v8996_v43 = vpop.f32.mrb[85].mxu1 }
 0x667   : > { %v8997_v26 = vadd.f32 %v8996_v43, %v17015_v1  ;;  %v9833_v43 = vld [vmem:[%s17203_s2 + $0xe8] sm:$0xff] }
 0x668   : > { %v8999_v29 = vmax.f32 %v8995_v8, 0.0  ;;  %v9832_v8 = vld [vmem:[%s17203_s2 + $0xe0] sm:$0xff] }
 0x669   : > { %v9000_v56 = vmax.f32 %v8997_v26, 0.0  ;;  %v9850_v26 = vld [vmem:[%s17203_s2 + $0x170] sm:$0xff] }
 0x66a   : > { %v9575_v25 = vmax.f32 %v8926_v58, %v8999_v29  ;;  %v9831_v58 = vld [vmem:[%s17203_s2 + $0xd8] sm:$0xff] }
 0x66b   : > { %v9576_v42 = vmax.f32 %v8927_v2, %v9000_v56  ;;  %v9848_v2 = vld [vmem:[%s17203_s2 + $0x160] sm:$0xff]  ;;  %v11716_v13 = vpack.c.bf16 %v9831_v58, %v9830_v40  ;;  %v9851_v29 = vld [vmem:[%s17203_s2 + $0x178] sm:$0xff]  ;;  %v11720_v56 = vpack.c.bf16 %v9833_v43, %v9832_v8 }
 0x66c   : > { %v11718_v57 = vpack.c.bf16 %v9849_v53, %v9848_v2 }
 0x680   : > { %v9067_v52 = vpop.f32.mrb[82].mxu0 }
 0x681   : > { %v9068_v34 = vadd.f32 %v9067_v52, %v17012_v0  ;;  %v9069_v12 = vpop.f32.mrb[83].mxu0  ;;  %v11696_v0 = vpack.c.bf16 %v9821_v61, %v9820_v31  ;;  %v9835_v52 = vld [vmem:[%s17203_s2 + $0xf8] sm:$0xff] }
 0x682   : > { %v9070_v18 = vadd.f32 %v9069_v12, %v17015_v1  ;;  %v9839_v1 = vld [vmem:[%s17203_s2 + $0x118] sm:$0xff] }
 0x683   : > { %v9072_v45 = vmax.f32 %v9068_v34, 0.0  ;;  %v11698_v22 = vpack.c.bf16 %v9839_v1, %v9838_v30 }
 0x684   : > { %v9073_v5 = vmax.f32 %v9070_v18, 0.0 }
 0x685   : > { %v9577_v27 = vmax.f32 %v9575_v25, %v9072_v45  ;;  %v11722_v25 = vpack.c.bf16 %v9851_v29, %v9850_v26 }
 0x686   : > { %v9578_v55 = vmax.f32 %v9576_v42, %v9073_v5  ;;  %v9834_v42 = vld [vmem:[%s17203_s2 + $0xf0] sm:$0xff] }
 0x687   : > { %v11724_v34 = vpack.c.bf16 %v9835_v52, %v9834_v42 }
 0x688   : > { %10139 = vmatprep.subr.msk.mxu1 %vm9085_vm4, %v9578_v55  ;;  %10142 = vmatprep.subr.msk.mxu0 %vm9085_vm4, %v9578_v55 }
 0x689   : > { %10140 = vmatpush1.msk.msra.mxu1 %vm9085_vm4, %v9577_v27  ;;  %10143 = vmatpush1.msk.msra.mxu0 %vm9085_vm4, %v9577_v27 }
 0x68a   : > { %10145 = vmatprep.subr.msk.mxu1 %vm9085_vm4, %v9578_v55  ;;  %10141 = vmatmul.mubr.msk.f32.vlgmr.msra.gmra.mrb[92].mxu1 %vm9081_vm5, %v17026_v7  ;;  %v9843_v7 = vld [vmem:[%s17203_s2 + $0x138] sm:$0xff] }
 0x68b   : > { %10146 = vmatpush1.msk.msra.mxu1 %vm9085_vm4, %v9577_v27  ;;  %10144 = vmatmul.mubr.msk.f32.vlgmr.msra.gmra.mrb[90].mxu0 %vm9081_vm5, %v17033_v23  ;;  %v9826_v23 = vld [vmem:[%s17203_s2 + $0xb0] sm:$0xff] }
 0x68c   : > { %9793 = vmatprep.mubr.f32.mxu1 %v16982_v54  ;;  %11695 = vmatprep.subr.bf16.mxu0 %v11694_v38  ;;  %v9823_v54 = vld [vmem:[%s17203_s2 + $0x98] sm:$0xff]  ;;  %v11708_v6 = vpack.c.bf16 %v9827_v63, %v9826_v23 }
 0x68d   : > { %11697 = vmatpush3.bf16.msra.mxu0 %v11696_v0  ;;  %v11700_v3 = vpack.c.bf16 %v9823_v54, %v9822_v11 }
 0x68e   : > { %10147 = vmatmul.mubr.msk.f32.vlgmr.msra.gmra.mrb[94].mxu1 %vm9081_vm5, %v17046_v17  ;;  %11699 = vmatprep.subr.bf16.mxu0 %v11698_v22  ;;  %v11706_v17 = vpack.c.bf16 %v9843_v7, %v9842_v59 }
 0x691   : > { %11701 = vmatpush3.bf16.msra.mxu0 %v11700_v3 }
 0x692   : > { %11703 = vmatprep.subr.bf16.mxu0 %v11702_v33 }
 0x695   : > { %11705 = vmatpush3.bf16.msra.mxu0 %v11704_v14 }
 0x696   : > { %11707 = vmatprep.subr.bf16.mxu0 %v11706_v17 }
 0x699   : > { %11709 = vmatpush3.bf16.msra.mxu0 %v11708_v6 }
 0x69a   : > { %11711 = vmatprep.subr.bf16.mxu0 %v11710_v36 }
 0x69d   : > { %11713 = vmatpush3.bf16.msra.mxu0 %v11712_v51 }
 0x69e   : > { %11715 = vmatprep.subr.bf16.mxu0 %v11714_v37 }
 0x6a1   : > { %11717 = vmatpush3.bf16.msra.mxu0 %v11716_v13 }
 0x6a2   : > { %11719 = vmatprep.subr.bf16.mxu0 %v11718_v57 }
 0x6a5   : > { %11721 = vmatpush3.bf16.msra.mxu0 %v11720_v56 }
 0x6a6   : > { %11723 = vmatprep.subr.bf16.mxu0 %v11722_v25 }
 0x6a9   : > { %11725 = vmatpush3.bf16.msra.mxu0 %v11724_v34 }
 0x6dd   : > { %v9158_v32 = vpop.f32.mrb[86].mxu1 }
 0x6de   : > { %v9232_v4 = vpop.f32.mrb[84].mxu0  ;;  %v9160_v35 = vpop.f32.mrb[87].mxu1 }
 0x6df   : > { %v9237_v48 = vmax.f32 %v9158_v32, %v9232_v4  ;;  %v9234_v44 = vpop.f32.mrb[85].mxu0 }
 0x6e0   : > { %v9238_v49 = vmax.f32 %v9160_v35, %v9234_v44 }
 0x6e1   : > { %v9308_v10 = vpop.f32.mrb[88].mxu1 }
 0x6e2   : > { %v9313_v62 = vmax.f32 %v9237_v48, %v9308_v10  ;;  %v9310_v41 = vpop.f32.mrb[89].mxu1 }
 0x6e3   : > { %v9314_v47 = vmax.f32 %v9238_v49, %v9310_v41 }
 0x6e4   : > { %v9316_v12 = vsel %vm9315_vm6, %v9313_v62, 0.0 }
 0x6e5   : > { %v9323_v18 = vsel %vm9315_vm6, %v9314_v47, 0.0  ;;  %v9317_v45 = vrot.slane %v9316_v12, 4 }
 0x6e6   : > { %v9324_v5 = vrot.slane %v9323_v18, 4 }
 0x6e7   : > { %v9318_v27 = vadd.f32 %v9317_v45, %v9316_v12 }
 0x6e8   : > { %v9325_v9 = vadd.f32 %v9324_v5, %v9323_v18 }
 0x6e9   : > { %v9319_v30 = vrot.slane %v9318_v27, 2 }
 0x6ea   : > { %v9326_v22 = vrot.slane %v9325_v9, 2 }
 0x6eb   : > { %v9320_v4 = vadd.f32 %v9319_v30, %v9318_v27 }
 0x6ec   : > { %v9327_v44 = vadd.f32 %v9326_v22, %v9325_v9 }
 0x6ed   : > { %v9321_v33 = vrot.slane %v9320_v4, 1 }
 0x6ee   : > { %v9328_v21 = vrot.slane %v9327_v44, 1 }
 0x6ef   : > { %v9322_v41 = vadd.f32 %v9321_v33, %v9320_v4 }
 0x6f0   : > { %v9329_v59 = vadd.f32 %v9328_v21, %v9327_v44 }
 0x71d   : > { %v9408_v50 = vpop.f32.mrb[86].mxu0 }
 0x71e   : > { %v9410_v55 = vpop.f32.mrb[87].mxu0  ;;  %v9479_v31 = vpop.f32.mrb[90].mxu1 }
 0x71f   : > { %v9484_v61 = vmax.f32 %v9408_v50, %v9479_v31  ;;  %v9481_v38 = vpop.f32.mrb[91].mxu1  ;;  %v9852_v50 = vld [vmem:[%s17202_s1 + $0x2e] sm:$0x1] }
 0x720   : > { %v9485_v0 = vmax.f32 %v9410_v55, %v9481_v38 }
 0x721   : > { %v9552_v1 = vpop.f32.mrb[88].mxu0 }
 0x722   : > { %v9557_v11 = vmax.f32 %v9484_v61, %v9552_v1  ;;  %v9554_v54 = vpop.f32.mrb[89].mxu0 }
 0x723   : > { %v9558_v3 = vmax.f32 %v9485_v0, %v9554_v54 }
 0x724   : > { %v9559_v32 = vsel %vm9315_vm6, %v9557_v11, 0.0 }
 0x725   : > { %v9560_v35 = vrot.slane %v9559_v32, 4  ;;  %v9566_v48 = vsel %vm9315_vm6, %v9558_v3, 0.0 }
 0x726   : > { %v9567_v24 = vrot.slane %v9566_v48, 4 }
 0x727   : > { %v9561_v28 = vadd.f32 %v9560_v35, %v9559_v32 }
 0x728   : > { %v9568_v49 = vadd.f32 %v9567_v24, %v9566_v48 }
 0x729   : > { %v9562_v20 = vrot.slane %v9561_v28, 2 }
 0x72a   : > { %v9569_v10 = vrot.slane %v9568_v49, 2 }
 0x72b   : > { %v9563_v14 = vadd.f32 %v9562_v20, %v9561_v28 }
 0x72c   : > { %v9570_v62 = vadd.f32 %v9569_v10, %v9568_v49 }
 0x72d   : > { %v9564_v47 = vrot.slane %v9563_v14, 1 }
 0x72e   : > { %v9571_v7 = vrot.slane %v9570_v62, 1 }
 0x72f   : > { %v9565_v23 = vadd.f32 %v9564_v47, %v9563_v14 }
 0x730   : > { %v9572_v17 = vadd.f32 %v9571_v7, %v9570_v62 }
 0x731   : > { %v9573_v63 = vadd.f32 %v9565_v23, %v9322_v41 }
 0x732   : > { %v9574_v19 = vadd.f32 %v9572_v17, %v9329_v59 }
 0x75d   : > { %v9651_v39 = vpop.f32.mrb[92].mxu1 }
 0x75e   : > { %v9722_v6 = vpop.f32.mrb[90].mxu0  ;;  %v9653_v36 = vpop.f32.mrb[93].mxu1 }
 0x75f   : > { %v9727_v46 = vmax.f32 %v9651_v39, %v9722_v6  ;;  %v9724_v15 = vpop.f32.mrb[91].mxu0 }
 0x760   : > { %v9728_v60 = vmax.f32 %v9653_v36, %v9724_v15 }
 0x761   : > { %v9795_v16 = vpop.f32.mrb[94].mxu1 }
 0x762   : > { %v9800_v51 = vmax.f32 %v9727_v46, %v9795_v16  ;;  %v9797_v37 = vpop.f32.mrb[95].mxu1 }
 0x763   : > { %v9801_v40 = vmax.f32 %v9728_v60, %v9797_v37 }
 0x764   : > { %v9802_v58 = vsel %vm9315_vm6, %v9800_v51, 0.0 }
 0x765   : > { %v9803_v2 = vrot.slane %v9802_v58, 4  ;;  %v9809_v53 = vsel %vm9315_vm6, %v9801_v40, 0.0 }
 0x766   : > { %v9810_v13 = vrot.slane %v9809_v53, 4 }
 0x767   : > { %v9804_v57 = vadd.f32 %v9803_v2, %v9802_v58 }
 0x768   : > { %v9811_v8 = vadd.f32 %v9810_v13, %v9809_v53 }
 0x769   : > { %v9805_v43 = vrot.slane %v9804_v57, 2 }
 0x76a   : > { %v9812_v26 = vrot.slane %v9811_v8, 2 }
 0x76b   : > { %v9806_v29 = vadd.f32 %v9805_v43, %v9804_v57 }
 0x76c   : > { %v9813_v56 = vadd.f32 %v9812_v26, %v9811_v8 }
 0x76d   : > { %v9807_v25 = vrot.slane %v9806_v29, 1 }
 0x76e   : > { %v9814_v42 = vrot.slane %v9813_v56, 1 }
 0x76f   : > { %v9808_v52 = vadd.f32 %v9807_v25, %v9806_v29 }
 0x770   : > { %v9815_v34 = vadd.f32 %v9814_v42, %v9813_v56 }
 0x771   : > { %v9816_v12 = vadd.f32 %v9808_v52, %v9573_v63 }
 0x772   : > { %v9817_v18 = vadd.f32 %v9815_v34, %v9574_v19 }
 0x773   : > { %v9818_v5 = vmul.f32 0.11111111, %v9816_v12 }
 0x774   : > { %v9819_v45 = vmul.f32 0.11111111, %v9817_v18 }
 0x776   : > { %9917 = vmatprep.mubr.f32.mxu0 %v9819_v45 }
 0x777   : > { %9918 = vmatmul.mubr.f32.vlgmr.msra.gmra.mrb[92].mxu0 %v9818_v5 }
 0x84a   : > { %v10369_v27 = vpop.f32.mrb[92].mxu0 }
 0x84b   : > { %v10370_v9 = vpop.f32.mrb[93].mxu0 }
 0x84c   : > { %v10371_v55 = vadd.f32 %v10370_v9, %v10369_v27 }
 0x84e   : > { %v9920_v31 = vadd.f32 %v10371_v55, %v9852_v50 }
 0x850   : > { %9923 = vst [vmem:[%s220_s11] sm:$0x1] %v9920_v31 }
 0x851 PF: > { %s15_s18 = sadd.s32 1, %s11858_s18  }
 0x852   : > { %p12_p4 = scmp.ge.s32.totalorder %s15_s18, 4  }
 0x854   :  { %14 = sbr.rel (!%p12_p4) target bundleno = 1 (0x1), region = 101 }

</bundles_post_ra>
